<compile_context>
chip_gen: v5e
topology: v5e:2x2
jax: 0.10.0
libtpu: 0.0.40
codegen_flags: <defaults>
</compile_context>

<pallas_src>
import math

import jax
import jax.numpy as jnp
from jax.experimental import pallas as pl
from jax.experimental.pallas import tpu as pltpu

n_embd = 384
_H_CHUNK = 512  # hidden dim (4*C = 1536) processed in 512-wide chunks


def _ffn_kernel(x_ref, w1_ref, b1_ref, w2_ref, b2_ref, o_ref):
    # x_ref : (tm, C) bf16   w1_ref: (C, H) bf16   b1_ref: (1, H) f32
    # w2_ref: (H, C) bf16    b2_ref: (1, C) f32    o_ref : (tm, C) f32
    x = x_ref[...]
    tm, C = x_ref.shape
    H = w1_ref.shape[1]
    n_chunks = H // _H_CHUNK

    acc = jnp.zeros((tm, C), jnp.float32)
    # Static unrolled loop over 512-wide hidden chunks. Keeps the f32
    # intermediate at (tm, 512) instead of (tm, 1536) and lets the
    # bias/ReLU/cast VPU work interleave under the next chunk's MXU pushes.
    for c in range(n_chunks):
        lo = c * _H_CHUNK
        h = jnp.dot(x, w1_ref[:, lo:lo + _H_CHUNK],
                    preferred_element_type=jnp.float32)          # (tm, 512) f32
        h = jnp.maximum(h + b1_ref[:, lo:lo + _H_CHUNK], 0.0)
        acc = acc + jnp.dot(h.astype(w2_ref.dtype),
                            w2_ref[lo:lo + _H_CHUNK, :],
                            preferred_element_type=jnp.float32)  # (tm, C) f32
    o_ref[...] = (acc + b2_ref[...]).astype(o_ref.dtype)


def _vmem_capacity_bytes():
    try:
        return int(pltpu.get_tpu_info().vmem_capacity_bytes)
    except Exception:
        return 128 * 1024 * 1024  # assume v5e/v6e-class if the query fails


def _pick_row_tile(M, vmem_cap):
    """Largest row tile (multiple of 8) dividing M, with a chip-aware cap."""
    # v7x has only 64 MiB VMEM per TensorCore -> cap tm lower than on
    # v5e/v6e (128 MiB).
    cap = 1024 if vmem_cap <= (64 << 20) else 2048
    candidates = tuple(c for c in (2048, 1024, 512, 256, 128, 64, 32, 16, 8)
                       if c <= cap)
    # Large M: prefer >= 2 grid steps so both v7x TensorCores get work.
    if M >= 1024:
        for tm in candidates:
            if M % tm == 0 and M // tm >= 2:
                return tm
    # Small M: a single grid step avoids re-DMA'ing the resident weights once
    # per core in a regime that is weight-DMA-bound.
    for tm in candidates:
        if M % tm == 0:
            return tm
    return M  # unaligned fallback (full array as one block; tiny shapes only)


def _vmem_limit_bytes(tm, C, H, vmem_cap):
    est = (2 * tm * C * 2            # double-buffered bf16 x tiles
           + 2 * tm * C * 4          # double-buffered f32 output tiles
           + 2 * C * H * 2           # W1^T + W2^T (bf16, single-buffered)
           + 2 * 2 * (H + C) * 4     # biases (tiny)
           + tm * _H_CHUNK * 6       # f32 hidden chunk + its bf16 copy
           + tm * C * 4)             # f32 accumulator
    limit = max(est + (16 << 20), 32 << 20)   # headroom for compiler temps
    return int(min(limit, vmem_cap - (8 << 20)))


def _weight_spec(shape, single_buffer):
    if single_buffer:
        # Constant index_map -> weights stay resident; double-buffering buys
        # nothing, single-buffering frees ~2.25 MiB of VMEM.
        return pl.BlockSpec(shape, lambda i: (0, 0),
                            pipeline_mode=pl.Buffered(1))
    return pl.BlockSpec(shape, lambda i: (0, 0))


def _make_ffn_call(M, C, H, tm, vmem_cap, single_buffer_weights):
    grid = (M // tm,)
    flops = 4 * M * C * H  # two matmuls, 2*M*C*H FLOPs each
    bytes_accessed = (M * C * 2            # x (bf16)
                      + 2 * C * H * 2      # W1^T + W2^T (bf16)
                      + (H + C) * 4        # biases
                      + M * C * 4)         # output (f32)
    cost = pl.CostEstimate(flops=flops, transcendentals=0,
                           bytes_accessed=bytes_accessed)
    return pl.pallas_call(
        _ffn_kernel,
        out_shape=jax.ShapeDtypeStruct((M, C), jnp.float32),
        grid_spec=pltpu.PrefetchScalarGridSpec(
            num_scalar_prefetch=0,
            grid=grid,
            in_specs=[
                pl.BlockSpec((tm, C), lambda i: (i, 0)),        # x rows
                _weight_spec((C, H), single_buffer_weights),    # W1^T (resident)
                pl.BlockSpec((1, H), lambda i: (0, 0)),         # b1
                _weight_spec((H, C), single_buffer_weights),    # W2^T (resident)
                pl.BlockSpec((1, C), lambda i: (0, 0)),         # b2
            ],
            out_specs=pl.BlockSpec((tm, C), lambda i: (i, 0)),
        ),
        compiler_params=pltpu.CompilerParams(
            dimension_semantics=("parallel",),
            vmem_limit_bytes=_vmem_limit_bytes(tm, C, H, vmem_cap),
        ),
        cost_estimate=cost,
    )


def feedforward_forward(x, w1, b1, w2, b2):
    """x: (B, T, C) float32.
    w1: (4C, C), b1: (4C,)  -- first torch.nn.Linear
    w2: (C, 4C), b2: (C,)   -- second torch.nn.Linear
    """
    B, T, C = x.shape
    H = w1.shape[0]
    assert C == n_embd and H == 4 * C
    M = B * T

    # Flatten batch*seq into rows; cast matmul operands to bf16 (f32 accum).
    x2 = x.reshape(M, C).astype(jnp.bfloat16)
    w1t = jnp.asarray(w1.T, dtype=jnp.bfloat16)   # (C, H)
    w2t = jnp.asarray(w2.T, dtype=jnp.bfloat16)   # (H, C)
    b1r = jnp.asarray(b1, dtype=jnp.float32).reshape(1, H)
    b2r = jnp.asarray(b2, dtype=jnp.float32).reshape(1, C)

    vmem_cap = _vmem_capacity_bytes()
    tm = _pick_row_tile(M, vmem_cap)

    try:
        out = _make_ffn_call(M, C, H, tm, vmem_cap, True)(x2, w1t, b1r, w2t, b2r)
    except Exception:
        # Fallback: default double-buffering for the resident weights.
        out = _make_ffn_call(M, C, H, tm, vmem_cap, False)(x2, w1t, b1r, w2t, b2r)

    return out.reshape(B, T, C)


def feedforward_reference(x, w1, b1, w2, b2):
    """Pure-JAX (float32) reference mirroring the PyTorch forward (eval mode)."""
    h = jnp.maximum(x @ w1.T + b1, 0.0)
    return h @ w2.T + b2


if __name__ == "__main__":
    B, T, C = 2, 8, n_embd
    H = 4 * C

    key = jax.random.PRNGKey(0)
    kx, kw1, kb1, kw2, kb2 = jax.random.split(key, 5)

    x = jax.random.normal(kx, (B, T, C), dtype=jnp.float32)

    # torch.nn.Linear default init: U(-1/sqrt(fan_in), 1/sqrt(fan_in))
    bound1 = 1.0 / math.sqrt(C)
    w1 = jax.random.uniform(kw1, (H, C), jnp.float32, -bound1, bound1)
    b1 = jax.random.uniform(kb1, (H,), jnp.float32, -bound1, bound1)
    bound2 = 1.0 / math.sqrt(H)
    w2 = jax.random.uniform(kw2, (C, H), jnp.float32, -bound2, bound2)
    b2 = jax.random.uniform(kb2, (C,), jnp.float32, -bound2, bound2)

    out = feedforward_forward(x, w1, b1, w2, b2)
    out = jax.block_until_ready(out)

    ref = feedforward_reference(x, w1, b1, w2, b2)
    assert out.shape == (B, T, C)
    # bf16 matmul inputs with f32 accumulation: small rounding vs pure-f32 ref.
    assert jnp.allclose(out, ref, atol=2e-2, rtol=2e-2), "mismatch vs reference"

    print("KERNEL_OK")
</pallas_src>

<mosaic_0001>
module attributes {stable_mosaic.version = 11 : i64} {
  func.func @_ffn_kernel(%arg0: i32, %arg1: memref<16x384xbf16, #tpu.memory_space<vmem>>, %arg2: memref<384x1536xbf16, #tpu.memory_space<vmem>>, %arg3: memref<1x1536xf32, #tpu.memory_space<vmem>>, %arg4: memref<1536x384xbf16, #tpu.memory_space<vmem>>, %arg5: memref<1x384xf32, #tpu.memory_space<vmem>>, %arg6: memref<16x384xf32, #tpu.memory_space<vmem>>) attributes {dimension_semantics = [#tpu.dimension_semantics<parallel>], iteration_bounds = array<i64: 1>, scalar_prefetch = 0 : i64, scratch_operands = 0 : i64, tpu.core_type = #tpu.core_type<tc>, window_params = [{transform_indices = @transform_0, window_bounds = array<i64: 16, 384>}, {pipeline_mode = #tpu.pipeline_mode<synchronous>, transform_indices = @transform_1, window_bounds = array<i64: 384, 1536>}, {pipeline_mode = #tpu.pipeline_mode<synchronous>, transform_indices = @transform_2, window_bounds = array<i64: 1, 1536>}, {pipeline_mode = #tpu.pipeline_mode<synchronous>, transform_indices = @transform_3, window_bounds = array<i64: 1536, 384>}, {pipeline_mode = #tpu.pipeline_mode<synchronous>, transform_indices = @transform_4, window_bounds = array<i64: 1, 384>}, {transform_indices = @transform_5, window_bounds = array<i64: 16, 384>}]} {
    %c0 = arith.constant 0 : index
    %c0_0 = arith.constant 0 : index
    %0 = vector.load %arg1[%c0, %c0_0] : memref<16x384xbf16, #tpu.memory_space<vmem>>, vector<16x384xbf16>
    %cst = arith.constant 0.000000e+00 : f32
    %1 = vector.broadcast %cst : f32 to vector<16x384xf32>
    %c0_1 = arith.constant 0 : index
    %c0_2 = arith.constant 0 : index
    %2 = vector.load %arg2[%c0_1, %c0_2] : memref<384x1536xbf16, #tpu.memory_space<vmem>>, vector<384x512xbf16>
    %cst_3 = arith.constant dense<0.000000e+00> : vector<16x512xf32>
    %3 = tpu.matmul %0, %2, %cst_3 {dimension_numbers = #tpu.dot_dimension_numbers<[1], [0], [0], [1], [0, 0, 1, 1], [], []>} : vector<16x384xbf16>, vector<384x512xbf16>, vector<16x512xf32> -> vector<16x512xf32>
    %c0_4 = arith.constant 0 : index
    %c0_5 = arith.constant 0 : index
    %4 = vector.load %arg3[%c0_4, %c0_5] : memref<1x1536xf32, #tpu.memory_space<vmem>>, vector<1x512xf32>
    %5 = vector.broadcast %4 : vector<1x512xf32> to vector<16x512xf32>
    %6 = arith.addf %3, %5 : vector<16x512xf32>
    %cst_6 = arith.constant 0.000000e+00 : f32
    %7 = vector.broadcast %cst_6 : f32 to vector<16x512xf32>
    %8 = arith.maximumf %6, %7 : vector<16x512xf32>
    %9 = arith.truncf %8 : vector<16x512xf32> to vector<16x512xbf16>
    %c0_7 = arith.constant 0 : index
    %c0_8 = arith.constant 0 : index
    %10 = vector.load %arg4[%c0_7, %c0_8] : memref<1536x384xbf16, #tpu.memory_space<vmem>>, vector<512x384xbf16>
    %cst_9 = arith.constant dense<0.000000e+00> : vector<16x384xf32>
    %11 = tpu.matmul %9, %10, %cst_9 {dimension_numbers = #tpu.dot_dimension_numbers<[1], [0], [0], [1], [0, 0, 1, 1], [], []>} : vector<16x512xbf16>, vector<512x384xbf16>, vector<16x384xf32> -> vector<16x384xf32>
    %12 = arith.addf %1, %11 : vector<16x384xf32>
    %c0_10 = arith.constant 0 : index
    %c512 = arith.constant 512 : index
    %13 = vector.load %arg2[%c0_10, %c512] : memref<384x1536xbf16, #tpu.memory_space<vmem>>, vector<384x512xbf16>
    %cst_11 = arith.constant dense<0.000000e+00> : vector<16x512xf32>
    %14 = tpu.matmul %0, %13, %cst_11 {dimension_numbers = #tpu.dot_dimension_numbers<[1], [0], [0], [1], [0, 0, 1, 1], [], []>} : vector<16x384xbf16>, vector<384x512xbf16>, vector<16x512xf32> -> vector<16x512xf32>
    %c0_12 = arith.constant 0 : index
    %c512_13 = arith.constant 512 : index
    %15 = vector.load %arg3[%c0_12, %c512_13] : memref<1x1536xf32, #tpu.memory_space<vmem>>, vector<1x512xf32>
    %16 = vector.broadcast %15 : vector<1x512xf32> to vector<16x512xf32>
    %17 = arith.addf %14, %16 : vector<16x512xf32>
    %cst_14 = arith.constant 0.000000e+00 : f32
    %18 = vector.broadcast %cst_14 : f32 to vector<16x512xf32>
    %19 = arith.maximumf %17, %18 : vector<16x512xf32>
    %20 = arith.truncf %19 : vector<16x512xf32> to vector<16x512xbf16>
    %c512_15 = arith.constant 512 : index
    %c0_16 = arith.constant 0 : index
    %21 = vector.load %arg4[%c512_15, %c0_16] : memref<1536x384xbf16, #tpu.memory_space<vmem>>, vector<512x384xbf16>
    %cst_17 = arith.constant dense<0.000000e+00> : vector<16x384xf32>
    %22 = tpu.matmul %20, %21, %cst_17 {dimension_numbers = #tpu.dot_dimension_numbers<[1], [0], [0], [1], [0, 0, 1, 1], [], []>} : vector<16x512xbf16>, vector<512x384xbf16>, vector<16x384xf32> -> vector<16x384xf32>
    %23 = arith.addf %12, %22 : vector<16x384xf32>
    %c0_18 = arith.constant 0 : index
    %c1024 = arith.constant 1024 : index
    %24 = vector.load %arg2[%c0_18, %c1024] : memref<384x1536xbf16, #tpu.memory_space<vmem>>, vector<384x512xbf16>
    %cst_19 = arith.constant dense<0.000000e+00> : vector<16x512xf32>
    %25 = tpu.matmul %0, %24, %cst_19 {dimension_numbers = #tpu.dot_dimension_numbers<[1], [0], [0], [1], [0, 0, 1, 1], [], []>} : vector<16x384xbf16>, vector<384x512xbf16>, vector<16x512xf32> -> vector<16x512xf32>
    %c0_20 = arith.constant 0 : index
    %c1024_21 = arith.constant 1024 : index
    %26 = vector.load %arg3[%c0_20, %c1024_21] : memref<1x1536xf32, #tpu.memory_space<vmem>>, vector<1x512xf32>
    %27 = vector.broadcast %26 : vector<1x512xf32> to vector<16x512xf32>
    %28 = arith.addf %25, %27 : vector<16x512xf32>
    %cst_22 = arith.constant 0.000000e+00 : f32
    %29 = vector.broadcast %cst_22 : f32 to vector<16x512xf32>
    %30 = arith.maximumf %28, %29 : vector<16x512xf32>
    %31 = arith.truncf %30 : vector<16x512xf32> to vector<16x512xbf16>
    %c1024_23 = arith.constant 1024 : index
    %c0_24 = arith.constant 0 : index
    %32 = vector.load %arg4[%c1024_23, %c0_24] : memref<1536x384xbf16, #tpu.memory_space<vmem>>, vector<512x384xbf16>
    %cst_25 = arith.constant dense<0.000000e+00> : vector<16x384xf32>
    %33 = tpu.matmul %31, %32, %cst_25 {dimension_numbers = #tpu.dot_dimension_numbers<[1], [0], [0], [1], [0, 0, 1, 1], [], []>} : vector<16x512xbf16>, vector<512x384xbf16>, vector<16x384xf32> -> vector<16x384xf32>
    %34 = arith.addf %23, %33 : vector<16x384xf32>
    %c0_26 = arith.constant 0 : index
    %c0_27 = arith.constant 0 : index
    %35 = vector.load %arg5[%c0_26, %c0_27] : memref<1x384xf32, #tpu.memory_space<vmem>>, vector<1x384xf32>
    %36 = vector.broadcast %35 : vector<1x384xf32> to vector<16x384xf32>
    %37 = arith.addf %34, %36 : vector<16x384xf32>
    %c0_28 = arith.constant 0 : index
    %c0_29 = arith.constant 0 : index
    %38 = vector.load %arg6[%c0_28, %c0_29] : memref<16x384xf32, #tpu.memory_space<vmem>>, vector<16x384xf32>
    tpu.vector_store %arg6[%c0_28, %c0_29], %37 {strides = array<i32>} : memref<16x384xf32, #tpu.memory_space<vmem>>, vector<16x384xf32>,
    return
  }
  func.func @transform_0(%arg0: i32) -> (i32, i32) {
    %c0_i32 = arith.constant 0 : i32
    %c0_i32_0 = arith.constant 0 : i32
    return %arg0, %c0_i32 : i32, i32
  }
  func.func @transform_1(%arg0: i32) -> (i32, i32) {
    %c0_i32 = arith.constant 0 : i32
    %c0_i32_0 = arith.constant 0 : i32
    %c0_i32_1 = arith.constant 0 : i32
    return %c0_i32, %c0_i32_0 : i32, i32
  }
  func.func @transform_2(%arg0: i32) -> (i32, i32) {
    %c0_i32 = arith.constant 0 : i32
    %c0_i32_0 = arith.constant 0 : i32
    %c0_i32_1 = arith.constant 0 : i32
    return %c0_i32, %c0_i32_0 : i32, i32
  }
  func.func @transform_3(%arg0: i32) -> (i32, i32) {
    %c0_i32 = arith.constant 0 : i32
    %c0_i32_0 = arith.constant 0 : i32
    %c0_i32_1 = arith.constant 0 : i32
    return %c0_i32, %c0_i32_0 : i32, i32
  }
  func.func @transform_4(%arg0: i32) -> (i32, i32) {
    %c0_i32 = arith.constant 0 : i32
    %c0_i32_0 = arith.constant 0 : i32
    %c0_i32_1 = arith.constant 0 : i32
    return %c0_i32, %c0_i32_0 : i32, i32
  }
  func.func @transform_5(%arg0: i32) -> (i32, i32) {
    %c0_i32 = arith.constant 0 : i32
    %c0_i32_0 = arith.constant 0 : i32
    return %arg0, %c0_i32 : i32, i32
  }
}

module attributes {stable_mosaic.version = 11 : i64} {
  func.func @_ffn_kernel(%arg0: i32, %arg1: memref<16x384xbf16, #tpu.memory_space<vmem>>, %arg2: memref<384x1536xbf16, #tpu.memory_space<vmem>>, %arg3: memref<1x1536xf32, #tpu.memory_space<vmem>>, %arg4: memref<1536x384xbf16, #tpu.memory_space<vmem>>, %arg5: memref<1x384xf32, #tpu.memory_space<vmem>>, %arg6: memref<16x384xf32, #tpu.memory_space<vmem>>) attributes {dimension_semantics = [#tpu.dimension_semantics<parallel>], iteration_bounds = array<i64: 1>, scalar_prefetch = 0 : i64, scratch_operands = 0 : i64, tpu.core_type = #tpu.core_type<tc>, window_params = [{transform_indices = @transform_0, window_bounds = array<i64: 16, 384>}, {pipeline_mode = #tpu.pipeline_mode<synchronous>, transform_indices = @transform_1, window_bounds = array<i64: 384, 1536>}, {pipeline_mode = #tpu.pipeline_mode<synchronous>, transform_indices = @transform_2, window_bounds = array<i64: 1, 1536>}, {pipeline_mode = #tpu.pipeline_mode<synchronous>, transform_indices = @transform_3, window_bounds = array<i64: 1536, 384>}, {pipeline_mode = #tpu.pipeline_mode<synchronous>, transform_indices = @transform_4, window_bounds = array<i64: 1, 384>}, {transform_indices = @transform_5, window_bounds = array<i64: 16, 384>}]} {
    %c0 = arith.constant 0 : index
    %c0_0 = arith.constant 0 : index
    %0 = vector.load %arg1[%c0, %c0_0] : memref<16x384xbf16, #tpu.memory_space<vmem>>, vector<16x384xbf16>
    %cst = arith.constant 0.000000e+00 : f32
    %1 = vector.broadcast %cst : f32 to vector<16x384xf32>
    %c0_1 = arith.constant 0 : index
    %c0_2 = arith.constant 0 : index
    %2 = vector.load %arg2[%c0_1, %c0_2] : memref<384x1536xbf16, #tpu.memory_space<vmem>>, vector<384x512xbf16>
    %cst_3 = arith.constant dense<0.000000e+00> : vector<16x512xf32>
    %3 = tpu.matmul %0, %2, %cst_3 {dimension_numbers = #tpu.dot_dimension_numbers<[1], [0], [0], [1], [0, 0, 1, 1], [], []>} : vector<16x384xbf16>, vector<384x512xbf16>, vector<16x512xf32> -> vector<16x512xf32>
    %c0_4 = arith.constant 0 : index
    %c0_5 = arith.constant 0 : index
    %4 = vector.load %arg3[%c0_4, %c0_5] : memref<1x1536xf32, #tpu.memory_space<vmem>>, vector<1x512xf32>
    %5 = vector.broadcast %4 : vector<1x512xf32> to vector<16x512xf32>
    %6 = arith.addf %3, %5 : vector<16x512xf32>
    %cst_6 = arith.constant 0.000000e+00 : f32
    %7 = vector.broadcast %cst_6 : f32 to vector<16x512xf32>
    %8 = arith.maximumf %6, %7 : vector<16x512xf32>
    %9 = arith.truncf %8 : vector<16x512xf32> to vector<16x512xbf16>
    %c0_7 = arith.constant 0 : index
    %c0_8 = arith.constant 0 : index
    %10 = vector.load %arg4[%c0_7, %c0_8] : memref<1536x384xbf16, #tpu.memory_space<vmem>>, vector<512x384xbf16>
    %cst_9 = arith.constant dense<0.000000e+00> : vector<16x384xf32>
    %11 = tpu.matmul %9, %10, %cst_9 {dimension_numbers = #tpu.dot_dimension_numbers<[1], [0], [0], [1], [0, 0, 1, 1], [], []>} : vector<16x512xbf16>, vector<512x384xbf16>, vector<16x384xf32> -> vector<16x384xf32>
    %12 = arith.addf %1, %11 : vector<16x384xf32>
    %c0_10 = arith.constant 0 : index
    %c512 = arith.constant 512 : index
    %13 = vector.load %arg2[%c0_10, %c512] : memref<384x1536xbf16, #tpu.memory_space<vmem>>, vector<384x512xbf16>
    %cst_11 = arith.constant dense<0.000000e+00> : vector<16x512xf32>
    %14 = tpu.matmul %0, %13, %cst_11 {dimension_numbers = #tpu.dot_dimension_numbers<[1], [0], [0], [1], [0, 0, 1, 1], [], []>} : vector<16x384xbf16>, vector<384x512xbf16>, vector<16x512xf32> -> vector<16x512xf32>
    %c0_12 = arith.constant 0 : index
    %c512_13 = arith.constant 512 : index
    %15 = vector.load %arg3[%c0_12, %c512_13] : memref<1x1536xf32, #tpu.memory_space<vmem>>, vector<1x512xf32>
    %16 = vector.broadcast %15 : vector<1x512xf32> to vector<16x512xf32>
    %17 = arith.addf %14, %16 : vector<16x512xf32>
    %cst_14 = arith.constant 0.000000e+00 : f32
    %18 = vector.broadcast %cst_14 : f32 to vector<16x512xf32>
    %19 = arith.maximumf %17, %18 : vector<16x512xf32>
    %20 = arith.truncf %19 : vector<16x512xf32> to vector<16x512xbf16>
    %c512_15 = arith.constant 512 : index
    %c0_16 = arith.constant 0 : index
    %21 = vector.load %arg4[%c512_15, %c0_16] : memref<1536x384xbf16, #tpu.memory_space<vmem>>, vector<512x384xbf16>
    %cst_17 = arith.constant dense<0.000000e+00> : vector<16x384xf32>
    %22 = tpu.matmul %20, %21, %cst_17 {dimension_numbers = #tpu.dot_dimension_numbers<[1], [0], [0], [1], [0, 0, 1, 1], [], []>} : vector<16x512xbf16>, vector<512x384xbf16>, vector<16x384xf32> -> vector<16x384xf32>
    %23 = arith.addf %12, %22 : vector<16x384xf32>
    %c0_18 = arith.constant 0 : index
    %c1024 = arith.constant 1024 : index
    %24 = vector.load %arg2[%c0_18, %c1024] : memref<384x1536xbf16, #tpu.memory_space<vmem>>, vector<384x512xbf16>
    %cst_19 = arith.constant dense<0.000000e+00> : vector<16x512xf32>
    %25 = tpu.matmul %0, %24, %cst_19 {dimension_numbers = #tpu.dot_dimension_numbers<[1], [0], [0], [1], [0, 0, 1, 1], [], []>} : vector<16x384xbf16>, vector<384x512xbf16>, vector<16x512xf32> -> vector<16x512xf32>
    %c0_20 = arith.constant 0 : index
    %c1024_21 = arith.constant 1024 : index
    %26 = vector.load %arg3[%c0_20, %c1024_21] : memref<1x1536xf32, #tpu.memory_space<vmem>>, vector<1x512xf32>
    %27 = vector.broadcast %26 : vector<1x512xf32> to vector<16x512xf32>
    %28 = arith.addf %25, %27 : vector<16x512xf32>
    %cst_22 = arith.constant 0.000000e+00 : f32
    %29 = vector.broadcast %cst_22 : f32 to vector<16x512xf32>
    %30 = arith.maximumf %28, %29 : vector<16x512xf32>
    %31 = arith.truncf %30 : vector<16x512xf32> to vector<16x512xbf16>
    %c1024_23 = arith.constant 1024 : index
    %c0_24 = arith.constant 0 : index
    %32 = vector.load %arg4[%c1024_23, %c0_24] : memref<1536x384xbf16, #tpu.memory_space<vmem>>, vector<512x384xbf16>
    %cst_25 = arith.constant dense<0.000000e+00> : vector<16x384xf32>
    %33 = tpu.matmul %31, %32, %cst_25 {dimension_numbers = #tpu.dot_dimension_numbers<[1], [0], [0], [1], [0, 0, 1, 1], [], []>} : vector<16x512xbf16>, vector<512x384xbf16>, vector<16x384xf32> -> vector<16x384xf32>
    %34 = arith.addf %23, %33 : vector<16x384xf32>
    %c0_26 = arith.constant 0 : index
    %c0_27 = arith.constant 0 : index
    %35 = vector.load %arg5[%c0_26, %c0_27] : memref<1x384xf32, #tpu.memory_space<vmem>>, vector<1x384xf32>
    %36 = vector.broadcast %35 : vector<1x384xf32> to vector<16x384xf32>
    %37 = arith.addf %34, %36 : vector<16x384xf32>
    %c0_28 = arith.constant 0 : index
    %c0_29 = arith.constant 0 : index
    %38 = vector.load %arg6[%c0_28, %c0_29] : memref<16x384xf32, #tpu.memory_space<vmem>>, vector<16x384xf32>
    tpu.vector_store %arg6[%c0_28, %c0_29], %37 {strides = array<i32>} : memref<16x384xf32, #tpu.memory_space<vmem>>, vector<16x384xf32>,
    return
  }
  func.func @transform_0(%arg0: i32) -> (i32, i32) {
    %c0_i32 = arith.constant 0 : i32
    %c0_i32_0 = arith.constant 0 : i32
    return %arg0, %c0_i32 : i32, i32
  }
  func.func @transform_1(%arg0: i32) -> (i32, i32) {
    %c0_i32 = arith.constant 0 : i32
    %c0_i32_0 = arith.constant 0 : i32
    %c0_i32_1 = arith.constant 0 : i32
    return %c0_i32, %c0_i32_0 : i32, i32
  }
  func.func @transform_2(%arg0: i32) -> (i32, i32) {
    %c0_i32 = arith.constant 0 : i32
    %c0_i32_0 = arith.constant 0 : i32
    %c0_i32_1 = arith.constant 0 : i32
    return %c0_i32, %c0_i32_0 : i32, i32
  }
  func.func @transform_3(%arg0: i32) -> (i32, i32) {
    %c0_i32 = arith.constant 0 : i32
    %c0_i32_0 = arith.constant 0 : i32
    %c0_i32_1 = arith.constant 0 : i32
    return %c0_i32, %c0_i32_0 : i32, i32
  }
  func.func @transform_4(%arg0: i32) -> (i32, i32) {
    %c0_i32 = arith.constant 0 : i32
    %c0_i32_0 = arith.constant 0 : i32
    %c0_i32_1 = arith.constant 0 : i32
    return %c0_i32, %c0_i32_0 : i32, i32
  }
  func.func @transform_5(%arg0: i32) -> (i32, i32) {
    %c0_i32 = arith.constant 0 : i32
    %c0_i32_0 = arith.constant 0 : i32
    return %arg0, %c0_i32 : i32, i32
  }
}

</mosaic_0001>

<bundles_post_ra>
// kernel: tpu_custom_call.1
= control target key start
LH: loop header
LB: loop body
LE: loop exit
PB: predicated region body
PF: predicated region fallthrough
CT: control target
= control target key end

     0   :  { %10 = vsyncpa [#allocation3], 0  ;;  %s8252_s0 = inlined_call_operand.hbm [shape: bf16[16,384], index: 0, kind: input, shape index: {}]   ;;  %s8253_s1 = inlined_call_operand.hbm [shape: bf16[384,1536], index: 1, kind: input, shape index: {}]   ;;  %s8254_s2 = inlined_call_operand.hbm [shape: f32[1,1536], index: 2, kind: input, shape index: {}]   ;;  %s8255_s3 = inlined_call_operand.hbm [shape: bf16[1536,384], index: 3, kind: input, shape index: {}]   ;;  %s8256_s4 = inlined_call_operand.hbm [shape: f32[1,384], index: 4, kind: input, shape index: {}]   ;;  %s8257_s5 = inlined_call_operand.hbm [shape: f32[16,384], index: 5, kind: output, shape index: {}]  }
   0x1   :  { %11 = vsyncpa [#allocation6], 0 }
   0x2   :  { %12 = vsyncpa [#allocation9], 0  ;;  %s31_s20 = sshll.u32 %s8253_s1, 4  ;;  %s32_s20 = int_to_ptr.hbm [resolvable:$true] %s31_s20 }
   0x3   :  { %13 = vsyncpa [#allocation4], 0  ;;  %s7943_s21 = smov [#allocation5]   ;;  %s7944_s23 = smov 768  }
   0x4   :  { %s33_s22 = sshll.u32 %s7943_s21, 4  ;;  %s7945_s24 = smov 48   ;;  %s34_s22 = int_to_ptr.vmem [resolvable:$true] %s33_s22 }
   0x5   :  { %39 = dma.hbm_to_vmem [thread:$0]  %s32_s20, 36864, %s34_s22, [#allocation6], %s7944_s23, %s7944_s23, %s7945_s24  }
   0x6   :  { %s55_s27 = sshll.u32 %s8255_s3, 4  ;;  %s7946_s28 = smov [#allocation8]   ;;  %s56_s27 = int_to_ptr.hbm [resolvable:$true] %s55_s27 }
   0x7   :  { %s57_s29 = sshll.u32 %s7946_s28, 4  ;;  %s18_s7 = sshll.u32 %s8252_s0, 4  ;;  %s58_s29 = int_to_ptr.vmem [resolvable:$true] %s57_s29  ;;  %s19_s7 = int_to_ptr.hbm [resolvable:$true] %s18_s7 }
   0x8   :  { %s7947_s1 = smov 192   ;;  %s7948_s8 = smov 12  }
   0x9   :  { %63 = dma.hbm_to_vmem [thread:$0]  %s56_s27, 36864, %s58_s29, [#allocation9], %s7947_s1, %s7947_s1, %s7948_s8  }
   0xa   :  { %s45_s11 = sshll.u32 %s8254_s2, 4  ;;  %s7949_s12 = smov [#allocation2]   ;;  %s46_s11 = int_to_ptr.hbm [resolvable:$true] %s45_s11 }
   0xb   :  { %s20_s13 = sshll.u32 %s7949_s12, 4  ;;  %s7950_s3 = smov [#allocation7]   ;;  %s21_s13 = int_to_ptr.vmem [resolvable:$true] %s20_s13 }
   0xc   :  { %26 = dma.hbm_to_vmem [thread:$0]  %s19_s7, 384, %s21_s13, [#allocation3], %s7947_s1, %s7947_s1, %s7948_s8  }
   0xd   :  { %s47_s14 = sshll.u32 %s7950_s3, 4  ;;  %s69_s0 = sshll.u32 %s8256_s4, 4  ;;  %s48_s14 = int_to_ptr.vmem [resolvable:$true] %s47_s14  ;;  %s70_s0 = int_to_ptr.hbm [resolvable:$true] %s69_s0 }
   0xe   :  { %50 = dma.hbm_to_vmem [thread:$0]  %s46_s11, 192, %s48_s14, [#allocation6]  }
   0xf   :  { %s7951_s17 = smov [#allocation10]  }
  0x10   :  { %s71_s18 = sshll.u32 %s7951_s17, 4  ;;  %s72_s18 = int_to_ptr.vmem [resolvable:$true] %s71_s18 }
  0x11   :  { %74 = dma.hbm_to_vmem [thread:$0]  %s70_s0, 48, %s72_s18, [#allocation9]  }
  0x12   :  { %7935 = dma.done.wait [#allocation3], 384  }
  0x13   :  { %7936 = vsyncadd [#allocation3], 4294966912 }
  0x14   :  { %7937 = dma.done.wait [#allocation6], 37056  }
  0x15   :  { %7938 = vsyncadd [#allocation6], 4294930240 }
  0x16   :  { %7939 = dma.done.wait [#allocation9], 36912  }
  0x17   :  { %7940 = vsyncadd [#allocation9], 4294930384  ;;  %v5010_v0 = vld [vmem:[#allocation5 + $0x2a0] sm:$0xf]  ;;  %v7233_v1 = vld [vmem:[#allocation5 + $0x2cc] sm:$0xf0] }
  0x18   :  { %v5138_v2 = vld [vmem:[#allocation5 + $0x5a0] sm:$0xf]  ;;  %v5011_v3 = vor.u32 %v7233_v1, %v5010_v0  ;;  %v7265_v4 = vld [vmem:[#allocation5 + $0x5cc] sm:$0xf0]  ;;  %v7231_v9 = vld [vmem:[#allocation5 + $0x2a4] sm:$0xf] }
  0x19   :  { %v5266_v5 = vld [vmem:[#allocation5 + $0x8a0] sm:$0xf]  ;;  %v7297_v6 = vld [vmem:[#allocation5 + $0x8cc] sm:$0xf0]  ;;  %v5139_v7 = vor.u32 %v7265_v4, %v5138_v2  ;;  %v5012_v10 = vld [vmem:[#allocation5 + $0x2d0] sm:$0xf0] }
  0x1a   :  { %v5267_v8 = vor.u32 %v7297_v6, %v5266_v5  ;;  %v4994_v11 = vld [vmem:[#allocation5 + $0x240] sm:$0xf]  ;;  %701 = vmatpush.bf16.msra.mxu0 %v5011_v3  ;;  %v5015_v12 = vor.u32 %v7231_v9, %v5012_v10  ;;  %v7229_v13 = vld [vmem:[#allocation5 + $0x26c] sm:$0xf0]  ;;  %v7227_v20 = vld [vmem:[#allocation5 + $0x244] sm:$0xf] }
  0x1b   :  { %v5122_v14 = vld [vmem:[#allocation5 + $0x540] sm:$0xf]  ;;  %v7261_v15 = vld [vmem:[#allocation5 + $0x56c] sm:$0xf0]  ;;  %715 = vmatpush.bf16.msra.mxu1 %v5139_v7  ;;  %v4995_v16 = vor.u32 %v7229_v13, %v4994_v11  ;;  %v4996_v22 = vld [vmem:[#allocation5 + $0x270] sm:$0xf0] }
  0x1c   :  { %729 = vmatpush.bf16.msra.mxu2 %v5267_v8  ;;  %v5123_v17 = vor.u32 %v7261_v15, %v5122_v14  ;;  %v5250_v18 = vld [vmem:[#allocation5 + $0x840] sm:$0xf]  ;;  %v7293_v19 = vld [vmem:[#allocation5 + $0x86c] sm:$0xf0]  ;;  %743 = vmatpush.bf16.msra.mxu3 %v5015_v12  ;;  %v4999_v25 = vor.u32 %v7227_v20, %v4996_v22  ;;  %v7223_v31 = vld [vmem:[#allocation5 + $0x1e4] sm:$0xf] }
  0x1d   :  { %v5251_v21 = vor.u32 %v7293_v19, %v5250_v18  ;;  %v4978_v23 = vld [vmem:[#allocation5 + $0x1e0] sm:$0xf]  ;;  %v7225_v24 = vld [vmem:[#allocation5 + $0x20c] sm:$0xf0]  ;;  %v4980_v32 = vld [vmem:[#allocation5 + $0x210] sm:$0xf0] }
  0x1e   :  { %v5106_v26 = vld [vmem:[#allocation5 + $0x4e0] sm:$0xf]  ;;  %v7257_v27 = vld [vmem:[#allocation5 + $0x50c] sm:$0xf0]  ;;  %702 = vmatpush.bf16.msra.mxu0 %v4995_v16  ;;  %v4979_v29 = vor.u32 %v7225_v24, %v4978_v23  ;;  %v4983_v38 = vor.u32 %v7223_v31, %v4980_v32  ;;  %v7219_v42 = vld [vmem:[#allocation5 + $0x184] sm:$0xf] }
  0x1f   :  { %v5234_v28 = vld [vmem:[#allocation5 + $0x7e0] sm:$0xf]  ;;  %v7289_v30 = vld [vmem:[#allocation5 + $0x80c] sm:$0xf0]  ;;  %716 = vmatpush.bf16.msra.mxu1 %v5123_v17  ;;  %v5107_v33 = vor.u32 %v7257_v27, %v5106_v26  ;;  %v4964_v43 = vld [vmem:[#allocation5 + $0x1b0] sm:$0xf0] }
  0x20   :  { %730 = vmatpush.bf16.msra.mxu2 %v5251_v21  ;;  %v5235_v34 = vor.u32 %v7289_v30, %v5234_v28  ;;  %v4962_v35 = vld [vmem:[#allocation5 + $0x180] sm:$0xf]  ;;  %v7221_v36 = vld [vmem:[#allocation5 + $0x1ac] sm:$0xf0]  ;;  %744 = vmatpush.bf16.msra.mxu3 %v4999_v25  ;;  %v4967_v50 = vor.u32 %v7219_v42, %v4964_v43  ;;  %v7215_v54 = vld [vmem:[#allocation5 + $0x124] sm:$0xf] }
  0x21   :  { %v5090_v37 = vld [vmem:[#allocation5 + $0x480] sm:$0xf]  ;;  %v7253_v39 = vld [vmem:[#allocation5 + $0x4ac] sm:$0xf0]  ;;  %v4963_v44 = vor.u32 %v7221_v36, %v4962_v35  ;;  %v4948_v55 = vld [vmem:[#allocation5 + $0x150] sm:$0xf0] }
  0x22   :  { %v5218_v40 = vld [vmem:[#allocation5 + $0x780] sm:$0xf]  ;;  %v7285_v41 = vld [vmem:[#allocation5 + $0x7ac] sm:$0xf0]  ;;  %703 = vmatpush.bf16.msra.mxu0 %v4979_v29  ;;  %v5091_v45 = vor.u32 %v7253_v39, %v5090_v37  ;;  %v4951_v62 = vor.u32 %v7215_v54, %v4948_v55  ;;  %v7211_v2 = vld [vmem:[#allocation5 + $0xc4] sm:$0xf] }
  0x23   :  { %717 = vmatpush.bf16.msra.mxu1 %v5107_v33  ;;  %v5219_v46 = vor.u32 %v7285_v41, %v5218_v40  ;;  %v4946_v47 = vld [vmem:[#allocation5 + $0x120] sm:$0xf]  ;;  %v7217_v48 = vld [vmem:[#allocation5 + $0x14c] sm:$0xf0]  ;;  %v4932_v3 = vld [vmem:[#allocation5 + $0xf0] sm:$0xf0] }
  0x24   :  { %731 = vmatpush.bf16.msra.mxu2 %v5235_v34  ;;  %v5074_v49 = vld [vmem:[#allocation5 + $0x420] sm:$0xf]  ;;  %745 = vmatpush.bf16.msra.mxu3 %v4983_v38  ;;  %v7249_v51 = vld [vmem:[#allocation5 + $0x44c] sm:$0xf0]  ;;  %v4947_v56 = vor.u32 %v7217_v48, %v4946_v47  ;;  %v4935_v10 = vor.u32 %v7211_v2, %v4932_v3  ;;  %v7207_v14 = vld [vmem:[#allocation5 + $0x64] sm:$0xf] }
  0x25   :  { %v5202_v52 = vld [vmem:[#allocation5 + $0x720] sm:$0xf]  ;;  %v7281_v53 = vld [vmem:[#allocation5 + $0x74c] sm:$0xf0]  ;;  %v5075_v57 = vor.u32 %v7249_v51, %v5074_v49  ;;  %v4916_v15 = vld [vmem:[#allocation5 + $0x90] sm:$0xf0] }
  0x26   :  { %704 = vmatpush.bf16.msra.mxu0 %v4963_v44  ;;  %v5203_v58 = vor.u32 %v7281_v53, %v5202_v52  ;;  %v4930_v59 = vld [vmem:[#allocation5 + $0xc0] sm:$0xf]  ;;  %v7213_v60 = vld [vmem:[#allocation5 + $0xec] sm:$0xf0]  ;;  %v4919_v24 = vor.u32 %v7207_v14, %v4916_v15  ;;  %v7203_v26 = vld [vmem:[#allocation5 + $0x4] sm:$0xf] }
  0x27   :  { %718 = vmatpush.bf16.msra.mxu1 %v5091_v45  ;;  %v5058_v61 = vld [vmem:[#allocation5 + $0x3c0] sm:$0xf]  ;;  %v7245_v63 = vld [vmem:[#allocation5 + $0x3ec] sm:$0xf0]  ;;  %v4931_v4 = vor.u32 %v7213_v60, %v4930_v59  ;;  %v4900_v27 = vld [vmem:[#allocation5 + $0x30] sm:$0xf0] }
  0x28   :  { %732 = vmatpush.bf16.msra.mxu2 %v5219_v46  ;;  %746 = vmatpush.bf16.msra.mxu3 %v4967_v50  ;;  %v5186_v0 = vld [vmem:[#allocation5 + $0x6c0] sm:$0xf]  ;;  %v7277_v1 = vld [vmem:[#allocation5 + $0x6ec] sm:$0xf0]  ;;  %v5059_v5 = vor.u32 %v7245_v63, %v5058_v61  ;;  %v7263_v28 = vld [vmem:[#allocation5 + $0x5a4] sm:$0xf]  ;;  %v4903_v39 = vor.u32 %v7203_v26, %v4900_v27 }
  0x29   :  { %v5187_v6 = vor.u32 %v7277_v1, %v5186_v0  ;;  %v4914_v7 = vld [vmem:[#allocation5 + $0x60] sm:$0xf]  ;;  %v7209_v8 = vld [vmem:[#allocation5 + $0x8c] sm:$0xf0]  ;;  %v5140_v29 = vld [vmem:[#allocation5 + $0x5d0] sm:$0xf0] }
  0x2a   :  { %705 = vmatpush.bf16.msra.mxu0 %v4947_v56  ;;  %v5042_v9 = vld [vmem:[#allocation5 + $0x360] sm:$0xf]  ;;  %v7241_v11 = vld [vmem:[#allocation5 + $0x38c] sm:$0xf0]  ;;  %v4915_v16 = vor.u32 %v7209_v8, %v4914_v7  ;;  %v7295_v30 = vld [vmem:[#allocation5 + $0x8a4] sm:$0xf]  ;;  %v5143_v40 = vor.u32 %v7263_v28, %v5140_v29 }
  0x2b   :  { %719 = vmatpush.bf16.msra.mxu1 %v5075_v57  ;;  %v5170_v12 = vld [vmem:[#allocation5 + $0x660] sm:$0xf]  ;;  %v7273_v13 = vld [vmem:[#allocation5 + $0x68c] sm:$0xf0]  ;;  %v5043_v19 = vor.u32 %v7241_v11, %v5042_v9  ;;  %v5268_v32 = vld [vmem:[#allocation5 + $0x8d0] sm:$0xf0] }
  0x2c   :  { %733 = vmatpush.bf16.msra.mxu2 %v5203_v58  ;;  %747 = vmatpush.bf16.msra.mxu3 %v4951_v62  ;;  %v4898_v17 = vld [vmem:[#allocation5] sm:$0xf]  ;;  %v7205_v18 = vld [vmem:[#allocation5 + $0x2c] sm:$0xf0]  ;;  %v5171_v20 = vor.u32 %v7273_v13, %v5170_v12  ;;  %v5018_v33 = vld [vmem:[#allocation5 + $0x2a8] sm:$0xf]  ;;  %v5271_v42 = vor.u32 %v7295_v30, %v5268_v32 }
  0x2d   :  { %v5026_v21 = vld [vmem:[#allocation5 + $0x300] sm:$0xf]  ;;  %v7237_v22 = vld [vmem:[#allocation5 + $0x32c] sm:$0xf0]  ;;  %v4899_v31 = vor.u32 %v7205_v18, %v4898_v17  ;;  %v7234_v34 = vld [vmem:[#allocation5 + $0x2d4] sm:$0xf0] }
  0x2e   :  { %706 = vmatpush.bf16.msra.mxu0 %v4931_v4  ;;  %v5154_v23 = vld [vmem:[#allocation5 + $0x600] sm:$0xf]  ;;  %v7269_v25 = vld [vmem:[#allocation5 + $0x62c] sm:$0xf0]  ;;  %v5027_v35 = vor.u32 %v7237_v22, %v5026_v21  ;;  %v5146_v37 = vld [vmem:[#allocation5 + $0x5a8] sm:$0xf]  ;;  %v5019_v43 = vor.u32 %v7234_v34, %v5018_v33 }
  0x2f   :  { %720 = vmatpush.bf16.msra.mxu1 %v5059_v5  ;;  %v5155_v36 = vor.u32 %v7269_v25, %v5154_v23  ;;  %v7266_v38 = vld [vmem:[#allocation5 + $0x5d4] sm:$0xf0]  ;;  %v7259_v41 = vld [vmem:[#allocation5 + $0x544] sm:$0xf]  ;;  %v5124_v44 = vld [vmem:[#allocation5 + $0x570] sm:$0xf0] }
  0x30   :  { %734 = vmatpush.bf16.msra.mxu2 %v5187_v6  ;;  %748 = vmatpush.bf16.msra.mxu3 %v4935_v10  ;;  %v7291_v45 = vld [vmem:[#allocation5 + $0x844] sm:$0xf]  ;;  %v5252_v46 = vld [vmem:[#allocation5 + $0x870] sm:$0xf0]  ;;  %v5147_v47 = vor.u32 %v7266_v38, %v5146_v37  ;;  %v5002_v48 = vld [vmem:[#allocation5 + $0x248] sm:$0xf]  ;;  %v5127_v54 = vor.u32 %v7259_v41, %v5124_v44 }
  0x31   :  { %v7230_v49 = vld [vmem:[#allocation5 + $0x274] sm:$0xf0]  ;;  %v5130_v50 = vld [vmem:[#allocation5 + $0x548] sm:$0xf]  ;;  %v7201_v53 = vld [vmem:[#allocation2 + $0x8] sm:$0xf0]  ;;  %v5255_v58 = vor.u32 %v7291_v45, %v5252_v46 }
  0x32   :  { %707 = vmatpush.bf16.msra.mxu0 %v4915_v16  ;;  %v7262_v51 = vld [vmem:[#allocation5 + $0x574] sm:$0xf0]  ;;  %v4886_v52 = vld [vmem:[#allocation2] sm:$0xf]  ;;  %v7255_v55 = vld [vmem:[#allocation5 + $0x4e4] sm:$0xf]  ;;  %v5003_v59 = vor.u32 %v7230_v49, %v5002_v48 }
  0x33   :  { %721 = vmatpush.bf16.msra.mxu1 %v5043_v19  ;;  %v5108_v56 = vld [vmem:[#allocation5 + $0x510] sm:$0xf0]  ;;  %v8000_v57 = vor.u32 %v7201_v53, %v4886_v52  ;;  %v7287_v60 = vld [vmem:[#allocation5 + $0x7e4] sm:$0xf]  ;;  %v4986_v62 = vld [vmem:[#allocation5 + $0x1e8] sm:$0xf]  ;;  %v5131_v63 = vor.u32 %v7262_v51, %v5130_v50 }
  0x34   :  { %735 = vmatpush.bf16.msra.mxu2 %v5171_v20  ;;  %749 = vmatpush.bf16.msra.mxu3 %v4919_v24  ;;  %v5236_v61 = vld [vmem:[#allocation5 + $0x810] sm:$0xf0]  ;;  %v7226_v0 = vld [vmem:[#allocation5 + $0x214] sm:$0xf0]  ;;  %v7200_v1 = vld [vmem:[#allocation2 + $0x4] sm:$0xf]  ;;  %v5111_v6 = vor.u32 %v7255_v55, %v5108_v56 }
  0x35   :  { %v4888_v2 = vld [vmem:[#allocation2 + $0xc] sm:$0xf0]  ;;  %v5114_v3 = vld [vmem:[#allocation5 + $0x4e8] sm:$0xf]  ;;  %v7251_v7 = vld [vmem:[#allocation5 + $0x484] sm:$0xf]  ;;  %v5239_v9 = vor.u32 %v7287_v60, %v5236_v61  ;;  %v4987_v10 = vor.u32 %v7226_v0, %v4986_v62 }
  0x36   :  { %708 = vmatpush.bf16.msra.mxu0 %v4899_v31  ;;  %v7258_v4 = vld [vmem:[#allocation5 + $0x514] sm:$0xf0]  ;;  %v8003_v5 = vor.u32 %v7200_v1, %v4888_v2  ;;  %v5092_v8 = vld [vmem:[#allocation5 + $0x4b0] sm:$0xf0]  ;;  %v7283_v11 = vld [vmem:[#allocation5 + $0x784] sm:$0xf] }
  0x37   :  { %722 = vmatpush.bf16.msra.mxu1 %v5027_v35  ;;  %v5220_v12 = vld [vmem:[#allocation5 + $0x7b0] sm:$0xf0]  ;;  %v4894_v13 = vld [vmem:[#allocation2 + $0x8] sm:$0xf]  ;;  %v5115_v14 = vor.u32 %v7258_v4, %v5114_v3  ;;  %v4970_v15 = vld [vmem:[#allocation5 + $0x188] sm:$0xf]  ;;  %v5095_v21 = vor.u32 %v7251_v7, %v5092_v8 }
  0x38   :  { %736 = vmatpush.bf16.msra.mxu2 %v5155_v36  ;;  %750 = vmatpush.bf16.msra.mxu3 %v4903_v39  ;;  %v7222_v16 = vld [vmem:[#allocation5 + $0x1b4] sm:$0xf0]  ;;  %v7202_v17 = vld [vmem:[#allocation2 + $0x10] sm:$0xf0]  ;;  %v5098_v18 = vld [vmem:[#allocation5 + $0x488] sm:$0xf]  ;;  %v5223_v22 = vor.u32 %v7283_v11, %v5220_v12 }
  0x39   :  { %709 = vmatmul.bf16.vlgmr.msra.gmra.mxu0 %v8000_v57  ;;  %v7254_v19 = vld [vmem:[#allocation5 + $0x4b4] sm:$0xf0]  ;;  %v8007_v20 = vor.u32 %v7202_v17, %v4894_v13  ;;  %v4971_v23 = vor.u32 %v7222_v16, %v4970_v15  ;;  %v7247_v24 = vld [vmem:[#allocation5 + $0x424] sm:$0xf]  ;;  %v5076_v25 = vld [vmem:[#allocation5 + $0x450] sm:$0xf0] }
  0x3a   :  { %757 = vmatpush.bf16.msrb.mxu0 %v5143_v40  ;;  %723 = vmatmul.bf16.vlgmr.msra.gmra.mxu1 %v8003_v5  ;;  %v7279_v26 = vld [vmem:[#allocation5 + $0x724] sm:$0xf]  ;;  %v5099_v27 = vor.u32 %v7254_v19, %v5098_v18  ;;  %v5204_v28 = vld [vmem:[#allocation5 + $0x750] sm:$0xf0]  ;;  %v4954_v29 = vld [vmem:[#allocation5 + $0x128] sm:$0xf]  ;;  %v5079_v33 = vor.u32 %v7247_v24, %v5076_v25 }
  0x3b   :  { %771 = vmatpush.bf16.msrb.mxu1 %v5271_v42  ;;  %751 = vmatmul.bf16.vlgmr.msra.gmra.mxu3 %v8000_v57  ;;  %v7218_v30 = vld [vmem:[#allocation5 + $0x154] sm:$0xf0]  ;;  %v5082_v31 = vld [vmem:[#allocation5 + $0x428] sm:$0xf]  ;;  %v5207_v34 = vor.u32 %v7279_v26, %v5204_v28  ;;  %v7243_v36 = vld [vmem:[#allocation5 + $0x3c4] sm:$0xf] }
  0x3c   :  { %785 = vmatpush.bf16.msrb.mxu2 %v5019_v43  ;;  %799 = vmatpush.bf16.msrb.mxu3 %v5147_v47  ;;  %v7250_v32 = vld [vmem:[#allocation5 + $0x454] sm:$0xf0]  ;;  %v4955_v35 = vor.u32 %v7218_v30, %v4954_v29  ;;  %v5060_v37 = vld [vmem:[#allocation5 + $0x3f0] sm:$0xf0]  ;;  %v7275_v38 = vld [vmem:[#allocation5 + $0x6c4] sm:$0xf] }
  0x3d   :  { %737 = vmatmul.bf16.vlgmr.msra.gmra.mxu2 %v8007_v20  ;;  %v5083_v39 = vor.u32 %v7250_v32, %v5082_v31  ;;  %v5188_v40 = vld [vmem:[#allocation5 + $0x6f0] sm:$0xf0]  ;;  %v4938_v41 = vld [vmem:[#allocation5 + $0xc8] sm:$0xf]  ;;  %v7214_v42 = vld [vmem:[#allocation5 + $0xf4] sm:$0xf0]  ;;  %v5063_v45 = vor.u32 %v7243_v36, %v5060_v37 }
  0x3e   :  { %758 = vmatpush.bf16.msrb.mxu0 %v5127_v54  ;;  %v5066_v43 = vld [vmem:[#allocation5 + $0x3c8] sm:$0xf]  ;;  %v7246_v44 = vld [vmem:[#allocation5 + $0x3f4] sm:$0xf0]  ;;  %v5191_v46 = vor.u32 %v7275_v38, %v5188_v40  ;;  %v4939_v47 = vor.u32 %v7214_v42, %v4938_v41  ;;  %v7239_v48 = vld [vmem:[#allocation5 + $0x364] sm:$0xf] }
  0x3f   :  { %772 = vmatpush.bf16.msrb.mxu1 %v5255_v58  ;;  %v5044_v49 = vld [vmem:[#allocation5 + $0x390] sm:$0xf0]  ;;  %v7271_v50 = vld [vmem:[#allocation5 + $0x664] sm:$0xf]  ;;  %v5067_v51 = vor.u32 %v7246_v44, %v5066_v43  ;;  %v4922_v53 = vld [vmem:[#allocation5 + $0x68] sm:$0xf] }
  0x40   :  { %786 = vmatpush.bf16.msrb.mxu2 %v5003_v59  ;;  %800 = vmatpush.bf16.msrb.mxu3 %v5131_v63  ;;  %v5172_v52 = vld [vmem:[#allocation5 + $0x690] sm:$0xf0]  ;;  %v7210_v54 = vld [vmem:[#allocation5 + $0x94] sm:$0xf0]  ;;  %v5050_v55 = vld [vmem:[#allocation5 + $0x368] sm:$0xf]  ;;  %v5047_v58 = vor.u32 %v7239_v48, %v5044_v49 }
  0x41   :  { %v7242_v56 = vld [vmem:[#allocation5 + $0x394] sm:$0xf0]  ;;  %v7235_v59 = vld [vmem:[#allocation5 + $0x304] sm:$0xf]  ;;  %v5028_v60 = vld [vmem:[#allocation5 + $0x330] sm:$0xf0]  ;;  %v5175_v61 = vor.u32 %v7271_v50, %v5172_v52  ;;  %v4923_v62 = vor.u32 %v7210_v54, %v4922_v53 }
  0x42   :  { %759 = vmatpush.bf16.msrb.mxu0 %v5111_v6  ;;  %v7267_v63 = vld [vmem:[#allocation5 + $0x604] sm:$0xf]  ;;  %v5156_v0 = vld [vmem:[#allocation5 + $0x630] sm:$0xf0]  ;;  %v4906_v1 = vld [vmem:[#allocation5 + $0x8] sm:$0xf]  ;;  %v5051_v2 = vor.u32 %v7242_v56, %v5050_v55 }
  0x43   :  { %773 = vmatpush.bf16.msrb.mxu1 %v5239_v9  ;;  %v7206_v3 = vld [vmem:[#allocation5 + $0x34] sm:$0xf0]  ;;  %v5034_v4 = vld [vmem:[#allocation5 + $0x308] sm:$0xf]  ;;  %v7232_v9 = vld [vmem:[#allocation5 + $0x2ac] sm:$0xf] }
  0x44   :  { %787 = vmatpush.bf16.msrb.mxu2 %v4987_v10  ;;  %801 = vmatpush.bf16.msrb.mxu3 %v5115_v14  ;;  %v7238_v6 = vld [vmem:[#allocation5 + $0x334] sm:$0xf0]  ;;  %v5274_v7 = vld [vmem:[#allocation5 + $0x8a8] sm:$0xf]  ;;  %v5031_v10 = vor.u32 %v7235_v59, %v5028_v60  ;;  %v5020_v11 = vld [vmem:[#allocation5 + $0x2d8] sm:$0xf0]  ;;  %v5159_v14 = vor.u32 %v7267_v63, %v5156_v0  ;;  %v4907_v15 = vor.u32 %v7206_v3, %v4906_v1 }
  0x45   :  { %v7298_v8 = vld [vmem:[#allocation5 + $0x8d4] sm:$0xf0]  ;;  %v7264_v12 = vld [vmem:[#allocation5 + $0x5ac] sm:$0xf]  ;;  %v5148_v13 = vld [vmem:[#allocation5 + $0x5d8] sm:$0xf0]  ;;  %v5035_v18 = vor.u32 %v7238_v6, %v5034_v4 }
  0x46   :  { %760 = vmatpush.bf16.msrb.mxu0 %v5095_v21  ;;  %v7296_v16 = vld [vmem:[#allocation5 + $0x8ac] sm:$0xf]  ;;  %v5276_v17 = vld [vmem:[#allocation5 + $0x8d8] sm:$0xf0]  ;;  %v5275_v19 = vor.u32 %v7298_v8, %v5274_v7  ;;  %v5023_v21 = vor.u32 %v7232_v9, %v5020_v11  ;;  %v7294_v24 = vld [vmem:[#allocation5 + $0x874] sm:$0xf0] }
  0x47   :  { %774 = vmatpush.bf16.msrb.mxu1 %v5223_v22  ;;  %v5151_v22 = vor.u32 %v7264_v12, %v5148_v13  ;;  %v7228_v25 = vld [vmem:[#allocation5 + $0x24c] sm:$0xf]  ;;  %v5279_v26 = vor.u32 %v7296_v16, %v5276_v17  ;;  %v5132_v29 = vld [vmem:[#allocation5 + $0x578] sm:$0xf0]  ;;  %v7290_v36 = vld [vmem:[#allocation5 + $0x814] sm:$0xf0] }
  0x48   :  { %788 = vmatpush.bf16.msrb.mxu2 %v4971_v23  ;;  %802 = vmatpush.bf16.msrb.mxu3 %v5099_v27  ;;  %v5258_v23 = vld [vmem:[#allocation5 + $0x848] sm:$0xf]  ;;  %v5004_v27 = vld [vmem:[#allocation5 + $0x278] sm:$0xf0]  ;;  %v7260_v28 = vld [vmem:[#allocation5 + $0x54c] sm:$0xf] }
  0x49   :  { %v7292_v30 = vld [vmem:[#allocation5 + $0x84c] sm:$0xf]  ;;  %v5260_v31 = vld [vmem:[#allocation5 + $0x878] sm:$0xf0]  ;;  %v5259_v32 = vor.u32 %v7294_v24, %v5258_v23  ;;  %v7286_v48 = vld [vmem:[#allocation5 + $0x7b4] sm:$0xf0] }
  0x4a   :  { %761 = vmatpush.bf16.msrb.mxu0 %v5079_v33  ;;  %v5007_v33 = vor.u32 %v7228_v25, %v5004_v27  ;;  %v7224_v37 = vld [vmem:[#allocation5 + $0x1ec] sm:$0xf]  ;;  %v5263_v38 = vor.u32 %v7292_v30, %v5260_v31  ;;  %v5116_v41 = vld [vmem:[#allocation5 + $0x518] sm:$0xf0]  ;;  %v5210_v60 = vld [vmem:[#allocation5 + $0x728] sm:$0xf] }
  0x4b   :  { %775 = vmatpush.bf16.msrb.mxu1 %v5207_v34  ;;  %v5135_v34 = vor.u32 %v7260_v28, %v5132_v29  ;;  %v7256_v40 = vld [vmem:[#allocation5 + $0x4ec] sm:$0xf]  ;;  %v5244_v43 = vld [vmem:[#allocation5 + $0x818] sm:$0xf0]  ;;  %v5194_v9 = vld [vmem:[#allocation5 + $0x6c8] sm:$0xf] }
  0x4c   :  { %789 = vmatpush.bf16.msrb.mxu2 %v4955_v35  ;;  %803 = vmatpush.bf16.msrb.mxu3 %v5083_v39  ;;  %v5242_v35 = vld [vmem:[#allocation5 + $0x7e8] sm:$0xf]  ;;  %v4988_v39 = vld [vmem:[#allocation5 + $0x218] sm:$0xf0]  ;;  %v7288_v42 = vld [vmem:[#allocation5 + $0x7ec] sm:$0xf] }
  0x4d   :  { %v5243_v44 = vor.u32 %v7290_v36, %v5242_v35  ;;  %v7220_v49 = vld [vmem:[#allocation5 + $0x18c] sm:$0xf]  ;;  %v5247_v50 = vor.u32 %v7288_v42, %v5244_v43  ;;  %v5100_v53 = vld [vmem:[#allocation5 + $0x4b8] sm:$0xf0]  ;;  %v7274_v23 = vld [vmem:[#allocation5 + $0x694] sm:$0xf0] }
  0x4e   :  { %762 = vmatpush.bf16.msrb.mxu0 %v5063_v45  ;;  %v4991_v45 = vor.u32 %v7224_v37, %v4988_v39  ;;  %v7252_v52 = vld [vmem:[#allocation5 + $0x48c] sm:$0xf]  ;;  %v5228_v55 = vld [vmem:[#allocation5 + $0x7b8] sm:$0xf0]  ;;  %v5394_v43 = vld [vmem:[#allocation5 + $0x2b0] sm:$0xf] }
  0x4f   :  { %776 = vmatpush.bf16.msrb.mxu1 %v5191_v46  ;;  %v5119_v46 = vor.u32 %v7256_v40, %v5116_v41  ;;  %v7284_v54 = vld [vmem:[#allocation5 + $0x78c] sm:$0xf]  ;;  %v5103_v59 = vor.u32 %v7252_v52, %v5100_v53  ;;  %v4956_v0 = vld [vmem:[#allocation5 + $0x158] sm:$0xf0]  ;;  %v7423_v52 = vld [vmem:[#allocation5 + $0x2b4] sm:$0xf] }
  0x50   :  { %790 = vmatpush.bf16.msrb.mxu2 %v4939_v47  ;;  %804 = vmatpush.bf16.msrb.mxu3 %v5067_v51  ;;  %v5226_v47 = vld [vmem:[#allocation5 + $0x788] sm:$0xf]  ;;  %v4972_v51 = vld [vmem:[#allocation5 + $0x1b8] sm:$0xf0]  ;;  %v5231_v63 = vor.u32 %v7284_v54, %v5228_v55  ;;  %v7248_v1 = vld [vmem:[#allocation5 + $0x42c] sm:$0xf] }
  0x51   :  { %v5227_v56 = vor.u32 %v7286_v48, %v5226_v47  ;;  %v7280_v3 = vld [vmem:[#allocation5 + $0x72c] sm:$0xf]  ;;  %v5212_v4 = vld [vmem:[#allocation5 + $0x758] sm:$0xf0]  ;;  %v7457_v47 = vld [vmem:[#allocation5 + $0x5dc] sm:$0xf0] }
  0x52   :  { %763 = vmatpush.bf16.msrb.mxu0 %v5047_v58  ;;  %v4975_v58 = vor.u32 %v7220_v49, %v4972_v51  ;;  %v7212_v11 = vld [vmem:[#allocation5 + $0xcc] sm:$0xf]  ;;  %v5215_v12 = vor.u32 %v7280_v3, %v5212_v4  ;;  %v4940_v13 = vld [vmem:[#allocation5 + $0xf8] sm:$0xf0]  ;;  %v5650_v48 = vld [vmem:[#allocation5 + $0x8b0] sm:$0xf] }
  0x53   :  { %777 = vmatpush.bf16.msrb.mxu1 %v5175_v61  ;;  %v7282_v61 = vld [vmem:[#allocation5 + $0x754] sm:$0xf0]  ;;  %v7276_v16 = vld [vmem:[#allocation5 + $0x6cc] sm:$0xf]  ;;  %v5196_v17 = vld [vmem:[#allocation5 + $0x6f8] sm:$0xf0] }
  0x54   :  { %791 = vmatpush.bf16.msrb.mxu2 %v4923_v62  ;;  %805 = vmatpush.bf16.msrb.mxu3 %v5051_v2  ;;  %v7216_v62 = vld [vmem:[#allocation5 + $0x12c] sm:$0xf]  ;;  %v5084_v2 = vld [vmem:[#allocation5 + $0x458] sm:$0xf0]  ;;  %v5211_v6 = vor.u32 %v7282_v61, %v5210_v60  ;;  %v5199_v25 = vor.u32 %v7276_v16, %v5196_v17  ;;  %v7489_v49 = vld [vmem:[#allocation5 + $0x8dc] sm:$0xf0] }
  0x55   :  { %v4959_v7 = vor.u32 %v7216_v62, %v4956_v0  ;;  %v5087_v8 = vor.u32 %v7248_v1, %v5084_v2  ;;  %v7208_v24 = vld [vmem:[#allocation5 + $0x6c] sm:$0xf]  ;;  %v5052_v28 = vld [vmem:[#allocation5 + $0x398] sm:$0xf0]  ;;  %v5396_v53 = vld [vmem:[#allocation5 + $0x2e0] sm:$0xf0] }
  0x56   :  { %764 = vmatpush.bf16.msrb.mxu0 %v5031_v10  ;;  %v7278_v10 = vld [vmem:[#allocation5 + $0x6f4] sm:$0xf0]  ;;  %v7240_v27 = vld [vmem:[#allocation5 + $0x36c] sm:$0xf]  ;;  %v5180_v30 = vld [vmem:[#allocation5 + $0x698] sm:$0xf0]  ;;  %v5399_v62 = vor.u32 %v7423_v52, %v5396_v53 }
  0x57   :  { %778 = vmatpush.bf16.msrb.mxu1 %v5159_v14  ;;  %v7244_v14 = vld [vmem:[#allocation5 + $0x3cc] sm:$0xf]  ;;  %v5055_v35 = vor.u32 %v7240_v27, %v5052_v28  ;;  %v4908_v37 = vld [vmem:[#allocation5 + $0x38] sm:$0xf0]  ;;  %v7421_v60 = vld [vmem:[#allocation5 + $0x27c] sm:$0xf0] }
  0x58   :  { %792 = vmatpush.bf16.msrb.mxu2 %v4907_v15  ;;  %806 = vmatpush.bf16.msrb.mxu3 %v5035_v18  ;;  %v5068_v15 = vld [vmem:[#allocation5 + $0x3f8] sm:$0xf0]  ;;  %v5195_v18 = vor.u32 %v7278_v10, %v5194_v9  ;;  %v7272_v29 = vld [vmem:[#allocation5 + $0x66c] sm:$0xf]  ;;  %v5506_v61 = vld [vmem:[#allocation5 + $0x550] sm:$0xf] }
  0x59   :  { %765 = vmatmul.bf16.vlgmr.msrb.gmra.mxu0 %v8003_v5  ;;  %v7204_v36 = vld [vmem:[#allocation5 + $0xc] sm:$0xf]  ;;  %v5183_v39 = vor.u32 %v7272_v29, %v5180_v30  ;;  %v5036_v40 = vld [vmem:[#allocation5 + $0x338] sm:$0xf0]  ;;  %v5634_v0 = vld [vmem:[#allocation5 + $0x850] sm:$0xf] }
  0x5a   :  { %813 = vmatpush.bf16.msra.mxu0 %v5275_v19  ;;  %779 = vmatmul.bf16.vlgmr.msrb.gmra.mxu1 %v8007_v20  ;;  %v4943_v19 = vor.u32 %v7212_v11, %v4940_v13  ;;  %v7268_v41 = vld [vmem:[#allocation5 + $0x60c] sm:$0xf]  ;;  %v5164_v42 = vld [vmem:[#allocation5 + $0x638] sm:$0xf0]  ;;  %v7485_v1 = vld [vmem:[#allocation5 + $0x87c] sm:$0xf0] }
  0x5b   :  { %827 = vmatpush.bf16.msra.mxu1 %v5023_v21  ;;  %793 = vmatmul.bf16.vlgmr.msrb.gmra.mxu2 %v8000_v57  ;;  %v5071_v21 = vor.u32 %v7244_v14, %v5068_v15  ;;  %v5167_v54 = vor.u32 %v7268_v41, %v5164_v42  ;;  %v7419_v2 = vld [vmem:[#allocation5 + $0x254] sm:$0xf]  ;;  %v5380_v3 = vld [vmem:[#allocation5 + $0x280] sm:$0xf0]  ;;  %v7417_v9 = vld [vmem:[#allocation5 + $0x21c] sm:$0xf0] }
  0x5c   :  { %841 = vmatpush.bf16.msra.mxu2 %v5151_v22  ;;  %855 = vmatpush.bf16.msra.mxu3 %v5279_v26  ;;  %v5178_v22 = vld [vmem:[#allocation5 + $0x668] sm:$0xf]  ;;  %v4924_v26 = vld [vmem:[#allocation5 + $0x98] sm:$0xf0]  ;;  %v5490_v10 = vld [vmem:[#allocation5 + $0x4f0] sm:$0xf]  ;;  %v5383_v11 = vor.u32 %v7419_v2, %v5380_v3 }
  0x5d   :  { %807 = vmatmul.bf16.vlgmr.msrb.gmra.mxu3 %v8003_v5  ;;  %v5179_v31 = vor.u32 %v7274_v23, %v5178_v22  ;;  %v5618_v13 = vld [vmem:[#allocation5 + $0x7f0] sm:$0xf]  ;;  %v7481_v14 = vld [vmem:[#allocation5 + $0x81c] sm:$0xf0]  ;;  %v7415_v15 = vld [vmem:[#allocation5 + $0x1f4] sm:$0xf] }
  0x5e   :  { %814 = vmatpush.bf16.msra.mxu0 %v5259_v32  ;;  %v5162_v32 = vld [vmem:[#allocation5 + $0x608] sm:$0xf]  ;;  %v5364_v16 = vld [vmem:[#allocation5 + $0x220] sm:$0xf0]  ;;  %v7413_v22 = vld [vmem:[#allocation5 + $0x1bc] sm:$0xf0] }
  0x5f   :  { %828 = vmatpush.bf16.msra.mxu1 %v5007_v33  ;;  %v7270_v33 = vld [vmem:[#allocation5 + $0x634] sm:$0xf0]  ;;  %v5474_v23 = vld [vmem:[#allocation5 + $0x490] sm:$0xf]  ;;  %v7477_v27 = vld [vmem:[#allocation5 + $0x7bc] sm:$0xf0] }
  0x60   :  { %842 = vmatpush.bf16.msra.mxu2 %v5135_v34  ;;  %856 = vmatpush.bf16.msra.mxu3 %v5263_v38  ;;  %v4927_v34 = vor.u32 %v7208_v24, %v4924_v26  ;;  %v7236_v38 = vld [vmem:[#allocation5 + $0x30c] sm:$0xf]  ;;  %v5367_v24 = vor.u32 %v7415_v15, %v5364_v16  ;;  %v5602_v26 = vld [vmem:[#allocation5 + $0x790] sm:$0xf]  ;;  %v7411_v28 = vld [vmem:[#allocation5 + $0x194] sm:$0xf] }
  0x61   :  { %v5039_v51 = vor.u32 %v7236_v38, %v5036_v40  ;;  %v5348_v29 = vld [vmem:[#allocation5 + $0x1c0] sm:$0xf0]  ;;  %v5586_v38 = vld [vmem:[#allocation5 + $0x730] sm:$0xf]  ;;  %v7407_v40 = vld [vmem:[#allocation5 + $0x134] sm:$0xf] }
  0x62   :  { %815 = vmatpush.bf16.msra.mxu0 %v5243_v44  ;;  %v7425_v44 = vld [vmem:[#allocation5 + $0x2dc] sm:$0xf0]  ;;  %v5332_v41 = vld [vmem:[#allocation5 + $0x160] sm:$0xf0]  ;;  %v7403_v52 = vld [vmem:[#allocation5 + $0xd4] sm:$0xf] }
  0x63   :  { %829 = vmatpush.bf16.msra.mxu1 %v4991_v45  ;;  %v5522_v45 = vld [vmem:[#allocation5 + $0x5b0] sm:$0xf]  ;;  %v5395_v55 = vor.u32 %v7425_v44, %v5394_v43  ;;  %v5316_v53 = vld [vmem:[#allocation5 + $0x100] sm:$0xf0]  ;;  %v7455_v16 = vld [vmem:[#allocation5 + $0x5b4] sm:$0xf] }
  0x64   :  { %843 = vmatpush.bf16.msra.mxu2 %v5119_v46  ;;  %857 = vmatpush.bf16.msra.mxu3 %v5247_v50  ;;  %v5163_v46 = vor.u32 %v7270_v33, %v5162_v32  ;;  %v4911_v50 = vor.u32 %v7204_v36, %v4908_v37  ;;  %v5603_v32 = vor.u32 %v7477_v27, %v5602_v26  ;;  %v5330_v33 = vld [vmem:[#allocation5 + $0x130] sm:$0xf]  ;;  %v7441_v37 = vld [vmem:[#allocation5 + $0x45c] sm:$0xf0]  ;;  %v5300_v2 = vld [vmem:[#allocation5 + $0xa0] sm:$0xf0] }
  0x65   :  { %v5351_v36 = vor.u32 %v7411_v28, %v5348_v29  ;;  %v5284_v15 = vld [vmem:[#allocation5 + $0x40] sm:$0xf0]  ;;  %v5530_v26 = vld [vmem:[#allocation5 + $0x5b8] sm:$0xf]  ;;  %v7458_v27 = vld [vmem:[#allocation5 + $0x5e4] sm:$0xf0] }
  0x66   :  { %816 = vmatpush.bf16.msra.mxu0 %v5227_v56  ;;  %v5523_v56 = vor.u32 %v7457_v47, %v5522_v45  ;;  %v5314_v45 = vld [vmem:[#allocation5 + $0xd0] sm:$0xf]  ;;  %s7952_s2 = smov [#allocation11]   ;;  %s4869_s21 = sshll.u32 %s8257_s5, 4  ;;  %s4870_s21 = int_to_ptr.hbm [resolvable:$true] %s4869_s21 }
  0x67   :  { %830 = vmatpush.bf16.msra.mxu1 %v4975_v58  ;;  %v5651_v58 = vor.u32 %v7489_v49, %v5650_v48  ;;  %v5442_v47 = vld [vmem:[#allocation5 + $0x3d0] sm:$0xf]  ;;  %v5335_v48 = vor.u32 %v7407_v40, %v5332_v41  ;;  %v7437_v49 = vld [vmem:[#allocation5 + $0x3fc] sm:$0xf0]  ;;  %v7454_v40 = vld [vmem:[#allocation5 + $0x584] sm:$0xf0] }
  0x68   :  { %844 = vmatpush.bf16.msra.mxu2 %v5103_v59  ;;  %858 = vmatpush.bf16.msra.mxu3 %v5231_v63  ;;  %v5378_v59 = vld [vmem:[#allocation5 + $0x250] sm:$0xf]  ;;  %v7453_v63 = vld [vmem:[#allocation5 + $0x57c] sm:$0xf0]  ;;  %s4867_s4 = sshll.u32 %s7952_s2, 4  ;;  %s7953_s22 = smov 384   ;;  %s4868_s4 = int_to_ptr.vmem [resolvable:$true] %s4867_s4 }
  0x69   :  { %v5379_v4 = vor.u32 %v7421_v60, %v5378_v59  ;;  %v7401_v59 = vld [vmem:[#allocation5 + $0x9c] sm:$0xf0]  ;;  %v5426_v60 = vld [vmem:[#allocation5 + $0x370] sm:$0xf]  ;;  %s7954_s23 = smov 24  }
  0x6a   :  { %817 = vmatpush.bf16.msra.mxu0 %v5211_v6  ;;  %v5507_v6 = vor.u32 %v7453_v63, %v5506_v61  ;;  %v5319_v61 = vor.u32 %v7403_v52, %v5316_v53  ;;  %v5554_v63 = vld [vmem:[#allocation5 + $0x670] sm:$0xf]  ;;  %v7450_v52 = vld [vmem:[#allocation5 + $0x524] sm:$0xf0] }
  0x6b   :  { %831 = vmatpush.bf16.msra.mxu1 %v4959_v7  ;;  %v5635_v7 = vor.u32 %v7485_v1, %v5634_v0  ;;  %v7465_v0 = vld [vmem:[#allocation5 + $0x69c] sm:$0xf0]  ;;  %v7399_v1 = vld [vmem:[#allocation5 + $0x74] sm:$0xf] }
  0x6c   :  { %845 = vmatpush.bf16.msra.mxu2 %v5087_v8  ;;  %859 = vmatpush.bf16.msra.mxu3 %v5215_v12  ;;  %v5362_v8 = vld [vmem:[#allocation5 + $0x1f0] sm:$0xf]  ;;  %v7449_v12 = vld [vmem:[#allocation5 + $0x51c] sm:$0xf0] }
  0x6d   :  { %v5363_v17 = vor.u32 %v7417_v9, %v5362_v8  ;;  %v5555_v8 = vor.u32 %v7465_v0, %v5554_v63  ;;  %v5410_v9 = vld [vmem:[#allocation5 + $0x310] sm:$0xf]  ;;  %v7414_v63 = vld [vmem:[#allocation5 + $0x1c4] sm:$0xf0]  ;;  %v5482_v0 = vld [vmem:[#allocation5 + $0x498] sm:$0xf] }
  0x6e   :  { %818 = vmatpush.bf16.msra.mxu0 %v5195_v18  ;;  %v5491_v18 = vor.u32 %v7449_v12, %v5490_v10  ;;  %v7429_v10 = vld [vmem:[#allocation5 + $0x33c] sm:$0xf0]  ;;  %v5303_v12 = vor.u32 %v7399_v1, %v5300_v2  ;;  %v7446_v1 = vld [vmem:[#allocation5 + $0x4c4] sm:$0xf0] }
  0x6f   :  { %832 = vmatpush.bf16.msra.mxu1 %v4943_v19  ;;  %v5619_v19 = vor.u32 %v7481_v14, %v5618_v13  ;;  %v7461_v13 = vld [vmem:[#allocation5 + $0x63c] sm:$0xf0]  ;;  %v7395_v14 = vld [vmem:[#allocation5 + $0x14] sm:$0xf] }
  0x70   :  { %846 = vmatpush.bf16.msra.mxu2 %v5071_v21  ;;  %860 = vmatpush.bf16.msra.mxu3 %v5199_v25  ;;  %v5346_v21 = vld [vmem:[#allocation5 + $0x190] sm:$0xf]  ;;  %v7445_v25 = vld [vmem:[#allocation5 + $0x4bc] sm:$0xf0]  ;;  %v5287_v28 = vor.u32 %v7395_v14, %v5284_v15  ;;  %v7442_v14 = vld [vmem:[#allocation5 + $0x464] sm:$0xf0] }
  0x71   :  { %v5347_v30 = vor.u32 %v7413_v22, %v5346_v21  ;;  %v5652_v21 = vld [vmem:[#allocation5 + $0x8e0] sm:$0xf0]  ;;  %v5402_v22 = vld [vmem:[#allocation5 + $0x2b8] sm:$0xf] }
  0x72   :  { %819 = vmatpush.bf16.msra.mxu0 %v5179_v31  ;;  %v5475_v31 = vor.u32 %v7445_v25, %v5474_v23  ;;  %v7426_v23 = vld [vmem:[#allocation5 + $0x2e4] sm:$0xf0] }
  0x73   :  { %833 = vmatpush.bf16.msra.mxu1 %v4927_v34  ;;  %v7409_v34 = vld [vmem:[#allocation5 + $0x15c] sm:$0xf0] }
  0x74   :  { %847 = vmatpush.bf16.msra.mxu2 %v5055_v35  ;;  %861 = vmatpush.bf16.msra.mxu3 %v5183_v39  ;;  %v5458_v35 = vld [vmem:[#allocation5 + $0x430] sm:$0xf]  ;;  %v7473_v39 = vld [vmem:[#allocation5 + $0x75c] sm:$0xf0]  ;;  %v5331_v42 = vor.u32 %v7409_v34, %v5330_v33  ;;  %v5508_v33 = vld [vmem:[#allocation5 + $0x580] sm:$0xf0] }
  0x75   :  { %v5459_v43 = vor.u32 %v7441_v37, %v5458_v35  ;;  %v5587_v44 = vor.u32 %v7473_v39, %v5586_v38  ;;  %v7483_v34 = vld [vmem:[#allocation5 + $0x854] sm:$0xf]  ;;  %v5531_v35 = vor.u32 %v7458_v27, %v5530_v26  ;;  %v5386_v37 = vld [vmem:[#allocation5 + $0x258] sm:$0xf]  ;;  %v7422_v38 = vld [vmem:[#allocation5 + $0x284] sm:$0xf0] }
  0x76   :  { %820 = vmatpush.bf16.msra.mxu0 %v5163_v46  ;;  %v7405_v46 = vld [vmem:[#allocation5 + $0xfc] sm:$0xf0]  ;;  %v5514_v39 = vld [vmem:[#allocation5 + $0x558] sm:$0xf]  ;;  %v7438_v27 = vld [vmem:[#allocation5 + $0x404] sm:$0xf0] }
  0x77   :  { %834 = vmatpush.bf16.msra.mxu1 %v4911_v50  ;;  %v5570_v50 = vld [vmem:[#allocation5 + $0x6d0] sm:$0xf]  ;;  %v5450_v26 = vld [vmem:[#allocation5 + $0x3d8] sm:$0xf] }
  0x78   :  { %848 = vmatpush.bf16.msra.mxu2 %v5039_v51  ;;  %862 = vmatpush.bf16.msra.mxu3 %v5167_v54  ;;  %v7469_v51 = vld [vmem:[#allocation5 + $0x6fc] sm:$0xf0]  ;;  %v5315_v54 = vor.u32 %v7405_v46, %v5314_v45  ;;  %v5492_v45 = vld [vmem:[#allocation5 + $0x520] sm:$0xf0]  ;;  %v7479_v46 = vld [vmem:[#allocation5 + $0x7f4] sm:$0xf] }
  0x79   :  { %821 = vmatmul.bf16.vlgmr.msra.gmra.mxu0 %v8007_v20 }
  0x7a   :  { %1595 = vmatpush.bf16.msrb.mxu0 %v5395_v55  ;;  %835 = vmatmul.bf16.vlgmr.msra.gmra.mxu1 %v8000_v57  ;;  %v5443_v55 = vor.u32 %v7437_v49, %v5442_v47  ;;  %v5515_v47 = vor.u32 %v7454_v40, %v5514_v39  ;;  %v5370_v49 = vld [vmem:[#allocation5 + $0x1f8] sm:$0xf]  ;;  %v7434_v39 = vld [vmem:[#allocation5 + $0x3a4] sm:$0xf0] }
  0x7b   :  { %1609 = vmatpush.bf16.msrb.mxu1 %v5523_v56  ;;  %849 = vmatmul.bf16.vlgmr.msra.gmra.mxu2 %v8003_v5  ;;  %v5571_v56 = vor.u32 %v7469_v51, %v5570_v50  ;;  %v7418_v50 = vld [vmem:[#allocation5 + $0x224] sm:$0xf0]  ;;  %v5498_v51 = vld [vmem:[#allocation5 + $0x4f8] sm:$0xf] }
  0x7c   :  { %1623 = vmatpush.bf16.msrb.mxu2 %v5651_v58  ;;  %1637 = vmatpush.bf16.msrb.mxu3 %v5399_v62  ;;  %v5298_v58 = vld [vmem:[#allocation5 + $0x70] sm:$0xf]  ;;  %v7433_v62 = vld [vmem:[#allocation5 + $0x39c] sm:$0xf0] }
  0x7d   :  { %863 = vmatmul.bf16.vlgmr.msra.gmra.mxu3 %v8007_v20  ;;  %v5299_v3 = vor.u32 %v7401_v59, %v5298_v58  ;;  %v5476_v58 = vld [vmem:[#allocation5 + $0x4c0] sm:$0xf0]  ;;  %v7475_v59 = vld [vmem:[#allocation5 + $0x794] sm:$0xf] }
  0x7e   :  { %1596 = vmatpush.bf16.msrb.mxu0 %v5379_v4  ;;  %v5282_v4 = vld [vmem:[#allocation5 + $0x10] sm:$0xf] }
  0x7f   :  { %1610 = vmatpush.bf16.msrb.mxu1 %v5507_v6  ;;  %v7397_v6 = vld [vmem:[#allocation5 + $0x3c] sm:$0xf0] }
  0x80   :  { %1624 = vmatpush.bf16.msrb.mxu2 %v5635_v7  ;;  %1638 = vmatpush.bf16.msrb.mxu3 %v5383_v11  ;;  %v5427_v7 = vor.u32 %v7433_v62, %v5426_v60  ;;  %v5538_v11 = vld [vmem:[#allocation5 + $0x610] sm:$0xf]  ;;  %v5499_v60 = vor.u32 %v7450_v52, %v5498_v51  ;;  %v5354_v62 = vld [vmem:[#allocation5 + $0x198] sm:$0xf]  ;;  %v7430_v51 = vld [vmem:[#allocation5 + $0x344] sm:$0xf0] }
  0x81   :  { %v5539_v25 = vor.u32 %v7461_v13, %v5538_v11  ;;  %v5338_v11 = vld [vmem:[#allocation5 + $0x138] sm:$0xf] }
  0x82   :  { %1597 = vmatpush.bf16.msrb.mxu0 %v5363_v17  ;;  %v5524_v17 = vld [vmem:[#allocation5 + $0x5e0] sm:$0xf0]  ;;  %v5466_v13 = vld [vmem:[#allocation5 + $0x438] sm:$0xf] }
  0x83   :  { %1611 = vmatpush.bf16.msrb.mxu1 %v5491_v18  ;;  %v7487_v18 = vld [vmem:[#allocation5 + $0x8b4] sm:$0xf]  ;;  %v5527_v29 = vor.u32 %v7455_v16, %v5524_v17  ;;  %v5658_v52 = vld [vmem:[#allocation5 + $0x8b8] sm:$0xf] }
  0x84   :  { %1625 = vmatpush.bf16.msrb.mxu2 %v5619_v19  ;;  %1639 = vmatpush.bf16.msrb.mxu3 %v5367_v24  ;;  %v5283_v19 = vor.u32 %v7397_v6, %v5282_v4  ;;  %v5411_v24 = vor.u32 %v7429_v10, %v5410_v9  ;;  %v5355_v4 = vor.u32 %v7414_v63, %v5354_v62  ;;  %v7439_v6 = vld [vmem:[#allocation5 + $0x434] sm:$0xf]  ;;  %v5588_v10 = vld [vmem:[#allocation5 + $0x760] sm:$0xf0]  ;;  %v7488_v62 = vld [vmem:[#allocation5 + $0x8bc] sm:$0xf] }
  0x85   :  { %v5483_v9 = vor.u32 %v7446_v1, %v5482_v0  ;;  %v5660_v63 = vld [vmem:[#allocation5 + $0x8e8] sm:$0xf0] }
  0x86   :  { %1598 = vmatpush.bf16.msrb.mxu0 %v5347_v30  ;;  %v5655_v30 = vor.u32 %v7487_v18, %v5652_v21  ;;  %v7435_v18 = vld [vmem:[#allocation5 + $0x3d4] sm:$0xf] }
  0x87   :  { %1612 = vmatpush.bf16.msrb.mxu1 %v5475_v31  ;;  %v5403_v31 = vor.u32 %v7426_v23, %v5402_v22  ;;  %v7467_v21 = vld [vmem:[#allocation5 + $0x6d4] sm:$0xf]  ;;  %v5467_v22 = vor.u32 %v7442_v14, %v5466_v13  ;;  %v5572_v23 = vld [vmem:[#allocation5 + $0x700] sm:$0xf0]  ;;  %v5644_v13 = vld [vmem:[#allocation5 + $0x888] sm:$0xf0] }
  0x88   :  { %1626 = vmatpush.bf16.msrb.mxu2 %v5603_v32  ;;  %1640 = vmatpush.bf16.msrb.mxu3 %v5351_v36  ;;  %v7451_v32 = vld [vmem:[#allocation5 + $0x554] sm:$0xf]  ;;  %v5636_v36 = vld [vmem:[#allocation5 + $0x880] sm:$0xf0] }
  0x89   :  { %v5511_v41 = vor.u32 %v7451_v32, %v5508_v33  ;;  %v5428_v32 = vld [vmem:[#allocation5 + $0x3a0] sm:$0xf0]  ;;  %v7463_v33 = vld [vmem:[#allocation5 + $0x674] sm:$0xf] }
  0x8a   :  { %1599 = vmatpush.bf16.msrb.mxu0 %v5331_v42  ;;  %v5639_v42 = vor.u32 %v7483_v34, %v5636_v36  ;;  %v5451_v34 = vor.u32 %v7438_v27, %v5450_v26  ;;  %v5306_v36 = vld [vmem:[#allocation5 + $0x78] sm:$0xf]  ;;  %v7480_v26 = vld [vmem:[#allocation5 + $0x7fc] sm:$0xf]  ;;  %v5628_v27 = vld [vmem:[#allocation5 + $0x828] sm:$0xf0] }
  0x8b   :  { %1613 = vmatpush.bf16.msrb.mxu1 %v5459_v43  ;;  %v5387_v43 = vor.u32 %v7422_v38, %v5386_v37  ;;  %v7402_v37 = vld [vmem:[#allocation5 + $0xa4] sm:$0xf0]  ;;  %v5434_v38 = vld [vmem:[#allocation5 + $0x378] sm:$0xf] }
  0x8c   :  { %1627 = vmatpush.bf16.msrb.mxu2 %v5587_v44  ;;  %1641 = vmatpush.bf16.msrb.mxu3 %v5335_v48  ;;  %v7447_v44 = vld [vmem:[#allocation5 + $0x4f4] sm:$0xf]  ;;  %v5620_v48 = vld [vmem:[#allocation5 + $0x820] sm:$0xf0] }
  0x8d   :  { %v5495_v53 = vor.u32 %v7447_v44, %v5492_v45  ;;  %v5307_v44 = vor.u32 %v7402_v37, %v5306_v36  ;;  %v7459_v45 = vld [vmem:[#allocation5 + $0x614] sm:$0xf]  ;;  %v5356_v36 = vld [vmem:[#allocation5 + $0x1c8] sm:$0xf0]  ;;  %v7444_v37 = vld [vmem:[#allocation5 + $0x49c] sm:$0xf] }
  0x8e   :  { %1600 = vmatpush.bf16.msrb.mxu0 %v5315_v54  ;;  %v5623_v54 = vor.u32 %v7479_v46, %v5620_v48  ;;  %v5540_v46 = vld [vmem:[#allocation5 + $0x640] sm:$0xf0]  ;;  %v5435_v48 = vor.u32 %v7434_v39, %v5434_v38  ;;  %v5484_v38 = vld [vmem:[#allocation5 + $0x4c8] sm:$0xf0]  ;;  %v7476_v39 = vld [vmem:[#allocation5 + $0x79c] sm:$0xf] }
  0x8f   :  { %1614 = vmatpush.bf16.msrb.mxu1 %v5443_v55  ;;  %v5371_v55 = vor.u32 %v7418_v50, %v5370_v49  ;;  %v7398_v49 = vld [vmem:[#allocation5 + $0x44] sm:$0xf0]  ;;  %v5418_v50 = vld [vmem:[#allocation5 + $0x318] sm:$0xf] }
  0x90   :  { %1628 = vmatpush.bf16.msrb.mxu2 %v5571_v56  ;;  %1642 = vmatpush.bf16.msrb.mxu3 %v5319_v61  ;;  %v7443_v56 = vld [vmem:[#allocation5 + $0x494] sm:$0xf]  ;;  %v5604_v61 = vld [vmem:[#allocation5 + $0x7c0] sm:$0xf0]  ;;  %v5419_v0 = vor.u32 %v7430_v51, %v5418_v50  ;;  %v5340_v50 = vld [vmem:[#allocation5 + $0x168] sm:$0xf0] }
  0x91   :  { %v5479_v2 = vor.u32 %v7443_v56, %v5476_v58  ;;  %v5404_v56 = vld [vmem:[#allocation5 + $0x2e8] sm:$0xf0]  ;;  %v7456_v58 = vld [vmem:[#allocation5 + $0x5bc] sm:$0xf] }
  0x92   :  { %1601 = vmatpush.bf16.msrb.mxu0 %v5299_v3  ;;  %v5607_v3 = vor.u32 %v7475_v59, %v5604_v61  ;;  %v5532_v59 = vld [vmem:[#allocation5 + $0x5e8] sm:$0xf0]  ;;  %v7440_v51 = vld [vmem:[#allocation5 + $0x43c] sm:$0xf] }
  0x93   :  { %1615 = vmatpush.bf16.msrb.mxu1 %v5427_v7  ;;  %v5460_v7 = vld [vmem:[#allocation5 + $0x460] sm:$0xf0] }
  0x94   :  { %1629 = vmatpush.bf16.msrb.mxu2 %v5555_v8  ;;  %1643 = vmatpush.bf16.msrb.mxu3 %v5303_v12  ;;  %v7471_v8 = vld [vmem:[#allocation5 + $0x734] sm:$0xf]  ;;  %v7410_v12 = vld [vmem:[#allocation5 + $0x164] sm:$0xf0]  ;;  %v5463_v15 = vor.u32 %v7439_v6, %v5460_v7  ;;  %v7420_v7 = vld [vmem:[#allocation5 + $0x25c] sm:$0xf] }
  0x95   :  { %v5591_v16 = vor.u32 %v7471_v8, %v5588_v10  ;;  %v5339_v17 = vor.u32 %v7410_v12, %v5338_v11  ;;  %v7486_v6 = vld [vmem:[#allocation5 + $0x884] sm:$0xf0]  ;;  %v5663_v8 = vor.u32 %v7488_v62, %v5660_v63  ;;  %v7452_v10 = vld [vmem:[#allocation5 + $0x55c] sm:$0xf]  ;;  %v5516_v11 = vld [vmem:[#allocation5 + $0x588] sm:$0xf0] }
  0x96   :  { %1602 = vmatpush.bf16.msrb.mxu0 %v5283_v19  ;;  %v5444_v19 = vld [vmem:[#allocation5 + $0x400] sm:$0xf0]  ;;  %v7484_v12 = vld [vmem:[#allocation5 + $0x85c] sm:$0xf]  ;;  %v7470_v62 = vld [vmem:[#allocation5 + $0x704] sm:$0xf0] }
  0x97   :  { %1616 = vmatpush.bf16.msrb.mxu1 %v5411_v24  ;;  %v5322_v24 = vld [vmem:[#allocation5 + $0xd8] sm:$0xf]  ;;  %v7404_v63 = vld [vmem:[#allocation5 + $0xdc] sm:$0xf] }
  0x98   :  { %1630 = vmatpush.bf16.msrb.mxu2 %v5539_v25  ;;  %1644 = vmatpush.bf16.msrb.mxu3 %v5287_v28  ;;  %v7406_v25 = vld [vmem:[#allocation5 + $0x104] sm:$0xf0]  ;;  %v5447_v28 = vor.u32 %v7435_v18, %v5444_v19  ;;  %v7416_v19 = vld [vmem:[#allocation5 + $0x1fc] sm:$0xf] }
  0x99   :  { %1603 = vmatmul.bf16.vlgmr.msrb.gmra.mxu0 %v8000_v57  ;;  %v7482_v18 = vld [vmem:[#allocation5 + $0x824] sm:$0xf0] }
  0x9a   :  { %1651 = vmatpush.bf16.msra.mxu0 %v5527_v29  ;;  %1617 = vmatmul.bf16.vlgmr.msrb.gmra.mxu1 %v8003_v5  ;;  %v5575_v29 = vor.u32 %v7467_v21, %v5572_v23  ;;  %v8022_v21 = vld [vmem:[#allocation7] sm:$0xf]  ;;  %v5372_v23 = vld [vmem:[#allocation5 + $0x228] sm:$0xf0] }
  0x9b   :  { %1665 = vmatpush.bf16.msra.mxu1 %v5655_v30  ;;  %1631 = vmatmul.bf16.vlgmr.msrb.gmra.mxu2 %v8007_v20  ;;  %v5323_v30 = vor.u32 %v7406_v25, %v5322_v24  ;;  %v7448_v24 = vld [vmem:[#allocation5 + $0x4fc] sm:$0xf]  ;;  %v5500_v25 = vld [vmem:[#allocation5 + $0x528] sm:$0xf0] }
  0x9c   :  { %1679 = vmatpush.bf16.msra.mxu2 %v5403_v31  ;;  %1693 = vmatpush.bf16.msra.mxu3 %v5531_v35  ;;  %v7431_v31 = vld [vmem:[#allocation5 + $0x374] sm:$0xf]  ;;  %v5556_v35 = vld [vmem:[#allocation5 + $0x6a0] sm:$0xf0] }
  0x9d   :  { %1645 = vmatmul.bf16.vlgmr.msrb.gmra.mxu3 %v8000_v57  ;;  %v5431_v40 = vor.u32 %v7431_v31, %v5428_v32  ;;  %v5503_v31 = vor.u32 %v7448_v24, %v5500_v25  ;;  %v5610_v32 = vld [vmem:[#allocation5 + $0x798] sm:$0xf]  ;;  %v7462_v25 = vld [vmem:[#allocation5 + $0x644] sm:$0xf0] }
  0x9e   :  { %1652 = vmatpush.bf16.msra.mxu0 %v5511_v41  ;;  %v7427_v41 = vld [vmem:[#allocation5 + $0x314] sm:$0xf] }
  0x9f   :  { %1666 = vmatpush.bf16.msra.mxu1 %v5639_v42  ;;  %v5412_v42 = vld [vmem:[#allocation5 + $0x340] sm:$0xf0] }
  0xa0   :  { %1680 = vmatpush.bf16.msra.mxu2 %v5387_v43  ;;  %1694 = vmatpush.bf16.msra.mxu3 %v5515_v47  ;;  %v5559_v43 = vor.u32 %v7463_v33, %v5556_v35  ;;  %v5290_v47 = vld [vmem:[#allocation5 + $0x18] sm:$0xf]  ;;  %v7478_v33 = vld [vmem:[#allocation5 + $0x7c4] sm:$0xf0]  ;;  %v5631_v35 = vor.u32 %v7480_v26, %v5628_v27  ;;  %v7396_v26 = vld [vmem:[#allocation5 + $0x1c] sm:$0xf] }
  0xa1   :  { %v5291_v61 = vor.u32 %v7398_v49, %v5290_v47  ;;  %v7474_v47 = vld [vmem:[#allocation5 + $0x764] sm:$0xf0]  ;;  %v5292_v27 = vld [vmem:[#allocation5 + $0x48] sm:$0xf0] }
  0xa2   :  { %1653 = vmatpush.bf16.msra.mxu0 %v5495_v53  ;;  %v7490_v53 = vld [vmem:[#allocation5 + $0x8e4] sm:$0xf0] }
  0xa3   :  { %1667 = vmatpush.bf16.msra.mxu1 %v5623_v54  ;;  %v7424_v54 = vld [vmem:[#allocation5 + $0x2bc] sm:$0xf]  ;;  %v5659_v1 = vor.u32 %v7490_v53, %v5658_v52  ;;  %v5468_v52 = vld [vmem:[#allocation5 + $0x468] sm:$0xf0] }
  0xa4   :  { %1681 = vmatpush.bf16.msra.mxu2 %v5371_v55  ;;  %1695 = vmatpush.bf16.msra.mxu3 %v5499_v60  ;;  %v5415_v55 = vor.u32 %v7427_v41, %v5412_v42  ;;  %v5543_v60 = vor.u32 %v7459_v45, %v5540_v46  ;;  %v5611_v42 = vor.u32 %v7478_v33, %v5610_v32  ;;  %v5594_v46 = vld [vmem:[#allocation5 + $0x738] sm:$0xf]  ;;  %v7472_v53 = vld [vmem:[#allocation5 + $0x73c] sm:$0xf]  ;;  %v5420_v32 = vld [vmem:[#allocation5 + $0x348] sm:$0xf0] }
  0xa5   :  { %v5487_v45 = vor.u32 %v7444_v37, %v5484_v38  ;;  %v7460_v33 = vld [vmem:[#allocation5 + $0x61c] sm:$0xf]  ;;  %v7513_v37 = vld [vmem:[#allocation8 + $0x3b0] sm:$0xf0] }
  0xa6   :  { %1654 = vmatpush.bf16.msra.mxu0 %v5479_v2  ;;  %v5407_v2 = vor.u32 %v7424_v54, %v5404_v56  ;;  %v5596_v54 = vld [vmem:[#allocation5 + $0x768] sm:$0xf0]  ;;  %v5595_v56 = vor.u32 %v7474_v47, %v5594_v46 }
  0xa7   :  { %1668 = vmatpush.bf16.msra.mxu1 %v5607_v3  ;;  %v5535_v3 = vor.u32 %v7456_v58, %v5532_v59 }
  0xa8   :  { %1682 = vmatpush.bf16.msra.mxu2 %v5355_v4  ;;  %1696 = vmatpush.bf16.msra.mxu3 %v5483_v9  ;;  %v5642_v4 = vld [vmem:[#allocation5 + $0x858] sm:$0xf]  ;;  %v5388_v9 = vld [vmem:[#allocation5 + $0x288] sm:$0xf0] }
  0xa9   :  { %v5643_v14 = vor.u32 %v7486_v6, %v5642_v4  ;;  %v7468_v4 = vld [vmem:[#allocation5 + $0x6dc] sm:$0xf]  ;;  %v5580_v6 = vld [vmem:[#allocation5 + $0x708] sm:$0xf0] }
  0xaa   :  { %1655 = vmatpush.bf16.msra.mxu0 %v5463_v15  ;;  %v5626_v15 = vld [vmem:[#allocation5 + $0x7f8] sm:$0xf] }
  0xab   :  { %1669 = vmatpush.bf16.msra.mxu1 %v5591_v16  ;;  %v5391_v16 = vor.u32 %v7420_v7, %v5388_v9 }
  0xac   :  { %1683 = vmatpush.bf16.msra.mxu2 %v5339_v17  ;;  %1697 = vmatpush.bf16.msra.mxu3 %v5467_v22  ;;  %v5519_v17 = vor.u32 %v7452_v10, %v5516_v11  ;;  %v5647_v22 = vor.u32 %v7484_v12, %v5644_v13  ;;  %v5562_v10 = vld [vmem:[#allocation5 + $0x678] sm:$0xf]  ;;  %v7466_v11 = vld [vmem:[#allocation5 + $0x6a4] sm:$0xf0]  ;;  %v7400_v12 = vld [vmem:[#allocation5 + $0x7c] sm:$0xf]  ;;  %v5583_v13 = vor.u32 %v7468_v4, %v5580_v6 }
  0xae   :  { %1656 = vmatpush.bf16.msra.mxu0 %v5447_v28  ;;  %v5627_v28 = vor.u32 %v7482_v18, %v5626_v15  ;;  %v7432_v15 = vld [vmem:[#allocation5 + $0x37c] sm:$0xf]  ;;  %v5564_v18 = vld [vmem:[#allocation5 + $0x6a8] sm:$0xf0] }
  0xaf   :  { %1670 = vmatpush.bf16.msra.mxu1 %v5575_v29  ;;  %v197_v29 = vperm.slane %v8022_v21, 0 }
  0xb0   :  { %1684 = vmatpush.bf16.msra.mxu2 %v5323_v30  ;;  %1698 = vmatpush.bf16.msra.mxu3 %v5451_v34  ;;  %v5375_v30 = vor.u32 %v7416_v19, %v5372_v23  ;;  %v7412_v34 = vld [vmem:[#allocation5 + $0x19c] sm:$0xf]  ;;  %v5563_v19 = vor.u32 %v7466_v11, %v5562_v10  ;;  %v7498_v10 = vld [vmem:[#allocation8 + $0x338] sm:$0xf0]  ;;  %v5678_v11 = vld [vmem:[#allocation8 + $0x318] sm:$0xf] }
  0xb2   :  { %1657 = vmatpush.bf16.msra.mxu0 %v5431_v40  ;;  %v5612_v40 = vld [vmem:[#allocation5 + $0x7c8] sm:$0xf0] }
  0xb3   :  { %1671 = vmatpush.bf16.msra.mxu1 %v5559_v43  ;;  %v5615_v49 = vor.u32 %v7476_v39, %v5612_v40  ;;  %v5295_v39 = vor.u32 %v7396_v26, %v5292_v27  ;;  %v5752_v26 = vld [vmem:[#allocation8 + $0x3b4] sm:$0xf0] }
  0xb4   :  { %1685 = vmatpush.bf16.msra.mxu2 %v5307_v44  ;;  %1699 = vmatpush.bf16.msra.mxu3 %v5435_v48  ;;  %v5359_v44 = vor.u32 %v7412_v34, %v5356_v36  ;;  %v7408_v48 = vld [vmem:[#allocation5 + $0x13c] sm:$0xf]  ;;  %v5750_v36 = vld [vmem:[#allocation8 + $0x3a8] sm:$0xf]  ;;  %v5822_v27 = vld [vmem:[#allocation8 + $0x438] sm:$0xf] }
  0xb5   :  { %v5343_v59 = vor.u32 %v7408_v48, %v5340_v50  ;;  %v198_v48 = vperm.slane %v8022_v21, 1 }
  0xb6   :  { %1658 = vmatpush.bf16.msra.mxu0 %v5415_v55  ;;  %v710_v41 = vpop.f32.mrf.mxu0 }
  0xb7   :  { %1672 = vmatpush.bf16.msra.mxu1 %v5543_v60  ;;  %v711_v43 = vadd.f32 %v710_v41, %v197_v29  ;;  %v724_v55 = vpop.f32.mrf.mxu1  ;;  %v5471_v60 = vor.u32 %v7440_v51, %v5468_v52  ;;  %v5726_v52 = vld [vmem:[#allocation8 + $0x378] sm:$0xf] }
  0xb8   :  { %1686 = vmatpush.bf16.msra.mxu2 %v5291_v61  ;;  %1700 = vmatpush.bf16.msra.mxu3 %v5419_v0  ;;  %v5578_v61 = vld [vmem:[#allocation5 + $0x6d8] sm:$0xf]  ;;  %v5599_v0 = vor.u32 %v7472_v53, %v5596_v54  ;;  %v7507_v53 = vld [vmem:[#allocation8 + $0x380] sm:$0xf0] }
  0xb9   :  { %1659 = vmatmul.bf16.vlgmr.msra.gmra.mxu0 %v8003_v5  ;;  %v725_v58 = vadd.f32 %v724_v55, %v711_v43  ;;  %v5579_v7 = vor.u32 %v7470_v62, %v5578_v61  ;;  %v5727_v55 = vor.u32 %v7507_v53, %v5726_v52 }
  0xba   :  { %1707 = vmatpush.bf16.msrb.mxu0 %v5659_v1  ;;  %1673 = vmatmul.bf16.vlgmr.msra.gmra.mxu1 %v8007_v20  ;;  %v5324_v1 = vld [vmem:[#allocation5 + $0x108] sm:$0xf0] }
  0xbb   :  { %1721 = vmatpush.bf16.msrb.mxu1 %v5407_v2  ;;  %1687 = vmatmul.bf16.vlgmr.msra.gmra.mxu2 %v8000_v57  ;;  %v7436_v2 = vld [vmem:[#allocation5 + $0x3dc] sm:$0xf] }
  0xbc   :  { %1735 = vmatpush.bf16.msrb.mxu2 %v5535_v3  ;;  %1749 = vmatpush.bf16.msrb.mxu3 %v5663_v8  ;;  %v5452_v3 = vld [vmem:[#allocation5 + $0x408] sm:$0xf0]  ;;  %v5327_v8 = vor.u32 %v7404_v63, %v5324_v1 }
  0xbd   :  { %1701 = vmatmul.bf16.vlgmr.msra.gmra.mxu3 %v8003_v5  ;;  %v5455_v9 = vor.u32 %v7436_v2, %v5452_v3  ;;  %v5702_v2 = vld [vmem:[#allocation8 + $0x348] sm:$0xf]  ;;  %v7501_v3 = vld [vmem:[#allocation8 + $0x350] sm:$0xf0] }
  0xbe   :  { %1708 = vmatpush.bf16.msrb.mxu0 %v5643_v14  ;;  %v5308_v14 = vld [vmem:[#allocation5 + $0xa8] sm:$0xf0]  ;;  %v8033_v43 = vpop.f32.mrf.mxu0  ;;  %v752_v46 = vpop.f32.mrf.mxu3  ;;  %v5703_v6 = vor.u32 %v7501_v3, %v5702_v2  ;;  %v5786_v2 = vld [vmem:[#allocation8 + $0x3f0] sm:$0xf]  ;;  %v7522_v3 = vld [vmem:[#allocation8 + $0x3f8] sm:$0xf0] }
  0xbf   :  { %1722 = vmatpush.bf16.msrb.mxu1 %v5391_v16  ;;  %v5436_v16 = vld [vmem:[#allocation5 + $0x3a8] sm:$0xf0]  ;;  %v5311_v23 = vor.u32 %v7400_v12, %v5308_v14  ;;  %v8035_v47 = vpop.f32.mrf.mxu1  ;;  %v753_v50 = vadd.f32 %v752_v46, %v198_v48  ;;  %v5846_v14 = vld [vmem:[#allocation8 + $0x468] sm:$0xf] }
  0xc0   :  { %1736 = vmatpush.bf16.msrb.mxu2 %v5519_v17  ;;  %1750 = vmatpush.bf16.msrb.mxu3 %v5647_v22  ;;  %v7464_v17 = vld [vmem:[#allocation5 + $0x67c] sm:$0xf]  ;;  %v5546_v22 = vld [vmem:[#allocation5 + $0x618] sm:$0xf]  ;;  %v5439_v24 = vor.u32 %v7432_v15, %v5436_v16  ;;  %v7537_v15 = vld [vmem:[#allocation8 + $0x470] sm:$0xf0] }
  0xc1   :  { %v5547_v38 = vor.u32 %v7462_v25, %v5546_v22  ;;  %v5666_v22 = vld [vmem:[#allocation8 + $0x300] sm:$0xf]  ;;  %v7512_v25 = vld [vmem:[#allocation8 + $0x3ac] sm:$0xf] }
  0xc2   :  { %1709 = vmatpush.bf16.msrb.mxu0 %v5627_v28  ;;  %v738_v28 = vpop.f32.mrf.mxu2 }
  0xc3   :  { %1723 = vmatpush.bf16.msrb.mxu1 %v5375_v30  ;;  %v5567_v30 = vor.u32 %v7464_v17, %v5564_v18  ;;  %v8031_v34 = vadd.f32 %v738_v28, %v725_v58  ;;  %v5847_v17 = vor.u32 %v7537_v15, %v5846_v14  ;;  %v5834_v18 = vld [vmem:[#allocation8 + $0x450] sm:$0xf]  ;;  %v7531_v28 = vld [vmem:[#allocation8 + $0x440] sm:$0xf0]  ;;  %v7497_v15 = vld [vmem:[#allocation8 + $0x334] sm:$0xf] }
  0xc4   :  { %1737 = vmatpush.bf16.msrb.mxu2 %v5503_v31  ;;  %1751 = vmatpush.bf16.msrb.mxu3 %v5631_v35  ;;  %v7428_v31 = vld [vmem:[#allocation5 + $0x31c] sm:$0xf]  ;;  %v5548_v35 = vld [vmem:[#allocation5 + $0x648] sm:$0xf0]  ;;  %v7519_v14 = vld [vmem:[#allocation8 + $0x3e0] sm:$0xf0] }
  0xc5   :  { %v5423_v40 = vor.u32 %v7428_v31, %v5420_v32  ;;  %v5551_v41 = vor.u32 %v7460_v33, %v5548_v35  ;;  %v5755_v31 = vor.u32 %v7512_v25, %v5752_v26  ;;  %v5823_v32 = vor.u32 %v7531_v28, %v5822_v27  ;;  %v7509_v33 = vld [vmem:[#allocation8 + $0x394] sm:$0xf]  ;;  %v5740_v35 = vld [vmem:[#allocation8 + $0x39c] sm:$0xf0]  ;;  %v7516_v25 = vld [vmem:[#allocation8 + $0x3c8] sm:$0xf0] }
  0xc6   :  { %1710 = vmatpush.bf16.msrb.mxu0 %v5611_v42  ;;  %v5751_v42 = vor.u32 %v7513_v37, %v5750_v36  ;;  %v8046_v58 = vpop.f32.mrf.mxu3  ;;  %v5810_v36 = vld [vmem:[#allocation8 + $0x420] sm:$0xf]  ;;  %v7528_v37 = vld [vmem:[#allocation8 + $0x428] sm:$0xf0]  ;;  %v7494_v26 = vld [vmem:[#allocation8 + $0x31c] sm:$0xf] }
  0xc7   :  { %1724 = vmatpush.bf16.msrb.mxu1 %v5359_v44  ;;  %v5738_v44 = vld [vmem:[#allocation8 + $0x390] sm:$0xf]  ;;  %v5680_v28 = vld [vmem:[#allocation8 + $0x324] sm:$0xf0] }
  0xc8   :  { %1738 = vmatpush.bf16.msrb.mxu2 %v5487_v45  ;;  %1752 = vmatpush.bf16.msrb.mxu3 %v5615_v49  ;;  %v7510_v45 = vld [vmem:[#allocation8 + $0x398] sm:$0xf0] }
  0xc9   :  { %v5739_v49 = vor.u32 %v7510_v45, %v5738_v44 }
  0xca   :  { %1711 = vmatpush.bf16.msrb.mxu0 %v5595_v56  ;;  %v8044_v51 = vpop.f32.mrf.mxu2 }
  0xcb   :  { %1725 = vmatpush.bf16.msrb.mxu1 %v5343_v59  ;;  %v5714_v59 = vld [vmem:[#allocation8 + $0x360] sm:$0xf] }
  0xcc   :  { %1739 = vmatpush.bf16.msrb.mxu2 %v5471_v60  ;;  %1753 = vmatpush.bf16.msrb.mxu3 %v5599_v0  ;;  %v7504_v60 = vld [vmem:[#allocation8 + $0x368] sm:$0xf0]  ;;  %v199_v0 = vperm.slane %v8022_v21, 2 }
  0xcd   :  { %v5715_v62 = vor.u32 %v7504_v60, %v5714_v59 }
  0xce   :  { %1712 = vmatpush.bf16.msrb.mxu0 %v5579_v7 }
  0xcf   :  { %1726 = vmatpush.bf16.msrb.mxu1 %v5327_v8 }
  0xd0   :  { %1740 = vmatpush.bf16.msrb.mxu2 %v5455_v9  ;;  %1754 = vmatpush.bf16.msrb.mxu3 %v5583_v13  ;;  %v5690_v9 = vld [vmem:[#allocation8 + $0x330] sm:$0xf]  ;;  %v7495_v13 = vld [vmem:[#allocation8 + $0x320] sm:$0xf0] }
  0xd1   :  { %v5691_v12 = vor.u32 %v7498_v10, %v5690_v9  ;;  %v5679_v16 = vor.u32 %v7495_v13, %v5678_v11  ;;  %v5774_v13 = vld [vmem:[#allocation8 + $0x3d8] sm:$0xf] }
  0xd2   :  { %1713 = vmatpush.bf16.msrb.mxu0 %v5563_v19  ;;  %v7534_v19 = vld [vmem:[#allocation8 + $0x458] sm:$0xf0] }
  0xd3   :  { %1727 = vmatpush.bf16.msrb.mxu1 %v5311_v23  ;;  %v7492_v23 = vld [vmem:[#allocation8 + $0x308] sm:$0xf0] }
  0xd4   :  { %1741 = vmatpush.bf16.msrb.mxu2 %v5439_v24  ;;  %1755 = vmatpush.bf16.msrb.mxu3 %v5567_v30  ;;  %v5835_v24 = vor.u32 %v7534_v19, %v5834_v18  ;;  %v5667_v30 = vor.u32 %v7492_v23, %v5666_v22  ;;  %v5942_v19 = vld [vmem:[#allocation8 + $0x528] sm:$0xf]  ;;  %v7561_v22 = vld [vmem:[#allocation8 + $0x530] sm:$0xf0] }
  0xd5   :  { %v5943_v23 = vor.u32 %v7561_v22, %v5942_v19  ;;  %v5894_v19 = vld [vmem:[#allocation8 + $0x4c8] sm:$0xf]  ;;  %v7549_v22 = vld [vmem:[#allocation8 + $0x4d0] sm:$0xf0] }
  0xd6   :  { %1714 = vmatpush.bf16.msrb.mxu0 %v5547_v38  ;;  %v766_v54 = vpop.f32.mrf.mxu0 }
  0xd7   :  { %1728 = vmatpush.bf16.msrb.mxu1 %v5295_v39  ;;  %v767_v56 = vadd.f32 %v766_v54, %v753_v50  ;;  %v780_v61 = vpop.f32.mrf.mxu1  ;;  %v5743_v39 = vor.u32 %v7509_v33, %v5740_v35  ;;  %v200_v50 = vperm.slane %v8022_v21, 3  ;;  %v5798_v54 = vld [vmem:[#allocation8 + $0x408] sm:$0xf]  ;;  %v5930_v35 = vld [vmem:[#allocation8 + $0x510] sm:$0xf] }
  0xd8   :  { %1742 = vmatpush.bf16.msrb.mxu2 %v5423_v40  ;;  %1756 = vmatpush.bf16.msrb.mxu3 %v5551_v41  ;;  %v5811_v40 = vor.u32 %v7528_v37, %v5810_v36  ;;  %v7506_v41 = vld [vmem:[#allocation8 + $0x37c] sm:$0xf]  ;;  %v7491_v37 = vld [vmem:[#allocation8 + $0x304] sm:$0xf] }
  0xd9   :  { %1715 = vmatmul.bf16.vlgmr.msrb.gmra.mxu0 %v8007_v20  ;;  %v8048_v63 = vadd.f32 %v780_v61, %v767_v56  ;;  %v7503_v56 = vld [vmem:[#allocation8 + $0x364] sm:$0xf]  ;;  %v5716_v61 = vld [vmem:[#allocation8 + $0x36c] sm:$0xf0]  ;;  %v7558_v36 = vld [vmem:[#allocation8 + $0x518] sm:$0xf0] }
  0xda   :  { %2415 = vmatpush.bf16.msra.mxu0 %v5751_v42  ;;  %1729 = vmatmul.bf16.vlgmr.msrb.gmra.mxu1 %v8000_v57  ;;  %v5728_v42 = vld [vmem:[#allocation8 + $0x384] sm:$0xf0] }
  0xdb   :  { %1743 = vmatmul.bf16.vlgmr.msrb.gmra.mxu2 %v8003_v5  ;;  %1757 = vmatmul.bf16.vlgmr.msrb.gmra.mxu3 %v8007_v20  ;;  %v5731_v45 = vor.u32 %v7506_v41, %v5728_v42  ;;  %v7533_v42 = vld [vmem:[#allocation8 + $0x454] sm:$0xf] }
  0xdc   :  { %2429 = vmatpush.bf16.msra.mxu1 %v5847_v17  ;;  %v5692_v17 = vld [vmem:[#allocation8 + $0x33c] sm:$0xf0]  ;;  %2443 = vmatpush.bf16.msra.mxu2 %v5943_v23  ;;  %v6014_v23 = vld [vmem:[#allocation8 + $0x5b8] sm:$0xf] }
  0xdd   :  { %v5695_v18 = vor.u32 %v7497_v15, %v5692_v17  ;;  %v7527_v15 = vld [vmem:[#allocation8 + $0x424] sm:$0xf] }
  0xde   :  { %2416 = vmatpush.bf16.msra.mxu0 %v5739_v49  ;;  %v794_v1 = vpop.f32.mrf.mxu2  ;;  %v8053_v38 = vpop.f32.mrf.mxu0 }
  0xdf   :  { %v795_v4 = vadd.f32 %v794_v1, %v199_v0  ;;  %v8055_v44 = vpop.f32.mrf.mxu1  ;;  %v5719_v1 = vor.u32 %v7503_v56, %v5716_v61  ;;  %v7555_v56 = vld [vmem:[#allocation8 + $0x500] sm:$0xf0] }
  0xe0   :  { %v808_v7 = vpop.f32.mrf.mxu3  ;;  %2430 = vmatpush.bf16.msra.mxu1 %v5835_v24  ;;  %v5762_v24 = vld [vmem:[#allocation8 + $0x3c0] sm:$0xf] }
  0xe1   :  { %v809_v8 = vadd.f32 %v808_v7, %v795_v4  ;;  %v7500_v4 = vld [vmem:[#allocation8 + $0x34c] sm:$0xf]  ;;  %v5787_v7 = vor.u32 %v7522_v3, %v5786_v2  ;;  %v5763_v27 = vor.u32 %v7516_v25, %v5762_v24  ;;  %v5824_v2 = vld [vmem:[#allocation8 + $0x444] sm:$0xf0]  ;;  %v5895_v24 = vor.u32 %v7549_v22, %v5894_v19  ;;  %v7579_v25 = vld [vmem:[#allocation8 + $0x5c0] sm:$0xf0] }
  0xe2   :  { %2417 = vmatpush.bf16.msra.mxu0 %v5727_v55  ;;  %v7525_v55 = vld [vmem:[#allocation8 + $0x410] sm:$0xf0] }
  0xe3   :  { %v5799_v60 = vor.u32 %v7525_v55, %v5798_v54  ;;  %v5918_v54 = vld [vmem:[#allocation8 + $0x4f8] sm:$0xf] }
  0xe4   :  { %2431 = vmatpush.bf16.msra.mxu1 %v5823_v32  ;;  %v5683_v32 = vor.u32 %v7494_v26, %v5680_v28  ;;  %v5919_v61 = vor.u32 %v7555_v56, %v5918_v54  ;;  %v6015_v28 = vor.u32 %v7579_v25, %v6014_v23  ;;  %v7570_v23 = vld [vmem:[#allocation8 + $0x578] sm:$0xf0]  ;;  %v5944_v25 = vld [vmem:[#allocation8 + $0x534] sm:$0xf0] }
  0xe6   :  { %2418 = vmatpush.bf16.msra.mxu0 %v5715_v62  ;;  %v8057_v46 = vpop.f32.mrf.mxu2 }
  0xe8   :  { %2432 = vmatpush.bf16.msra.mxu1 %v5811_v40  ;;  %v8062_v53 = vpop.f32.mrf.mxu3  ;;  %v5668_v40 = vld [vmem:[#allocation8 + $0x30c] sm:$0xf0] }
  0xe9   :  { %v5671_v41 = vor.u32 %v7491_v37, %v5668_v40  ;;  %v6002_v37 = vld [vmem:[#allocation8 + $0x5a0] sm:$0xf]  ;;  %v7576_v40 = vld [vmem:[#allocation8 + $0x5a8] sm:$0xf0] }
  0xea   :  { %2419 = vmatpush.bf16.msra.mxu0 %v5703_v6 }
  0xec   :  { %2433 = vmatpush.bf16.msra.mxu1 %v5799_v60  ;;  %v7585_v60 = vld [vmem:[#allocation8 + $0x5f0] sm:$0xf0] }
  0xee   :  { %2420 = vmatpush.bf16.msra.mxu0 %v5691_v12 }
  0xf0   :  { %2434 = vmatpush.bf16.msra.mxu1 %v5787_v7  ;;  %v7552_v7 = vld [vmem:[#allocation8 + $0x4e8] sm:$0xf0] }
  0xf2   :  { %2421 = vmatpush.bf16.msra.mxu0 %v5679_v16  ;;  %v5775_v16 = vor.u32 %v7519_v14, %v5774_v13 }
  0xf4   :  { %2435 = vmatpush.bf16.msra.mxu1 %v5775_v16  ;;  %v5812_v16 = vld [vmem:[#allocation8 + $0x42c] sm:$0xf0] }
  0xf6   :  { %2422 = vmatpush.bf16.msra.mxu0 %v5667_v30  ;;  %v822_v49 = vpop.f32.mrf.mxu0  ;;  %v7536_v30 = vld [vmem:[#allocation8 + $0x46c] sm:$0xf] }
  0xf7   :  { %v8060_v52 = vadd.f32 %v822_v49, %v809_v8  ;;  %v836_v59 = vpop.f32.mrf.mxu1  ;;  %v5704_v8 = vld [vmem:[#allocation8 + $0x354] sm:$0xf0] }
  0xf8   :  { %v837_v62 = vadd.f32 %v836_v59, %v200_v50  ;;  %v5707_v10 = vor.u32 %v7500_v4, %v5704_v8  ;;  %2436 = vmatpush.bf16.msra.mxu1 %v5763_v27  ;;  %v6038_v59 = vld [vmem:[#allocation8 + $0x5e8] sm:$0xf]  ;;  %v8072_v8 = vld [vmem:[#allocation7 + $0x4] sm:$0xf] }
  0xf9   :  { %v1107_v17 = vperm.slane %v8072_v8, 0 }
  0xfa   :  { %2471 = vmatpush.bf16.msrb.mxu0 %v5755_v31  ;;  %v5848_v31 = vld [vmem:[#allocation8 + $0x474] sm:$0xf0] }
  0xfb   :  { %v5851_v33 = vor.u32 %v7536_v30, %v5848_v31  ;;  %v7524_v30 = vld [vmem:[#allocation8 + $0x40c] sm:$0xf]  ;;  %v5800_v31 = vld [vmem:[#allocation8 + $0x414] sm:$0xf0] }
  0xfd   :  { %2485 = vmatpush.bf16.msrb.mxu1 %v5851_v33 }
  0xfe   :  { %2472 = vmatpush.bf16.msrb.mxu0 %v5743_v39  ;;  %v850_v6 = vpop.f32.mrf.mxu2  ;;  %v5931_v39 = vor.u32 %v7558_v36, %v5930_v35  ;;  %v8070_v3 = vpop.f32.mrf.mxu0  ;;  %v5882_v35 = vld [vmem:[#allocation8 + $0x4b0] sm:$0xf]  ;;  %v7546_v36 = vld [vmem:[#allocation8 + $0x4b8] sm:$0xf0] }
  0xff   :  { %v851_v9 = vadd.f32 %v850_v6, %v837_v62  ;;  %v8068_v55 = vpop.f32.mrf.mxu1  ;;  %v6039_v62 = vor.u32 %v7585_v60, %v6038_v59  ;;  %v5906_v6 = vld [vmem:[#allocation8 + $0x4e0] sm:$0xf]  ;;  %v5870_v59 = vld [vmem:[#allocation8 + $0x498] sm:$0xf]  ;;  %v7543_v60 = vld [vmem:[#allocation8 + $0x4a0] sm:$0xf0] }
 0x100   :  { %v864_v11 = vpop.f32.mrf.mxu3  ;;  %2444 = vmatpush.bf16.msra.mxu2 %v5931_v39  ;;  %v5883_v39 = vor.u32 %v7546_v36, %v5882_v35 }
 0x101   :  { %v8066_v12 = vadd.f32 %v864_v11, %v851_v9  ;;  %2457 = vmatpush.bf16.msra.mxu3 %v6039_v62  ;;  %v5907_v9 = vor.u32 %v7552_v7, %v5906_v6  ;;  %v7582_v11 = vld [vmem:[#allocation8 + $0x5d8] sm:$0xf0]  ;;  %v5871_v62 = vor.u32 %v7543_v60, %v5870_v59  ;;  %v5746_v59 = vld [vmem:[#allocation8 + $0x398] sm:$0xf] }
 0x102   :  { %2473 = vmatpush.bf16.msrb.mxu0 %v5731_v45  ;;  %v5836_v45 = vld [vmem:[#allocation8 + $0x45c] sm:$0xf0]  ;;  %v7518_v7 = vld [vmem:[#allocation8 + $0x3dc] sm:$0xf] }
 0x103   :  { %v5839_v49 = vor.u32 %v7533_v42, %v5836_v45  ;;  %v7521_v42 = vld [vmem:[#allocation8 + $0x3f4] sm:$0xf]  ;;  %v5788_v45 = vld [vmem:[#allocation8 + $0x3fc] sm:$0xf0] }
 0x104   :  { %2445 = vmatpush.bf16.msra.mxu2 %v5919_v61  ;;  %v5791_v54 = vor.u32 %v7521_v42, %v5788_v45  ;;  %v5990_v61 = vld [vmem:[#allocation8 + $0x588] sm:$0xf]  ;;  %v7557_v42 = vld [vmem:[#allocation8 + $0x514] sm:$0xf]  ;;  %v5932_v45 = vld [vmem:[#allocation8 + $0x51c] sm:$0xf0] }
 0x105   :  { %2486 = vmatpush.bf16.msrb.mxu1 %v5839_v49 }
 0x106   :  { %2474 = vmatpush.bf16.msrb.mxu0 %v5719_v1  ;;  %v7530_v1 = vld [vmem:[#allocation8 + $0x43c] sm:$0xf]  ;;  %v8074_v13 = vpop.f32.mrf.mxu2 }
 0x107   :  { %v5827_v4 = vor.u32 %v7530_v1, %v5824_v2  ;;  %v7573_v1 = vld [vmem:[#allocation8 + $0x590] sm:$0xf0] }
 0x108   :  { %2446 = vmatpush.bf16.msra.mxu2 %v5907_v9  ;;  %v5991_v6 = vor.u32 %v7573_v1, %v5990_v61  ;;  %v5776_v9 = vld [vmem:[#allocation8 + $0x3e4] sm:$0xf0]  ;;  %v7511_v61 = vld [vmem:[#allocation8 + $0x3a0] sm:$0xf0]  ;;  %v7564_v1 = vld [vmem:[#allocation8 + $0x548] sm:$0xf0] }
 0x109   :  { %2487 = vmatpush.bf16.msrb.mxu1 %v5827_v4 }
 0x10a   :  { %2475 = vmatpush.bf16.msrb.mxu0 %v5707_v10  ;;  %v6026_v10 = vld [vmem:[#allocation8 + $0x5d0] sm:$0xf] }
 0x10b   :  { %v6027_v14 = vor.u32 %v7582_v11, %v6026_v10  ;;  %v5779_v11 = vor.u32 %v7518_v7, %v5776_v9  ;;  %v7584_v7 = vld [vmem:[#allocation8 + $0x5ec] sm:$0xf] }
 0x10c   :  { %2447 = vmatpush.bf16.msra.mxu2 %v5895_v24  ;;  %v7560_v24 = vld [vmem:[#allocation8 + $0x52c] sm:$0xf] }
 0x10d   :  { %2458 = vmatpush.bf16.msra.mxu3 %v6027_v14 }
 0x10e   :  { %2476 = vmatpush.bf16.msrb.mxu0 %v5695_v18  ;;  %v5815_v18 = vor.u32 %v7527_v15, %v5812_v16  ;;  %v5858_v15 = vld [vmem:[#allocation8 + $0x480] sm:$0xf]  ;;  %v7540_v16 = vld [vmem:[#allocation8 + $0x488] sm:$0xf0] }
 0x10f   :  { %v5859_v22 = vor.u32 %v7540_v16, %v5858_v15  ;;  %v5734_v16 = vld [vmem:[#allocation8 + $0x380] sm:$0xf] }
 0x110   :  { %2488 = vmatpush.bf16.msrb.mxu1 %v5815_v18  ;;  %2448 = vmatpush.bf16.msra.mxu2 %v5883_v39  ;;  %v5978_v18 = vld [vmem:[#allocation8 + $0x570] sm:$0xf]  ;;  %v5966_v39 = vld [vmem:[#allocation8 + $0x558] sm:$0xf] }
 0x111   :  { %2459 = vmatpush.bf16.msra.mxu3 %v6015_v28  ;;  %v7515_v28 = vld [vmem:[#allocation8 + $0x3c4] sm:$0xf] }
 0x112   :  { %2477 = vmatpush.bf16.msrb.mxu0 %v5683_v32  ;;  %v5803_v32 = vor.u32 %v7524_v30, %v5800_v31  ;;  %v5764_v30 = vld [vmem:[#allocation8 + $0x3cc] sm:$0xf0]  ;;  %v8077_v31 = vpop.f32.mrf.mxu3 }
 0x113   :  { %v5767_v35 = vor.u32 %v7515_v28, %v5764_v30  ;;  %v5722_v30 = vld [vmem:[#allocation8 + $0x368] sm:$0xf] }
 0x114   :  { %2489 = vmatpush.bf16.msrb.mxu1 %v5803_v32  ;;  %2449 = vmatpush.bf16.msra.mxu2 %v5871_v62  ;;  %v5758_v32 = vld [vmem:[#allocation8 + $0x3b0] sm:$0xf]  ;;  %v5954_v62 = vld [vmem:[#allocation8 + $0x540] sm:$0xf] }
 0x116   :  { %2478 = vmatpush.bf16.msrb.mxu0 %v5671_v41  ;;  %v1604_v26 = vpop.f32.mrf.mxu0  ;;  %v6003_v41 = vor.u32 %v7576_v40, %v6002_v37  ;;  %v7567_v40 = vld [vmem:[#allocation8 + $0x560] sm:$0xf0] }
 0x117   :  { %v1618_v27 = vpop.f32.mrf.mxu1  ;;  %v1605_v33 = vadd.f32 %v1604_v26, %v1107_v17  ;;  %v5979_v26 = vor.u32 %v7570_v23, %v5978_v18  ;;  %v7508_v18 = vld [vmem:[#allocation8 + $0x388] sm:$0xf0]  ;;  %v7581_v23 = vld [vmem:[#allocation8 + $0x5d4] sm:$0xf] }
 0x118   :  { %2460 = vmatpush.bf16.msra.mxu3 %v6003_v41  ;;  %2490 = vmatpush.bf16.msrb.mxu1 %v5791_v54  ;;  %v5967_v41 = vor.u32 %v7567_v40, %v5966_v39  ;;  %v5935_v54 = vor.u32 %v7557_v42, %v5932_v45  ;;  %v6016_v39 = vld [vmem:[#allocation8 + $0x5c4] sm:$0xf0] }
 0x119   :  { %v1619_v56 = vadd.f32 %v1618_v27, %v1605_v33  ;;  %v5947_v27 = vor.u32 %v7560_v24, %v5944_v25  ;;  %v7514_v33 = vld [vmem:[#allocation8 + $0x3b8] sm:$0xf0]  ;;  %2450 = vmatpush.bf16.msra.mxu2 %v5859_v22  ;;  %v5908_v22 = vld [vmem:[#allocation8 + $0x4ec] sm:$0xf0]  ;;  %v1108_v24 = vperm.slane %v8072_v8, 1 }
 0x11c   :  { %2461 = vmatpush.bf16.msra.mxu3 %v5991_v6  ;;  %2491 = vmatpush.bf16.msrb.mxu1 %v5779_v11  ;;  %v5920_v6 = vld [vmem:[#allocation8 + $0x504] sm:$0xf0]  ;;  %v5747_v11 = vor.u32 %v7511_v61, %v5746_v59  ;;  %v7545_v59 = vld [vmem:[#allocation8 + $0x4b4] sm:$0xf]  ;;  %v5884_v61 = vld [vmem:[#allocation8 + $0x4bc] sm:$0xf0] }
 0x11d   :  { %2499 = vmatpush.bf16.msrb.mxu2 %v5947_v27  ;;  %v5735_v27 = vor.u32 %v7508_v18, %v5734_v16  ;;  %v7572_v16 = vld [vmem:[#allocation8 + $0x58c] sm:$0xf] }
 0x11e   :  { %v1632_v49 = vpop.f32.mrf.mxu2  ;;  %v1606_v2 = vpop.f32.mrf.mxu0 }
 0x11f   :  { %v1620_v4 = vpop.f32.mrf.mxu1  ;;  %v1607_v10 = vadd.f32 %v1606_v2, %v1107_v17  ;;  %v1633_v14 = vadd.f32 %v1632_v49, %v1619_v56  ;;  %v5759_v56 = vor.u32 %v7514_v33, %v5758_v32  ;;  %v5955_v2 = vor.u32 %v7564_v1, %v5954_v62  ;;  %v7548_v32 = vld [vmem:[#allocation8 + $0x4cc] sm:$0xf]  ;;  %v5896_v33 = vld [vmem:[#allocation8 + $0x4d4] sm:$0xf0]  ;;  %v7575_v62 = vld [vmem:[#allocation8 + $0x5a4] sm:$0xf] }
 0x120   :  { %2462 = vmatpush.bf16.msra.mxu3 %v5979_v26  ;;  %2492 = vmatpush.bf16.msrb.mxu1 %v5767_v35  ;;  %v6028_v26 = vld [vmem:[#allocation8 + $0x5dc] sm:$0xf0]  ;;  %v7578_v35 = vld [vmem:[#allocation8 + $0x5bc] sm:$0xf] }
 0x121   :  { %v1621_v19 = vadd.f32 %v1620_v4, %v1607_v10  ;;  %v1763_v36 = vmax.f32 %v1633_v14, 0.0  ;;  %2500 = vmatpush.bf16.msrb.mxu2 %v5935_v54  ;;  %v7554_v4 = vld [vmem:[#allocation8 + $0x4fc] sm:$0xf]  ;;  %v6040_v10 = vld [vmem:[#allocation8 + $0x5f4] sm:$0xf0]  ;;  %v1646_v14 = vpop.f32.mrf.mxu3  ;;  %v6031_v28 = vor.u32 %v7581_v23, %v6028_v26  ;;  %v6019_v42 = vor.u32 %v7578_v35, %v6016_v39 }
 0x122   :  { %v5923_v9 = vor.u32 %v7554_v4, %v5920_v6  ;;  %v6043_v15 = vor.u32 %v7584_v7, %v6040_v10  ;;  %v7502_v54 = vld [vmem:[#allocation8 + $0x358] sm:$0xf0]  ;;  %v6004_v4 = vld [vmem:[#allocation8 + $0x5ac] sm:$0xf0]  ;;  %v5698_v10 = vld [vmem:[#allocation8 + $0x338] sm:$0xf] }
 0x123   :  { %v6007_v7 = vor.u32 %v7575_v62, %v6004_v4  ;;  %v7569_v35 = vld [vmem:[#allocation8 + $0x574] sm:$0xf]  ;;  %v7538_v39 = vld [vmem:[#allocation8 + $0x478] sm:$0xf0] }
 0x124   :  { %2463 = vmatpush.bf16.msra.mxu3 %v5967_v41  ;;  %v7321_v62 = vld [vmem:[#allocation8 + $0xb0] sm:$0xf0] }
 0x125   :  { %2501 = vmatpush.bf16.msrb.mxu2 %v5923_v9 }
 0x126   :  { %v1634_v17 = vpop.f32.mrf.mxu2 }
 0x127   :  { %v1635_v37 = vadd.f32 %v1634_v17, %v1621_v19  ;;  %v7551_v19 = vld [vmem:[#allocation8 + $0x4e4] sm:$0xf]  ;;  %v7505_v17 = vld [vmem:[#allocation8 + $0x370] sm:$0xf0] }
 0x128   :  { %2464 = vmatpush.bf16.msra.mxu3 %v5955_v2  ;;  %v5911_v25 = vor.u32 %v7551_v19, %v5908_v22  ;;  %v5723_v41 = vor.u32 %v7505_v17, %v5722_v30  ;;  %v5887_v2 = vor.u32 %v7545_v59, %v5884_v61  ;;  %v5992_v22 = vld [vmem:[#allocation8 + $0x594] sm:$0xf0]  ;;  %v5686_v30 = vld [vmem:[#allocation8 + $0x320] sm:$0xf]  ;;  %v5854_v17 = vld [vmem:[#allocation8 + $0x470] sm:$0xf] }
 0x129   :  { %v1767_v49 = vmax.f32 %v1635_v37, 0.0  ;;  %v5899_v37 = vor.u32 %v7548_v32, %v5896_v33  ;;  %v5995_v26 = vor.u32 %v7572_v16, %v5992_v22  ;;  %v7539_v32 = vld [vmem:[#allocation8 + $0x484] sm:$0xf]  ;;  %v5860_v33 = vld [vmem:[#allocation8 + $0x48c] sm:$0xf0]  ;;  %v5855_v61 = vor.u32 %v7538_v39, %v5854_v17 }
 0x12a   :  { %2502 = vmatpush.bf16.msrb.mxu2 %v5911_v25  ;;  %v6134_v59 = vld [vmem:[#allocation8 + $0xa8] sm:$0xf]  ;;  %v5956_v22 = vld [vmem:[#allocation8 + $0x54c] sm:$0xf0]  ;;  %v7315_v17 = vld [vmem:[#allocation8 + $0x80] sm:$0xf0] }
 0x12b   :  { %v8079_v60 = vpack.c.bf16 %v1767_v49, %v1763_v36  ;;  %v1647_v36 = vadd.f32 %v1646_v14, %v1108_v24  ;;  %v5710_v49 = vld [vmem:[#allocation8 + $0x350] sm:$0xf]  ;;  %v7542_v14 = vld [vmem:[#allocation8 + $0x49c] sm:$0xf]  ;;  %v6098_v39 = vld [vmem:[#allocation8 + $0x60] sm:$0xf] }
 0x12c   :  { %2513 = vmatpush.bf16.msrb.mxu3 %v6043_v15  ;;  %v5711_v6 = vor.u32 %v7502_v54, %v5710_v49  ;;  %v5872_v15 = vld [vmem:[#allocation8 + $0x4a4] sm:$0xf0] }
 0x12d   :  { %2423 = vmatmul.bf16.vlgmr.msra.gmra.mxu0 %v8079_v60  ;;  %v5875_v19 = vor.u32 %v7542_v14, %v5872_v15  ;;  %v6122_v14 = vld [vmem:[#allocation8 + $0x90] sm:$0xf] }
 0x12e   :  { %2527 = vmatpush.bf16.msra.mxu0 %v5759_v56  ;;  %2503 = vmatpush.bf16.msrb.mxu2 %v5899_v37  ;;  %v1648_v56 = vpop.f32.mrf.mxu3 }
 0x12f   :  { %v1649_v9 = vadd.f32 %v1648_v56, %v1108_v24  ;;  %v7496_v24 = vld [vmem:[#allocation8 + $0x328] sm:$0xf0]  ;;  %v7493_v56 = vld [vmem:[#allocation8 + $0x310] sm:$0xf0] }
 0x130   :  { %2514 = vmatpush.bf16.msrb.mxu3 %v6031_v28 }
 0x132   :  { %2528 = vmatpush.bf16.msra.mxu0 %v5747_v11  ;;  %v7499_v11 = vld [vmem:[#allocation8 + $0x340] sm:$0xf0]  ;;  %2504 = vmatpush.bf16.msrb.mxu2 %v5887_v2  ;;  %v5968_v2 = vld [vmem:[#allocation8 + $0x564] sm:$0xf0] }
 0x133   :  { %v5699_v25 = vor.u32 %v7499_v11, %v5698_v10  ;;  %v6135_v11 = vor.u32 %v7321_v62, %v6134_v59  ;;  %v6086_v62 = vld [vmem:[#allocation8 + $0x48] sm:$0xf] }
 0x134   :  { %2515 = vmatpush.bf16.msrb.mxu3 %v6019_v42  ;;  %v5687_v42 = vor.u32 %v7496_v24, %v5686_v30  ;;  %v6110_v24 = vld [vmem:[#allocation8 + $0x78] sm:$0xf] }
 0x136   :  { %v1660_v40 = vpop.f32.mrf.mxu0  ;;  %2529 = vmatpush.bf16.msra.mxu0 %v5735_v27  ;;  %2505 = vmatpush.bf16.msrb.mxu2 %v5875_v19  ;;  %v7563_v19 = vld [vmem:[#allocation8 + $0x544] sm:$0xf] }
 0x137   :  { %v1674_v45 = vpop.f32.mrf.mxu1  ;;  %v1661_v1 = vadd.f32 %v1660_v40, %v1647_v36  ;;  %v5863_v40 = vor.u32 %v7539_v32, %v5860_v33  ;;  %v5818_v32 = vld [vmem:[#allocation8 + $0x428] sm:$0xf]  ;;  %v7529_v33 = vld [vmem:[#allocation8 + $0x430] sm:$0xf0] }
 0x138   :  { %2516 = vmatpush.bf16.msrb.mxu3 %v6007_v7  ;;  %v7535_v7 = vld [vmem:[#allocation8 + $0x460] sm:$0xf0] }
 0x139   :  { %v1675_v18 = vadd.f32 %v1674_v45, %v1661_v1  ;;  %v5674_v45 = vld [vmem:[#allocation8 + $0x308] sm:$0xf]  ;;  %v7566_v1 = vld [vmem:[#allocation8 + $0x55c] sm:$0xf] }
 0x13a   :  { %2530 = vmatpush.bf16.msra.mxu0 %v5723_v41  ;;  %v5980_v41 = vld [vmem:[#allocation8 + $0x57c] sm:$0xf0]  ;;  %2506 = vmatpush.bf16.msrb.mxu2 %v5863_v40  ;;  %v5675_v10 = vor.u32 %v7493_v56, %v5674_v45  ;;  %v7312_v40 = vld [vmem:[#allocation8 + $0x68] sm:$0xf0] }
 0x13b   :  { %v1764_v36 = vmax.f32 %v1675_v18, 0.0  ;;  %v5983_v49 = vor.u32 %v7569_v35, %v5980_v41  ;;  %v7318_v18 = vld [vmem:[#allocation8 + $0x98] sm:$0xf0]  ;;  %v6111_v35 = vor.u32 %v7315_v17, %v6110_v24  ;;  %v5806_v41 = vld [vmem:[#allocation8 + $0x410] sm:$0xf]  ;;  %v6099_v56 = vor.u32 %v7312_v40, %v6098_v39 }
 0x13c   :  { %2517 = vmatpush.bf16.msrb.mxu3 %v5995_v26  ;;  %v7532_v26 = vld [vmem:[#allocation8 + $0x448] sm:$0xf0]  ;;  %v5950_v17 = vld [vmem:[#allocation8 + $0x530] sm:$0xf] }
 0x13d   :  { %2479 = vmatmul.bf16.vlgmr.msrb.gmra.mxu0 %v8079_v60 }
 0x13e   :  { %v1662_v23 = vpop.f32.mrf.mxu0  ;;  %2531 = vmatpush.bf16.msra.mxu0 %v5711_v6  ;;  %v5842_v6 = vld [vmem:[#allocation8 + $0x458] sm:$0xf]  ;;  %v1688_v15 = vpop.f32.mrf.mxu2 }
 0x13f   :  { %v1663_v27 = vadd.f32 %v1662_v23, %v1649_v9  ;;  %v1676_v28 = vpop.f32.mrf.mxu1  ;;  %v5971_v9 = vor.u32 %v7566_v1, %v5968_v2  ;;  %v5843_v16 = vor.u32 %v7535_v7, %v5842_v6  ;;  %v7309_v1 = vld [vmem:[#allocation8 + $0x50] sm:$0xf0]  ;;  %v5794_v2 = vld [vmem:[#allocation8 + $0x3f8] sm:$0xf]  ;;  %v7523_v6 = vld [vmem:[#allocation8 + $0x400] sm:$0xf0] }
 0x140   :  { %2518 = vmatpush.bf16.msrb.mxu3 %v5983_v49  ;;  %v1702_v23 = vpop.f32.mrf.mxu3 }
 0x141   :  { %v1677_v37 = vadd.f32 %v1676_v28, %v1663_v27  ;;  %v5959_v27 = vor.u32 %v7563_v19, %v5956_v22  ;;  %v6123_v28 = vor.u32 %v7318_v18, %v6122_v14  ;;  %v7306_v18 = vld [vmem:[#allocation8 + $0x38] sm:$0xf0]  ;;  %v5782_v19 = vld [vmem:[#allocation8 + $0x3e0] sm:$0xf]  ;;  %v7520_v22 = vld [vmem:[#allocation8 + $0x3e8] sm:$0xf0] }
 0x142   :  { %2532 = vmatpush.bf16.msra.mxu0 %v5699_v25  ;;  %v5830_v25 = vld [vmem:[#allocation8 + $0x440] sm:$0xf] }
 0x143   :  { %v1768_v54 = vmax.f32 %v1677_v37, 0.0  ;;  %v5831_v30 = vor.u32 %v7532_v26, %v5830_v25  ;;  %v5819_v37 = vor.u32 %v7529_v33, %v5818_v32 }
 0x144   :  { %2519 = vmatpush.bf16.msrb.mxu3 %v5971_v9  ;;  %v1110_v9 = vperm.slane %v8072_v8, 3 }
 0x145   :  { %v8084_v4 = vpack.c.bf16 %v1768_v54, %v1764_v36  ;;  %v1109_v36 = vperm.slane %v8072_v8, 2 }
 0x146   :  { %2533 = vmatpush.bf16.msra.mxu0 %v5687_v42  ;;  %v7526_v42 = vld [vmem:[#allocation8 + $0x418] sm:$0xf0]  ;;  %v1690_v45 = vpop.f32.mrf.mxu2 }
 0x147   :  { %2437 = vmatmul.bf16.vlgmr.msra.gmra.mxu1 %v8084_v4  ;;  %v1689_v59 = vadd.f32 %v1688_v15, %v1109_v36  ;;  %v1691_v7 = vadd.f32 %v1690_v45, %v1109_v36  ;;  %v5795_v15 = vor.u32 %v7523_v6, %v5794_v2  ;;  %v5770_v36 = vld [vmem:[#allocation8 + $0x3c8] sm:$0xf]  ;;  %v7345_v45 = vld [vmem:[#allocation8 + $0x170] sm:$0xf0]  ;;  %v6050_v6 = vld [vmem:[#allocation8] sm:$0xf] }
 0x148   :  { %2541 = vmatpush.bf16.msra.mxu1 %v5855_v61  ;;  %2520 = vmatpush.bf16.msrb.mxu3 %v5959_v27  ;;  %v1704_v49 = vpop.f32.mrf.mxu3 }
 0x149   :  { %v1703_v14 = vadd.f32 %v1702_v23, %v1689_v59  ;;  %v1705_v25 = vadd.f32 %v1704_v49, %v1691_v7  ;;  %v6062_v23 = vld [vmem:[#allocation8 + $0x18] sm:$0xf]  ;;  %v7300_v7 = vld [vmem:[#allocation8 + $0x8] sm:$0xf0] }
 0x14a   :  { %2534 = vmatpush.bf16.msra.mxu0 %v5675_v10  ;;  %v6087_v10 = vor.u32 %v7309_v1, %v6086_v62  ;;  %v7559_v62 = vld [vmem:[#allocation8 + $0x520] sm:$0xf0] }
 0x14c   :  { %2542 = vmatpush.bf16.msra.mxu1 %v5843_v16  ;;  %v6074_v16 = vld [vmem:[#allocation8 + $0x30] sm:$0xf] }
 0x14d   :  { %2535 = vmatmul.bf16.vlgmr.msra.gmra.mxu0 %v8079_v60  ;;  %v5807_v60 = vor.u32 %v7526_v42, %v5806_v41  ;;  %v6075_v24 = vor.u32 %v7306_v18, %v6074_v16  ;;  %v6230_v42 = vld [vmem:[#allocation8 + $0x168] sm:$0xf]  ;;  %v6136_v16 = vld [vmem:[#allocation8 + $0xb4] sm:$0xf0] }
 0x14e   :  { %3095 = vmatpush.bf16.msrb.mxu0 %v6135_v11  ;;  %v713_v11 = vadd.f32 %v8033_v43, %v197_v29  ;;  %v5783_v29 = vor.u32 %v7520_v22, %v5782_v19  ;;  %v7562_v43 = vld [vmem:[#allocation8 + $0x538] sm:$0xf0]  ;;  %v6231_v2 = vor.u32 %v7345_v45, %v6230_v42  ;;  %v869_v22 = vmax.f32 %v8031_v34, 0.0 }
 0x150   :  { %2543 = vmatpush.bf16.msra.mxu1 %v5831_v30  ;;  %v727_v32 = vadd.f32 %v8035_v47, %v713_v11 }
 0x152   :  { %3096 = vmatpush.bf16.msrb.mxu0 %v6123_v28  ;;  %v741_v59 = vadd.f32 %v8044_v51, %v727_v32  ;;  %v6046_v32 = vld [vmem:[#allocation8 + $0x5f0] sm:$0xf] }
 0x154   :  { %2544 = vmatpush.bf16.msra.mxu1 %v5819_v37  ;;  %v7517_v37 = vld [vmem:[#allocation8 + $0x3d0] sm:$0xf0] }
 0x156   :  { %v1716_v54 = vpop.f32.mrf.mxu0  ;;  %3097 = vmatpush.bf16.msrb.mxu0 %v6111_v35  ;;  %v7303_v35 = vld [vmem:[#allocation8 + $0x20] sm:$0xf0] }
 0x157   :  { %v1730_v61 = vpop.f32.mrf.mxu1  ;;  %2493 = vmatmul.bf16.vlgmr.msrb.gmra.mxu1 %v8084_v4  ;;  %v1717_v26 = vadd.f32 %v1716_v54, %v1703_v14  ;;  %v5951_v54 = vor.u32 %v7562_v43, %v5950_v17  ;;  %v7342_v14 = vld [vmem:[#allocation8 + $0x158] sm:$0xf0]  ;;  %v7317_v43 = vld [vmem:[#allocation8 + $0x94] sm:$0xf] }
 0x158   :  { %2545 = vmatpush.bf16.msra.mxu1 %v5807_v60  ;;  %v1731_v28 = vadd.f32 %v1730_v61, %v1110_v9  ;;  %v5771_v61 = vor.u32 %v7517_v37, %v5770_v36  ;;  %v5938_v60 = vld [vmem:[#allocation8 + $0x518] sm:$0xf] }
 0x159   :  { %v1765_v39 = vmax.f32 %v1717_v26, 0.0  ;;  %v5939_v51 = vor.u32 %v7559_v62, %v5938_v60  ;;  %v7314_v60 = vld [vmem:[#allocation8 + $0x7c] sm:$0xf]  ;;  %v6112_v62 = vld [vmem:[#allocation8 + $0x84] sm:$0xf0] }
 0x15a   :  { %3098 = vmatpush.bf16.msrb.mxu0 %v6099_v56  ;;  %v6063_v56 = vor.u32 %v7303_v35, %v6062_v23  ;;  %v6124_v23 = vld [vmem:[#allocation8 + $0x9c] sm:$0xf0] }
 0x15b   :  { %v6127_v45 = vor.u32 %v7317_v43, %v6124_v23  ;;  %v5878_v43 = vld [vmem:[#allocation8 + $0x4a0] sm:$0xf]  ;;  %v7544_v23 = vld [vmem:[#allocation8 + $0x4a8] sm:$0xf0] }
 0x15c   :  { %2546 = vmatpush.bf16.msra.mxu1 %v5795_v15  ;;  %v7320_v15 = vld [vmem:[#allocation8 + $0xac] sm:$0xf] }
 0x15d   :  { %v6139_v17 = vor.u32 %v7320_v15, %v6136_v16  ;;  %v6182_v15 = vld [vmem:[#allocation8 + $0x108] sm:$0xf]  ;;  %v7333_v16 = vld [vmem:[#allocation8 + $0x110] sm:$0xf0] }
 0x15e   :  { %v1744_v27 = vpop.f32.mrf.mxu2  ;;  %v1758_v8 = vpop.f32.mrf.mxu3  ;;  %3099 = vmatpush.bf16.msrb.mxu0 %v6087_v10  ;;  %v6218_v10 = vld [vmem:[#allocation8 + $0x150] sm:$0xf] }
 0x15f   :  { %v1718_v30 = vpop.f32.mrf.mxu0  ;;  %v1732_v41 = vpop.f32.mrf.mxu1  ;;  %v1745_v49 = vadd.f32 %v1744_v27, %v1731_v28  ;;  %v5926_v27 = vld [vmem:[#allocation8 + $0x500] sm:$0xf]  ;;  %v7556_v28 = vld [vmem:[#allocation8 + $0x508] sm:$0xf0] }
 0x160   :  { %v1719_v33 = vadd.f32 %v1718_v30, %v1705_v25  ;;  %2547 = vmatpush.bf16.msra.mxu1 %v5783_v29  ;;  %v1733_v1 = vadd.f32 %v1732_v41, %v1110_v9  ;;  %v873_v25 = vmax.f32 %v741_v59, 0.0  ;;  %v6051_v9 = vor.u32 %v7300_v7, %v6050_v6  ;;  %v6206_v29 = vld [vmem:[#allocation8 + $0x138] sm:$0xf]  ;;  %v7550_v6 = vld [vmem:[#allocation8 + $0x4d8] sm:$0xf0] }
 0x161   :  { %v1759_v18 = vadd.f32 %v1758_v8, %v1745_v49  ;;  %v7339_v8 = vld [vmem:[#allocation8 + $0x140] sm:$0xf0]  ;;  %v5927_v34 = vor.u32 %v7556_v28, %v5926_v27  ;;  %v6034_v49 = vld [vmem:[#allocation8 + $0x5d8] sm:$0xf]  ;;  %v6183_v27 = vor.u32 %v7333_v16, %v6182_v15 }
 0x162   :  { %v1769_v40 = vmax.f32 %v1719_v33, 0.0  ;;  %3100 = vmatpush.bf16.msrb.mxu0 %v6075_v24  ;;  %v6219_v24 = vor.u32 %v7342_v14, %v6218_v10  ;;  %v7586_v33 = vld [vmem:[#allocation8 + $0x5f8] sm:$0xf0]  ;;  %v6207_v42 = vor.u32 %v7339_v8, %v6206_v29  ;;  %v8103_v59 = vpack.c.bf16 %v873_v25, %v869_v22  ;;  %v7580_v14 = vld [vmem:[#allocation8 + $0x5c8] sm:$0xf0] }
 0x163   :  { %v1766_v35 = vmax.f32 %v1759_v18, 0.0  ;;  %v6047_v37 = vor.u32 %v7586_v33, %v6046_v32  ;;  %v6115_v10 = vor.u32 %v7314_v60, %v6112_v62  ;;  %v7311_v18 = vld [vmem:[#allocation8 + $0x64] sm:$0xf]  ;;  %v755_v22 = vadd.f32 %v8046_v58, %v198_v48  ;;  %v7330_v32 = vld [vmem:[#allocation8 + $0xf8] sm:$0xf0] }
 0x164   :  { %v8096_v47 = vpack.c.bf16 %v1769_v40, %v1765_v39  ;;  %2548 = vmatpush.bf16.msra.mxu1 %v5771_v61  ;;  %v5914_v39 = vld [vmem:[#allocation8 + $0x4e8] sm:$0xf]  ;;  %v7553_v40 = vld [vmem:[#allocation8 + $0x4f0] sm:$0xf0]  ;;  %v7336_v61 = vld [vmem:[#allocation8 + $0x128] sm:$0xf0] }
 0x165   :  { %v7308_v33 = vld [vmem:[#allocation8 + $0x4c] sm:$0xf]  ;;  %v6088_v29 = vld [vmem:[#allocation8 + $0x54] sm:$0xf0]  ;;  %v769_v48 = vadd.f32 %v8053_v38, %v755_v22  ;;  %v7571_v62 = vld [vmem:[#allocation8 + $0x580] sm:$0xf0] }
 0x166   :  { %v1746_v11 = vpop.f32.mrf.mxu2  ;;  %2451 = vmatmul.bf16.vlgmr.msra.gmra.mxu2 %v8096_v47  ;;  %3101 = vmatpush.bf16.msrb.mxu0 %v6063_v56  ;;  %v1760_v26 = vpop.f32.mrf.mxu3  ;;  %v6194_v56 = vld [vmem:[#allocation8 + $0x120] sm:$0xf]  ;;  %v5986_v60 = vld [vmem:[#allocation8 + $0x578] sm:$0xf] }
 0x167   :  { %v1747_v19 = vadd.f32 %v1746_v11, %v1733_v1  ;;  %2555 = vmatpush.bf16.msra.mxu2 %v5951_v54  ;;  %2549 = vmatmul.bf16.vlgmr.msra.gmra.mxu1 %v8084_v4  ;;  %v7583_v54 = vld [vmem:[#allocation8 + $0x5e0] sm:$0xf0]  ;;  %v5915_v4 = vor.u32 %v7553_v40, %v5914_v39  ;;  %v6195_v7 = vor.u32 %v7336_v61, %v6194_v56  ;;  %v6022_v11 = vld [vmem:[#allocation8 + $0x5c0] sm:$0xf]  ;;  %v6158_v39 = vld [vmem:[#allocation8 + $0xd8] sm:$0xf] }
 0x168   :  { %3109 = vmatpush.bf16.msrb.mxu1 %v6231_v2  ;;  %v6035_v1 = vor.u32 %v7583_v54, %v6034_v49  ;;  %v5902_v2 = vld [vmem:[#allocation8 + $0x4d0] sm:$0xf]  ;;  %v6023_v25 = vor.u32 %v7580_v14, %v6022_v11  ;;  %v7327_v40 = vld [vmem:[#allocation8 + $0xe0] sm:$0xf0]  ;;  %v5879_v49 = vor.u32 %v7544_v23, %v5878_v43  ;;  %v5866_v54 = vld [vmem:[#allocation8 + $0x488] sm:$0xf]  ;;  %v783_v56 = vadd.f32 %v8055_v44, %v769_v48 }
 0x169   :  { %v1761_v30 = vadd.f32 %v1760_v26, %v1747_v19  ;;  %v6100_v19 = vld [vmem:[#allocation8 + $0x6c] sm:$0xf0]  ;;  %v5890_v26 = vld [vmem:[#allocation8 + $0x4b8] sm:$0xf]  ;;  %v7541_v61 = vld [vmem:[#allocation8 + $0x490] sm:$0xf0] }
 0x16a   :  { %3102 = vmatpush.bf16.msrb.mxu0 %v6051_v9  ;;  %v7547_v9 = vld [vmem:[#allocation8 + $0x4c0] sm:$0xf0]  ;;  %v6103_v28 = vor.u32 %v7311_v18, %v6100_v19  ;;  %v7302_v11 = vld [vmem:[#allocation8 + $0x1c] sm:$0xf]  ;;  %v6064_v14 = vld [vmem:[#allocation8 + $0x24] sm:$0xf0]  ;;  %v5867_v15 = vor.u32 %v7541_v61, %v5866_v54 }
 0x16b   :  { %v1770_v36 = vmax.f32 %v1761_v30, 0.0  ;;  %2556 = vmatpush.bf16.msra.mxu2 %v5939_v51  ;;  %v5903_v51 = vor.u32 %v7550_v6, %v5902_v2  ;;  %v6010_v30 = vld [vmem:[#allocation8 + $0x5a8] sm:$0xf]  ;;  %v5891_v8 = vor.u32 %v7547_v9, %v5890_v26  ;;  %v7369_v6 = vld [vmem:[#allocation8 + $0x230] sm:$0xf0]  ;;  %v870_v18 = vmax.f32 %v8048_v63, 0.0 }
 0x16c   :  { %3110 = vmatpush.bf16.msrb.mxu1 %v6219_v24  ;;  %v7577_v24 = vld [vmem:[#allocation8 + $0x5b0] sm:$0xf0]  ;;  %v6326_v2 = vld [vmem:[#allocation8 + $0x228] sm:$0xf]  ;;  %v7344_v44 = vld [vmem:[#allocation8 + $0x16c] sm:$0xf]  ;;  %v6067_v9 = vor.u32 %v7302_v11, %v6064_v14 }
 0x16d   :  { %v8101_v41 = vpack.c.bf16 %v1770_v36, %v1766_v35  ;;  %3103 = vmatmul.bf16.vlgmr.msrb.gmra.mxu0 %v8103_v59  ;;  %v6011_v58 = vor.u32 %v7577_v24, %v6010_v30  ;;  %v6091_v36 = vor.u32 %v7308_v33, %v6088_v29  ;;  %v6232_v16 = vld [vmem:[#allocation8 + $0x174] sm:$0xf0]  ;;  %v874_v19 = vmax.f32 %v783_v56, 0.0  ;;  %v7366_v30 = vld [vmem:[#allocation8 + $0x218] sm:$0xf0] }
 0x16e   :  { %3151 = vmatpush.bf16.msra.mxu0 %v6139_v17  ;;  %v6170_v17 = vld [vmem:[#allocation8 + $0xf0] sm:$0xf]  ;;  %v6327_v22 = vor.u32 %v7369_v6, %v6326_v2  ;;  %v6235_v24 = vor.u32 %v7344_v44, %v6232_v16  ;;  %v7341_v33 = vld [vmem:[#allocation8 + $0x154] sm:$0xf]  ;;  %v6220_v29 = vld [vmem:[#allocation8 + $0x15c] sm:$0xf0] }
 0x16f   :  { %2465 = vmatmul.bf16.vlgmr.msra.gmra.mxu3 %v8101_v41  ;;  %2557 = vmatpush.bf16.msra.mxu2 %v5927_v34  ;;  %v6171_v35 = vor.u32 %v7330_v32, %v6170_v17  ;;  %v5998_v34 = vld [vmem:[#allocation8 + $0x590] sm:$0xf]  ;;  %v7299_v17 = vld [vmem:[#allocation8 + $0x4] sm:$0xf]  ;;  %v7322_v63 = vld [vmem:[#allocation8 + $0xb8] sm:$0xf0] }
 0x170   :  { %2569 = vmatpush.bf16.msra.mxu3 %v6047_v37  ;;  %3111 = vmatpush.bf16.msrb.mxu1 %v6207_v42  ;;  %v7574_v37 = vld [vmem:[#allocation8 + $0x598] sm:$0xf0]  ;;  %v7305_v42 = vld [vmem:[#allocation8 + $0x34] sm:$0xf]  ;;  %v6052_v32 = vld [vmem:[#allocation8 + $0xc] sm:$0xf0] }
 0x171   :  { %v5999_v38 = vor.u32 %v7574_v37, %v5998_v34  ;;  %v6055_v23 = vor.u32 %v7299_v17, %v6052_v32  ;;  %v7363_v34 = vld [vmem:[#allocation8 + $0x200] sm:$0xf0]  ;;  %v8115_v37 = vpack.c.bf16 %v874_v19, %v870_v18  ;;  %v6208_v54 = vld [vmem:[#allocation8 + $0x144] sm:$0xf0]  ;;  %v6130_v56 = vld [vmem:[#allocation8 + $0x98] sm:$0xf] }
 0x172   :  { %3152 = vmatpush.bf16.msra.mxu0 %v6127_v45  ;;  %v6076_v45 = vld [vmem:[#allocation8 + $0x3c] sm:$0xf0]  ;;  %v6410_v6 = vld [vmem:[#allocation8 + $0x2d0] sm:$0xf]  ;;  %v6278_v18 = vld [vmem:[#allocation8 + $0x1c8] sm:$0xf] }
 0x173   :  { %2558 = vmatpush.bf16.msra.mxu2 %v5915_v4  ;;  %v6159_v4 = vor.u32 %v7327_v40, %v6158_v39  ;;  %v6223_v39 = vor.u32 %v7341_v33, %v6220_v29  ;;  %v6196_v11 = vld [vmem:[#allocation8 + $0x12c] sm:$0xf0]  ;;  %v6118_v14 = vld [vmem:[#allocation8 + $0x80] sm:$0xf]  ;;  %v7357_v19 = vld [vmem:[#allocation8 + $0x1d0] sm:$0xf0] }
 0x174   :  { %2570 = vmatpush.bf16.msra.mxu3 %v6035_v1  ;;  %3112 = vmatpush.bf16.msrb.mxu1 %v6195_v7  ;;  %v6079_v1 = vor.u32 %v7305_v42, %v6076_v45  ;;  %v6146_v7 = vld [vmem:[#allocation8 + $0xc0] sm:$0xf]  ;;  %v6422_v42 = vld [vmem:[#allocation8 + $0x2e8] sm:$0xf]  ;;  %v7393_v45 = vld [vmem:[#allocation8 + $0x2f0] sm:$0xf0]  ;;  %v6279_v17 = vor.u32 %v7357_v19, %v6278_v18 }
 0x175   :  { %v6266_v33 = vld [vmem:[#allocation8 + $0x1b0] sm:$0xf]  ;;  %v7354_v29 = vld [vmem:[#allocation8 + $0x1b8] sm:$0xf0] }
 0x176   :  { %3153 = vmatpush.bf16.msra.mxu0 %v6115_v10  ;;  %2507 = vmatmul.bf16.vlgmr.msrb.gmra.mxu2 %v8096_v47  ;;  %v7324_v10 = vld [vmem:[#allocation8 + $0xc8] sm:$0xf0]  ;;  %v6238_v18 = vld [vmem:[#allocation8 + $0x170] sm:$0xf]  ;;  %v7346_v19 = vld [vmem:[#allocation8 + $0x178] sm:$0xf0] }
 0x177   :  { %2559 = vmatpush.bf16.msra.mxu2 %v5903_v51  ;;  %v5987_v51 = vor.u32 %v7571_v62, %v5986_v60  ;;  %v6147_v26 = vor.u32 %v7324_v10, %v6146_v7  ;;  %v6423_v62 = vor.u32 %v7393_v45, %v6422_v42  ;;  %v7390_v7 = vld [vmem:[#allocation8 + $0x2d8] sm:$0xf0]  ;;  %v7335_v10 = vld [vmem:[#allocation8 + $0x124] sm:$0xf]  ;;  %v6374_v45 = vld [vmem:[#allocation8 + $0x288] sm:$0xf] }
 0x178   :  { %2571 = vmatpush.bf16.msra.mxu3 %v6023_v25  ;;  %3113 = vmatpush.bf16.msrb.mxu1 %v6183_v27  ;;  %v5974_v25 = vld [vmem:[#allocation8 + $0x560] sm:$0xf]  ;;  %v7568_v27 = vld [vmem:[#allocation8 + $0x568] sm:$0xf0]  ;;  %v6411_v16 = vor.u32 %v7390_v7, %v6410_v6 }
 0x179   :  { %v5975_v48 = vor.u32 %v7568_v27, %v5974_v25  ;;  %v6398_v25 = vld [vmem:[#allocation8 + $0x2b8] sm:$0xf] }
 0x17a   :  { %3154 = vmatpush.bf16.msra.mxu0 %v6103_v28  ;;  %v6314_v28 = vld [vmem:[#allocation8 + $0x210] sm:$0xf]  ;;  %v6184_v27 = vld [vmem:[#allocation8 + $0x114] sm:$0xf0] }
 0x17b   :  { %2560 = vmatpush.bf16.msra.mxu2 %v5891_v8  ;;  %v6142_v8 = vld [vmem:[#allocation8 + $0xb0] sm:$0xf]  ;;  %v6315_v43 = vor.u32 %v7366_v30, %v6314_v28  ;;  %v6106_v28 = vld [vmem:[#allocation8 + $0x68] sm:$0xf]  ;;  %v7313_v30 = vld [vmem:[#allocation8 + $0x70] sm:$0xf0] }
 0x17c   :  { %2572 = vmatpush.bf16.msra.mxu3 %v6011_v58  ;;  %3114 = vmatpush.bf16.msrb.mxu1 %v6171_v35  ;;  %v5962_v58 = vld [vmem:[#allocation8 + $0x548] sm:$0xf]  ;;  %v7565_v35 = vld [vmem:[#allocation8 + $0x550] sm:$0xf0]  ;;  %v6143_v40 = vor.u32 %v7322_v63, %v6142_v8  ;;  %v6107_v63 = vor.u32 %v7313_v30, %v6106_v28  ;;  %v6239_v30 = vor.u32 %v7346_v19, %v6238_v18  ;;  %v7617_v18 = vld [vmem:[#allocation5 + $0x2ec] sm:$0xf0] }
 0x17d   :  { %v5963_v61 = vor.u32 %v7565_v35, %v5962_v58  ;;  %v7384_v58 = vld [vmem:[#allocation8 + $0x2a8] sm:$0xf0]  ;;  %v7310_v35 = vld [vmem:[#allocation8 + $0x58] sm:$0xf0] }
 0x17e   :  { %3155 = vmatpush.bf16.msra.mxu0 %v6091_v36  ;;  %v6302_v36 = vld [vmem:[#allocation8 + $0x1f8] sm:$0xf] }
 0x17f   :  { %2521 = vmatmul.bf16.vlgmr.msrb.gmra.mxu3 %v8101_v41  ;;  %2561 = vmatpush.bf16.msra.mxu2 %v5879_v49  ;;  %v7338_v49 = vld [vmem:[#allocation8 + $0x13c] sm:$0xf]  ;;  %v6303_v60 = vor.u32 %v7363_v34, %v6302_v36  ;;  %v6254_v34 = vld [vmem:[#allocation8 + $0x198] sm:$0xf] }
 0x180   :  { %2573 = vmatpush.bf16.msra.mxu3 %v5999_v38  ;;  %3115 = vmatpush.bf16.msrb.mxu1 %v6159_v4  ;;  %v7319_v38 = vld [vmem:[#allocation8 + $0xa0] sm:$0xf0]  ;;  %v6290_v4 = vld [vmem:[#allocation8 + $0x1e0] sm:$0xf] }
 0x181   :  { %v6131_v2 = vor.u32 %v7319_v38, %v6130_v56  ;;  %v6160_v56 = vld [vmem:[#allocation8 + $0xe4] sm:$0xf0]  ;;  %v6082_v38 = vld [vmem:[#allocation8 + $0x38] sm:$0xf] }
 0x182   :  { %3156 = vmatpush.bf16.msra.mxu0 %v6079_v1  ;;  %v7360_v1 = vld [vmem:[#allocation8 + $0x1e8] sm:$0xf0] }
 0x183   :  { %2562 = vmatpush.bf16.msra.mxu2 %v5867_v15  ;;  %v7316_v15 = vld [vmem:[#allocation8 + $0x88] sm:$0xf0]  ;;  %v6291_v44 = vor.u32 %v7360_v1, %v6290_v4  ;;  %v6242_v4 = vld [vmem:[#allocation8 + $0x180] sm:$0xf] }
 0x184   :  { %2574 = vmatpush.bf16.msra.mxu3 %v5987_v51  ;;  %3116 = vmatpush.bf16.msrb.mxu1 %v6147_v26  ;;  %v6199_v51 = vor.u32 %v7335_v10, %v6196_v11  ;;  %v7387_v26 = vld [vmem:[#allocation8 + $0x2c0] sm:$0xf0]  ;;  %v7348_v1 = vld [vmem:[#allocation8 + $0x188] sm:$0xf0]  ;;  %v7378_v10 = vld [vmem:[#allocation8 + $0x278] sm:$0xf0] }
 0x185   :  { %v6399_v32 = vor.u32 %v7387_v26, %v6398_v25  ;;  %v7368_v11 = vld [vmem:[#allocation8 + $0x22c] sm:$0xf]  ;;  %v6243_v21 = vor.u32 %v7348_v1, %v6242_v4 }
 0x186   :  { %3157 = vmatpush.bf16.msra.mxu0 %v6067_v9  ;;  %2563 = vmatmul.bf16.vlgmr.msra.gmra.mxu2 %v8096_v47  ;;  %v6211_v47 = vor.u32 %v7338_v49, %v6208_v54  ;;  %v7332_v9 = vld [vmem:[#allocation8 + $0x10c] sm:$0xf]  ;;  %v7381_v49 = vld [vmem:[#allocation8 + $0x290] sm:$0xf0]  ;;  %v7326_v54 = vld [vmem:[#allocation8 + $0xdc] sm:$0xf] }
 0x187   :  { %3123 = vmatpush.bf16.msrb.mxu2 %v6327_v22  ;;  %3117 = vmatmul.bf16.vlgmr.msrb.gmra.mxu1 %v8115_v37  ;;  %v6119_v22 = vor.u32 %v7316_v15, %v6118_v14  ;;  %v6187_v8 = vor.u32 %v7332_v9, %v6184_v27  ;;  %v6163_v6 = vor.u32 %v7326_v54, %v6160_v56  ;;  %v6328_v14 = vld [vmem:[#allocation8 + $0x234] sm:$0xf0]  ;;  %v7323_v15 = vld [vmem:[#allocation8 + $0xc4] sm:$0xf] }
 0x188   :  { %3165 = vmatpush.bf16.msra.mxu1 %v6235_v24  ;;  %2575 = vmatpush.bf16.msra.mxu3 %v5975_v48  ;;  %v797_v24 = vadd.f32 %v8057_v46, %v199_v0  ;;  %v6386_v48 = vld [vmem:[#allocation8 + $0x2a0] sm:$0xf]  ;;  %v6267_v0 = vor.u32 %v7354_v29, %v6266_v33  ;;  %v6331_v25 = vor.u32 %v7368_v11, %v6328_v14  ;;  %v6350_v9 = vld [vmem:[#allocation8 + $0x258] sm:$0xf]  ;;  %v7375_v27 = vld [vmem:[#allocation8 + $0x260] sm:$0xf0] }
 0x189   :  { %v6387_v46 = vor.u32 %v7384_v58, %v6386_v48  ;;  %v7301_v33 = vld [vmem:[#allocation8 + $0x10] sm:$0xf0]  ;;  %v7343_v29 = vld [vmem:[#allocation8 + $0x160] sm:$0xf0]  ;;  %v6338_v58 = vld [vmem:[#allocation8 + $0x240] sm:$0xf] }
 0x18a   :  { %3158 = vmatpush.bf16.msra.mxu0 %v6055_v23  ;;  %v6094_v23 = vld [vmem:[#allocation8 + $0x50] sm:$0xf]  ;;  %v811_v36 = vadd.f32 %v8062_v53, %v797_v24  ;;  %v7365_v24 = vld [vmem:[#allocation8 + $0x214] sm:$0xf]  ;;  %v7359_v54 = vld [vmem:[#allocation8 + $0x1e4] sm:$0xf] }
 0x18b   :  { %3124 = vmatpush.bf16.msrb.mxu2 %v6315_v43  ;;  %v6172_v43 = vld [vmem:[#allocation8 + $0xfc] sm:$0xf0]  ;;  %v6095_v42 = vor.u32 %v7310_v35, %v6094_v23  ;;  %v6190_v11 = vld [vmem:[#allocation8 + $0x110] sm:$0xf]  ;;  %v7334_v14 = vld [vmem:[#allocation8 + $0x118] sm:$0xf0] }
 0x18c   :  { %3166 = vmatpush.bf16.msra.mxu1 %v6223_v39  ;;  %2576 = vmatpush.bf16.msra.mxu3 %v5963_v61  ;;  %v7351_v39 = vld [vmem:[#allocation8 + $0x1a0] sm:$0xf0]  ;;  %v6191_v19 = vor.u32 %v7334_v14, %v6190_v11 }
 0x18d   :  { %3159 = vmatmul.bf16.vlgmr.msra.gmra.mxu0 %v8103_v59  ;;  %v7307_v61 = vld [vmem:[#allocation8 + $0x40] sm:$0xf0]  ;;  %v6255_v53 = vor.u32 %v7351_v39, %v6254_v34  ;;  %v6214_v34 = vld [vmem:[#allocation8 + $0x140] sm:$0xf]  ;;  %v7340_v39 = vld [vmem:[#allocation8 + $0x148] sm:$0xf0] }
 0x18e   :  { %3207 = vmatpush.bf16.msrb.mxu0 %v6143_v40  ;;  %v6083_v7 = vor.u32 %v7307_v61, %v6082_v38  ;;  %v6215_v56 = vor.u32 %v7340_v39, %v6214_v34  ;;  %v6292_v38 = vld [vmem:[#allocation8 + $0x1ec] sm:$0xf0]  ;;  %v7389_v61 = vld [vmem:[#allocation8 + $0x2d4] sm:$0xf]  ;;  %v7370_v39 = vld [vmem:[#allocation8 + $0x238] sm:$0xf0] }
 0x18f   :  { %3125 = vmatpush.bf16.msrb.mxu2 %v6303_v60  ;;  %2577 = vmatmul.bf16.vlgmr.msra.gmra.mxu3 %v8101_v41  ;;  %v7329_v41 = vld [vmem:[#allocation8 + $0xf4] sm:$0xf]  ;;  %v825_v60 = vadd.f32 %v8070_v3, %v811_v36  ;;  %v6148_v3 = vld [vmem:[#allocation8 + $0xcc] sm:$0xf0]  ;;  %v6304_v36 = vld [vmem:[#allocation8 + $0x204] sm:$0xf0]  ;;  %v6295_v1 = vor.u32 %v7359_v54, %v6292_v38 }
 0x190   :  { %3137 = vmatpush.bf16.msrb.mxu3 %v6423_v62  ;;  %3167 = vmatpush.bf16.msra.mxu1 %v6211_v47  ;;  %v6175_v40 = vor.u32 %v7329_v41, %v6172_v43  ;;  %v6375_v62 = vor.u32 %v7381_v49, %v6374_v45  ;;  %v6362_v47 = vld [vmem:[#allocation8 + $0x270] sm:$0xf]  ;;  %v6151_v26 = vor.u32 %v7323_v15, %v6148_v3  ;;  %v7372_v41 = vld [vmem:[#allocation8 + $0x248] sm:$0xf0]  ;;  %v7362_v43 = vld [vmem:[#allocation8 + $0x1fc] sm:$0xf] }
 0x191   :  { %v6307_v45 = vor.u32 %v7362_v43, %v6304_v36  ;;  %v6546_v15 = vld [vmem:[#allocation5 + $0x2c0] sm:$0xf]  ;;  %v7609_v43 = vld [vmem:[#allocation5 + $0x22c] sm:$0xf0]  ;;  %v6364_v36 = vld [vmem:[#allocation8 + $0x27c] sm:$0xf0] }
 0x192   :  { %3208 = vmatpush.bf16.msrb.mxu0 %v6131_v2  ;;  %v839_v2 = vadd.f32 %v8068_v55, %v200_v50  ;;  %v875_v50 = vmax.f32 %v825_v60, 0.0  ;;  %v6412_v60 = vld [vmem:[#allocation8 + $0x2dc] sm:$0xf0]  ;;  %v7605_v38 = vld [vmem:[#allocation5 + $0x1cc] sm:$0xf0] }
 0x193   :  { %3126 = vmatpush.bf16.msrb.mxu2 %v6291_v44  ;;  %v6070_v44 = vld [vmem:[#allocation8 + $0x20] sm:$0xf]  ;;  %v7601_v14 = vld [vmem:[#allocation5 + $0x16c] sm:$0xf0] }
 0x194   :  { %3138 = vmatpush.bf16.msrb.mxu3 %v6411_v16  ;;  %3168 = vmatpush.bf16.msra.mxu1 %v6199_v51  ;;  %v7304_v16 = vld [vmem:[#allocation8 + $0x28] sm:$0xf0]  ;;  %v871_v51 = vmax.f32 %v8060_v52, 0.0  ;;  %v853_v55 = vadd.f32 %v8074_v13, %v839_v2  ;;  %v6226_v52 = vld [vmem:[#allocation8 + $0x158] sm:$0xf] }
 0x195   :  { %v6071_v28 = vor.u32 %v7304_v16, %v6070_v44  ;;  %v6227_v35 = vor.u32 %v7343_v29, %v6226_v52  ;;  %v7353_v16 = vld [vmem:[#allocation8 + $0x1b4] sm:$0xf]  ;;  %v6166_v52 = vld [vmem:[#allocation8 + $0xe0] sm:$0xf]  ;;  %v7328_v29 = vld [vmem:[#allocation8 + $0xe8] sm:$0xf0] }
 0x196   :  { %3209 = vmatpush.bf16.msrb.mxu0 %v6119_v22  ;;  %v6363_v22 = vor.u32 %v7378_v10, %v6362_v47  ;;  %v867_v13 = vadd.f32 %v8077_v31, %v853_v55  ;;  %v6339_v31 = vor.u32 %v7372_v41, %v6338_v58  ;;  %v7356_v47 = vld [vmem:[#allocation8 + $0x1cc] sm:$0xf]  ;;  %v6400_v10 = vld [vmem:[#allocation8 + $0x2c4] sm:$0xf0]  ;;  %v7331_v55 = vld [vmem:[#allocation8 + $0x100] sm:$0xf0] }
 0x197   :  { %3127 = vmatpush.bf16.msrb.mxu2 %v6279_v17  ;;  %v6316_v17 = vld [vmem:[#allocation8 + $0x21c] sm:$0xf0]  ;;  %v7347_v58 = vld [vmem:[#allocation8 + $0x184] sm:$0xf]  ;;  %v6244_v41 = vld [vmem:[#allocation8 + $0x18c] sm:$0xf0] }
 0x198   :  { %3139 = vmatpush.bf16.msrb.mxu3 %v6399_v32  ;;  %3169 = vmatpush.bf16.msra.mxu1 %v6187_v8  ;;  %v6058_v32 = vld [vmem:[#allocation8 + $0x8] sm:$0xf]  ;;  %v6351_v8 = vor.u32 %v7375_v27, %v6350_v9  ;;  %v6319_v48 = vor.u32 %v7365_v24, %v6316_v17  ;;  %v7350_v9 = vld [vmem:[#allocation8 + $0x19c] sm:$0xf]  ;;  %v6530_v27 = vld [vmem:[#allocation5 + $0x260] sm:$0xf] }
 0x199   :  { %v6059_v23 = vor.u32 %v7301_v33, %v6058_v32  ;;  %v6256_v24 = vld [vmem:[#allocation8 + $0x1a4] sm:$0xf0]  ;;  %v7380_v17 = vld [vmem:[#allocation8 + $0x28c] sm:$0xf]  ;;  %v6376_v32 = vld [vmem:[#allocation8 + $0x294] sm:$0xf0] }
 0x19a   :  { %3210 = vmatpush.bf16.msrb.mxu0 %v6107_v63  ;;  %v8131_v63 = vpack.c.bf16 %v875_v50, %v871_v51  ;;  %v6268_v51 = vld [vmem:[#allocation8 + $0x1bc] sm:$0xf0]  ;;  %v6178_v50 = vld [vmem:[#allocation8 + $0xf8] sm:$0xf] }
 0x19b   :  { %3128 = vmatpush.bf16.msrb.mxu2 %v6267_v0  ;;  %v7392_v0 = vld [vmem:[#allocation8 + $0x2ec] sm:$0xf] }
 0x19c   :  { %3140 = vmatpush.bf16.msrb.mxu3 %v6387_v46  ;;  %3170 = vmatpush.bf16.msra.mxu1 %v6175_v40  ;;  %v6424_v46 = vld [vmem:[#allocation8 + $0x2f4] sm:$0xf0]  ;;  %v872_v40 = vmax.f32 %v8066_v12, 0.0  ;;  %v6415_v12 = vor.u32 %v7389_v61, %v6412_v60 }
 0x19d   :  { %v6427_v49 = vor.u32 %v7392_v0, %v6424_v46  ;;  %v6334_v0 = vld [vmem:[#allocation8 + $0x230] sm:$0xf] }
 0x19e   :  { %3211 = vmatpush.bf16.msrb.mxu0 %v6095_v42  ;;  %v876_v42 = vmax.f32 %v867_v13, 0.0  ;;  %v6259_v13 = vor.u32 %v7350_v9, %v6256_v24  ;;  %v6335_v61 = vor.u32 %v7370_v39, %v6334_v0  ;;  %v7597_v9 = vld [vmem:[#allocation5 + $0x10c] sm:$0xf0]  ;;  %v7361_v24 = vld [vmem:[#allocation8 + $0x1f0] sm:$0xf0] }
 0x19f   :  { %3129 = vmatpush.bf16.msrb.mxu2 %v6255_v53  ;;  %v6202_v53 = vld [vmem:[#allocation8 + $0x128] sm:$0xf]  ;;  %v7388_v0 = vld [vmem:[#allocation8 + $0x2c8] sm:$0xf0]  ;;  %v6610_v39 = vld [vmem:[#allocation5 + $0x440] sm:$0xf] }
 0x1a0   :  { %3141 = vmatpush.bf16.msrb.mxu3 %v6375_v62  ;;  %3171 = vmatpush.bf16.msra.mxu1 %v6163_v6  ;;  %v7337_v62 = vld [vmem:[#allocation8 + $0x130] sm:$0xf0]  ;;  %v8137_v4 = vpack.c.bf16 %v876_v42, %v872_v40  ;;  %v6280_v6 = vld [vmem:[#allocation8 + $0x1d4] sm:$0xf0] }
 0x1a1   :  { %v6203_v2 = vor.u32 %v7337_v62, %v6202_v53  ;;  %v6283_v3 = vor.u32 %v7356_v47, %v6280_v6  ;;  %v7325_v40 = vld [vmem:[#allocation8 + $0xd0] sm:$0xf0]  ;;  %v7374_v53 = vld [vmem:[#allocation8 + $0x25c] sm:$0xf]  ;;  %v6352_v62 = vld [vmem:[#allocation8 + $0x264] sm:$0xf0] }
 0x1a2   :  { %3212 = vmatpush.bf16.msrb.mxu0 %v6083_v7  ;;  %v7386_v7 = vld [vmem:[#allocation8 + $0x2bc] sm:$0xf]  ;;  %v6674_v42 = vld [vmem:[#allocation5 + $0x5c0] sm:$0xf]  ;;  %v7367_v47 = vld [vmem:[#allocation8 + $0x220] sm:$0xf0]  ;;  %v6355_v11 = vor.u32 %v7374_v53, %v6352_v62 }
 0x1a3   :  { %3130 = vmatpush.bf16.msrb.mxu2 %v6243_v21  ;;  %v6403_v44 = vor.u32 %v7386_v7, %v6400_v10  ;;  %v6388_v21 = vld [vmem:[#allocation8 + $0x2ac] sm:$0xf0]  ;;  %v6658_v6 = vld [vmem:[#allocation5 + $0x560] sm:$0xf]  ;;  %v7645_v7 = vld [vmem:[#allocation5 + $0x58c] sm:$0xf0] }
 0x1a4   :  { %3142 = vmatpush.bf16.msrb.mxu3 %v6363_v22  ;;  %3172 = vmatpush.bf16.msra.mxu1 %v6151_v26  ;;  %v6547_v22 = vor.u32 %v7617_v18, %v6546_v15  ;;  %v6482_v10 = vld [vmem:[#allocation5 + $0x140] sm:$0xf]  ;;  %v7355_v62 = vld [vmem:[#allocation8 + $0x1c0] sm:$0xf0] }
 0x1a5   :  { %v6483_v18 = vor.u32 %v7601_v14, %v6482_v10  ;;  %v6262_v14 = vld [vmem:[#allocation8 + $0x1a0] sm:$0xf] }
 0x1a6   :  { %3213 = vmatpush.bf16.msrb.mxu0 %v6071_v28  ;;  %3131 = vmatmul.bf16.vlgmr.msrb.gmra.mxu2 %v8131_v63  ;;  %v7613_v28 = vld [vmem:[#allocation5 + $0x28c] sm:$0xf0] }
 0x1a7   :  { %3179 = vmatpush.bf16.msra.mxu2 %v6331_v25  ;;  %3173 = vmatmul.bf16.vlgmr.msra.gmra.mxu1 %v8115_v37  ;;  %v6271_v25 = vor.u32 %v7353_v16, %v6268_v51  ;;  %v6531_v33 = vor.u32 %v7613_v28, %v6530_v27  ;;  %v6310_v16 = vld [vmem:[#allocation8 + $0x200] sm:$0xf]  ;;  %v6430_v51 = vld [vmem:[#allocation8 + $0x2f0] sm:$0xf] }
 0x1a8   :  { %3221 = vmatpush.bf16.msrb.mxu1 %v6239_v30  ;;  %3143 = vmatpush.bf16.msrb.mxu3 %v6351_v8  ;;  %v6179_v30 = vor.u32 %v7331_v55, %v6178_v50  ;;  %v6514_v8 = vld [vmem:[#allocation5 + $0x200] sm:$0xf]  ;;  %v7641_v50 = vld [vmem:[#allocation5 + $0x52c] sm:$0xf0] }
 0x1a9   :  { %v6515_v46 = vor.u32 %v7609_v43, %v6514_v8  ;;  %v6466_v55 = vld [vmem:[#allocation5 + $0xe0] sm:$0xf]  ;;  %v7637_v8 = vld [vmem:[#allocation5 + $0x4cc] sm:$0xf0]  ;;  %v6286_v43 = vld [vmem:[#allocation8 + $0x1d0] sm:$0xf] }
 0x1aa   :  { %3214 = vmatpush.bf16.msrb.mxu0 %v6059_v23  ;;  %v6167_v23 = vor.u32 %v7328_v29, %v6166_v52  ;;  %v8141_v34 = vpop.f32.mrf.mxu0  ;;  %v6626_v29 = vld [vmem:[#allocation5 + $0x4a0] sm:$0xf] }
 0x1ab   :  { %3180 = vmatpush.bf16.msra.mxu2 %v6319_v48  ;;  %v6379_v48 = vor.u32 %v7380_v17, %v6376_v32  ;;  %v6467_v17 = vor.u32 %v7597_v9, %v6466_v55  ;;  %v6418_v32 = vld [vmem:[#allocation8 + $0x2d8] sm:$0xf]  ;;  %v7349_v9 = vld [vmem:[#allocation8 + $0x190] sm:$0xf0] }
 0x1ac   :  { %3222 = vmatpush.bf16.msrb.mxu1 %v6227_v35  ;;  %3144 = vmatpush.bf16.msrb.mxu3 %v6339_v31  ;;  %v7377_v35 = vld [vmem:[#allocation8 + $0x274] sm:$0xf]  ;;  %v6154_v31 = vld [vmem:[#allocation8 + $0xc8] sm:$0xf] }
 0x1ad   :  { %3215 = vmatmul.bf16.vlgmr.msrb.gmra.mxu0 %v8103_v59  ;;  %v7383_v59 = vld [vmem:[#allocation8 + $0x2a4] sm:$0xf]  ;;  %v6367_v54 = vor.u32 %v7377_v35, %v6364_v36  ;;  %v6155_v60 = vor.u32 %v7325_v40, %v6154_v31  ;;  %v6406_v36 = vld [vmem:[#allocation8 + $0x2c0] sm:$0xf] }
 0x1ae   :  { %3849 = vmatpush.bf16.msra.mxu0 %v6547_v22  ;;  %v6391_v26 = vor.u32 %v7383_v59, %v6388_v21  ;;  %v7394_v59 = vld [vmem:[#allocation8 + $0x2f8] sm:$0xf0]  ;;  %v6659_v21 = vor.u32 %v7645_v7, %v6658_v6  ;;  %v6642_v22 = vld [vmem:[#allocation5 + $0x500] sm:$0xf]  ;;  %v7633_v40 = vld [vmem:[#allocation5 + $0x46c] sm:$0xf0] }
 0x1af   :  { %3181 = vmatpush.bf16.msra.mxu2 %v6307_v45  ;;  %3145 = vmatmul.bf16.vlgmr.msrb.gmra.mxu3 %v8137_v4  ;;  %v7649_v45 = vld [vmem:[#allocation5 + $0x5ec] sm:$0xf0]  ;;  %v6431_v28 = vor.u32 %v7394_v59, %v6430_v51  ;;  %v6643_v52 = vor.u32 %v7641_v50, %v6642_v22  ;;  %v7643_v7 = vld [vmem:[#allocation5 + $0x564] sm:$0xf]  ;;  %v6250_v50 = vld [vmem:[#allocation8 + $0x188] sm:$0xf] }
 0x1b0   :  { %3193 = vmatpush.bf16.msra.mxu3 %v6427_v49  ;;  %3223 = vmatpush.bf16.msrb.mxu1 %v6215_v56  ;;  %v6247_v49 = vor.u32 %v7347_v58, %v6244_v41  ;;  %v6498_v56 = vld [vmem:[#allocation5 + $0x1a0] sm:$0xf]  ;;  %v7629_v6 = vld [vmem:[#allocation5 + $0x40c] sm:$0xf0] }
 0x1b1   :  { %v7625_v22 = vld [vmem:[#allocation5 + $0x3ac] sm:$0xf0] }
 0x1b2   :  { %3850 = vmatpush.bf16.msra.mxu0 %v6531_v33  ;;  %v7391_v33 = vld [vmem:[#allocation8 + $0x2e0] sm:$0xf0] }
 0x1b3   :  { %3182 = vmatpush.bf16.msra.mxu2 %v6295_v1  ;;  %v6499_v1 = vor.u32 %v7605_v38, %v6498_v56  ;;  %v6419_v41 = vor.u32 %v7391_v33, %v6418_v32  ;;  %v6407_v56 = vor.u32 %v7388_v0, %v6406_v36  ;;  %v6274_v38 = vld [vmem:[#allocation8 + $0x1b8] sm:$0xf]  ;;  %v6358_v36 = vld [vmem:[#allocation8 + $0x260] sm:$0xf]  ;;  %v7376_v0 = vld [vmem:[#allocation8 + $0x268] sm:$0xf0] }
 0x1b4   :  { %3194 = vmatpush.bf16.msra.mxu3 %v6415_v12  ;;  %3224 = vmatpush.bf16.msrb.mxu1 %v6203_v2  ;;  %v6322_v12 = vld [vmem:[#allocation8 + $0x218] sm:$0xf]  ;;  %v6675_v2 = vor.u32 %v7649_v45, %v6674_v42  ;;  %v6434_v42 = vld [vmem:[#allocation5 + $0x20] sm:$0xf]  ;;  %v7589_v45 = vld [vmem:[#allocation5 + $0x4c] sm:$0xf0]  ;;  %v6275_v10 = vor.u32 %v7355_v62, %v6274_v38 }
 0x1b5   :  { %v6323_v15 = vor.u32 %v7367_v47, %v6322_v12  ;;  %v7385_v12 = vld [vmem:[#allocation8 + $0x2b0] sm:$0xf0]  ;;  %v7631_v38 = vld [vmem:[#allocation5 + $0x444] sm:$0xf]  ;;  %v6612_v62 = vld [vmem:[#allocation5 + $0x470] sm:$0xf0] }
 0x1b6   :  { %3851 = vmatpush.bf16.msra.mxu0 %v6515_v46  ;;  %v6627_v46 = vor.u32 %v7637_v8, %v6626_v29  ;;  %v7621_v29 = vld [vmem:[#allocation5 + $0x34c] sm:$0xf0] }
 0x1b7   :  { %3183 = vmatpush.bf16.msra.mxu2 %v6283_v3  ;;  %v7371_v3 = vld [vmem:[#allocation8 + $0x244] sm:$0xf] }
 0x1b8   :  { %3195 = vmatpush.bf16.msra.mxu3 %v6403_v44  ;;  %3225 = vmatpush.bf16.msrb.mxu1 %v6191_v19  ;;  %v6340_v44 = vld [vmem:[#allocation8 + $0x24c] sm:$0xf0]  ;;  %v7364_v19 = vld [vmem:[#allocation8 + $0x208] sm:$0xf0] }
 0x1b9   :  { %v6311_v27 = vor.u32 %v7364_v19, %v6310_v16  ;;  %v6382_v16 = vld [vmem:[#allocation8 + $0x290] sm:$0xf] }
 0x1ba   :  { %3852 = vmatpush.bf16.msra.mxu0 %v6499_v1  ;;  %v6394_v1 = vld [vmem:[#allocation8 + $0x2a8] sm:$0xf] }
 0x1bb   :  { %3184 = vmatpush.bf16.msra.mxu2 %v6271_v25  ;;  %v8144_v25 = vpop.f32.mrf.mxu0 }
 0x1bc   :  { %3196 = vmatpush.bf16.msra.mxu3 %v6391_v26  ;;  %3226 = vmatpush.bf16.msrb.mxu1 %v6179_v30  ;;  %v6343_v26 = vor.u32 %v7371_v3, %v6340_v44  ;;  %v6298_v30 = vld [vmem:[#allocation8 + $0x1e8] sm:$0xf]  ;;  %v7352_v44 = vld [vmem:[#allocation8 + $0x1a8] sm:$0xf0] }
 0x1bd   :  { %v6263_v55 = vor.u32 %v7352_v44, %v6262_v14  ;;  %v7627_v14 = vld [vmem:[#allocation5 + $0x3e4] sm:$0xf] }
 0x1be   :  { %3853 = vmatpush.bf16.msra.mxu0 %v6483_v18  ;;  %v7382_v18 = vld [vmem:[#allocation8 + $0x298] sm:$0xf0] }
 0x1bf   :  { %3185 = vmatpush.bf16.msra.mxu2 %v6259_v13  ;;  %v6450_v13 = vld [vmem:[#allocation5 + $0x80] sm:$0xf] }
 0x1c0   :  { %3197 = vmatpush.bf16.msra.mxu3 %v6379_v48  ;;  %3227 = vmatpush.bf16.msrb.mxu1 %v6167_v23  ;;  %v7593_v48 = vld [vmem:[#allocation5 + $0xac] sm:$0xf0]  ;;  %v7358_v23 = vld [vmem:[#allocation8 + $0x1d8] sm:$0xf0] }
 0x1c1   :  { %v6451_v58 = vor.u32 %v7593_v48, %v6450_v13  ;;  %v7679_v13 = vld [vmem:[#allocation5 + $0x8c4] sm:$0xf]  ;;  %v6804_v48 = vld [vmem:[#allocation5 + $0x8f0] sm:$0xf0] }
 0x1c2   :  { %3854 = vmatpush.bf16.msra.mxu0 %v6467_v17  ;;  %v6802_v17 = vld [vmem:[#allocation5 + $0x8c0] sm:$0xf] }
 0x1c3   :  { %3186 = vmatpush.bf16.msra.mxu2 %v6247_v49  ;;  %v6435_v49 = vor.u32 %v7589_v45, %v6434_v42  ;;  %v8151_v53 = vpop.f32.mrf.mxu0  ;;  %v6786_v42 = vld [vmem:[#allocation5 + $0x860] sm:$0xf]  ;;  %v7677_v45 = vld [vmem:[#allocation5 + $0x88c] sm:$0xf0] }
 0x1c4   :  { %3198 = vmatpush.bf16.msra.mxu3 %v6367_v54  ;;  %3228 = vmatpush.bf16.msrb.mxu1 %v6155_v60  ;;  %v2438_v35 = vpop.f32.mrf.mxu1  ;;  %v6287_v54 = vor.u32 %v7358_v23, %v6286_v43  ;;  %v6676_v60 = vld [vmem:[#allocation5 + $0x5f0] sm:$0xf0] }
 0x1c5   :  { %v8149_v31 = vadd.f32 %v2438_v35, %v8141_v34  ;;  %v6611_v34 = vor.u32 %v7633_v40, %v6610_v39  ;;  %v6628_v43 = vld [vmem:[#allocation5 + $0x4d0] sm:$0xf0] }
 0x1c6   :  { %3187 = vmatmul.bf16.vlgmr.msra.gmra.mxu2 %v8131_v63  ;;  %3855 = vmatpush.bf16.msra.mxu0 %v6451_v58  ;;  %v7635_v58 = vld [vmem:[#allocation5 + $0x4a4] sm:$0xf] }
 0x1c7   :  { %3235 = vmatpush.bf16.msrb.mxu2 %v6335_v61  ;;  %3229 = vmatmul.bf16.vlgmr.msrb.gmra.mxu1 %v8115_v37  ;;  %v6299_v37 = vor.u32 %v7361_v24, %v6298_v30  ;;  %v7647_v61 = vld [vmem:[#allocation5 + $0x5c4] sm:$0xf]  ;;  %v7379_v24 = vld [vmem:[#allocation8 + $0x280] sm:$0xf0]  ;;  %v6631_v39 = vor.u32 %v7635_v58, %v6628_v43 }
 0x1c8   :  { %3863 = vmatpush.bf16.msra.mxu1 %v6675_v2  ;;  %3199 = vmatpush.bf16.msra.mxu3 %v6355_v11  ;;  %v6679_v47 = vor.u32 %v7647_v61, %v6676_v60  ;;  %v6594_v2 = vld [vmem:[#allocation5 + $0x3e0] sm:$0xf]  ;;  %v6395_v11 = vor.u32 %v7385_v12, %v6394_v1  ;;  %v6370_v30 = vld [vmem:[#allocation8 + $0x278] sm:$0xf]  ;;  %v6359_v61 = vor.u32 %v7376_v0, %v6358_v36  ;;  %v6346_v60 = vld [vmem:[#allocation8 + $0x248] sm:$0xf] }
 0x1c9   :  { %v6595_v19 = vor.u32 %v7629_v6, %v6594_v2  ;;  %v6787_v1 = vor.u32 %v7677_v45, %v6786_v42  ;;  %v7373_v12 = vld [vmem:[#allocation8 + $0x250] sm:$0xf0]  ;;  %v7615_v2 = vld [vmem:[#allocation5 + $0x2c4] sm:$0xf]  ;;  %v6548_v6 = vld [vmem:[#allocation5 + $0x2f0] sm:$0xf0] }
 0x1ca   :  { %3856 = vmatpush.bf16.msra.mxu0 %v6435_v49  ;;  %v6807_v49 = vor.u32 %v7679_v13, %v6804_v48  ;;  %v7663_v13 = vld [vmem:[#allocation5 + $0x744] sm:$0xf]  ;;  %v6740_v48 = vld [vmem:[#allocation5 + $0x770] sm:$0xf0]  ;;  %v6722_v36 = vld [vmem:[#allocation5 + $0x6e0] sm:$0xf] }
 0x1cb   :  { %3236 = vmatpush.bf16.msrb.mxu2 %v6323_v15  ;;  %v6660_v15 = vld [vmem:[#allocation5 + $0x590] sm:$0xf0]  ;;  %v2482_v8 = vpop.f32.mrf.mxu0  ;;  %v7619_v58 = vld [vmem:[#allocation5 + $0x324] sm:$0xf]  ;;  %v6810_v0 = vld [vmem:[#allocation5 + $0x8c8] sm:$0xf] }
 0x1cc   :  { %3864 = vmatpush.bf16.msra.mxu1 %v6659_v21  ;;  %3200 = vmatpush.bf16.msra.mxu3 %v6343_v26  ;;  %v2440_v3 = vpop.f32.mrf.mxu1  ;;  %v6663_v51 = vor.u32 %v7643_v7, %v6660_v15  ;;  %v6578_v21 = vld [vmem:[#allocation5 + $0x380] sm:$0xf]  ;;  %v6383_v26 = vor.u32 %v7382_v18, %v6382_v16  ;;  %v6596_v15 = vld [vmem:[#allocation5 + $0x410] sm:$0xf0]  ;;  %v7661_v45 = vld [vmem:[#allocation5 + $0x70c] sm:$0xf0] }
 0x1cd   :  { %3857 = vmatmul.bf16.vlgmr.msra.gmra.mxu0 %v8000_v57  ;;  %v8155_v59 = vadd.f32 %v2440_v3, %v8144_v25  ;;  %v6579_v32 = vor.u32 %v7625_v22, %v6578_v21  ;;  %v6562_v25 = vld [vmem:[#allocation5 + $0x320] sm:$0xf]  ;;  %v6347_v3 = vor.u32 %v7373_v12, %v6346_v60  ;;  %v6599_v44 = vor.u32 %v7627_v14, %v6596_v15  ;;  %v7669_v22 = vld [vmem:[#allocation5 + $0x7cc] sm:$0xf0]  ;;  %v7659_v60 = vld [vmem:[#allocation5 + $0x6e4] sm:$0xf] }
 0x1ce   :  { %3905 = vmatpush.bf16.msrb.mxu0 %v6679_v47  ;;  %v7673_v47 = vld [vmem:[#allocation5 + $0x82c] sm:$0xf0]  ;;  %v6754_v21 = vld [vmem:[#allocation5 + $0x7a0] sm:$0xf]  ;;  %v6708_v14 = vld [vmem:[#allocation5 + $0x6b0] sm:$0xf0] }
 0x1cf   :  { %3237 = vmatpush.bf16.msrb.mxu2 %v6311_v27  ;;  %3201 = vmatmul.bf16.vlgmr.msra.gmra.mxu3 %v8137_v4  ;;  %v7639_v27 = vld [vmem:[#allocation5 + $0x504] sm:$0xf]  ;;  %v6778_v15 = vld [vmem:[#allocation5 + $0x808] sm:$0xf] }
 0x1d0   :  { %3249 = vmatpush.bf16.msrb.mxu3 %v6431_v28  ;;  %3865 = vmatpush.bf16.msra.mxu1 %v6643_v52  ;;  %v6644_v28 = vld [vmem:[#allocation5 + $0x530] sm:$0xf0]  ;;  %v7681_v52 = vld [vmem:[#allocation5 + $0x8ec] sm:$0xf0] }
 0x1d1   :  { %v6647_v33 = vor.u32 %v7639_v27, %v6644_v28  ;;  %v6803_v35 = vor.u32 %v7681_v52, %v6802_v17  ;;  %v6756_v27 = vld [vmem:[#allocation5 + $0x7d0] sm:$0xf0]  ;;  %v7623_v28 = vld [vmem:[#allocation5 + $0x384] sm:$0xf]  ;;  %v6755_v17 = vor.u32 %v7669_v22, %v6754_v21  ;;  %v7665_v52 = vld [vmem:[#allocation5 + $0x76c] sm:$0xf0] }
 0x1d2   :  { %3906 = vmatpush.bf16.msrb.mxu0 %v6663_v51  ;;  %v6551_v51 = vor.u32 %v7615_v2, %v6548_v6  ;;  %v7657_v2 = vld [vmem:[#allocation5 + $0x6ac] sm:$0xf0]  ;;  %v7599_v6 = vld [vmem:[#allocation5 + $0x144] sm:$0xf] }
 0x1d3   :  { %3238 = vmatpush.bf16.msrb.mxu2 %v6299_v37  ;;  %v6251_v37 = vor.u32 %v7349_v9, %v6250_v50  ;;  %v2536_v16 = vpop.f32.mrf.mxu0  ;;  %v7667_v9 = vld [vmem:[#allocation5 + $0x7a4] sm:$0xf] }
 0x1d4   :  { %3250 = vmatpush.bf16.msrb.mxu3 %v6419_v41  ;;  %3866 = vmatpush.bf16.msra.mxu1 %v6627_v46  ;;  %v6371_v41 = vor.u32 %v7379_v24, %v6370_v30  ;;  %v2494_v23 = vpop.f32.mrf.mxu1  ;;  %v6563_v46 = vor.u32 %v7621_v29, %v6562_v25  ;;  %v6580_v30 = vld [vmem:[#allocation5 + $0x3b0] sm:$0xf0]  ;;  %v7607_v25 = vld [vmem:[#allocation5 + $0x204] sm:$0xf] }
 0x1d5   :  { %v8158_v40 = vadd.f32 %v2494_v23, %v8151_v53  ;;  %v6615_v53 = vor.u32 %v7631_v38, %v6612_v62  ;;  %v6583_v24 = vor.u32 %v7623_v28, %v6580_v30  ;;  %v6516_v29 = vld [vmem:[#allocation5 + $0x230] sm:$0xf0] }
 0x1d6   :  { %3907 = vmatpush.bf16.msrb.mxu0 %v6647_v33  ;;  %v6738_v33 = vld [vmem:[#allocation5 + $0x740] sm:$0xf]  ;;  %v6724_v62 = vld [vmem:[#allocation5 + $0x710] sm:$0xf0] }
 0x1d7   :  { %3239 = vmatpush.bf16.msrb.mxu2 %v6287_v54  ;;  %v7675_v54 = vld [vmem:[#allocation5 + $0x864] sm:$0xf]  ;;  %v6739_v23 = vor.u32 %v7665_v52, %v6738_v33  ;;  %v6692_v33 = vld [vmem:[#allocation5 + $0x650] sm:$0xf0] }
 0x1d8   :  { %3251 = vmatpush.bf16.msrb.mxu3 %v6407_v56  ;;  %3867 = vmatpush.bf16.msra.mxu1 %v6611_v34  ;;  %v6788_v56 = vld [vmem:[#allocation5 + $0x890] sm:$0xf0]  ;;  %v6770_v34 = vld [vmem:[#allocation5 + $0x800] sm:$0xf] }
 0x1d9   :  { %v6791_v7 = vor.u32 %v7675_v54, %v6788_v56  ;;  %v6500_v54 = vld [vmem:[#allocation5 + $0x1d0] sm:$0xf0] }
 0x1da   :  { %3908 = vmatpush.bf16.msrb.mxu0 %v6631_v39 }
 0x1db   :  { %3240 = vmatpush.bf16.msrb.mxu2 %v6275_v10  ;;  %v7671_v10 = vld [vmem:[#allocation5 + $0x804] sm:$0xf]  ;;  %v2538_v38 = vpop.f32.mrf.mxu0 }
 0x1dc   :  { %3252 = vmatpush.bf16.msrb.mxu3 %v6395_v11  ;;  %3868 = vmatpush.bf16.msra.mxu1 %v6595_v19  ;;  %v6772_v11 = vld [vmem:[#allocation5 + $0x830] sm:$0xf0]  ;;  %v2496_v18 = vpop.f32.mrf.mxu1  ;;  %v6771_v19 = vor.u32 %v7673_v47, %v6770_v34  ;;  %v6706_v34 = vld [vmem:[#allocation5 + $0x680] sm:$0xf]  ;;  %v6794_v47 = vld [vmem:[#allocation5 + $0x868] sm:$0xf] }
 0x1dd   :  { %v8162_v50 = vadd.f32 %v2496_v18, %v2482_v8  ;;  %v6759_v8 = vor.u32 %v7667_v9, %v6756_v27  ;;  %v6690_v18 = vld [vmem:[#allocation5 + $0x620] sm:$0xf] }
 0x1de   :  { %3909 = vmatpush.bf16.msrb.mxu0 %v6615_v53  ;;  %v7678_v53 = vld [vmem:[#allocation5 + $0x894] sm:$0xf0] }
 0x1df   :  { %3241 = vmatpush.bf16.msrb.mxu2 %v6263_v55  ;;  %v7611_v55 = vld [vmem:[#allocation5 + $0x264] sm:$0xf] }
 0x1e0   :  { %3253 = vmatpush.bf16.msrb.mxu3 %v6383_v26  ;;  %3869 = vmatpush.bf16.msra.mxu1 %v6579_v32  ;;  %v6775_v26 = vor.u32 %v7671_v10, %v6772_v11  ;;  %v6727_v10 = vor.u32 %v7659_v60, %v6724_v62  ;;  %v6795_v11 = vor.u32 %v7678_v53, %v6794_v47  ;;  %v6522_v60 = vld [vmem:[#allocation5 + $0x208] sm:$0xf]  ;;  %v7610_v62 = vld [vmem:[#allocation5 + $0x234] sm:$0xf0]  ;;  %v7612_v53 = vld [vmem:[#allocation5 + $0x26c] sm:$0xf] }
 0x1e1   :  { %v7650_v47 = vld [vmem:[#allocation5 + $0x5f4] sm:$0xf0] }
 0x1e2   :  { %3910 = vmatpush.bf16.msrb.mxu0 %v6599_v44  ;;  %v6707_v44 = vor.u32 %v7657_v2, %v6706_v34  ;;  %v6540_v2 = vld [vmem:[#allocation5 + $0x298] sm:$0xf0] }
 0x1e3   :  { %3242 = vmatpush.bf16.msrb.mxu2 %v6251_v37  ;;  %v6564_v37 = vld [vmem:[#allocation5 + $0x350] sm:$0xf0] }
 0x1e4   :  { %3254 = vmatpush.bf16.msrb.mxu3 %v6371_v41  ;;  %3870 = vmatpush.bf16.msra.mxu1 %v6563_v46  ;;  %v6567_v41 = vor.u32 %v7619_v58, %v6564_v37  ;;  %v2550_v43 = vpop.f32.mrf.mxu1  ;;  %v7682_v46 = vld [vmem:[#allocation5 + $0x8f4] sm:$0xf0]  ;;  %v7591_v58 = vld [vmem:[#allocation5 + $0x84] sm:$0xf]  ;;  %v6452_v37 = vld [vmem:[#allocation5 + $0xb0] sm:$0xf0] }
 0x1e5   :  { %v8165_v39 = vadd.f32 %v2550_v43, %v2536_v16  ;;  %v6811_v56 = vor.u32 %v7682_v46, %v6810_v0  ;;  %v6556_v0 = vld [vmem:[#allocation5 + $0x2f8] sm:$0xf0] }
 0x1e6   :  { %3243 = vmatmul.bf16.vlgmr.msrb.gmra.mxu2 %v8131_v63  ;;  %v6532_v63 = vld [vmem:[#allocation5 + $0x290] sm:$0xf0]  ;;  %3911 = vmatpush.bf16.msrb.mxu0 %v6583_v24 }
 0x1e7   :  { %3877 = vmatpush.bf16.msra.mxu2 %v6803_v35  ;;  %3871 = vmatmul.bf16.vlgmr.msra.gmra.mxu1 %v8003_v5  ;;  %v6535_v32 = vor.u32 %v7611_v55, %v6532_v63  ;;  %v6519_v35 = vor.u32 %v7607_v25, %v6516_v29  ;;  %v7595_v55 = vld [vmem:[#allocation5 + $0xe4] sm:$0xf]  ;;  %v6468_v63 = vld [vmem:[#allocation5 + $0x110] sm:$0xf0] }
 0x1e8   :  { %3919 = vmatpush.bf16.msrb.mxu1 %v6807_v49  ;;  %3255 = vmatpush.bf16.msrb.mxu3 %v6359_v61  ;;  %v7603_v49 = vld [vmem:[#allocation5 + $0x1a4] sm:$0xf]  ;;  %v6471_v29 = vor.u32 %v7595_v55, %v6468_v63  ;;  %v6524_v55 = vld [vmem:[#allocation5 + $0x238] sm:$0xf0] }
 0x1e9   :  { %v2452_v42 = vpop.f32.mrf.mxu2  ;;  %v6503_v12 = vor.u32 %v7603_v49, %v6500_v54  ;;  %v6455_v49 = vor.u32 %v7591_v58, %v6452_v37  ;;  %v7587_v54 = vld [vmem:[#allocation5 + $0x24] sm:$0xf]  ;;  %v6698_v37 = vld [vmem:[#allocation5 + $0x628] sm:$0xf] }
 0x1ea   :  { %v2453_v61 = vadd.f32 %v2452_v42, %v8149_v31  ;;  %3912 = vmatpush.bf16.msrb.mxu0 %v6567_v41  ;;  %v7655_v31 = vld [vmem:[#allocation5 + $0x684] sm:$0xf]  ;;  %v3104_v28 = vpop.f32.mrf.mxu0  ;;  %v6538_v41 = vld [vmem:[#allocation5 + $0x268] sm:$0xf] }
 0x1eb   :  { %3878 = vmatpush.bf16.msra.mxu2 %v6787_v1  ;;  %v6723_v1 = vor.u32 %v7661_v45, %v6722_v36  ;;  %v6711_v9 = vor.u32 %v7655_v31, %v6708_v14  ;;  %v7616_v36 = vld [vmem:[#allocation5 + $0x2cc] sm:$0xf]  ;;  %v6746_v42 = vld [vmem:[#allocation5 + $0x748] sm:$0xf]  ;;  %v7666_v45 = vld [vmem:[#allocation5 + $0x774] sm:$0xf0] }
 0x1ec   :  { %3920 = vmatpush.bf16.msrb.mxu1 %v6791_v7  ;;  %3256 = vmatpush.bf16.msrb.mxu3 %v6347_v3  ;;  %v6484_v7 = vld [vmem:[#allocation5 + $0x170] sm:$0xf0]  ;;  %v2552_v3 = vpop.f32.mrf.mxu1  ;;  %v6559_v46 = vor.u32 %v7616_v36, %v6556_v0  ;;  %v7662_v14 = vld [vmem:[#allocation5 + $0x714] sm:$0xf0]  ;;  %v6474_v0 = vld [vmem:[#allocation5 + $0xe8] sm:$0xf] }
 0x1ed   :  { %3913 = vmatmul.bf16.vlgmr.msrb.gmra.mxu0 %v8003_v5  ;;  %v6487_v16 = vor.u32 %v7599_v6, %v6484_v7  ;;  %v8169_v21 = vadd.f32 %v2552_v3, %v2538_v38  ;;  %v6543_v7 = vor.u32 %v7612_v53, %v6540_v2  ;;  %v7634_v53 = vld [vmem:[#allocation5 + $0x474] sm:$0xf0]  ;;  %v7596_v2 = vld [vmem:[#allocation5 + $0xec] sm:$0xf] }
 0x1ee   :  { %3961 = vmatpush.bf16.msra.mxu0 %v6811_v56  ;;  %v6747_v56 = vor.u32 %v7666_v45, %v6746_v42  ;;  %v7638_v45 = vld [vmem:[#allocation5 + $0x4d4] sm:$0xf0] }
 0x1ef   :  { %3879 = vmatpush.bf16.msra.mxu2 %v6771_v19  ;;  %3257 = vmatmul.bf16.vlgmr.msrb.gmra.mxu3 %v8137_v4  ;;  %v6743_v4 = vor.u32 %v7663_v13, %v6740_v48  ;;  %v7653_v19 = vld [vmem:[#allocation5 + $0x64c] sm:$0xf0]  ;;  %v7670_v13 = vld [vmem:[#allocation5 + $0x7d4] sm:$0xf0] }
 0x1f0   :  { %3891 = vmatpush.bf16.msra.mxu3 %v6551_v51  ;;  %3921 = vmatpush.bf16.msrb.mxu1 %v6775_v26  ;;  %v7674_v51 = vld [vmem:[#allocation5 + $0x834] sm:$0xf0]  ;;  %v6554_v26 = vld [vmem:[#allocation5 + $0x2c8] sm:$0xf]  ;;  %v6691_v25 = vor.u32 %v7653_v19, %v6690_v18 }
 0x1f1   :  { %v2454_v22 = vpop.f32.mrf.mxu2  ;;  %v6779_v27 = vor.u32 %v7674_v51, %v6778_v15  ;;  %v6523_v15 = vor.u32 %v7610_v62, %v6522_v60  ;;  %v7646_v51 = vld [vmem:[#allocation5 + $0x594] sm:$0xf0]  ;;  %v6458_v62 = vld [vmem:[#allocation5 + $0x88] sm:$0xf] }
 0x1f2   :  { %3962 = vmatpush.bf16.msra.mxu0 %v6795_v11  ;;  %v2455_v30 = vadd.f32 %v2454_v22, %v8155_v59  ;;  %v2466_v24 = vpop.f32.mrf.mxu3  ;;  %v3106_v11 = vpop.f32.mrf.mxu0  ;;  %v7608_v22 = vld [vmem:[#allocation5 + $0x20c] sm:$0xf] }
 0x1f3   :  { %3880 = vmatpush.bf16.msra.mxu2 %v6755_v17  ;;  %v7618_v17 = vld [vmem:[#allocation5 + $0x2f4] sm:$0xf0]  ;;  %v2467_v52 = vadd.f32 %v2466_v24, %v2453_v61  ;;  %v6527_v63 = vor.u32 %v7608_v22, %v6524_v55  ;;  %v6684_v22 = vld [vmem:[#allocation5 + $0x5f8] sm:$0xf0] }
 0x1f4   :  { %3892 = vmatpush.bf16.msra.mxu3 %v6535_v32  ;;  %3922 = vmatpush.bf16.msrb.mxu1 %v6759_v8  ;;  %v7651_v32 = vld [vmem:[#allocation5 + $0x624] sm:$0xf]  ;;  %v6762_v8 = vld [vmem:[#allocation5 + $0x7a8] sm:$0xf]  ;;  %v6555_v48 = vor.u32 %v7618_v17, %v6554_v26 }
 0x1f5   :  { %v8172_v43 = vadd.f32 %v3104_v28, %v2467_v52  ;;  %v6695_v59 = vor.u32 %v7651_v32, %v6692_v33  ;;  %v6714_v26 = vld [vmem:[#allocation5 + $0x688] sm:$0xf]  ;;  %v7602_v32 = vld [vmem:[#allocation5 + $0x174] sm:$0xf0] }
 0x1f6   :  { %3963 = vmatpush.bf16.msra.mxu0 %v6779_v27  ;;  %v6490_v17 = vld [vmem:[#allocation5 + $0x148] sm:$0xf] }
 0x1f7   :  { %3881 = vmatpush.bf16.msra.mxu2 %v6739_v23  ;;  %v6763_v23 = vor.u32 %v7670_v13, %v6762_v8  ;;  %v6650_v33 = vld [vmem:[#allocation5 + $0x508] sm:$0xf]  ;;  %v7604_v8 = vld [vmem:[#allocation5 + $0x1ac] sm:$0xf]  ;;  %v6508_v13 = vld [vmem:[#allocation5 + $0x1d8] sm:$0xf0] }
 0x1f8   :  { %3893 = vmatpush.bf16.msra.mxu3 %v6519_v35  ;;  %3923 = vmatpush.bf16.msrb.mxu1 %v6743_v4  ;;  %v7614_v35 = vld [vmem:[#allocation5 + $0x294] sm:$0xf0]  ;;  %v6436_v4 = vld [vmem:[#allocation5 + $0x50] sm:$0xf0]  ;;  %v6511_v58 = vor.u32 %v7604_v8, %v6508_v13  ;;  %v6668_v8 = vld [vmem:[#allocation5 + $0x598] sm:$0xf0] }
 0x1f9   :  { %v2508_v38 = vpop.f32.mrf.mxu2  ;;  %v6539_v61 = vor.u32 %v7614_v35, %v6538_v41  ;;  %v6439_v31 = vor.u32 %v7587_v54, %v6436_v4  ;;  %v7654_v41 = vld [vmem:[#allocation5 + $0x654] sm:$0xf0]  ;;  %v6491_v35 = vor.u32 %v7602_v32, %v6490_v17  ;;  %v6492_v54 = vld [vmem:[#allocation5 + $0x178] sm:$0xf0] }
 0x1fa   :  { %3964 = vmatpush.bf16.msra.mxu0 %v6763_v23  ;;  %v2509_v34 = vadd.f32 %v2508_v38, %v8158_v40  ;;  %v6506_v40 = vld [vmem:[#allocation5 + $0x1a8] sm:$0xf]  ;;  %v7626_v32 = vld [vmem:[#allocation5 + $0x3b4] sm:$0xf0] }
 0x1fb   :  { %3882 = vmatpush.bf16.msra.mxu2 %v6723_v1  ;;  %v6682_v1 = vld [vmem:[#allocation5 + $0x5c8] sm:$0xf] }
 0x1fc   :  { %3894 = vmatpush.bf16.msra.mxu3 %v6503_v12  ;;  %3924 = vmatpush.bf16.msrb.mxu1 %v6727_v10  ;;  %v2468_v12 = vpop.f32.mrf.mxu3  ;;  %v6730_v10 = vld [vmem:[#allocation5 + $0x6e8] sm:$0xf]  ;;  %v6683_v3 = vor.u32 %v7650_v47, %v6682_v1  ;;  %v7594_v1 = vld [vmem:[#allocation5 + $0xb4] sm:$0xf0] }
 0x1fd   :  { %v2469_v6 = vadd.f32 %v2468_v12, %v2455_v30  ;;  %v6731_v19 = vor.u32 %v7662_v14, %v6730_v10  ;;  %v6618_v12 = vld [vmem:[#allocation5 + $0x448] sm:$0xf] }
 0x1fe   :  { %3965 = vmatpush.bf16.msra.mxu0 %v6747_v56  ;;  %v6619_v14 = vor.u32 %v7634_v53, %v6618_v12  ;;  %v6780_v12 = vld [vmem:[#allocation5 + $0x838] sm:$0xf0]  ;;  %v7628_v53 = vld [vmem:[#allocation5 + $0x3ec] sm:$0xf] }
 0x1ff   :  { %3883 = vmatpush.bf16.msra.mxu2 %v6707_v44  ;;  %v7606_v44 = vld [vmem:[#allocation5 + $0x1d4] sm:$0xf0]  ;;  %v8177_v18 = vadd.f32 %v3106_v11, %v2469_v6  ;;  %v6476_v6 = vld [vmem:[#allocation5 + $0x118] sm:$0xf0] }
 0x200   :  { %3895 = vmatpush.bf16.msra.mxu3 %v6487_v16  ;;  %3925 = vmatpush.bf16.msrb.mxu1 %v6711_v9  ;;  %v6666_v16 = vld [vmem:[#allocation5 + $0x568] sm:$0xf]  ;;  %v7658_v9 = vld [vmem:[#allocation5 + $0x6b4] sm:$0xf0]  ;;  %v6507_v30 = vor.u32 %v7606_v44, %v6506_v40  ;;  %v6479_v10 = vor.u32 %v7596_v2, %v6476_v6  ;;  %v6604_v6 = vld [vmem:[#allocation5 + $0x418] sm:$0xf0] }
 0x201   :  { %v6715_v27 = vor.u32 %v7658_v9, %v6714_v26  ;;  %v2510_v28 = vpop.f32.mrf.mxu2  ;;  %v6667_v24 = vor.u32 %v7646_v51, %v6666_v16  ;;  %v6602_v40 = vld [vmem:[#allocation5 + $0x3e8] sm:$0xf]  ;;  %v7592_v16 = vld [vmem:[#allocation5 + $0x8c] sm:$0xf] }
 0x202   :  { %3966 = vmatpush.bf16.msra.mxu0 %v6731_v19  ;;  %v2511_v52 = vadd.f32 %v2510_v28, %v8162_v50  ;;  %v7598_v50 = vld [vmem:[#allocation5 + $0x114] sm:$0xf0]  ;;  %v6460_v19 = vld [vmem:[#allocation5 + $0xb8] sm:$0xf0]  ;;  %v7648_v51 = vld [vmem:[#allocation5 + $0x5cc] sm:$0xf] }
 0x203   :  { %3884 = vmatpush.bf16.msra.mxu2 %v6691_v25  ;;  %v6463_v55 = vor.u32 %v7592_v16, %v6460_v19  ;;  %v6586_v28 = vld [vmem:[#allocation5 + $0x388] sm:$0xf]  ;;  %v6687_v17 = vor.u32 %v7648_v51, %v6684_v22 }
 0x204   :  { %3896 = vmatpush.bf16.msra.mxu3 %v6471_v29  ;;  %3926 = vmatpush.bf16.msrb.mxu1 %v6695_v59  ;;  %v2522_v25 = vpop.f32.mrf.mxu3  ;;  %v7642_v29 = vld [vmem:[#allocation5 + $0x534] sm:$0xf0]  ;;  %v6699_v59 = vor.u32 %v7654_v41, %v6698_v37  ;;  %v3118_v23 = vpop.f32.mrf.mxu1  ;;  %v6570_v37 = vld [vmem:[#allocation5 + $0x328] sm:$0xf] }
 0x205   :  { %v6651_v36 = vor.u32 %v7642_v29, %v6650_v33  ;;  %v8182_v42 = vadd.f32 %v3118_v23, %v8172_v43  ;;  %v7588_v33 = vld [vmem:[#allocation5 + $0x2c] sm:$0xf]  ;;  %v7622_v41 = vld [vmem:[#allocation5 + $0x354] sm:$0xf0] }
 0x206   :  { %3885 = vmatmul.bf16.vlgmr.msra.gmra.mxu2 %v8007_v20  ;;  %3967 = vmatpush.bf16.msra.mxu0 %v6715_v27  ;;  %v7644_v29 = vld [vmem:[#allocation5 + $0x56c] sm:$0xf] }
 0x207   :  { %3933 = vmatpush.bf16.msrb.mxu2 %v6555_v48  ;;  %3927 = vmatmul.bf16.vlgmr.msrb.gmra.mxu1 %v8007_v20  ;;  %v2523_v48 = vadd.f32 %v2522_v25, %v2509_v34  ;;  %v7680_v23 = vld [vmem:[#allocation5 + $0x8cc] sm:$0xf] }
 0x208   :  { %3975 = vmatpush.bf16.msra.mxu1 %v6559_v46  ;;  %3897 = vmatpush.bf16.msra.mxu3 %v6455_v49  ;;  %v6634_v46 = vld [vmem:[#allocation5 + $0x4a8] sm:$0xf]  ;;  %v7600_v49 = vld [vmem:[#allocation5 + $0x14c] sm:$0xf] }
 0x209   :  { %v6495_v4 = vor.u32 %v7600_v49, %v6492_v54  ;;  %v2564_v38 = vpop.f32.mrf.mxu2  ;;  %v6635_v60 = vor.u32 %v7638_v45, %v6634_v46  ;;  %v7636_v45 = vld [vmem:[#allocation5 + $0x4ac] sm:$0xf]  ;;  %v6636_v54 = vld [vmem:[#allocation5 + $0x4d8] sm:$0xf0] }
 0x20a   :  { %3968 = vmatpush.bf16.msra.mxu0 %v6699_v59  ;;  %v3160_v56 = vpop.f32.mrf.mxu0  ;;  %v2565_v43 = vadd.f32 %v2564_v38, %v8165_v39  ;;  %v7630_v39 = vld [vmem:[#allocation5 + $0x414] sm:$0xf0]  ;;  %v7640_v59 = vld [vmem:[#allocation5 + $0x50c] sm:$0xf]  ;;  %v6639_v38 = vor.u32 %v7636_v45, %v6636_v54 }
 0x20b   :  { %3934 = vmatpush.bf16.msrb.mxu2 %v6539_v61  ;;  %v6475_v61 = vor.u32 %v7598_v50, %v6474_v0  ;;  %v8184_v34 = vadd.f32 %v3160_v56, %v2523_v48  ;;  %v6603_v27 = vor.u32 %v7630_v39, %v6602_v40  ;;  %v6587_v48 = vor.u32 %v7626_v32, %v6586_v28  ;;  %v6796_v56 = vld [vmem:[#allocation5 + $0x898] sm:$0xf0]  ;;  %v7664_v40 = vld [vmem:[#allocation5 + $0x74c] sm:$0xf] }
 0x20c   :  { %3976 = vmatpush.bf16.msra.mxu1 %v6543_v7  ;;  %3898 = vmatpush.bf16.msra.mxu3 %v6439_v31  ;;  %v2524_v47 = vpop.f32.mrf.mxu3  ;;  %v3120_v11 = vpop.f32.mrf.mxu1  ;;  %v6459_v31 = vor.u32 %v7594_v1, %v6458_v62  ;;  %v6620_v62 = vld [vmem:[#allocation5 + $0x478] sm:$0xf0]  ;;  %v7672_v1 = vld [vmem:[#allocation5 + $0x80c] sm:$0xf] }
 0x20d   :  { %3969 = vmatmul.bf16.vlgmr.msra.gmra.mxu0 %v8007_v20  ;;  %v2525_v7 = vadd.f32 %v2524_v47, %v2511_v52  ;;  %v8189_v44 = vadd.f32 %v3120_v11, %v8177_v18  ;;  %v6444_v52 = vld [vmem:[#allocation5 + $0x58] sm:$0xf0]  ;;  %v6607_v11 = vor.u32 %v7628_v53, %v6604_v6  ;;  %v7656_v32 = vld [vmem:[#allocation5 + $0x68c] sm:$0xf] }
 0x20e   :  { %v6447_v13 = vor.u32 %v7588_v33, %v6444_v52  ;;  %v6748_v39 = vld [vmem:[#allocation5 + $0x778] sm:$0xf0] }
 0x20f   :  { %3935 = vmatpush.bf16.msrb.mxu2 %v6523_v15  ;;  %3899 = vmatmul.bf16.vlgmr.msra.gmra.mxu3 %v8000_v57  ;;  %v6442_v15 = vld [vmem:[#allocation5 + $0x28] sm:$0xf]  ;;  %v6732_v28 = vld [vmem:[#allocation5 + $0x718] sm:$0xf0] }
 0x210   :  { %3947 = vmatpush.bf16.msrb.mxu3 %v6683_v3  ;;  %3977 = vmatpush.bf16.msra.mxu1 %v6527_v63  ;;  %v7590_v3 = vld [vmem:[#allocation5 + $0x54] sm:$0xf0]  ;;  %v6716_v33 = vld [vmem:[#allocation5 + $0x6b8] sm:$0xf0] }
 0x211   :  { %v2566_v26 = vpop.f32.mrf.mxu2  ;;  %v6443_v9 = vor.u32 %v7590_v3, %v6442_v15  ;;  %v6588_v3 = vld [vmem:[#allocation5 + $0x3b8] sm:$0xf0] }
 0x212   :  { %v3162_v63 = vpop.f32.mrf.mxu0 }
 0x213   :  { %3936 = vmatpush.bf16.msrb.mxu2 %v6507_v30  ;;  %v8191_v30 = vadd.f32 %v3162_v63, %v2525_v7  ;;  %v7668_v7 = vld [vmem:[#allocation5 + $0x7ac] sm:$0xf] }
 0x214   :  { %3948 = vmatpush.bf16.msrb.mxu3 %v6667_v24  ;;  %3978 = vmatpush.bf16.msra.mxu1 %v6511_v58  ;;  %v2567_v24 = vadd.f32 %v2566_v26, %v8169_v21  ;;  %v2578_v18 = vpop.f32.mrf.mxu3  ;;  %v6671_v58 = vor.u32 %v7644_v29, %v6668_v8  ;;  %v6652_v21 = vld [vmem:[#allocation5 + $0x538] sm:$0xf0]  ;;  %v7620_v63 = vld [vmem:[#allocation5 + $0x32c] sm:$0xf] }
 0x215   :  { %v2579_v25 = vadd.f32 %v2578_v18, %v2565_v43  ;;  %v6655_v50 = vor.u32 %v7640_v59, %v6652_v21  ;;  %v6783_v43 = vor.u32 %v7672_v1, %v6780_v12  ;;  %v6890_v59 = vld [vmem:[#allocation8 + $0x690] sm:$0xf]  ;;  %v7702_v21 = vld [vmem:[#allocation8 + $0x698] sm:$0xf0] }
 0x216   :  { %v6986_v1 = vld [vmem:[#allocation8 + $0x750] sm:$0xf] }
 0x217   :  { %3937 = vmatpush.bf16.msrb.mxu2 %v6491_v35  ;;  %v6812_v35 = vld [vmem:[#allocation5 + $0x8f8] sm:$0xf0] }
 0x218   :  { %3949 = vmatpush.bf16.msrb.mxu3 %v6651_v36  ;;  %3979 = vmatpush.bf16.msra.mxu1 %v6495_v4  ;;  %v6571_v36 = vor.u32 %v7622_v41, %v6570_v37  ;;  %v6815_v46 = vor.u32 %v7680_v23, %v6812_v35  ;;  %v7676_v4 = vld [vmem:[#allocation5 + $0x86c] sm:$0xf]  ;;  %v6700_v37 = vld [vmem:[#allocation5 + $0x658] sm:$0xf0]  ;;  %v6878_v35 = vld [vmem:[#allocation8 + $0x678] sm:$0xf] }
 0x21b   :  { %3938 = vmatpush.bf16.msrb.mxu2 %v6475_v61  ;;  %v6799_v61 = vor.u32 %v7676_v4, %v6796_v56  ;;  %v6866_v4 = vld [vmem:[#allocation8 + $0x660] sm:$0xf]  ;;  %v7696_v56 = vld [vmem:[#allocation8 + $0x668] sm:$0xf0] }
 0x21c   :  { %3950 = vmatpush.bf16.msrb.mxu3 %v6635_v60  ;;  %3980 = vmatpush.bf16.msra.mxu1 %v6479_v10  ;;  %v2580_v0 = vpop.f32.mrf.mxu3  ;;  %v7632_v60 = vld [vmem:[#allocation5 + $0x44c] sm:$0xf]  ;;  %v6764_v10 = vld [vmem:[#allocation5 + $0x7d8] sm:$0xf0] }
 0x21d   :  { %v2581_v49 = vadd.f32 %v2580_v0, %v2567_v24  ;;  %v6623_v47 = vor.u32 %v7632_v60, %v6620_v62  ;;  %v6854_v60 = vld [vmem:[#allocation8 + $0x648] sm:$0xf]  ;;  %v7693_v62 = vld [vmem:[#allocation8 + $0x650] sm:$0xf0] }
 0x21e   :  { %v6855_v12 = vor.u32 %v7693_v62, %v6854_v60  ;;  %v7082_v60 = vld [vmem:[#allocation8 + $0x810] sm:$0xf]  ;;  %v7750_v62 = vld [vmem:[#allocation8 + $0x818] sm:$0xf0] }
 0x21f   :  { %3939 = vmatpush.bf16.msrb.mxu2 %v6459_v31  ;;  %v6767_v31 = vor.u32 %v7668_v7, %v6764_v10  ;;  %v6974_v7 = vld [vmem:[#allocation8 + $0x738] sm:$0xf]  ;;  %v7723_v10 = vld [vmem:[#allocation8 + $0x740] sm:$0xf0] }
 0x220   :  { %3951 = vmatpush.bf16.msrb.mxu3 %v6619_v14  ;;  %3981 = vmatpush.bf16.msra.mxu1 %v6463_v55  ;;  %v7624_v14 = vld [vmem:[#allocation5 + $0x38c] sm:$0xf]  ;;  %v6751_v55 = vor.u32 %v7664_v40, %v6748_v39  ;;  %v7687_v40 = vld [vmem:[#allocation8 + $0x620] sm:$0xf0] }
 0x221   :  { %v6591_v22 = vor.u32 %v7624_v14, %v6588_v3  ;;  %v6830_v3 = vld [vmem:[#allocation8 + $0x618] sm:$0xf]  ;;  %v6962_v39 = vld [vmem:[#allocation8 + $0x720] sm:$0xf] }
 0x223   :  { %3940 = vmatpush.bf16.msrb.mxu2 %v6443_v9  ;;  %v6572_v9 = vld [vmem:[#allocation5 + $0x358] sm:$0xf0] }
 0x224   :  { %3952 = vmatpush.bf16.msrb.mxu3 %v6603_v27  ;;  %3982 = vmatpush.bf16.msra.mxu1 %v6447_v13  ;;  %v7660_v27 = vld [vmem:[#allocation5 + $0x6ec] sm:$0xf]  ;;  %v6575_v24 = vor.u32 %v7620_v63, %v6572_v9  ;;  %v6902_v13 = vld [vmem:[#allocation8 + $0x6a8] sm:$0xf]  ;;  %v7717_v9 = vld [vmem:[#allocation8 + $0x710] sm:$0xf0] }
 0x225   :  { %v6735_v18 = vor.u32 %v7660_v27, %v6732_v28 }
 0x226   :  { %3941 = vmatmul.bf16.vlgmr.msrb.gmra.mxu2 %v8000_v57 }
 0x227   :  { %3989 = vmatpush.bf16.msra.mxu2 %v6687_v17  ;;  %3983 = vmatmul.bf16.vlgmr.msra.gmra.mxu1 %v8000_v57  ;;  %v3174_v57 = vpop.f32.mrf.mxu1 }
 0x228   :  { %3953 = vmatpush.bf16.msrb.mxu3 %v6587_v48  ;;  %v8198_v2 = vadd.f32 %v3174_v57, %v8184_v34  ;;  %v7705_v48 = vld [vmem:[#allocation8 + $0x6b0] sm:$0xf0]  ;;  %v7726_v57 = vld [vmem:[#allocation8 + $0x758] sm:$0xf0] }
 0x229   :  { %v3132_v15 = vpop.f32.mrf.mxu2  ;;  %v6903_v41 = vor.u32 %v7705_v48, %v6902_v13  ;;  %v6987_v6 = vor.u32 %v7726_v57, %v6986_v1  ;;  %v6926_v13 = vld [vmem:[#allocation8 + $0x6d8] sm:$0xf]  ;;  %v7083_v1 = vor.u32 %v7750_v62, %v7082_v60  ;;  %v7777_v60 = vld [vmem:[#allocation8 + $0x8f0] sm:$0xf0] }
 0x22a   :  { %v3133_v16 = vadd.f32 %v3132_v15, %v8182_v42  ;;  %v3216_v19 = vpop.f32.mrf.mxu0  ;;  %v6856_v57 = vld [vmem:[#allocation8 + $0x654] sm:$0xf0] }
 0x22b   :  { %3990 = vmatpush.bf16.msra.mxu2 %v6671_v58  ;;  %v3217_v51 = vadd.f32 %v3216_v19, %v2579_v25  ;;  %v7652_v58 = vld [vmem:[#allocation5 + $0x62c] sm:$0xf]  ;;  %4669 = vmatpush.bf16.msrb.mxu0 %v6903_v41  ;;  %v7720_v19 = vld [vmem:[#allocation8 + $0x728] sm:$0xf0] }
 0x22c   :  { %3954 = vmatpush.bf16.msrb.mxu3 %v6571_v36  ;;  %v6703_v23 = vor.u32 %v7652_v58, %v6700_v37  ;;  %v7699_v36 = vld [vmem:[#allocation8 + $0x680] sm:$0xf0]  ;;  %v6963_v63 = vor.u32 %v7720_v19, %v6962_v39  ;;  %v7698_v37 = vld [vmem:[#allocation8 + $0x67c] sm:$0xf]  ;;  %v6976_v39 = vld [vmem:[#allocation8 + $0x744] sm:$0xf0] }
 0x22d   :  { %v6879_v54 = vor.u32 %v7699_v36, %v6878_v35  ;;  %v7711_v58 = vld [vmem:[#allocation8 + $0x6e0] sm:$0xf0] }
 0x22f   :  { %3991 = vmatpush.bf16.msra.mxu2 %v6655_v50  ;;  %3955 = vmatmul.bf16.vlgmr.msrb.gmra.mxu3 %v8003_v5  ;;  %v3176_v34 = vpop.f32.mrf.mxu1  ;;  %v6998_v50 = vld [vmem:[#allocation8 + $0x768] sm:$0xf] }
 0x230   :  { %4003 = vmatpush.bf16.msra.mxu3 %v6815_v46  ;;  %v8202_v26 = vadd.f32 %v3176_v34, %v8191_v30  ;;  %v6719_v30 = vor.u32 %v7656_v32, %v6716_v33  ;;  %v7729_v46 = vld [vmem:[#allocation8 + $0x770] sm:$0xf0]  ;;  %v7684_v34 = vld [vmem:[#allocation8 + $0x608] sm:$0xf0]  ;;  %v6938_v33 = vld [vmem:[#allocation8 + $0x6f0] sm:$0xf] }
 0x231   :  { %v3134_v17 = vpop.f32.mrf.mxu2 }
 0x232   :  { %v3146_v42 = vpop.f32.mrf.mxu3  ;;  %v3135_v52 = vadd.f32 %v3134_v17, %v8189_v44  ;;  %v3218_v29 = vpop.f32.mrf.mxu0  ;;  %v6891_v44 = vor.u32 %v7702_v21, %v6890_v59  ;;  %v7704_v17 = vld [vmem:[#allocation8 + $0x6ac] sm:$0xf]  ;;  %v6880_v59 = vld [vmem:[#allocation8 + $0x684] sm:$0xf0] }
 0x233   :  { %3992 = vmatpush.bf16.msra.mxu2 %v6639_v38  ;;  %v8205_v25 = vadd.f32 %v3146_v42, %v3133_v16  ;;  %v3219_v8 = vadd.f32 %v3218_v29, %v2581_v49  ;;  %v6999_v49 = vor.u32 %v7729_v46, %v6998_v50  ;;  %v6831_v16 = vor.u32 %v7687_v40, %v6830_v3  ;;  %v6904_v42 = vld [vmem:[#allocation8 + $0x6b4] sm:$0xf0]  ;;  %v7701_v29 = vld [vmem:[#allocation8 + $0x694] sm:$0xf]  ;;  %v7094_v21 = vld [vmem:[#allocation8 + $0x828] sm:$0xf] }
 0x234   :  { %4004 = vmatpush.bf16.msra.mxu3 %v6799_v61  ;;  %4670 = vmatpush.bf16.msrb.mxu0 %v6891_v44  ;;  %v6907_v32 = vor.u32 %v7704_v17, %v6904_v42  ;;  %v6927_v44 = vor.u32 %v7711_v58, %v6926_v13  ;;  %v6883_v35 = vor.u32 %v7698_v37, %v6880_v59  ;;  %v7708_v50 = vld [vmem:[#allocation8 + $0x6c8] sm:$0xf0]  ;;  %v7695_v46 = vld [vmem:[#allocation8 + $0x664] sm:$0xf]  ;;  %v6844_v3 = vld [vmem:[#allocation8 + $0x63c] sm:$0xf0] }
 0x235   :  { %4683 = vmatpush.bf16.msrb.mxu1 %v6999_v49  ;;  %v6868_v49 = vld [vmem:[#allocation8 + $0x66c] sm:$0xf0]  ;;  %v7722_v40 = vld [vmem:[#allocation8 + $0x73c] sm:$0xf]  ;;  %v7046_v17 = vld [vmem:[#allocation8 + $0x7c8] sm:$0xf] }
 0x236   :  { %v6979_v19 = vor.u32 %v7722_v40, %v6976_v39  ;;  %v7741_v42 = vld [vmem:[#allocation8 + $0x7d0] sm:$0xf0]  ;;  %v7716_v13 = vld [vmem:[#allocation8 + $0x70c] sm:$0xf]  ;;  %v7034_v58 = vld [vmem:[#allocation8 + $0x7b0] sm:$0xf] }
 0x237   :  { %3993 = vmatpush.bf16.msra.mxu2 %v6623_v47  ;;  %v6842_v47 = vld [vmem:[#allocation8 + $0x630] sm:$0xf]  ;;  %v7738_v37 = vld [vmem:[#allocation8 + $0x7b8] sm:$0xf0]  ;;  %v7749_v40 = vld [vmem:[#allocation8 + $0x814] sm:$0xf] }
 0x238   :  { %4005 = vmatpush.bf16.msra.mxu3 %v6783_v43  ;;  %4671 = vmatpush.bf16.msrb.mxu0 %v6879_v54  ;;  %v7690_v43 = vld [vmem:[#allocation8 + $0x638] sm:$0xf0]  ;;  %v7728_v54 = vld [vmem:[#allocation8 + $0x76c] sm:$0xf]  ;;  %v7035_v59 = vor.u32 %v7738_v37, %v7034_v58  ;;  %v7084_v39 = vld [vmem:[#allocation8 + $0x81c] sm:$0xf0] }
 0x239   :  { %4684 = vmatpush.bf16.msrb.mxu1 %v6987_v6  ;;  %v7765_v58 = vld [vmem:[#allocation8 + $0x890] sm:$0xf0] }
 0x23a   :  { %v3148_v0 = vpop.f32.mrf.mxu3 }
 0x23b   :  { %3994 = vmatpush.bf16.msra.mxu2 %v6607_v11  ;;  %v8208_v45 = vadd.f32 %v3148_v0, %v3135_v52  ;;  %v7714_v52 = vld [vmem:[#allocation8 + $0x6f8] sm:$0xf0]  ;;  %v6914_v0 = vld [vmem:[#allocation8 + $0x6c0] sm:$0xf] }
 0x23c   :  { %4006 = vmatpush.bf16.msra.mxu3 %v6767_v31  ;;  %v6975_v31 = vor.u32 %v7723_v10, %v6974_v7  ;;  %v7070_v10 = vld [vmem:[#allocation8 + $0x7f8] sm:$0xf] }
 0x23e   :  { %4685 = vmatpush.bf16.msrb.mxu1 %v6975_v31 }
 0x23f   :  { %3995 = vmatpush.bf16.msra.mxu2 %v6591_v22 }
 0x240   :  { %4007 = vmatpush.bf16.msra.mxu3 %v6751_v55 }
 0x242   :  { %4686 = vmatpush.bf16.msrb.mxu1 %v6963_v63  ;;  %v6832_v63 = vld [vmem:[#allocation8 + $0x624] sm:$0xf0] }
 0x243   :  { %3996 = vmatpush.bf16.msra.mxu2 %v6575_v24 }
 0x244   :  { %4008 = vmatpush.bf16.msra.mxu3 %v6735_v18  ;;  %v3230_v38 = vpop.f32.mrf.mxu1 }
 0x245   :  { %v8211_v61 = vadd.f32 %v3230_v38, %v3217_v51  ;;  %v6818_v51 = vld [vmem:[#allocation8 + $0x600] sm:$0xf] }
 0x246   :  { %3997 = vmatmul.bf16.vlgmr.msra.gmra.mxu2 %v8003_v5  ;;  %v6867_v5 = vor.u32 %v7696_v56, %v6866_v4  ;;  %v6819_v24 = vor.u32 %v7684_v34, %v6818_v51  ;;  %v7000_v4 = vld [vmem:[#allocation8 + $0x774] sm:$0xf0]  ;;  %v6915_v56 = vor.u32 %v7708_v50, %v6914_v0  ;;  %v7058_v51 = vld [vmem:[#allocation8 + $0x7e0] sm:$0xf]  ;;  %v7744_v34 = vld [vmem:[#allocation8 + $0x7e8] sm:$0xf0] }
 0x247   :  { %v7003_v38 = vor.u32 %v7728_v54, %v7000_v4  ;;  %v7022_v0 = vld [vmem:[#allocation8 + $0x798] sm:$0xf]  ;;  %v7735_v50 = vld [vmem:[#allocation8 + $0x7a0] sm:$0xf0]  ;;  %v7710_v54 = vld [vmem:[#allocation8 + $0x6dc] sm:$0xf] }
 0x248   :  { %4009 = vmatpush.bf16.msra.mxu3 %v6719_v30  ;;  %4672 = vmatpush.bf16.msrb.mxu0 %v6867_v5  ;;  %v6892_v30 = vld [vmem:[#allocation8 + $0x69c] sm:$0xf0]  ;;  %v6871_v5 = vor.u32 %v7695_v46, %v6868_v49  ;;  %v7023_v49 = vor.u32 %v7735_v50, %v7022_v0  ;;  %v6928_v4 = vld [vmem:[#allocation8 + $0x6e4] sm:$0xf0]  ;;  %v6910_v50 = vld [vmem:[#allocation8 + $0x6b0] sm:$0xf] }
 0x249   :  { %v3188_v53 = vpop.f32.mrf.mxu2 }
 0x24a   :  { %v3189_v11 = vadd.f32 %v3188_v53, %v8198_v2  ;;  %v6950_v2 = vld [vmem:[#allocation8 + $0x708] sm:$0xf]  ;;  %v6988_v53 = vld [vmem:[#allocation8 + $0x75c] sm:$0xf0] }
 0x24b   :  { %v6951_v18 = vor.u32 %v7717_v9, %v6950_v2  ;;  %v7719_v2 = vld [vmem:[#allocation8 + $0x724] sm:$0xf] }
 0x24c   :  { %4010 = vmatpush.bf16.msra.mxu3 %v6703_v23  ;;  %4673 = vmatpush.bf16.msrb.mxu0 %v6855_v12  ;;  %v3232_v14 = vpop.f32.mrf.mxu1  ;;  %v7753_v23 = vld [vmem:[#allocation8 + $0x830] sm:$0xf0]  ;;  %v7692_v12 = vld [vmem:[#allocation8 + $0x64c] sm:$0xf] }
 0x24d   :  { %v8214_v15 = vadd.f32 %v3232_v14, %v3219_v8  ;;  %4687 = vmatpush.bf16.msrb.mxu1 %v6951_v18  ;;  %v6939_v8 = vor.u32 %v7714_v52, %v6938_v33  ;;  %v7095_v36 = vor.u32 %v7753_v23, %v7094_v21  ;;  %v7047_v52 = vor.u32 %v7741_v42, %v7046_v17  ;;  %v7713_v21 = vld [vmem:[#allocation8 + $0x6f4] sm:$0xf]  ;;  %v6940_v23 = vld [vmem:[#allocation8 + $0x6fc] sm:$0xf0]  ;;  %v7768_v17 = vld [vmem:[#allocation8 + $0x8a8] sm:$0xf0] }
 0x24f   :  { %4011 = vmatmul.bf16.vlgmr.msra.gmra.mxu3 %v8007_v20  ;;  %v6843_v20 = vor.u32 %v7690_v43, %v6842_v47  ;;  %4697 = vmatpush.bf16.msrb.mxu2 %v7095_v36  ;;  %v7725_v47 = vld [vmem:[#allocation8 + $0x754] sm:$0xf]  ;;  %v6859_v43 = vor.u32 %v7692_v12, %v6856_v57  ;;  %v7732_v12 = vld [vmem:[#allocation8 + $0x788] sm:$0xf0] }
 0x250   :  { %v6991_v7 = vor.u32 %v7725_v47, %v6988_v53  ;;  %v7752_v47 = vld [vmem:[#allocation8 + $0x82c] sm:$0xf] }
 0x251   :  { %4674 = vmatpush.bf16.msrb.mxu0 %v6843_v20  ;;  %v3190_v22 = vpop.f32.mrf.mxu2  ;;  %4688 = vmatpush.bf16.msrb.mxu1 %v6939_v8  ;;  %v7689_v20 = vld [vmem:[#allocation8 + $0x634] sm:$0xf]  ;;  %v6820_v8 = vld [vmem:[#allocation8 + $0x60c] sm:$0xf0] }
 0x252   :  { %v3202_v55 = vpop.f32.mrf.mxu3  ;;  %v3191_v27 = vadd.f32 %v3190_v22, %v8202_v26  ;;  %v6895_v26 = vor.u32 %v7701_v29, %v6892_v30  ;;  %v7059_v22 = vor.u32 %v7744_v34, %v7058_v51  ;;  %v7683_v29 = vld [vmem:[#allocation8 + $0x604] sm:$0xf]  ;;  %v7087_v51 = vor.u32 %v7749_v40, %v7084_v39  ;;  %v7166_v34 = vld [vmem:[#allocation8 + $0x8b8] sm:$0xf]  ;;  %v7024_v40 = vld [vmem:[#allocation8 + $0x7a4] sm:$0xf0] }
 0x253   :  { %v8217_v28 = vadd.f32 %v3202_v55, %v3189_v11  ;;  %4698 = vmatpush.bf16.msrb.mxu2 %v7083_v1  ;;  %v7747_v11 = vld [vmem:[#allocation8 + $0x800] sm:$0xf0]  ;;  %v7686_v55 = vld [vmem:[#allocation8 + $0x61c] sm:$0xf]  ;;  %v6823_v30 = vor.u32 %v7683_v29, %v6820_v8  ;;  %v7010_v1 = vld [vmem:[#allocation8 + $0x780] sm:$0xf] }
 0x254   :  { %v7071_v14 = vor.u32 %v7747_v11, %v7070_v10  ;;  %v6835_v9 = vor.u32 %v7686_v55, %v6832_v63  ;;  %v7011_v57 = vor.u32 %v7732_v12, %v7010_v1  ;;  %v6916_v10 = vld [vmem:[#allocation8 + $0x6cc] sm:$0xf0]  ;;  %v7737_v1 = vld [vmem:[#allocation8 + $0x7b4] sm:$0xf]  ;;  %v7036_v12 = vld [vmem:[#allocation8 + $0x7bc] sm:$0xf0] }
 0x255   :  { %4675 = vmatpush.bf16.msrb.mxu0 %v6831_v16  ;;  %4689 = vmatpush.bf16.msrb.mxu1 %v6927_v44  ;;  %v6847_v16 = vor.u32 %v7689_v20, %v6844_v3  ;;  %v6943_v44 = vor.u32 %v7713_v21, %v6940_v23  ;;  %v7178_v20 = vld [vmem:[#allocation8 + $0x8d0] sm:$0xf] }
 0x257   :  { %4699 = vmatpush.bf16.msrb.mxu2 %v7071_v14 }
 0x259   :  { %4676 = vmatpush.bf16.msrb.mxu0 %v6819_v24  ;;  %4690 = vmatpush.bf16.msrb.mxu1 %v6915_v56  ;;  %v8227_v56 = vld [vmem:[#allocation7 + $0x8] sm:$0xf] }
 0x25a   :  { %v3204_v48 = vpop.f32.mrf.mxu3  ;;  %v3361_v53 = vperm.slane %v8227_v56, 0 }
 0x25b   :  { %v8219_v41 = vadd.f32 %v3204_v48, %v3191_v27  ;;  %4700 = vmatpush.bf16.msrb.mxu2 %v7059_v22  ;;  %v6952_v48 = vld [vmem:[#allocation8 + $0x714] sm:$0xf0]  ;;  %v7771_v22 = vld [vmem:[#allocation8 + $0x8c0] sm:$0xf0] }
 0x25c   :  { %v7167_v55 = vor.u32 %v7771_v22, %v7166_v34 }
 0x25d   :  { %4725 = vmatpush.bf16.msra.mxu0 %v6907_v32  ;;  %4739 = vmatpush.bf16.msra.mxu1 %v7003_v38  ;;  %v7190_v38 = vld [vmem:[#allocation8 + $0x8e8] sm:$0xf] }
 0x25e   :  { %v7191_v62 = vor.u32 %v7777_v60, %v7190_v38 }
 0x25f   :  { %4701 = vmatpush.bf16.msrb.mxu2 %v7047_v52  ;;  %v7060_v52 = vld [vmem:[#allocation8 + $0x7ec] sm:$0xf0] }
 0x260   :  { %4711 = vmatpush.bf16.msrb.mxu3 %v7191_v62 }
 0x261   :  { %4726 = vmatpush.bf16.msra.mxu0 %v6895_v26  ;;  %4740 = vmatpush.bf16.msra.mxu1 %v6991_v7  ;;  %v6955_v26 = vor.u32 %v7716_v13, %v6952_v48  ;;  %v7707_v7 = vld [vmem:[#allocation8 + $0x6c4] sm:$0xf] }
 0x262   :  { %v6919_v11 = vor.u32 %v7707_v7, %v6916_v10  ;;  %v7118_v7 = vld [vmem:[#allocation8 + $0x858] sm:$0xf]  ;;  %v7759_v10 = vld [vmem:[#allocation8 + $0x860] sm:$0xf0] }
 0x263   :  { %4702 = vmatpush.bf16.msrb.mxu2 %v7035_v59 }
 0x264   :  { %v3872_v36 = vpop.f32.mrf.mxu1 }
 0x265   :  { %4727 = vmatpush.bf16.msra.mxu0 %v6883_v35  ;;  %4741 = vmatpush.bf16.msra.mxu1 %v6979_v19 }
 0x267   :  { %4703 = vmatpush.bf16.msrb.mxu2 %v7023_v49  ;;  %v7706_v49 = vld [vmem:[#allocation8 + $0x6b8] sm:$0xf0] }
 0x268   :  { %v6911_v62 = vor.u32 %v7706_v49, %v6910_v50  ;;  %v7770_v50 = vld [vmem:[#allocation8 + $0x8bc] sm:$0xf]  ;;  %v7168_v49 = vld [vmem:[#allocation8 + $0x8c4] sm:$0xf0] }
 0x269   :  { %4728 = vmatpush.bf16.msra.mxu0 %v6871_v5  ;;  %v3244_v6 = vpop.f32.mrf.mxu2  ;;  %v6931_v5 = vor.u32 %v7710_v54, %v6928_v4  ;;  %v7130_v4 = vld [vmem:[#allocation8 + $0x870] sm:$0xf] }
 0x26a   :  { %v3245_v31 = vadd.f32 %v3244_v6, %v8211_v61  ;;  %v6964_v61 = vld [vmem:[#allocation8 + $0x72c] sm:$0xf0] }
 0x26b   :  { %v6967_v18 = vor.u32 %v7719_v2, %v6964_v61  ;;  %4704 = vmatpush.bf16.msrb.mxu2 %v7011_v57  ;;  %v7746_v2 = vld [vmem:[#allocation8 + $0x7fc] sm:$0xf] }
 0x26c   :  { %v3874_v19 = vpop.f32.mrf.mxu1 }
 0x26d   :  { %4729 = vmatpush.bf16.msra.mxu0 %v6859_v43  ;;  %4742 = vmatpush.bf16.msra.mxu1 %v6967_v18  ;;  %v7096_v43 = vld [vmem:[#allocation8 + $0x834] sm:$0xf0]  ;;  %v7154_v18 = vld [vmem:[#allocation8 + $0x8a0] sm:$0xf] }
 0x26e   :  { %v7099_v6 = vor.u32 %v7752_v47, %v7096_v43  ;;  %v7155_v42 = vor.u32 %v7768_v17, %v7154_v18  ;;  %v6898_v43 = vld [vmem:[#allocation8 + $0x698] sm:$0xf]  ;;  %v7697_v17 = vld [vmem:[#allocation8 + $0x670] sm:$0xf0] }
 0x270   :  { %4753 = vmatpush.bf16.msra.mxu2 %v7099_v6  ;;  %v7039_v6 = vor.u32 %v7737_v1, %v7036_v12  ;;  %v6982_v1 = vld [vmem:[#allocation8 + $0x740] sm:$0xf]  ;;  %v7724_v12 = vld [vmem:[#allocation8 + $0x748] sm:$0xf0] }
 0x271   :  { %4730 = vmatpush.bf16.msra.mxu0 %v6847_v16  ;;  %v3246_v27 = vpop.f32.mrf.mxu2  ;;  %4743 = vmatpush.bf16.msra.mxu1 %v6955_v26  ;;  %v7142_v26 = vld [vmem:[#allocation8 + $0x888] sm:$0xf] }
 0x272   :  { %v3258_v24 = vpop.f32.mrf.mxu3  ;;  %v3247_v32 = vadd.f32 %v3246_v27, %v8214_v15  ;;  %v3858_v15 = vpop.f32.mrf.mxu0  ;;  %v7143_v59 = vor.u32 %v7765_v58, %v7142_v26  ;;  %v7773_v58 = vld [vmem:[#allocation8 + $0x8d4] sm:$0xf] }
 0x273   :  { %v8223_v33 = vadd.f32 %v3258_v24, %v3245_v31  ;;  %v7774_v31 = vld [vmem:[#allocation8 + $0x8d8] sm:$0xf0]  ;;  %v3859_v16 = vadd.f32 %v3858_v15, %v3361_v53  ;;  %v7740_v15 = vld [vmem:[#allocation8 + $0x7cc] sm:$0xf] }
 0x274   :  { %v7179_v14 = vor.u32 %v7774_v31, %v7178_v20  ;;  %4754 = vmatpush.bf16.msra.mxu2 %v7087_v51  ;;  %v7700_v51 = vld [vmem:[#allocation8 + $0x688] sm:$0xf0] }
 0x275   :  { %4731 = vmatpush.bf16.msra.mxu0 %v6835_v9  ;;  %4744 = vmatpush.bf16.msra.mxu1 %v6943_v44  ;;  %v7072_v9 = vld [vmem:[#allocation8 + $0x804] sm:$0xf0]  ;;  %v3873_v61 = vadd.f32 %v3872_v36, %v3859_v16  ;;  %v7048_v44 = vld [vmem:[#allocation8 + $0x7d4] sm:$0xf0] }
 0x276   :  { %4712 = vmatpush.bf16.msrb.mxu3 %v7179_v14  ;;  %v7075_v24 = vor.u32 %v7746_v2, %v7072_v9  ;;  %v7051_v54 = vor.u32 %v7740_v15, %v7048_v44  ;;  %v6874_v9 = vld [vmem:[#allocation8 + $0x668] sm:$0xf] }
 0x278   :  { %4755 = vmatpush.bf16.msra.mxu2 %v7075_v24  ;;  %v7192_v24 = vld [vmem:[#allocation8 + $0x8f4] sm:$0xf0] }
 0x279   :  { %4732 = vmatpush.bf16.msra.mxu0 %v6823_v30  ;;  %4745 = vmatpush.bf16.msra.mxu1 %v6931_v5  ;;  %v3362_v30 = vperm.slane %v8227_v56, 1  ;;  %v7762_v5 = vld [vmem:[#allocation8 + $0x878] sm:$0xf0] }
 0x27a   :  { %v3260_v35 = vpop.f32.mrf.mxu3  ;;  %v3860_v3 = vpop.f32.mrf.mxu0  ;;  %4713 = vmatpush.bf16.msrb.mxu3 %v7167_v55  ;;  %v7131_v60 = vor.u32 %v7762_v5, %v7130_v4  ;;  %v7106_v55 = vld [vmem:[#allocation8 + $0x840] sm:$0xf]  ;;  %v6850_v5 = vld [vmem:[#allocation8 + $0x638] sm:$0xf] }
 0x27b   :  { %v8225_v46 = vadd.f32 %v3260_v35, %v3247_v32  ;;  %v3861_v27 = vadd.f32 %v3860_v3, %v3361_v53  ;;  %v7743_v32 = vld [vmem:[#allocation8 + $0x7e4] sm:$0xf]  ;;  %v7734_v3 = vld [vmem:[#allocation8 + $0x79c] sm:$0xf] }
 0x27c   :  { %v7063_v13 = vor.u32 %v7743_v32, %v7060_v52  ;;  %v7703_v53 = vld [vmem:[#allocation8 + $0x6a0] sm:$0xf0]  ;;  %v7027_v34 = vor.u32 %v7734_v3, %v7024_v40  ;;  %v7012_v52 = vld [vmem:[#allocation8 + $0x78c] sm:$0xf0] }
 0x27d   :  { %4746 = vmatpush.bf16.msra.mxu1 %v6919_v11  ;;  %v3875_v8 = vadd.f32 %v3874_v19, %v3861_v27  ;;  %v7119_v11 = vor.u32 %v7759_v10, %v7118_v7  ;;  %v6899_v14 = vor.u32 %v7703_v53, %v6898_v43  ;;  %v6886_v19 = vld [vmem:[#allocation8 + $0x680] sm:$0xf]  ;;  %v7776_v27 = vld [vmem:[#allocation8 + $0x8ec] sm:$0xf]  ;;  %v7731_v32 = vld [vmem:[#allocation8 + $0x784] sm:$0xf]  ;;  %v6983_v7 = vor.u32 %v7724_v12, %v6982_v1 }
 0x27e   :  { %4714 = vmatpush.bf16.msrb.mxu3 %v7155_v42  ;;  %4756 = vmatpush.bf16.msra.mxu2 %v7063_v13  ;;  %v6887_v18 = vor.u32 %v7700_v51, %v6886_v19  ;;  %v7195_v42 = vor.u32 %v7776_v27, %v7192_v24  ;;  %v7730_v13 = vld [vmem:[#allocation8 + $0x778] sm:$0xf0]  ;;  %v7156_v43 = vld [vmem:[#allocation8 + $0x8ac] sm:$0xf0]  ;;  %v3363_v53 = vperm.slane %v8227_v56, 2 }
 0x27f   :  { %v6838_v10 = vld [vmem:[#allocation8 + $0x620] sm:$0xf]  ;;  %v7761_v24 = vld [vmem:[#allocation8 + $0x874] sm:$0xf] }
 0x282   :  { %v3914_v48 = vpop.f32.mrf.mxu0  ;;  %4715 = vmatpush.bf16.msrb.mxu3 %v7143_v59  ;;  %4757 = vmatpush.bf16.msra.mxu2 %v7051_v54  ;;  %v6875_v59 = vor.u32 %v7697_v17, %v6874_v9  ;;  %v7718_v9 = vld [vmem:[#allocation8 + $0x718] sm:$0xf0] }
 0x284   :  { %v3928_v37 = vpop.f32.mrf.mxu1 }
 0x286   :  { %4716 = vmatpush.bf16.msrb.mxu3 %v7131_v60  ;;  %4758 = vmatpush.bf16.msra.mxu2 %v7039_v6 }
 0x289   :  { %v3886_v63 = vpop.f32.mrf.mxu2 }
 0x28a   :  { %v3887_v29 = vadd.f32 %v3886_v63, %v3873_v61  ;;  %v3916_v31 = vpop.f32.mrf.mxu0  ;;  %4717 = vmatpush.bf16.msrb.mxu3 %v7119_v11  ;;  %v7756_v63 = vld [vmem:[#allocation8 + $0x848] sm:$0xf0]  ;;  %4759 = vmatpush.bf16.msra.mxu2 %v7027_v34  ;;  %v6826_v34 = vld [vmem:[#allocation8 + $0x608] sm:$0xf] }
 0x28b   :  { %v7107_v61 = vor.u32 %v7756_v63, %v7106_v55  ;;  %v7688_v11 = vld [vmem:[#allocation8 + $0x628] sm:$0xf0] }
 0x28c   :  { %v4017_v35 = vmax.f32 %v3887_v29, 0.0  ;;  %v3930_v22 = vpop.f32.mrf.mxu1  ;;  %v6839_v40 = vor.u32 %v7688_v11, %v6838_v10 }
 0x28e   :  { %4718 = vmatpush.bf16.msrb.mxu3 %v7107_v61 }
 0x291   :  { %v3888_v21 = vpop.f32.mrf.mxu2 }
 0x292   :  { %v3900_v23 = vpop.f32.mrf.mxu3  ;;  %v3889_v36 = vadd.f32 %v3888_v21, %v3875_v8  ;;  %4767 = vmatpush.bf16.msra.mxu3 %v7195_v42  ;;  %v3970_v3 = vpop.f32.mrf.mxu0 }
 0x293   :  { %v3901_v0 = vadd.f32 %v3900_v23, %v3362_v30  ;;  %v6862_v23 = vld [vmem:[#allocation8 + $0x650] sm:$0xf] }
 0x294   :  { %v4021_v38 = vmax.f32 %v3889_v36, 0.0  ;;  %v6994_v36 = vld [vmem:[#allocation8 + $0x758] sm:$0xf] }
 0x295   :  { %v3915_v47 = vadd.f32 %v3914_v48, %v3901_v0  ;;  %v7015_v48 = vor.u32 %v7731_v32, %v7012_v52  ;;  %v7727_v0 = vld [vmem:[#allocation8 + $0x760] sm:$0xf0]  ;;  %v6946_v52 = vld [vmem:[#allocation8 + $0x6f8] sm:$0xf] }
 0x296   :  { %v8231_v57 = vpack.c.bf16 %v4021_v38, %v4017_v35  ;;  %v7694_v35 = vld [vmem:[#allocation8 + $0x658] sm:$0xf0]  ;;  %v6995_v4 = vor.u32 %v7727_v0, %v6994_v36  ;;  %v7171_v38 = vor.u32 %v7770_v50, %v7168_v49  ;;  %v7108_v36 = vld [vmem:[#allocation8 + $0x84c] sm:$0xf0] }
 0x297   :  { %v3929_v39 = vadd.f32 %v3928_v37, %v3915_v47  ;;  %4760 = vmatpush.bf16.msra.mxu2 %v7015_v48  ;;  %v7180_v37 = vld [vmem:[#allocation8 + $0x8dc] sm:$0xf0]  ;;  %v6863_v54 = vor.u32 %v7694_v35, %v6862_v23  ;;  %v7767_v47 = vld [vmem:[#allocation8 + $0x8a4] sm:$0xf]  ;;  %v7712_v23 = vld [vmem:[#allocation8 + $0x6e8] sm:$0xf0] }
 0x298   :  { %4677 = vmatmul.bf16.vlgmr.msrb.gmra.mxu0 %v8231_v57  ;;  %v7183_v15 = vor.u32 %v7773_v58, %v7180_v37  ;;  %v7755_v35 = vld [vmem:[#allocation8 + $0x844] sm:$0xf] }
 0x299   :  { %4781 = vmatpush.bf16.msrb.mxu0 %v6911_v62  ;;  %v4018_v29 = vmax.f32 %v3929_v39, 0.0  ;;  %v7691_v62 = vld [vmem:[#allocation8 + $0x640] sm:$0xf0]  ;;  %v7764_v39 = vld [vmem:[#allocation8 + $0x88c] sm:$0xf] }
 0x29a   :  { %v3902_v20 = vpop.f32.mrf.mxu3  ;;  %4768 = vmatpush.bf16.msra.mxu3 %v7183_v15  ;;  %v6851_v6 = vor.u32 %v7691_v62, %v6850_v5  ;;  %v7111_v5 = vor.u32 %v7755_v35, %v7108_v36  ;;  %v7772_v35 = vld [vmem:[#allocation8 + $0x8c8] sm:$0xf0] }
 0x29b   :  { %v3903_v16 = vadd.f32 %v3902_v20, %v3362_v30  ;;  %v7006_v30 = vld [vmem:[#allocation8 + $0x770] sm:$0xf]  ;;  %v7159_v20 = vor.u32 %v7767_v47, %v7156_v43  ;;  %v7090_v43 = vld [vmem:[#allocation8 + $0x818] sm:$0xf] }
 0x29c   :  { %v7007_v21 = vor.u32 %v7730_v13, %v7006_v30  ;;  %v7758_v30 = vld [vmem:[#allocation8 + $0x85c] sm:$0xf]  ;;  %v7120_v13 = vld [vmem:[#allocation8 + $0x864] sm:$0xf0] }
 0x29d   :  { %v3917_v2 = vadd.f32 %v3916_v31, %v3903_v16  ;;  %4782 = vmatpush.bf16.msrb.mxu0 %v6899_v14  ;;  %v6970_v31 = vld [vmem:[#allocation8 + $0x728] sm:$0xf]  ;;  %v7721_v14 = vld [vmem:[#allocation8 + $0x730] sm:$0xf0]  ;;  %v7144_v16 = vld [vmem:[#allocation8 + $0x894] sm:$0xf0]  ;;  %v7123_v58 = vor.u32 %v7758_v30, %v7120_v13 }
 0x29e   :  { %4769 = vmatpush.bf16.msra.mxu3 %v7171_v38  ;;  %v6971_v51 = vor.u32 %v7721_v14, %v6970_v31  ;;  %v7147_v55 = vor.u32 %v7764_v39, %v7144_v16  ;;  %v6922_v38 = vld [vmem:[#allocation8 + $0x6c8] sm:$0xf]  ;;  %v7745_v14 = vld [vmem:[#allocation8 + $0x7f0] sm:$0xf0]  ;;  %v7054_v39 = vld [vmem:[#allocation8 + $0x7d0] sm:$0xf] }
 0x29f   :  { %v3931_v8 = vadd.f32 %v3930_v22, %v3917_v2  ;;  %v7685_v22 = vld [vmem:[#allocation8 + $0x610] sm:$0xf0]  ;;  %v6958_v2 = vld [vmem:[#allocation8 + $0x710] sm:$0xf]  ;;  %v7066_v31 = vld [vmem:[#allocation8 + $0x7e8] sm:$0xf] }
 0x2a0   :  { %v6827_v27 = vor.u32 %v7685_v22, %v6826_v34  ;;  %v6959_v42 = vor.u32 %v7718_v9, %v6958_v2  ;;  %v7742_v16 = vld [vmem:[#allocation8 + $0x7d8] sm:$0xf0]  ;;  %v7733_v30 = vld [vmem:[#allocation8 + $0x790] sm:$0xf0] }
 0x2a1   :  { %v4022_v26 = vmax.f32 %v3931_v8, 0.0  ;;  %4783 = vmatpush.bf16.msrb.mxu0 %v6887_v18  ;;  %v7132_v18 = vld [vmem:[#allocation8 + $0x87c] sm:$0xf0]  ;;  %v7055_v34 = vor.u32 %v7742_v16, %v7054_v39 }
 0x2a2   :  { %4770 = vmatpush.bf16.msra.mxu3 %v7159_v20  ;;  %v7135_v32 = vor.u32 %v7761_v24, %v7132_v18  ;;  %v7736_v24 = vld [vmem:[#allocation8 + $0x7a8] sm:$0xf0] }
 0x2a3   :  { %v8234_v44 = vpack.c.bf16 %v4022_v26, %v4018_v29  ;;  %v7715_v29 = vld [vmem:[#allocation8 + $0x700] sm:$0xf0] }
 0x2a4   :  { %v6947_v26 = vor.u32 %v7715_v29, %v6946_v52  ;;  %v3984_v10 = vpop.f32.mrf.mxu1  ;;  %v7198_v52 = vld [vmem:[#allocation8 + $0x8f0] sm:$0xf]  ;;  %v7778_v29 = vld [vmem:[#allocation8 + $0x8f8] sm:$0xf0] }
 0x2a5   :  { %4691 = vmatmul.bf16.vlgmr.msrb.gmra.mxu1 %v8234_v44  ;;  %4784 = vmatpush.bf16.msrb.mxu0 %v6875_v59  ;;  %v3972_v59 = vpop.f32.mrf.mxu0 }
 0x2a6   :  { %4795 = vmatpush.bf16.msrb.mxu1 %v7007_v21  ;;  %4771 = vmatpush.bf16.msra.mxu3 %v7147_v55  ;;  %v6934_v21 = vld [vmem:[#allocation8 + $0x6e0] sm:$0xf]  ;;  %v7042_v55 = vld [vmem:[#allocation8 + $0x7b8] sm:$0xf] }
 0x2a7   :  { %v6935_v49 = vor.u32 %v7712_v23, %v6934_v21  ;;  %v7775_v21 = vld [vmem:[#allocation8 + $0x8e0] sm:$0xf0] }
 0x2a8   :  { %4733 = vmatmul.bf16.vlgmr.msra.gmra.mxu0 %v8231_v57 }
 0x2a9   :  { %v3942_v60 = vpop.f32.mrf.mxu2  ;;  %4785 = vmatpush.bf16.msrb.mxu0 %v6863_v54  ;;  %v7102_v54 = vld [vmem:[#allocation8 + $0x830] sm:$0xf] }
 0x2aa   :  { %4796 = vmatpush.bf16.msrb.mxu1 %v6995_v4  ;;  %v3943_v19 = vadd.f32 %v3942_v60, %v3363_v53  ;;  %4772 = vmatpush.bf16.msra.mxu3 %v7135_v32  ;;  %v7754_v4 = vld [vmem:[#allocation8 + $0x838] sm:$0xf0]  ;;  %v7709_v60 = vld [vmem:[#allocation8 + $0x6d0] sm:$0xf0] }
 0x2ab   :  { %v7103_v1 = vor.u32 %v7754_v4, %v7102_v54  ;;  %v6923_v47 = vor.u32 %v7709_v60, %v6922_v38  ;;  %v7150_v54 = vld [vmem:[#allocation8 + $0x890] sm:$0xf]  ;;  %v7766_v4 = vld [vmem:[#allocation8 + $0x898] sm:$0xf0]  ;;  %v7138_v38 = vld [vmem:[#allocation8 + $0x878] sm:$0xf] }
 0x2ac   :  { %v3986_v22 = vpop.f32.mrf.mxu1  ;;  %v7763_v60 = vld [vmem:[#allocation8 + $0x880] sm:$0xf0] }
 0x2ad   :  { %4786 = vmatpush.bf16.msrb.mxu0 %v6851_v6  ;;  %v7078_v6 = vld [vmem:[#allocation8 + $0x800] sm:$0xf] }
 0x2ae   :  { %4797 = vmatpush.bf16.msrb.mxu1 %v6983_v7  ;;  %4773 = vmatpush.bf16.msra.mxu3 %v7123_v58  ;;  %v7748_v7 = vld [vmem:[#allocation8 + $0x808] sm:$0xf0] }
 0x2af   :  { %v7079_v11 = vor.u32 %v7748_v7, %v7078_v6 }
 0x2b1   :  { %v3944_v61 = vpop.f32.mrf.mxu2  ;;  %4787 = vmatpush.bf16.msrb.mxu0 %v6839_v40  ;;  %v7067_v40 = vor.u32 %v7745_v14, %v7066_v31 }
 0x2b2   :  { %v3956_v63 = vpop.f32.mrf.mxu3  ;;  %4798 = vmatpush.bf16.msrb.mxu1 %v6971_v51  ;;  %v3945_v8 = vadd.f32 %v3944_v61, %v3363_v53  ;;  %4774 = vmatpush.bf16.msra.mxu3 %v7111_v5  ;;  %v7751_v53 = vld [vmem:[#allocation8 + $0x820] sm:$0xf0]  ;;  %v7151_v5 = vor.u32 %v7766_v4, %v7150_v54 }
 0x2b3   :  { %v3957_v17 = vadd.f32 %v3956_v63, %v3943_v19  ;;  %v7739_v63 = vld [vmem:[#allocation8 + $0x7c0] sm:$0xf0] }
 0x2b4   :  { %v7043_v61 = vor.u32 %v7739_v63, %v7042_v55 }
 0x2b5   :  { %4747 = vmatmul.bf16.vlgmr.msra.gmra.mxu1 %v8234_v44  ;;  %v3971_v48 = vadd.f32 %v3970_v3, %v3957_v17  ;;  %4788 = vmatpush.bf16.msrb.mxu0 %v6827_v27  ;;  %v3364_v3 = vperm.slane %v8227_v56, 3  ;;  %v7030_v27 = vld [vmem:[#allocation8 + $0x7a0] sm:$0xf] }
 0x2b6   :  { %4799 = vmatpush.bf16.msrb.mxu1 %v6959_v42  ;;  %v7031_v32 = vor.u32 %v7736_v24, %v7030_v27 }
 0x2b7   :  { %v4019_v0 = vmax.f32 %v3971_v48, 0.0  ;;  %v3985_v19 = vadd.f32 %v3984_v10, %v3364_v3  ;;  %v3987_v9 = vadd.f32 %v3986_v22, %v3364_v3  ;;  %v4843_v3 = vld [vmem:[#allocation10] sm:$0x7] }
 0x2b8   :  { %4789 = vmatmul.bf16.vlgmr.msrb.gmra.mxu0 %v8231_v57  ;;  %v7091_v57 = vor.u32 %v7751_v53, %v7090_v43  ;;  %v7757_v53 = vld [vmem:[#allocation8 + $0x850] sm:$0xf0] }
 0x2ba   :  { %v3958_v37 = vpop.f32.mrf.mxu3  ;;  %4800 = vmatpush.bf16.msrb.mxu1 %v6947_v26  ;;  %v7199_v26 = vor.u32 %v7778_v29, %v7198_v52  ;;  %v4846_v29 = vperm.slane %v4843_v3, 1 }
 0x2bb   :  { %v3959_v15 = vadd.f32 %v3958_v37, %v3945_v8  ;;  %v7018_v8 = vld [vmem:[#allocation8 + $0x788] sm:$0xf] }
 0x2bc   :  { %v7019_v37 = vor.u32 %v7733_v30, %v7018_v8 }
 0x2bd   :  { %v3973_v50 = vadd.f32 %v3972_v59, %v3959_v15  ;;  %v7186_v59 = vld [vmem:[#allocation8 + $0x8d8] sm:$0xf]  ;;  %v7174_v15 = vld [vmem:[#allocation8 + $0x8c0] sm:$0xf] }
 0x2be   :  { %4801 = vmatpush.bf16.msrb.mxu1 %v6935_v49  ;;  %v7187_v23 = vor.u32 %v7775_v21, %v7186_v59  ;;  %v7175_v36 = vor.u32 %v7772_v35, %v7174_v15 }
 0x2bf   :  { %v4023_v62 = vmax.f32 %v3973_v50, 0.0  ;;  %v7769_v50 = vld [vmem:[#allocation8 + $0x8b0] sm:$0xf0] }
 0x2c1   :  { %v4027_v12 = vpack.c.bf16 %v4023_v62, %v4019_v0  ;;  %v7162_v0 = vld [vmem:[#allocation8 + $0x8a8] sm:$0xf]  ;;  %v7139_v62 = vor.u32 %v7763_v60, %v7138_v38 }
 0x2c2   :  { %4802 = vmatpush.bf16.msrb.mxu1 %v6923_v47  ;;  %v7163_v49 = vor.u32 %v7769_v50, %v7162_v0  ;;  %v7760_v47 = vld [vmem:[#allocation8 + $0x868] sm:$0xf0]  ;;  %v4847_v50 = vperm.slane %v4843_v3, 2 }
 0x2c3   :  { %4705 = vmatmul.bf16.vlgmr.msrb.gmra.mxu2 %v4027_v12 }
 0x2c4   :  { %4809 = vmatpush.bf16.msrb.mxu2 %v7103_v1  ;;  %v7126_v1 = vld [vmem:[#allocation8 + $0x860] sm:$0xf] }
 0x2c5   :  { %4803 = vmatmul.bf16.vlgmr.msrb.gmra.mxu1 %v8234_v44  ;;  %v7127_v43 = vor.u32 %v7760_v47, %v7126_v1 }
 0x2c8   :  { %4810 = vmatpush.bf16.msrb.mxu2 %v7091_v57 }
 0x2c9   :  { %v3998_v20 = vpop.f32.mrf.mxu2 }
 0x2ca   :  { %v3999_v2 = vadd.f32 %v3998_v20, %v3985_v19  ;;  %v4845_v19 = vperm.slane %v4843_v3, 0 }
 0x2cc   :  { %4811 = vmatpush.bf16.msrb.mxu2 %v7079_v11 }
 0x2d0   :  { %4812 = vmatpush.bf16.msrb.mxu2 %v7067_v40 }
 0x2d1   :  { %v4000_v44 = vpop.f32.mrf.mxu2 }
 0x2d2   :  { %v4012_v51 = vpop.f32.mrf.mxu3  ;;  %v4001_v56 = vadd.f32 %v4000_v44, %v3987_v9 }
 0x2d3   :  { %4761 = vmatmul.bf16.vlgmr.msra.gmra.mxu2 %v4027_v12  ;;  %v4013_v18 = vadd.f32 %v4012_v51, %v3999_v2 }
 0x2d4   :  { %4813 = vmatpush.bf16.msrb.mxu2 %v7055_v34 }
 0x2d5   :  { %v4020_v13 = vmax.f32 %v4013_v18, 0.0 }
 0x2d8   :  { %4814 = vmatpush.bf16.msrb.mxu2 %v7043_v61 }
 0x2da   :  { %v4014_v17 = vpop.f32.mrf.mxu3 }
 0x2db   :  { %v4015_v42 = vadd.f32 %v4014_v17, %v4001_v56 }
 0x2dc   :  { %4815 = vmatpush.bf16.msrb.mxu2 %v7031_v32 }
 0x2dd   :  { %v4024_v48 = vmax.f32 %v4015_v42, 0.0 }
 0x2df   :  { %v4028_v58 = vpack.c.bf16 %v4024_v48, %v4020_v13 }
 0x2e0   :  { %4816 = vmatpush.bf16.msrb.mxu2 %v7019_v37 }
 0x2e1   :  { %4719 = vmatmul.bf16.vlgmr.msrb.gmra.mxu3 %v4028_v58 }
 0x2e2   :  { %4823 = vmatpush.bf16.msrb.mxu3 %v7199_v26 }
 0x2e3   :  { %4817 = vmatmul.bf16.vlgmr.msrb.gmra.mxu2 %v4027_v12  ;;  %v7114_v12 = vld [vmem:[#allocation8 + $0x848] sm:$0xf] }
 0x2e4   :  { %v7115_v57 = vor.u32 %v7757_v53, %v7114_v12 }
 0x2e6   :  { %4824 = vmatpush.bf16.msrb.mxu3 %v7187_v23 }
 0x2ea   :  { %4825 = vmatpush.bf16.msrb.mxu3 %v7175_v36 }
 0x2ee   :  { %4826 = vmatpush.bf16.msrb.mxu3 %v7163_v49 }
 0x2f1   :  { %4775 = vmatmul.bf16.vlgmr.msra.gmra.mxu3 %v4028_v58 }
 0x2f2   :  { %4827 = vmatpush.bf16.msrb.mxu3 %v7151_v5 }
 0x2f6   :  { %4828 = vmatpush.bf16.msrb.mxu3 %v7139_v62 }
 0x2fa   :  { %4829 = vmatpush.bf16.msrb.mxu3 %v7127_v43 }
 0x2fe   :  { %4830 = vmatpush.bf16.msrb.mxu3 %v7115_v57 }
 0x301   :  { %4831 = vmatmul.bf16.vlgmr.msrb.gmra.mxu3 %v4028_v58 }
 0x315   :  { %v4678_v7 = vpop.f32.mrf.mxu0 }
 0x31d   :  { %v4680_v20 = vpop.f32.mrf.mxu0 }
 0x322   :  { %v4692_v6 = vpop.f32.mrf.mxu1 }
 0x323   :  { %v4693_v14 = vadd.f32 %v4692_v6, %v4678_v7 }
 0x325   :  { %v4734_v22 = vpop.f32.mrf.mxu0 }
 0x32a   :  { %v4694_v11 = vpop.f32.mrf.mxu1 }
 0x32b   :  { %v4695_v55 = vadd.f32 %v4694_v11, %v4680_v20 }
 0x32d   :  { %v4736_v17 = vpop.f32.mrf.mxu0 }
 0x332   :  { %v4748_v34 = vpop.f32.mrf.mxu1 }
 0x333   :  { %v4749_v24 = vadd.f32 %v4748_v34, %v4734_v22 }
 0x33a   :  { %v4750_v18 = vpop.f32.mrf.mxu1 }
 0x33b   :  { %v4751_v30 = vadd.f32 %v4750_v18, %v4736_v17 }
 0x342   :  { %v4804_v26 = vpop.f32.mrf.mxu1 }
 0x346   :  { %v4706_v10 = vpop.f32.mrf.mxu2 }
 0x347   :  { %v4707_v40 = vadd.f32 %v4706_v10, %v4693_v14 }
 0x34a   :  { %v4806_v49 = vpop.f32.mrf.mxu1 }
 0x34e   :  { %v4708_v31 = vpop.f32.mrf.mxu2 }
 0x34f   :  { %v4709_v44 = vadd.f32 %v4708_v31, %v4695_v55 }
 0x356   :  { %v4762_v2 = vpop.f32.mrf.mxu2 }
 0x357   :  { %v4763_v42 = vadd.f32 %v4762_v2, %v4749_v24 }
 0x35e   :  { %v4764_v32 = vpop.f32.mrf.mxu2 }
 0x35f   :  { %v4765_v48 = vadd.f32 %v4764_v32, %v4751_v30 }
 0x364   :  { %v4720_v39 = vpop.f32.mrf.mxu3 }
 0x365   :  { %v4721_v16 = vadd.f32 %v4720_v39, %v4707_v40 }
 0x366   :  { %v4818_v59 = vpop.f32.mrf.mxu2 }
 0x367   :  { %v4837_v51 = vadd.f32 %v4721_v16, %v8205_v25 }
 0x369   :  { %v4851_v63 = vadd.f32 %v4845_v19, %v4837_v51 }
 0x36b   :  { %4857 = vst [vmem:[#allocation11] sm:$0xff] %v4851_v63 }
 0x36c   :  { %v4722_v9 = vpop.f32.mrf.mxu3 }
 0x36d   :  { %v4723_v61 = vadd.f32 %v4722_v9, %v4709_v44 }
 0x36e   :  { %v4820_v4 = vpop.f32.mrf.mxu2 }
 0x36f   :  { %v4840_v27 = vadd.f32 %v4723_v61, %v8208_v45  ;;  %v4790_v45 = vpop.f32.mrf.mxu0 }
 0x370   :  { %v4805_v23 = vadd.f32 %v4804_v26, %v4790_v45 }
 0x371   :  { %v4854_v56 = vadd.f32 %v4845_v19, %v4840_v27 }
 0x372   :  { %v4819_v35 = vadd.f32 %v4818_v59, %v4805_v23 }
 0x373   :  { %4860 = vst [vmem:[#allocation11 + $0x18] sm:$0xff] %v4854_v56 }
 0x374   :  { %v4776_v52 = vpop.f32.mrf.mxu3 }
 0x375   :  { %v4777_v25 = vadd.f32 %v4776_v52, %v4763_v42 }
 0x377   :  { %v4838_v8 = vadd.f32 %v4777_v25, %v8217_v28  ;;  %v4792_v54 = vpop.f32.mrf.mxu0 }
 0x378   :  { %v4807_v5 = vadd.f32 %v4806_v49, %v4792_v54 }
 0x379   :  { %v4852_v13 = vadd.f32 %v4846_v29, %v4838_v8 }
 0x37a   :  { %v4821_v60 = vadd.f32 %v4820_v4, %v4807_v5 }
 0x37b   :  { %4858 = vst [vmem:[#allocation11 + $0x8] sm:$0xff] %v4852_v13 }
 0x37c   :  { %v4778_v58 = vpop.f32.mrf.mxu3 }
 0x37d   :  { %v4779_v37 = vadd.f32 %v4778_v58, %v4765_v48 }
 0x37f   :  { %v4841_v21 = vadd.f32 %v4779_v37, %v8219_v41 }
 0x381   :  { %v4855_v15 = vadd.f32 %v4846_v29, %v4841_v21 }
 0x383   :  { %4861 = vst [vmem:[#allocation11 + $0x20] sm:$0xff] %v4855_v15 }
 0x384   :  { %v4832_v36 = vpop.f32.mrf.mxu3 }
 0x385   :  { %v4833_v0 = vadd.f32 %v4832_v36, %v4819_v35 }
 0x387   :  { %v4839_v28 = vadd.f32 %v4833_v0, %v8223_v33 }
 0x389   :  { %v4853_v38 = vadd.f32 %v4847_v50, %v4839_v28 }
 0x38b   :  { %4859 = vst [vmem:[#allocation11 + $0x10] sm:$0xff] %v4853_v38 }
 0x38c   :  { %v4834_v62 = vpop.f32.mrf.mxu3 }
 0x38d   :  { %v4835_v1 = vadd.f32 %v4834_v62, %v4821_v60 }
 0x38f   :  { %v4842_v41 = vadd.f32 %v4835_v1, %v8225_v46 }
 0x391   :  { %v4856_v47 = vadd.f32 %v4847_v50, %v4842_v41 }
 0x393   :  { %4862 = vst [vmem:[#allocation11 + $0x28] sm:$0xff] %v4856_v47 }
 0x394   :  { %4875 = dma.vmem_to_hbm [thread:$0]  %s4868_s4, 768, %s4870_s21, [#allocation4], %s7953_s22, %s7953_s22, %s7954_s23  }
 0x395   :  { %7941 = dma.done.wait [#allocation4], 768  }
 0x396   :  { %7942 = vsyncadd [#allocation4], 4294966528 }
 0x397   :  { %4880 = vsyncpa [#allocation3], 1 }
 0x398   :  { %4881 = vsyncpa [#allocation6], 1 }
 0x399   :  { %4882 = vsyncpa [#allocation9], 1 }
 0x39a   :  { %4883 = vsyncpa [#allocation4], 1 }

// kernel: tpu_custom_call.1
= control target key start
LH: loop header
LB: loop body
LE: loop exit
PB: predicated region body
PF: predicated region fallthrough
CT: control target
= control target key end

     0   :  { %10 = vsyncpa [#allocation3], 0  ;;  %s8252_s0 = inlined_call_operand.hbm [shape: bf16[16,384], index: 0, kind: input, shape index: {}]   ;;  %s8253_s1 = inlined_call_operand.hbm [shape: bf16[384,1536], index: 1, kind: input, shape index: {}]   ;;  %s8254_s2 = inlined_call_operand.hbm [shape: f32[1,1536], index: 2, kind: input, shape index: {}]   ;;  %s8255_s3 = inlined_call_operand.hbm [shape: bf16[1536,384], index: 3, kind: input, shape index: {}]   ;;  %s8256_s4 = inlined_call_operand.hbm [shape: f32[1,384], index: 4, kind: input, shape index: {}]   ;;  %s8257_s5 = inlined_call_operand.hbm [shape: f32[16,384], index: 5, kind: output, shape index: {}]  }
   0x1   :  { %11 = vsyncpa [#allocation6], 0 }
   0x2   :  { %12 = vsyncpa [#allocation9], 0  ;;  %s31_s20 = sshll.u32 %s8253_s1, 4  ;;  %s32_s20 = int_to_ptr.hbm [resolvable:$true] %s31_s20 }
   0x3   :  { %13 = vsyncpa [#allocation4], 0  ;;  %s7943_s21 = smov [#allocation5]   ;;  %s7944_s23 = smov 768  }
   0x4   :  { %s33_s22 = sshll.u32 %s7943_s21, 4  ;;  %s7945_s24 = smov 48   ;;  %s34_s22 = int_to_ptr.vmem [resolvable:$true] %s33_s22 }
   0x5   :  { %39 = dma.hbm_to_vmem [thread:$0]  %s32_s20, 36864, %s34_s22, [#allocation6], %s7944_s23, %s7944_s23, %s7945_s24  }
   0x6   :  { %s55_s27 = sshll.u32 %s8255_s3, 4  ;;  %s7946_s28 = smov [#allocation8]   ;;  %s56_s27 = int_to_ptr.hbm [resolvable:$true] %s55_s27 }
   0x7   :  { %s57_s29 = sshll.u32 %s7946_s28, 4  ;;  %s18_s7 = sshll.u32 %s8252_s0, 4  ;;  %s58_s29 = int_to_ptr.vmem [resolvable:$true] %s57_s29  ;;  %s19_s7 = int_to_ptr.hbm [resolvable:$true] %s18_s7 }
   0x8   :  { %s7947_s1 = smov 192   ;;  %s7948_s8 = smov 12  }
   0x9   :  { %63 = dma.hbm_to_vmem [thread:$0]  %s56_s27, 36864, %s58_s29, [#allocation9], %s7947_s1, %s7947_s1, %s7948_s8  }
   0xa   :  { %s45_s11 = sshll.u32 %s8254_s2, 4  ;;  %s7949_s12 = smov [#allocation2]   ;;  %s46_s11 = int_to_ptr.hbm [resolvable:$true] %s45_s11 }
   0xb   :  { %s20_s13 = sshll.u32 %s7949_s12, 4  ;;  %s7950_s3 = smov [#allocation7]   ;;  %s21_s13 = int_to_ptr.vmem [resolvable:$true] %s20_s13 }
   0xc   :  { %26 = dma.hbm_to_vmem [thread:$0]  %s19_s7, 384, %s21_s13, [#allocation3], %s7947_s1, %s7947_s1, %s7948_s8  }
   0xd   :  { %s47_s14 = sshll.u32 %s7950_s3, 4  ;;  %s69_s0 = sshll.u32 %s8256_s4, 4  ;;  %s48_s14 = int_to_ptr.vmem [resolvable:$true] %s47_s14  ;;  %s70_s0 = int_to_ptr.hbm [resolvable:$true] %s69_s0 }
   0xe   :  { %50 = dma.hbm_to_vmem [thread:$0]  %s46_s11, 192, %s48_s14, [#allocation6]  }
   0xf   :  { %s7951_s17 = smov [#allocation10]  }
  0x10   :  { %s71_s18 = sshll.u32 %s7951_s17, 4  ;;  %s72_s18 = int_to_ptr.vmem [resolvable:$true] %s71_s18 }
  0x11   :  { %74 = dma.hbm_to_vmem [thread:$0]  %s70_s0, 48, %s72_s18, [#allocation9]  }
  0x12   :  { %7935 = dma.done.wait [#allocation3], 384  }
  0x13   :  { %7936 = vsyncadd [#allocation3], 4294966912 }
  0x14   :  { %7937 = dma.done.wait [#allocation6], 37056  }
  0x15   :  { %7938 = vsyncadd [#allocation6], 4294930240 }
  0x16   :  { %7939 = dma.done.wait [#allocation9], 36912  }
  0x17   :  { %7940 = vsyncadd [#allocation9], 4294930384  ;;  %v5010_v0 = vld [vmem:[#allocation5 + $0x2a0] sm:$0xf]  ;;  %v7233_v1 = vld [vmem:[#allocation5 + $0x2cc] sm:$0xf0] }
  0x18   :  { %v5138_v2 = vld [vmem:[#allocation5 + $0x5a0] sm:$0xf]  ;;  %v5011_v3 = vor.u32 %v7233_v1, %v5010_v0  ;;  %v7265_v4 = vld [vmem:[#allocation5 + $0x5cc] sm:$0xf0]  ;;  %v7231_v9 = vld [vmem:[#allocation5 + $0x2a4] sm:$0xf] }
  0x19   :  { %v5266_v5 = vld [vmem:[#allocation5 + $0x8a0] sm:$0xf]  ;;  %v7297_v6 = vld [vmem:[#allocation5 + $0x8cc] sm:$0xf0]  ;;  %v5139_v7 = vor.u32 %v7265_v4, %v5138_v2  ;;  %v5012_v10 = vld [vmem:[#allocation5 + $0x2d0] sm:$0xf0] }
  0x1a   :  { %v5267_v8 = vor.u32 %v7297_v6, %v5266_v5  ;;  %v4994_v11 = vld [vmem:[#allocation5 + $0x240] sm:$0xf]  ;;  %701 = vmatpush.bf16.msra.mxu0 %v5011_v3  ;;  %v5015_v12 = vor.u32 %v7231_v9, %v5012_v10  ;;  %v7229_v13 = vld [vmem:[#allocation5 + $0x26c] sm:$0xf0]  ;;  %v7227_v20 = vld [vmem:[#allocation5 + $0x244] sm:$0xf] }
  0x1b   :  { %v5122_v14 = vld [vmem:[#allocation5 + $0x540] sm:$0xf]  ;;  %v7261_v15 = vld [vmem:[#allocation5 + $0x56c] sm:$0xf0]  ;;  %715 = vmatpush.bf16.msra.mxu1 %v5139_v7  ;;  %v4995_v16 = vor.u32 %v7229_v13, %v4994_v11  ;;  %v4996_v22 = vld [vmem:[#allocation5 + $0x270] sm:$0xf0] }
  0x1c   :  { %729 = vmatpush.bf16.msra.mxu2 %v5267_v8  ;;  %v5123_v17 = vor.u32 %v7261_v15, %v5122_v14  ;;  %v5250_v18 = vld [vmem:[#allocation5 + $0x840] sm:$0xf]  ;;  %v7293_v19 = vld [vmem:[#allocation5 + $0x86c] sm:$0xf0]  ;;  %743 = vmatpush.bf16.msra.mxu3 %v5015_v12  ;;  %v4999_v25 = vor.u32 %v7227_v20, %v4996_v22  ;;  %v7223_v31 = vld [vmem:[#allocation5 + $0x1e4] sm:$0xf] }
  0x1d   :  { %v5251_v21 = vor.u32 %v7293_v19, %v5250_v18  ;;  %v4978_v23 = vld [vmem:[#allocation5 + $0x1e0] sm:$0xf]  ;;  %v7225_v24 = vld [vmem:[#allocation5 + $0x20c] sm:$0xf0]  ;;  %v4980_v32 = vld [vmem:[#allocation5 + $0x210] sm:$0xf0] }
  0x1e   :  { %v5106_v26 = vld [vmem:[#allocation5 + $0x4e0] sm:$0xf]  ;;  %v7257_v27 = vld [vmem:[#allocation5 + $0x50c] sm:$0xf0]  ;;  %702 = vmatpush.bf16.msra.mxu0 %v4995_v16  ;;  %v4979_v29 = vor.u32 %v7225_v24, %v4978_v23  ;;  %v4983_v38 = vor.u32 %v7223_v31, %v4980_v32  ;;  %v7219_v42 = vld [vmem:[#allocation5 + $0x184] sm:$0xf] }
  0x1f   :  { %v5234_v28 = vld [vmem:[#allocation5 + $0x7e0] sm:$0xf]  ;;  %v7289_v30 = vld [vmem:[#allocation5 + $0x80c] sm:$0xf0]  ;;  %716 = vmatpush.bf16.msra.mxu1 %v5123_v17  ;;  %v5107_v33 = vor.u32 %v7257_v27, %v5106_v26  ;;  %v4964_v43 = vld [vmem:[#allocation5 + $0x1b0] sm:$0xf0] }
  0x20   :  { %730 = vmatpush.bf16.msra.mxu2 %v5251_v21  ;;  %v5235_v34 = vor.u32 %v7289_v30, %v5234_v28  ;;  %v4962_v35 = vld [vmem:[#allocation5 + $0x180] sm:$0xf]  ;;  %v7221_v36 = vld [vmem:[#allocation5 + $0x1ac] sm:$0xf0]  ;;  %744 = vmatpush.bf16.msra.mxu3 %v4999_v25  ;;  %v4967_v50 = vor.u32 %v7219_v42, %v4964_v43  ;;  %v7215_v54 = vld [vmem:[#allocation5 + $0x124] sm:$0xf] }
  0x21   :  { %v5090_v37 = vld [vmem:[#allocation5 + $0x480] sm:$0xf]  ;;  %v7253_v39 = vld [vmem:[#allocation5 + $0x4ac] sm:$0xf0]  ;;  %v4963_v44 = vor.u32 %v7221_v36, %v4962_v35  ;;  %v4948_v55 = vld [vmem:[#allocation5 + $0x150] sm:$0xf0] }
  0x22   :  { %v5218_v40 = vld [vmem:[#allocation5 + $0x780] sm:$0xf]  ;;  %v7285_v41 = vld [vmem:[#allocation5 + $0x7ac] sm:$0xf0]  ;;  %703 = vmatpush.bf16.msra.mxu0 %v4979_v29  ;;  %v5091_v45 = vor.u32 %v7253_v39, %v5090_v37  ;;  %v4951_v62 = vor.u32 %v7215_v54, %v4948_v55  ;;  %v7211_v2 = vld [vmem:[#allocation5 + $0xc4] sm:$0xf] }
  0x23   :  { %717 = vmatpush.bf16.msra.mxu1 %v5107_v33  ;;  %v5219_v46 = vor.u32 %v7285_v41, %v5218_v40  ;;  %v4946_v47 = vld [vmem:[#allocation5 + $0x120] sm:$0xf]  ;;  %v7217_v48 = vld [vmem:[#allocation5 + $0x14c] sm:$0xf0]  ;;  %v4932_v3 = vld [vmem:[#allocation5 + $0xf0] sm:$0xf0] }
  0x24   :  { %731 = vmatpush.bf16.msra.mxu2 %v5235_v34  ;;  %v5074_v49 = vld [vmem:[#allocation5 + $0x420] sm:$0xf]  ;;  %745 = vmatpush.bf16.msra.mxu3 %v4983_v38  ;;  %v7249_v51 = vld [vmem:[#allocation5 + $0x44c] sm:$0xf0]  ;;  %v4947_v56 = vor.u32 %v7217_v48, %v4946_v47  ;;  %v4935_v10 = vor.u32 %v7211_v2, %v4932_v3  ;;  %v7207_v14 = vld [vmem:[#allocation5 + $0x64] sm:$0xf] }
  0x25   :  { %v5202_v52 = vld [vmem:[#allocation5 + $0x720] sm:$0xf]  ;;  %v7281_v53 = vld [vmem:[#allocation5 + $0x74c] sm:$0xf0]  ;;  %v5075_v57 = vor.u32 %v7249_v51, %v5074_v49  ;;  %v4916_v15 = vld [vmem:[#allocation5 + $0x90] sm:$0xf0] }
  0x26   :  { %704 = vmatpush.bf16.msra.mxu0 %v4963_v44  ;;  %v5203_v58 = vor.u32 %v7281_v53, %v5202_v52  ;;  %v4930_v59 = vld [vmem:[#allocation5 + $0xc0] sm:$0xf]  ;;  %v7213_v60 = vld [vmem:[#allocation5 + $0xec] sm:$0xf0]  ;;  %v4919_v24 = vor.u32 %v7207_v14, %v4916_v15  ;;  %v7203_v26 = vld [vmem:[#allocation5 + $0x4] sm:$0xf] }
  0x27   :  { %718 = vmatpush.bf16.msra.mxu1 %v5091_v45  ;;  %v5058_v61 = vld [vmem:[#allocation5 + $0x3c0] sm:$0xf]  ;;  %v7245_v63 = vld [vmem:[#allocation5 + $0x3ec] sm:$0xf0]  ;;  %v4931_v4 = vor.u32 %v7213_v60, %v4930_v59  ;;  %v4900_v27 = vld [vmem:[#allocation5 + $0x30] sm:$0xf0] }
  0x28   :  { %732 = vmatpush.bf16.msra.mxu2 %v5219_v46  ;;  %746 = vmatpush.bf16.msra.mxu3 %v4967_v50  ;;  %v5186_v0 = vld [vmem:[#allocation5 + $0x6c0] sm:$0xf]  ;;  %v7277_v1 = vld [vmem:[#allocation5 + $0x6ec] sm:$0xf0]  ;;  %v5059_v5 = vor.u32 %v7245_v63, %v5058_v61  ;;  %v7263_v28 = vld [vmem:[#allocation5 + $0x5a4] sm:$0xf]  ;;  %v4903_v39 = vor.u32 %v7203_v26, %v4900_v27 }
  0x29   :  { %v5187_v6 = vor.u32 %v7277_v1, %v5186_v0  ;;  %v4914_v7 = vld [vmem:[#allocation5 + $0x60] sm:$0xf]  ;;  %v7209_v8 = vld [vmem:[#allocation5 + $0x8c] sm:$0xf0]  ;;  %v5140_v29 = vld [vmem:[#allocation5 + $0x5d0] sm:$0xf0] }
  0x2a   :  { %705 = vmatpush.bf16.msra.mxu0 %v4947_v56  ;;  %v5042_v9 = vld [vmem:[#allocation5 + $0x360] sm:$0xf]  ;;  %v7241_v11 = vld [vmem:[#allocation5 + $0x38c] sm:$0xf0]  ;;  %v4915_v16 = vor.u32 %v7209_v8, %v4914_v7  ;;  %v7295_v30 = vld [vmem:[#allocation5 + $0x8a4] sm:$0xf]  ;;  %v5143_v40 = vor.u32 %v7263_v28, %v5140_v29 }
  0x2b   :  { %719 = vmatpush.bf16.msra.mxu1 %v5075_v57  ;;  %v5170_v12 = vld [vmem:[#allocation5 + $0x660] sm:$0xf]  ;;  %v7273_v13 = vld [vmem:[#allocation5 + $0x68c] sm:$0xf0]  ;;  %v5043_v19 = vor.u32 %v7241_v11, %v5042_v9  ;;  %v5268_v32 = vld [vmem:[#allocation5 + $0x8d0] sm:$0xf0] }
  0x2c   :  { %733 = vmatpush.bf16.msra.mxu2 %v5203_v58  ;;  %747 = vmatpush.bf16.msra.mxu3 %v4951_v62  ;;  %v4898_v17 = vld [vmem:[#allocation5] sm:$0xf]  ;;  %v7205_v18 = vld [vmem:[#allocation5 + $0x2c] sm:$0xf0]  ;;  %v5171_v20 = vor.u32 %v7273_v13, %v5170_v12  ;;  %v5018_v33 = vld [vmem:[#allocation5 + $0x2a8] sm:$0xf]  ;;  %v5271_v42 = vor.u32 %v7295_v30, %v5268_v32 }
  0x2d   :  { %v5026_v21 = vld [vmem:[#allocation5 + $0x300] sm:$0xf]  ;;  %v7237_v22 = vld [vmem:[#allocation5 + $0x32c] sm:$0xf0]  ;;  %v4899_v31 = vor.u32 %v7205_v18, %v4898_v17  ;;  %v7234_v34 = vld [vmem:[#allocation5 + $0x2d4] sm:$0xf0] }
  0x2e   :  { %706 = vmatpush.bf16.msra.mxu0 %v4931_v4  ;;  %v5154_v23 = vld [vmem:[#allocation5 + $0x600] sm:$0xf]  ;;  %v7269_v25 = vld [vmem:[#allocation5 + $0x62c] sm:$0xf0]  ;;  %v5027_v35 = vor.u32 %v7237_v22, %v5026_v21  ;;  %v5146_v37 = vld [vmem:[#allocation5 + $0x5a8] sm:$0xf]  ;;  %v5019_v43 = vor.u32 %v7234_v34, %v5018_v33 }
  0x2f   :  { %720 = vmatpush.bf16.msra.mxu1 %v5059_v5  ;;  %v5155_v36 = vor.u32 %v7269_v25, %v5154_v23  ;;  %v7266_v38 = vld [vmem:[#allocation5 + $0x5d4] sm:$0xf0]  ;;  %v7259_v41 = vld [vmem:[#allocation5 + $0x544] sm:$0xf]  ;;  %v5124_v44 = vld [vmem:[#allocation5 + $0x570] sm:$0xf0] }
  0x30   :  { %734 = vmatpush.bf16.msra.mxu2 %v5187_v6  ;;  %748 = vmatpush.bf16.msra.mxu3 %v4935_v10  ;;  %v7291_v45 = vld [vmem:[#allocation5 + $0x844] sm:$0xf]  ;;  %v5252_v46 = vld [vmem:[#allocation5 + $0x870] sm:$0xf0]  ;;  %v5147_v47 = vor.u32 %v7266_v38, %v5146_v37  ;;  %v5002_v48 = vld [vmem:[#allocation5 + $0x248] sm:$0xf]  ;;  %v5127_v54 = vor.u32 %v7259_v41, %v5124_v44 }
  0x31   :  { %v7230_v49 = vld [vmem:[#allocation5 + $0x274] sm:$0xf0]  ;;  %v5130_v50 = vld [vmem:[#allocation5 + $0x548] sm:$0xf]  ;;  %v7201_v53 = vld [vmem:[#allocation2 + $0x8] sm:$0xf0]  ;;  %v5255_v58 = vor.u32 %v7291_v45, %v5252_v46 }
  0x32   :  { %707 = vmatpush.bf16.msra.mxu0 %v4915_v16  ;;  %v7262_v51 = vld [vmem:[#allocation5 + $0x574] sm:$0xf0]  ;;  %v4886_v52 = vld [vmem:[#allocation2] sm:$0xf]  ;;  %v7255_v55 = vld [vmem:[#allocation5 + $0x4e4] sm:$0xf]  ;;  %v5003_v59 = vor.u32 %v7230_v49, %v5002_v48 }
  0x33   :  { %721 = vmatpush.bf16.msra.mxu1 %v5043_v19  ;;  %v5108_v56 = vld [vmem:[#allocation5 + $0x510] sm:$0xf0]  ;;  %v8000_v57 = vor.u32 %v7201_v53, %v4886_v52  ;;  %v7287_v60 = vld [vmem:[#allocation5 + $0x7e4] sm:$0xf]  ;;  %v4986_v62 = vld [vmem:[#allocation5 + $0x1e8] sm:$0xf]  ;;  %v5131_v63 = vor.u32 %v7262_v51, %v5130_v50 }
  0x34   :  { %735 = vmatpush.bf16.msra.mxu2 %v5171_v20  ;;  %749 = vmatpush.bf16.msra.mxu3 %v4919_v24  ;;  %v5236_v61 = vld [vmem:[#allocation5 + $0x810] sm:$0xf0]  ;;  %v7226_v0 = vld [vmem:[#allocation5 + $0x214] sm:$0xf0]  ;;  %v7200_v1 = vld [vmem:[#allocation2 + $0x4] sm:$0xf]  ;;  %v5111_v6 = vor.u32 %v7255_v55, %v5108_v56 }
  0x35   :  { %v4888_v2 = vld [vmem:[#allocation2 + $0xc] sm:$0xf0]  ;;  %v5114_v3 = vld [vmem:[#allocation5 + $0x4e8] sm:$0xf]  ;;  %v7251_v7 = vld [vmem:[#allocation5 + $0x484] sm:$0xf]  ;;  %v5239_v9 = vor.u32 %v7287_v60, %v5236_v61  ;;  %v4987_v10 = vor.u32 %v7226_v0, %v4986_v62 }
  0x36   :  { %708 = vmatpush.bf16.msra.mxu0 %v4899_v31  ;;  %v7258_v4 = vld [vmem:[#allocation5 + $0x514] sm:$0xf0]  ;;  %v8003_v5 = vor.u32 %v7200_v1, %v4888_v2  ;;  %v5092_v8 = vld [vmem:[#allocation5 + $0x4b0] sm:$0xf0]  ;;  %v7283_v11 = vld [vmem:[#allocation5 + $0x784] sm:$0xf] }
  0x37   :  { %722 = vmatpush.bf16.msra.mxu1 %v5027_v35  ;;  %v5220_v12 = vld [vmem:[#allocation5 + $0x7b0] sm:$0xf0]  ;;  %v4894_v13 = vld [vmem:[#allocation2 + $0x8] sm:$0xf]  ;;  %v5115_v14 = vor.u32 %v7258_v4, %v5114_v3  ;;  %v4970_v15 = vld [vmem:[#allocation5 + $0x188] sm:$0xf]  ;;  %v5095_v21 = vor.u32 %v7251_v7, %v5092_v8 }
  0x38   :  { %736 = vmatpush.bf16.msra.mxu2 %v5155_v36  ;;  %750 = vmatpush.bf16.msra.mxu3 %v4903_v39  ;;  %v7222_v16 = vld [vmem:[#allocation5 + $0x1b4] sm:$0xf0]  ;;  %v7202_v17 = vld [vmem:[#allocation2 + $0x10] sm:$0xf0]  ;;  %v5098_v18 = vld [vmem:[#allocation5 + $0x488] sm:$0xf]  ;;  %v5223_v22 = vor.u32 %v7283_v11, %v5220_v12 }
  0x39   :  { %709 = vmatmul.bf16.vlgmr.msra.gmra.mxu0 %v8000_v57  ;;  %v7254_v19 = vld [vmem:[#allocation5 + $0x4b4] sm:$0xf0]  ;;  %v8007_v20 = vor.u32 %v7202_v17, %v4894_v13  ;;  %v4971_v23 = vor.u32 %v7222_v16, %v4970_v15  ;;  %v7247_v24 = vld [vmem:[#allocation5 + $0x424] sm:$0xf]  ;;  %v5076_v25 = vld [vmem:[#allocation5 + $0x450] sm:$0xf0] }
  0x3a   :  { %757 = vmatpush.bf16.msrb.mxu0 %v5143_v40  ;;  %723 = vmatmul.bf16.vlgmr.msra.gmra.mxu1 %v8003_v5  ;;  %v7279_v26 = vld [vmem:[#allocation5 + $0x724] sm:$0xf]  ;;  %v5099_v27 = vor.u32 %v7254_v19, %v5098_v18  ;;  %v5204_v28 = vld [vmem:[#allocation5 + $0x750] sm:$0xf0]  ;;  %v4954_v29 = vld [vmem:[#allocation5 + $0x128] sm:$0xf]  ;;  %v5079_v33 = vor.u32 %v7247_v24, %v5076_v25 }
  0x3b   :  { %771 = vmatpush.bf16.msrb.mxu1 %v5271_v42  ;;  %751 = vmatmul.bf16.vlgmr.msra.gmra.mxu3 %v8000_v57  ;;  %v7218_v30 = vld [vmem:[#allocation5 + $0x154] sm:$0xf0]  ;;  %v5082_v31 = vld [vmem:[#allocation5 + $0x428] sm:$0xf]  ;;  %v5207_v34 = vor.u32 %v7279_v26, %v5204_v28  ;;  %v7243_v36 = vld [vmem:[#allocation5 + $0x3c4] sm:$0xf] }
  0x3c   :  { %785 = vmatpush.bf16.msrb.mxu2 %v5019_v43  ;;  %799 = vmatpush.bf16.msrb.mxu3 %v5147_v47  ;;  %v7250_v32 = vld [vmem:[#allocation5 + $0x454] sm:$0xf0]  ;;  %v4955_v35 = vor.u32 %v7218_v30, %v4954_v29  ;;  %v5060_v37 = vld [vmem:[#allocation5 + $0x3f0] sm:$0xf0]  ;;  %v7275_v38 = vld [vmem:[#allocation5 + $0x6c4] sm:$0xf] }
  0x3d   :  { %737 = vmatmul.bf16.vlgmr.msra.gmra.mxu2 %v8007_v20  ;;  %v5083_v39 = vor.u32 %v7250_v32, %v5082_v31  ;;  %v5188_v40 = vld [vmem:[#allocation5 + $0x6f0] sm:$0xf0]  ;;  %v4938_v41 = vld [vmem:[#allocation5 + $0xc8] sm:$0xf]  ;;  %v7214_v42 = vld [vmem:[#allocation5 + $0xf4] sm:$0xf0]  ;;  %v5063_v45 = vor.u32 %v7243_v36, %v5060_v37 }
  0x3e   :  { %758 = vmatpush.bf16.msrb.mxu0 %v5127_v54  ;;  %v5066_v43 = vld [vmem:[#allocation5 + $0x3c8] sm:$0xf]  ;;  %v7246_v44 = vld [vmem:[#allocation5 + $0x3f4] sm:$0xf0]  ;;  %v5191_v46 = vor.u32 %v7275_v38, %v5188_v40  ;;  %v4939_v47 = vor.u32 %v7214_v42, %v4938_v41  ;;  %v7239_v48 = vld [vmem:[#allocation5 + $0x364] sm:$0xf] }
  0x3f   :  { %772 = vmatpush.bf16.msrb.mxu1 %v5255_v58  ;;  %v5044_v49 = vld [vmem:[#allocation5 + $0x390] sm:$0xf0]  ;;  %v7271_v50 = vld [vmem:[#allocation5 + $0x664] sm:$0xf]  ;;  %v5067_v51 = vor.u32 %v7246_v44, %v5066_v43  ;;  %v4922_v53 = vld [vmem:[#allocation5 + $0x68] sm:$0xf] }
  0x40   :  { %786 = vmatpush.bf16.msrb.mxu2 %v5003_v59  ;;  %800 = vmatpush.bf16.msrb.mxu3 %v5131_v63  ;;  %v5172_v52 = vld [vmem:[#allocation5 + $0x690] sm:$0xf0]  ;;  %v7210_v54 = vld [vmem:[#allocation5 + $0x94] sm:$0xf0]  ;;  %v5050_v55 = vld [vmem:[#allocation5 + $0x368] sm:$0xf]  ;;  %v5047_v58 = vor.u32 %v7239_v48, %v5044_v49 }
  0x41   :  { %v7242_v56 = vld [vmem:[#allocation5 + $0x394] sm:$0xf0]  ;;  %v7235_v59 = vld [vmem:[#allocation5 + $0x304] sm:$0xf]  ;;  %v5028_v60 = vld [vmem:[#allocation5 + $0x330] sm:$0xf0]  ;;  %v5175_v61 = vor.u32 %v7271_v50, %v5172_v52  ;;  %v4923_v62 = vor.u32 %v7210_v54, %v4922_v53 }
  0x42   :  { %759 = vmatpush.bf16.msrb.mxu0 %v5111_v6  ;;  %v7267_v63 = vld [vmem:[#allocation5 + $0x604] sm:$0xf]  ;;  %v5156_v0 = vld [vmem:[#allocation5 + $0x630] sm:$0xf0]  ;;  %v4906_v1 = vld [vmem:[#allocation5 + $0x8] sm:$0xf]  ;;  %v5051_v2 = vor.u32 %v7242_v56, %v5050_v55 }
  0x43   :  { %773 = vmatpush.bf16.msrb.mxu1 %v5239_v9  ;;  %v7206_v3 = vld [vmem:[#allocation5 + $0x34] sm:$0xf0]  ;;  %v5034_v4 = vld [vmem:[#allocation5 + $0x308] sm:$0xf]  ;;  %v7232_v9 = vld [vmem:[#allocation5 + $0x2ac] sm:$0xf] }
  0x44   :  { %787 = vmatpush.bf16.msrb.mxu2 %v4987_v10  ;;  %801 = vmatpush.bf16.msrb.mxu3 %v5115_v14  ;;  %v7238_v6 = vld [vmem:[#allocation5 + $0x334] sm:$0xf0]  ;;  %v5274_v7 = vld [vmem:[#allocation5 + $0x8a8] sm:$0xf]  ;;  %v5031_v10 = vor.u32 %v7235_v59, %v5028_v60  ;;  %v5020_v11 = vld [vmem:[#allocation5 + $0x2d8] sm:$0xf0]  ;;  %v5159_v14 = vor.u32 %v7267_v63, %v5156_v0  ;;  %v4907_v15 = vor.u32 %v7206_v3, %v4906_v1 }
  0x45   :  { %v7298_v8 = vld [vmem:[#allocation5 + $0x8d4] sm:$0xf0]  ;;  %v7264_v12 = vld [vmem:[#allocation5 + $0x5ac] sm:$0xf]  ;;  %v5148_v13 = vld [vmem:[#allocation5 + $0x5d8] sm:$0xf0]  ;;  %v5035_v18 = vor.u32 %v7238_v6, %v5034_v4 }
  0x46   :  { %760 = vmatpush.bf16.msrb.mxu0 %v5095_v21  ;;  %v7296_v16 = vld [vmem:[#allocation5 + $0x8ac] sm:$0xf]  ;;  %v5276_v17 = vld [vmem:[#allocation5 + $0x8d8] sm:$0xf0]  ;;  %v5275_v19 = vor.u32 %v7298_v8, %v5274_v7  ;;  %v5023_v21 = vor.u32 %v7232_v9, %v5020_v11  ;;  %v7294_v24 = vld [vmem:[#allocation5 + $0x874] sm:$0xf0] }
  0x47   :  { %774 = vmatpush.bf16.msrb.mxu1 %v5223_v22  ;;  %v5151_v22 = vor.u32 %v7264_v12, %v5148_v13  ;;  %v7228_v25 = vld [vmem:[#allocation5 + $0x24c] sm:$0xf]  ;;  %v5279_v26 = vor.u32 %v7296_v16, %v5276_v17  ;;  %v5132_v29 = vld [vmem:[#allocation5 + $0x578] sm:$0xf0]  ;;  %v7290_v36 = vld [vmem:[#allocation5 + $0x814] sm:$0xf0] }
  0x48   :  { %788 = vmatpush.bf16.msrb.mxu2 %v4971_v23  ;;  %802 = vmatpush.bf16.msrb.mxu3 %v5099_v27  ;;  %v5258_v23 = vld [vmem:[#allocation5 + $0x848] sm:$0xf]  ;;  %v5004_v27 = vld [vmem:[#allocation5 + $0x278] sm:$0xf0]  ;;  %v7260_v28 = vld [vmem:[#allocation5 + $0x54c] sm:$0xf] }
  0x49   :  { %v7292_v30 = vld [vmem:[#allocation5 + $0x84c] sm:$0xf]  ;;  %v5260_v31 = vld [vmem:[#allocation5 + $0x878] sm:$0xf0]  ;;  %v5259_v32 = vor.u32 %v7294_v24, %v5258_v23  ;;  %v7286_v48 = vld [vmem:[#allocation5 + $0x7b4] sm:$0xf0] }
  0x4a   :  { %761 = vmatpush.bf16.msrb.mxu0 %v5079_v33  ;;  %v5007_v33 = vor.u32 %v7228_v25, %v5004_v27  ;;  %v7224_v37 = vld [vmem:[#allocation5 + $0x1ec] sm:$0xf]  ;;  %v5263_v38 = vor.u32 %v7292_v30, %v5260_v31  ;;  %v5116_v41 = vld [vmem:[#allocation5 + $0x518] sm:$0xf0]  ;;  %v5210_v60 = vld [vmem:[#allocation5 + $0x728] sm:$0xf] }
  0x4b   :  { %775 = vmatpush.bf16.msrb.mxu1 %v5207_v34  ;;  %v5135_v34 = vor.u32 %v7260_v28, %v5132_v29  ;;  %v7256_v40 = vld [vmem:[#allocation5 + $0x4ec] sm:$0xf]  ;;  %v5244_v43 = vld [vmem:[#allocation5 + $0x818] sm:$0xf0]  ;;  %v5194_v9 = vld [vmem:[#allocation5 + $0x6c8] sm:$0xf] }
  0x4c   :  { %789 = vmatpush.bf16.msrb.mxu2 %v4955_v35  ;;  %803 = vmatpush.bf16.msrb.mxu3 %v5083_v39  ;;  %v5242_v35 = vld [vmem:[#allocation5 + $0x7e8] sm:$0xf]  ;;  %v4988_v39 = vld [vmem:[#allocation5 + $0x218] sm:$0xf0]  ;;  %v7288_v42 = vld [vmem:[#allocation5 + $0x7ec] sm:$0xf] }
  0x4d   :  { %v5243_v44 = vor.u32 %v7290_v36, %v5242_v35  ;;  %v7220_v49 = vld [vmem:[#allocation5 + $0x18c] sm:$0xf]  ;;  %v5247_v50 = vor.u32 %v7288_v42, %v5244_v43  ;;  %v5100_v53 = vld [vmem:[#allocation5 + $0x4b8] sm:$0xf0]  ;;  %v7274_v23 = vld [vmem:[#allocation5 + $0x694] sm:$0xf0] }
  0x4e   :  { %762 = vmatpush.bf16.msrb.mxu0 %v5063_v45  ;;  %v4991_v45 = vor.u32 %v7224_v37, %v4988_v39  ;;  %v7252_v52 = vld [vmem:[#allocation5 + $0x48c] sm:$0xf]  ;;  %v5228_v55 = vld [vmem:[#allocation5 + $0x7b8] sm:$0xf0]  ;;  %v5394_v43 = vld [vmem:[#allocation5 + $0x2b0] sm:$0xf] }
  0x4f   :  { %776 = vmatpush.bf16.msrb.mxu1 %v5191_v46  ;;  %v5119_v46 = vor.u32 %v7256_v40, %v5116_v41  ;;  %v7284_v54 = vld [vmem:[#allocation5 + $0x78c] sm:$0xf]  ;;  %v5103_v59 = vor.u32 %v7252_v52, %v5100_v53  ;;  %v4956_v0 = vld [vmem:[#allocation5 + $0x158] sm:$0xf0]  ;;  %v7423_v52 = vld [vmem:[#allocation5 + $0x2b4] sm:$0xf] }
  0x50   :  { %790 = vmatpush.bf16.msrb.mxu2 %v4939_v47  ;;  %804 = vmatpush.bf16.msrb.mxu3 %v5067_v51  ;;  %v5226_v47 = vld [vmem:[#allocation5 + $0x788] sm:$0xf]  ;;  %v4972_v51 = vld [vmem:[#allocation5 + $0x1b8] sm:$0xf0]  ;;  %v5231_v63 = vor.u32 %v7284_v54, %v5228_v55  ;;  %v7248_v1 = vld [vmem:[#allocation5 + $0x42c] sm:$0xf] }
  0x51   :  { %v5227_v56 = vor.u32 %v7286_v48, %v5226_v47  ;;  %v7280_v3 = vld [vmem:[#allocation5 + $0x72c] sm:$0xf]  ;;  %v5212_v4 = vld [vmem:[#allocation5 + $0x758] sm:$0xf0]  ;;  %v7457_v47 = vld [vmem:[#allocation5 + $0x5dc] sm:$0xf0] }
  0x52   :  { %763 = vmatpush.bf16.msrb.mxu0 %v5047_v58  ;;  %v4975_v58 = vor.u32 %v7220_v49, %v4972_v51  ;;  %v7212_v11 = vld [vmem:[#allocation5 + $0xcc] sm:$0xf]  ;;  %v5215_v12 = vor.u32 %v7280_v3, %v5212_v4  ;;  %v4940_v13 = vld [vmem:[#allocation5 + $0xf8] sm:$0xf0]  ;;  %v5650_v48 = vld [vmem:[#allocation5 + $0x8b0] sm:$0xf] }
  0x53   :  { %777 = vmatpush.bf16.msrb.mxu1 %v5175_v61  ;;  %v7282_v61 = vld [vmem:[#allocation5 + $0x754] sm:$0xf0]  ;;  %v7276_v16 = vld [vmem:[#allocation5 + $0x6cc] sm:$0xf]  ;;  %v5196_v17 = vld [vmem:[#allocation5 + $0x6f8] sm:$0xf0] }
  0x54   :  { %791 = vmatpush.bf16.msrb.mxu2 %v4923_v62  ;;  %805 = vmatpush.bf16.msrb.mxu3 %v5051_v2  ;;  %v7216_v62 = vld [vmem:[#allocation5 + $0x12c] sm:$0xf]  ;;  %v5084_v2 = vld [vmem:[#allocation5 + $0x458] sm:$0xf0]  ;;  %v5211_v6 = vor.u32 %v7282_v61, %v5210_v60  ;;  %v5199_v25 = vor.u32 %v7276_v16, %v5196_v17  ;;  %v7489_v49 = vld [vmem:[#allocation5 + $0x8dc] sm:$0xf0] }
  0x55   :  { %v4959_v7 = vor.u32 %v7216_v62, %v4956_v0  ;;  %v5087_v8 = vor.u32 %v7248_v1, %v5084_v2  ;;  %v7208_v24 = vld [vmem:[#allocation5 + $0x6c] sm:$0xf]  ;;  %v5052_v28 = vld [vmem:[#allocation5 + $0x398] sm:$0xf0]  ;;  %v5396_v53 = vld [vmem:[#allocation5 + $0x2e0] sm:$0xf0] }
  0x56   :  { %764 = vmatpush.bf16.msrb.mxu0 %v5031_v10  ;;  %v7278_v10 = vld [vmem:[#allocation5 + $0x6f4] sm:$0xf0]  ;;  %v7240_v27 = vld [vmem:[#allocation5 + $0x36c] sm:$0xf]  ;;  %v5180_v30 = vld [vmem:[#allocation5 + $0x698] sm:$0xf0]  ;;  %v5399_v62 = vor.u32 %v7423_v52, %v5396_v53 }
  0x57   :  { %778 = vmatpush.bf16.msrb.mxu1 %v5159_v14  ;;  %v7244_v14 = vld [vmem:[#allocation5 + $0x3cc] sm:$0xf]  ;;  %v5055_v35 = vor.u32 %v7240_v27, %v5052_v28  ;;  %v4908_v37 = vld [vmem:[#allocation5 + $0x38] sm:$0xf0]  ;;  %v7421_v60 = vld [vmem:[#allocation5 + $0x27c] sm:$0xf0] }
  0x58   :  { %792 = vmatpush.bf16.msrb.mxu2 %v4907_v15  ;;  %806 = vmatpush.bf16.msrb.mxu3 %v5035_v18  ;;  %v5068_v15 = vld [vmem:[#allocation5 + $0x3f8] sm:$0xf0]  ;;  %v5195_v18 = vor.u32 %v7278_v10, %v5194_v9  ;;  %v7272_v29 = vld [vmem:[#allocation5 + $0x66c] sm:$0xf]  ;;  %v5506_v61 = vld [vmem:[#allocation5 + $0x550] sm:$0xf] }
  0x59   :  { %765 = vmatmul.bf16.vlgmr.msrb.gmra.mxu0 %v8003_v5  ;;  %v7204_v36 = vld [vmem:[#allocation5 + $0xc] sm:$0xf]  ;;  %v5183_v39 = vor.u32 %v7272_v29, %v5180_v30  ;;  %v5036_v40 = vld [vmem:[#allocation5 + $0x338] sm:$0xf0]  ;;  %v5634_v0 = vld [vmem:[#allocation5 + $0x850] sm:$0xf] }
  0x5a   :  { %813 = vmatpush.bf16.msra.mxu0 %v5275_v19  ;;  %779 = vmatmul.bf16.vlgmr.msrb.gmra.mxu1 %v8007_v20  ;;  %v4943_v19 = vor.u32 %v7212_v11, %v4940_v13  ;;  %v7268_v41 = vld [vmem:[#allocation5 + $0x60c] sm:$0xf]  ;;  %v5164_v42 = vld [vmem:[#allocation5 + $0x638] sm:$0xf0]  ;;  %v7485_v1 = vld [vmem:[#allocation5 + $0x87c] sm:$0xf0] }
  0x5b   :  { %827 = vmatpush.bf16.msra.mxu1 %v5023_v21  ;;  %793 = vmatmul.bf16.vlgmr.msrb.gmra.mxu2 %v8000_v57  ;;  %v5071_v21 = vor.u32 %v7244_v14, %v5068_v15  ;;  %v5167_v54 = vor.u32 %v7268_v41, %v5164_v42  ;;  %v7419_v2 = vld [vmem:[#allocation5 + $0x254] sm:$0xf]  ;;  %v5380_v3 = vld [vmem:[#allocation5 + $0x280] sm:$0xf0]  ;;  %v7417_v9 = vld [vmem:[#allocation5 + $0x21c] sm:$0xf0] }
  0x5c   :  { %841 = vmatpush.bf16.msra.mxu2 %v5151_v22  ;;  %855 = vmatpush.bf16.msra.mxu3 %v5279_v26  ;;  %v5178_v22 = vld [vmem:[#allocation5 + $0x668] sm:$0xf]  ;;  %v4924_v26 = vld [vmem:[#allocation5 + $0x98] sm:$0xf0]  ;;  %v5490_v10 = vld [vmem:[#allocation5 + $0x4f0] sm:$0xf]  ;;  %v5383_v11 = vor.u32 %v7419_v2, %v5380_v3 }
  0x5d   :  { %807 = vmatmul.bf16.vlgmr.msrb.gmra.mxu3 %v8003_v5  ;;  %v5179_v31 = vor.u32 %v7274_v23, %v5178_v22  ;;  %v5618_v13 = vld [vmem:[#allocation5 + $0x7f0] sm:$0xf]  ;;  %v7481_v14 = vld [vmem:[#allocation5 + $0x81c] sm:$0xf0]  ;;  %v7415_v15 = vld [vmem:[#allocation5 + $0x1f4] sm:$0xf] }
  0x5e   :  { %814 = vmatpush.bf16.msra.mxu0 %v5259_v32  ;;  %v5162_v32 = vld [vmem:[#allocation5 + $0x608] sm:$0xf]  ;;  %v5364_v16 = vld [vmem:[#allocation5 + $0x220] sm:$0xf0]  ;;  %v7413_v22 = vld [vmem:[#allocation5 + $0x1bc] sm:$0xf0] }
  0x5f   :  { %828 = vmatpush.bf16.msra.mxu1 %v5007_v33  ;;  %v7270_v33 = vld [vmem:[#allocation5 + $0x634] sm:$0xf0]  ;;  %v5474_v23 = vld [vmem:[#allocation5 + $0x490] sm:$0xf]  ;;  %v7477_v27 = vld [vmem:[#allocation5 + $0x7bc] sm:$0xf0] }
  0x60   :  { %842 = vmatpush.bf16.msra.mxu2 %v5135_v34  ;;  %856 = vmatpush.bf16.msra.mxu3 %v5263_v38  ;;  %v4927_v34 = vor.u32 %v7208_v24, %v4924_v26  ;;  %v7236_v38 = vld [vmem:[#allocation5 + $0x30c] sm:$0xf]  ;;  %v5367_v24 = vor.u32 %v7415_v15, %v5364_v16  ;;  %v5602_v26 = vld [vmem:[#allocation5 + $0x790] sm:$0xf]  ;;  %v7411_v28 = vld [vmem:[#allocation5 + $0x194] sm:$0xf] }
  0x61   :  { %v5039_v51 = vor.u32 %v7236_v38, %v5036_v40  ;;  %v5348_v29 = vld [vmem:[#allocation5 + $0x1c0] sm:$0xf0]  ;;  %v5586_v38 = vld [vmem:[#allocation5 + $0x730] sm:$0xf]  ;;  %v7407_v40 = vld [vmem:[#allocation5 + $0x134] sm:$0xf] }
  0x62   :  { %815 = vmatpush.bf16.msra.mxu0 %v5243_v44  ;;  %v7425_v44 = vld [vmem:[#allocation5 + $0x2dc] sm:$0xf0]  ;;  %v5332_v41 = vld [vmem:[#allocation5 + $0x160] sm:$0xf0]  ;;  %v7403_v52 = vld [vmem:[#allocation5 + $0xd4] sm:$0xf] }
  0x63   :  { %829 = vmatpush.bf16.msra.mxu1 %v4991_v45  ;;  %v5522_v45 = vld [vmem:[#allocation5 + $0x5b0] sm:$0xf]  ;;  %v5395_v55 = vor.u32 %v7425_v44, %v5394_v43  ;;  %v5316_v53 = vld [vmem:[#allocation5 + $0x100] sm:$0xf0]  ;;  %v7455_v16 = vld [vmem:[#allocation5 + $0x5b4] sm:$0xf] }
  0x64   :  { %843 = vmatpush.bf16.msra.mxu2 %v5119_v46  ;;  %857 = vmatpush.bf16.msra.mxu3 %v5247_v50  ;;  %v5163_v46 = vor.u32 %v7270_v33, %v5162_v32  ;;  %v4911_v50 = vor.u32 %v7204_v36, %v4908_v37  ;;  %v5603_v32 = vor.u32 %v7477_v27, %v5602_v26  ;;  %v5330_v33 = vld [vmem:[#allocation5 + $0x130] sm:$0xf]  ;;  %v7441_v37 = vld [vmem:[#allocation5 + $0x45c] sm:$0xf0]  ;;  %v5300_v2 = vld [vmem:[#allocation5 + $0xa0] sm:$0xf0] }
  0x65   :  { %v5351_v36 = vor.u32 %v7411_v28, %v5348_v29  ;;  %v5284_v15 = vld [vmem:[#allocation5 + $0x40] sm:$0xf0]  ;;  %v5530_v26 = vld [vmem:[#allocation5 + $0x5b8] sm:$0xf]  ;;  %v7458_v27 = vld [vmem:[#allocation5 + $0x5e4] sm:$0xf0] }
  0x66   :  { %816 = vmatpush.bf16.msra.mxu0 %v5227_v56  ;;  %v5523_v56 = vor.u32 %v7457_v47, %v5522_v45  ;;  %v5314_v45 = vld [vmem:[#allocation5 + $0xd0] sm:$0xf]  ;;  %s7952_s2 = smov [#allocation11]   ;;  %s4869_s21 = sshll.u32 %s8257_s5, 4  ;;  %s4870_s21 = int_to_ptr.hbm [resolvable:$true] %s4869_s21 }
  0x67   :  { %830 = vmatpush.bf16.msra.mxu1 %v4975_v58  ;;  %v5651_v58 = vor.u32 %v7489_v49, %v5650_v48  ;;  %v5442_v47 = vld [vmem:[#allocation5 + $0x3d0] sm:$0xf]  ;;  %v5335_v48 = vor.u32 %v7407_v40, %v5332_v41  ;;  %v7437_v49 = vld [vmem:[#allocation5 + $0x3fc] sm:$0xf0]  ;;  %v7454_v40 = vld [vmem:[#allocation5 + $0x584] sm:$0xf0] }
  0x68   :  { %844 = vmatpush.bf16.msra.mxu2 %v5103_v59  ;;  %858 = vmatpush.bf16.msra.mxu3 %v5231_v63  ;;  %v5378_v59 = vld [vmem:[#allocation5 + $0x250] sm:$0xf]  ;;  %v7453_v63 = vld [vmem:[#allocation5 + $0x57c] sm:$0xf0]  ;;  %s4867_s4 = sshll.u32 %s7952_s2, 4  ;;  %s7953_s22 = smov 384   ;;  %s4868_s4 = int_to_ptr.vmem [resolvable:$true] %s4867_s4 }
  0x69   :  { %v5379_v4 = vor.u32 %v7421_v60, %v5378_v59  ;;  %v7401_v59 = vld [vmem:[#allocation5 + $0x9c] sm:$0xf0]  ;;  %v5426_v60 = vld [vmem:[#allocation5 + $0x370] sm:$0xf]  ;;  %s7954_s23 = smov 24  }
  0x6a   :  { %817 = vmatpush.bf16.msra.mxu0 %v5211_v6  ;;  %v5507_v6 = vor.u32 %v7453_v63, %v5506_v61  ;;  %v5319_v61 = vor.u32 %v7403_v52, %v5316_v53  ;;  %v5554_v63 = vld [vmem:[#allocation5 + $0x670] sm:$0xf]  ;;  %v7450_v52 = vld [vmem:[#allocation5 + $0x524] sm:$0xf0] }
  0x6b   :  { %831 = vmatpush.bf16.msra.mxu1 %v4959_v7  ;;  %v5635_v7 = vor.u32 %v7485_v1, %v5634_v0  ;;  %v7465_v0 = vld [vmem:[#allocation5 + $0x69c] sm:$0xf0]  ;;  %v7399_v1 = vld [vmem:[#allocation5 + $0x74] sm:$0xf] }
  0x6c   :  { %845 = vmatpush.bf16.msra.mxu2 %v5087_v8  ;;  %859 = vmatpush.bf16.msra.mxu3 %v5215_v12  ;;  %v5362_v8 = vld [vmem:[#allocation5 + $0x1f0] sm:$0xf]  ;;  %v7449_v12 = vld [vmem:[#allocation5 + $0x51c] sm:$0xf0] }
  0x6d   :  { %v5363_v17 = vor.u32 %v7417_v9, %v5362_v8  ;;  %v5555_v8 = vor.u32 %v7465_v0, %v5554_v63  ;;  %v5410_v9 = vld [vmem:[#allocation5 + $0x310] sm:$0xf]  ;;  %v7414_v63 = vld [vmem:[#allocation5 + $0x1c4] sm:$0xf0]  ;;  %v5482_v0 = vld [vmem:[#allocation5 + $0x498] sm:$0xf] }
  0x6e   :  { %818 = vmatpush.bf16.msra.mxu0 %v5195_v18  ;;  %v5491_v18 = vor.u32 %v7449_v12, %v5490_v10  ;;  %v7429_v10 = vld [vmem:[#allocation5 + $0x33c] sm:$0xf0]  ;;  %v5303_v12 = vor.u32 %v7399_v1, %v5300_v2  ;;  %v7446_v1 = vld [vmem:[#allocation5 + $0x4c4] sm:$0xf0] }
  0x6f   :  { %832 = vmatpush.bf16.msra.mxu1 %v4943_v19  ;;  %v5619_v19 = vor.u32 %v7481_v14, %v5618_v13  ;;  %v7461_v13 = vld [vmem:[#allocation5 + $0x63c] sm:$0xf0]  ;;  %v7395_v14 = vld [vmem:[#allocation5 + $0x14] sm:$0xf] }
  0x70   :  { %846 = vmatpush.bf16.msra.mxu2 %v5071_v21  ;;  %860 = vmatpush.bf16.msra.mxu3 %v5199_v25  ;;  %v5346_v21 = vld [vmem:[#allocation5 + $0x190] sm:$0xf]  ;;  %v7445_v25 = vld [vmem:[#allocation5 + $0x4bc] sm:$0xf0]  ;;  %v5287_v28 = vor.u32 %v7395_v14, %v5284_v15  ;;  %v7442_v14 = vld [vmem:[#allocation5 + $0x464] sm:$0xf0] }
  0x71   :  { %v5347_v30 = vor.u32 %v7413_v22, %v5346_v21  ;;  %v5652_v21 = vld [vmem:[#allocation5 + $0x8e0] sm:$0xf0]  ;;  %v5402_v22 = vld [vmem:[#allocation5 + $0x2b8] sm:$0xf] }
  0x72   :  { %819 = vmatpush.bf16.msra.mxu0 %v5179_v31  ;;  %v5475_v31 = vor.u32 %v7445_v25, %v5474_v23  ;;  %v7426_v23 = vld [vmem:[#allocation5 + $0x2e4] sm:$0xf0] }
  0x73   :  { %833 = vmatpush.bf16.msra.mxu1 %v4927_v34  ;;  %v7409_v34 = vld [vmem:[#allocation5 + $0x15c] sm:$0xf0] }
  0x74   :  { %847 = vmatpush.bf16.msra.mxu2 %v5055_v35  ;;  %861 = vmatpush.bf16.msra.mxu3 %v5183_v39  ;;  %v5458_v35 = vld [vmem:[#allocation5 + $0x430] sm:$0xf]  ;;  %v7473_v39 = vld [vmem:[#allocation5 + $0x75c] sm:$0xf0]  ;;  %v5331_v42 = vor.u32 %v7409_v34, %v5330_v33  ;;  %v5508_v33 = vld [vmem:[#allocation5 + $0x580] sm:$0xf0] }
  0x75   :  { %v5459_v43 = vor.u32 %v7441_v37, %v5458_v35  ;;  %v5587_v44 = vor.u32 %v7473_v39, %v5586_v38  ;;  %v7483_v34 = vld [vmem:[#allocation5 + $0x854] sm:$0xf]  ;;  %v5531_v35 = vor.u32 %v7458_v27, %v5530_v26  ;;  %v5386_v37 = vld [vmem:[#allocation5 + $0x258] sm:$0xf]  ;;  %v7422_v38 = vld [vmem:[#allocation5 + $0x284] sm:$0xf0] }
  0x76   :  { %820 = vmatpush.bf16.msra.mxu0 %v5163_v46  ;;  %v7405_v46 = vld [vmem:[#allocation5 + $0xfc] sm:$0xf0]  ;;  %v5514_v39 = vld [vmem:[#allocation5 + $0x558] sm:$0xf]  ;;  %v7438_v27 = vld [vmem:[#allocation5 + $0x404] sm:$0xf0] }
  0x77   :  { %834 = vmatpush.bf16.msra.mxu1 %v4911_v50  ;;  %v5570_v50 = vld [vmem:[#allocation5 + $0x6d0] sm:$0xf]  ;;  %v5450_v26 = vld [vmem:[#allocation5 + $0x3d8] sm:$0xf] }
  0x78   :  { %848 = vmatpush.bf16.msra.mxu2 %v5039_v51  ;;  %862 = vmatpush.bf16.msra.mxu3 %v5167_v54  ;;  %v7469_v51 = vld [vmem:[#allocation5 + $0x6fc] sm:$0xf0]  ;;  %v5315_v54 = vor.u32 %v7405_v46, %v5314_v45  ;;  %v5492_v45 = vld [vmem:[#allocation5 + $0x520] sm:$0xf0]  ;;  %v7479_v46 = vld [vmem:[#allocation5 + $0x7f4] sm:$0xf] }
  0x79   :  { %821 = vmatmul.bf16.vlgmr.msra.gmra.mxu0 %v8007_v20 }
  0x7a   :  { %1595 = vmatpush.bf16.msrb.mxu0 %v5395_v55  ;;  %835 = vmatmul.bf16.vlgmr.msra.gmra.mxu1 %v8000_v57  ;;  %v5443_v55 = vor.u32 %v7437_v49, %v5442_v47  ;;  %v5515_v47 = vor.u32 %v7454_v40, %v5514_v39  ;;  %v5370_v49 = vld [vmem:[#allocation5 + $0x1f8] sm:$0xf]  ;;  %v7434_v39 = vld [vmem:[#allocation5 + $0x3a4] sm:$0xf0] }
  0x7b   :  { %1609 = vmatpush.bf16.msrb.mxu1 %v5523_v56  ;;  %849 = vmatmul.bf16.vlgmr.msra.gmra.mxu2 %v8003_v5  ;;  %v5571_v56 = vor.u32 %v7469_v51, %v5570_v50  ;;  %v7418_v50 = vld [vmem:[#allocation5 + $0x224] sm:$0xf0]  ;;  %v5498_v51 = vld [vmem:[#allocation5 + $0x4f8] sm:$0xf] }
  0x7c   :  { %1623 = vmatpush.bf16.msrb.mxu2 %v5651_v58  ;;  %1637 = vmatpush.bf16.msrb.mxu3 %v5399_v62  ;;  %v5298_v58 = vld [vmem:[#allocation5 + $0x70] sm:$0xf]  ;;  %v7433_v62 = vld [vmem:[#allocation5 + $0x39c] sm:$0xf0] }
  0x7d   :  { %863 = vmatmul.bf16.vlgmr.msra.gmra.mxu3 %v8007_v20  ;;  %v5299_v3 = vor.u32 %v7401_v59, %v5298_v58  ;;  %v5476_v58 = vld [vmem:[#allocation5 + $0x4c0] sm:$0xf0]  ;;  %v7475_v59 = vld [vmem:[#allocation5 + $0x794] sm:$0xf] }
  0x7e   :  { %1596 = vmatpush.bf16.msrb.mxu0 %v5379_v4  ;;  %v5282_v4 = vld [vmem:[#allocation5 + $0x10] sm:$0xf] }
  0x7f   :  { %1610 = vmatpush.bf16.msrb.mxu1 %v5507_v6  ;;  %v7397_v6 = vld [vmem:[#allocation5 + $0x3c] sm:$0xf0] }
  0x80   :  { %1624 = vmatpush.bf16.msrb.mxu2 %v5635_v7  ;;  %1638 = vmatpush.bf16.msrb.mxu3 %v5383_v11  ;;  %v5427_v7 = vor.u32 %v7433_v62, %v5426_v60  ;;  %v5538_v11 = vld [vmem:[#allocation5 + $0x610] sm:$0xf]  ;;  %v5499_v60 = vor.u32 %v7450_v52, %v5498_v51  ;;  %v5354_v62 = vld [vmem:[#allocation5 + $0x198] sm:$0xf]  ;;  %v7430_v51 = vld [vmem:[#allocation5 + $0x344] sm:$0xf0] }
  0x81   :  { %v5539_v25 = vor.u32 %v7461_v13, %v5538_v11  ;;  %v5338_v11 = vld [vmem:[#allocation5 + $0x138] sm:$0xf] }
  0x82   :  { %1597 = vmatpush.bf16.msrb.mxu0 %v5363_v17  ;;  %v5524_v17 = vld [vmem:[#allocation5 + $0x5e0] sm:$0xf0]  ;;  %v5466_v13 = vld [vmem:[#allocation5 + $0x438] sm:$0xf] }
  0x83   :  { %1611 = vmatpush.bf16.msrb.mxu1 %v5491_v18  ;;  %v7487_v18 = vld [vmem:[#allocation5 + $0x8b4] sm:$0xf]  ;;  %v5527_v29 = vor.u32 %v7455_v16, %v5524_v17  ;;  %v5658_v52 = vld [vmem:[#allocation5 + $0x8b8] sm:$0xf] }
  0x84   :  { %1625 = vmatpush.bf16.msrb.mxu2 %v5619_v19  ;;  %1639 = vmatpush.bf16.msrb.mxu3 %v5367_v24  ;;  %v5283_v19 = vor.u32 %v7397_v6, %v5282_v4  ;;  %v5411_v24 = vor.u32 %v7429_v10, %v5410_v9  ;;  %v5355_v4 = vor.u32 %v7414_v63, %v5354_v62  ;;  %v7439_v6 = vld [vmem:[#allocation5 + $0x434] sm:$0xf]  ;;  %v5588_v10 = vld [vmem:[#allocation5 + $0x760] sm:$0xf0]  ;;  %v7488_v62 = vld [vmem:[#allocation5 + $0x8bc] sm:$0xf] }
  0x85   :  { %v5483_v9 = vor.u32 %v7446_v1, %v5482_v0  ;;  %v5660_v63 = vld [vmem:[#allocation5 + $0x8e8] sm:$0xf0] }
  0x86   :  { %1598 = vmatpush.bf16.msrb.mxu0 %v5347_v30  ;;  %v5655_v30 = vor.u32 %v7487_v18, %v5652_v21  ;;  %v7435_v18 = vld [vmem:[#allocation5 + $0x3d4] sm:$0xf] }
  0x87   :  { %1612 = vmatpush.bf16.msrb.mxu1 %v5475_v31  ;;  %v5403_v31 = vor.u32 %v7426_v23, %v5402_v22  ;;  %v7467_v21 = vld [vmem:[#allocation5 + $0x6d4] sm:$0xf]  ;;  %v5467_v22 = vor.u32 %v7442_v14, %v5466_v13  ;;  %v5572_v23 = vld [vmem:[#allocation5 + $0x700] sm:$0xf0]  ;;  %v5644_v13 = vld [vmem:[#allocation5 + $0x888] sm:$0xf0] }
  0x88   :  { %1626 = vmatpush.bf16.msrb.mxu2 %v5603_v32  ;;  %1640 = vmatpush.bf16.msrb.mxu3 %v5351_v36  ;;  %v7451_v32 = vld [vmem:[#allocation5 + $0x554] sm:$0xf]  ;;  %v5636_v36 = vld [vmem:[#allocation5 + $0x880] sm:$0xf0] }
  0x89   :  { %v5511_v41 = vor.u32 %v7451_v32, %v5508_v33  ;;  %v5428_v32 = vld [vmem:[#allocation5 + $0x3a0] sm:$0xf0]  ;;  %v7463_v33 = vld [vmem:[#allocation5 + $0x674] sm:$0xf] }
  0x8a   :  { %1599 = vmatpush.bf16.msrb.mxu0 %v5331_v42  ;;  %v5639_v42 = vor.u32 %v7483_v34, %v5636_v36  ;;  %v5451_v34 = vor.u32 %v7438_v27, %v5450_v26  ;;  %v5306_v36 = vld [vmem:[#allocation5 + $0x78] sm:$0xf]  ;;  %v7480_v26 = vld [vmem:[#allocation5 + $0x7fc] sm:$0xf]  ;;  %v5628_v27 = vld [vmem:[#allocation5 + $0x828] sm:$0xf0] }
  0x8b   :  { %1613 = vmatpush.bf16.msrb.mxu1 %v5459_v43  ;;  %v5387_v43 = vor.u32 %v7422_v38, %v5386_v37  ;;  %v7402_v37 = vld [vmem:[#allocation5 + $0xa4] sm:$0xf0]  ;;  %v5434_v38 = vld [vmem:[#allocation5 + $0x378] sm:$0xf] }
  0x8c   :  { %1627 = vmatpush.bf16.msrb.mxu2 %v5587_v44  ;;  %1641 = vmatpush.bf16.msrb.mxu3 %v5335_v48  ;;  %v7447_v44 = vld [vmem:[#allocation5 + $0x4f4] sm:$0xf]  ;;  %v5620_v48 = vld [vmem:[#allocation5 + $0x820] sm:$0xf0] }
  0x8d   :  { %v5495_v53 = vor.u32 %v7447_v44, %v5492_v45  ;;  %v5307_v44 = vor.u32 %v7402_v37, %v5306_v36  ;;  %v7459_v45 = vld [vmem:[#allocation5 + $0x614] sm:$0xf]  ;;  %v5356_v36 = vld [vmem:[#allocation5 + $0x1c8] sm:$0xf0]  ;;  %v7444_v37 = vld [vmem:[#allocation5 + $0x49c] sm:$0xf] }
  0x8e   :  { %1600 = vmatpush.bf16.msrb.mxu0 %v5315_v54  ;;  %v5623_v54 = vor.u32 %v7479_v46, %v5620_v48  ;;  %v5540_v46 = vld [vmem:[#allocation5 + $0x640] sm:$0xf0]  ;;  %v5435_v48 = vor.u32 %v7434_v39, %v5434_v38  ;;  %v5484_v38 = vld [vmem:[#allocation5 + $0x4c8] sm:$0xf0]  ;;  %v7476_v39 = vld [vmem:[#allocation5 + $0x79c] sm:$0xf] }
  0x8f   :  { %1614 = vmatpush.bf16.msrb.mxu1 %v5443_v55  ;;  %v5371_v55 = vor.u32 %v7418_v50, %v5370_v49  ;;  %v7398_v49 = vld [vmem:[#allocation5 + $0x44] sm:$0xf0]  ;;  %v5418_v50 = vld [vmem:[#allocation5 + $0x318] sm:$0xf] }
  0x90   :  { %1628 = vmatpush.bf16.msrb.mxu2 %v5571_v56  ;;  %1642 = vmatpush.bf16.msrb.mxu3 %v5319_v61  ;;  %v7443_v56 = vld [vmem:[#allocation5 + $0x494] sm:$0xf]  ;;  %v5604_v61 = vld [vmem:[#allocation5 + $0x7c0] sm:$0xf0]  ;;  %v5419_v0 = vor.u32 %v7430_v51, %v5418_v50  ;;  %v5340_v50 = vld [vmem:[#allocation5 + $0x168] sm:$0xf0] }
  0x91   :  { %v5479_v2 = vor.u32 %v7443_v56, %v5476_v58  ;;  %v5404_v56 = vld [vmem:[#allocation5 + $0x2e8] sm:$0xf0]  ;;  %v7456_v58 = vld [vmem:[#allocation5 + $0x5bc] sm:$0xf] }
  0x92   :  { %1601 = vmatpush.bf16.msrb.mxu0 %v5299_v3  ;;  %v5607_v3 = vor.u32 %v7475_v59, %v5604_v61  ;;  %v5532_v59 = vld [vmem:[#allocation5 + $0x5e8] sm:$0xf0]  ;;  %v7440_v51 = vld [vmem:[#allocation5 + $0x43c] sm:$0xf] }
  0x93   :  { %1615 = vmatpush.bf16.msrb.mxu1 %v5427_v7  ;;  %v5460_v7 = vld [vmem:[#allocation5 + $0x460] sm:$0xf0] }
  0x94   :  { %1629 = vmatpush.bf16.msrb.mxu2 %v5555_v8  ;;  %1643 = vmatpush.bf16.msrb.mxu3 %v5303_v12  ;;  %v7471_v8 = vld [vmem:[#allocation5 + $0x734] sm:$0xf]  ;;  %v7410_v12 = vld [vmem:[#allocation5 + $0x164] sm:$0xf0]  ;;  %v5463_v15 = vor.u32 %v7439_v6, %v5460_v7  ;;  %v7420_v7 = vld [vmem:[#allocation5 + $0x25c] sm:$0xf] }
  0x95   :  { %v5591_v16 = vor.u32 %v7471_v8, %v5588_v10  ;;  %v5339_v17 = vor.u32 %v7410_v12, %v5338_v11  ;;  %v7486_v6 = vld [vmem:[#allocation5 + $0x884] sm:$0xf0]  ;;  %v5663_v8 = vor.u32 %v7488_v62, %v5660_v63  ;;  %v7452_v10 = vld [vmem:[#allocation5 + $0x55c] sm:$0xf]  ;;  %v5516_v11 = vld [vmem:[#allocation5 + $0x588] sm:$0xf0] }
  0x96   :  { %1602 = vmatpush.bf16.msrb.mxu0 %v5283_v19  ;;  %v5444_v19 = vld [vmem:[#allocation5 + $0x400] sm:$0xf0]  ;;  %v7484_v12 = vld [vmem:[#allocation5 + $0x85c] sm:$0xf]  ;;  %v7470_v62 = vld [vmem:[#allocation5 + $0x704] sm:$0xf0] }
  0x97   :  { %1616 = vmatpush.bf16.msrb.mxu1 %v5411_v24  ;;  %v5322_v24 = vld [vmem:[#allocation5 + $0xd8] sm:$0xf]  ;;  %v7404_v63 = vld [vmem:[#allocation5 + $0xdc] sm:$0xf] }
  0x98   :  { %1630 = vmatpush.bf16.msrb.mxu2 %v5539_v25  ;;  %1644 = vmatpush.bf16.msrb.mxu3 %v5287_v28  ;;  %v7406_v25 = vld [vmem:[#allocation5 + $0x104] sm:$0xf0]  ;;  %v5447_v28 = vor.u32 %v7435_v18, %v5444_v19  ;;  %v7416_v19 = vld [vmem:[#allocation5 + $0x1fc] sm:$0xf] }
  0x99   :  { %1603 = vmatmul.bf16.vlgmr.msrb.gmra.mxu0 %v8000_v57  ;;  %v7482_v18 = vld [vmem:[#allocation5 + $0x824] sm:$0xf0] }
  0x9a   :  { %1651 = vmatpush.bf16.msra.mxu0 %v5527_v29  ;;  %1617 = vmatmul.bf16.vlgmr.msrb.gmra.mxu1 %v8003_v5  ;;  %v5575_v29 = vor.u32 %v7467_v21, %v5572_v23  ;;  %v8022_v21 = vld [vmem:[#allocation7] sm:$0xf]  ;;  %v5372_v23 = vld [vmem:[#allocation5 + $0x228] sm:$0xf0] }
  0x9b   :  { %1665 = vmatpush.bf16.msra.mxu1 %v5655_v30  ;;  %1631 = vmatmul.bf16.vlgmr.msrb.gmra.mxu2 %v8007_v20  ;;  %v5323_v30 = vor.u32 %v7406_v25, %v5322_v24  ;;  %v7448_v24 = vld [vmem:[#allocation5 + $0x4fc] sm:$0xf]  ;;  %v5500_v25 = vld [vmem:[#allocation5 + $0x528] sm:$0xf0] }
  0x9c   :  { %1679 = vmatpush.bf16.msra.mxu2 %v5403_v31  ;;  %1693 = vmatpush.bf16.msra.mxu3 %v5531_v35  ;;  %v7431_v31 = vld [vmem:[#allocation5 + $0x374] sm:$0xf]  ;;  %v5556_v35 = vld [vmem:[#allocation5 + $0x6a0] sm:$0xf0] }
  0x9d   :  { %1645 = vmatmul.bf16.vlgmr.msrb.gmra.mxu3 %v8000_v57  ;;  %v5431_v40 = vor.u32 %v7431_v31, %v5428_v32  ;;  %v5503_v31 = vor.u32 %v7448_v24, %v5500_v25  ;;  %v5610_v32 = vld [vmem:[#allocation5 + $0x798] sm:$0xf]  ;;  %v7462_v25 = vld [vmem:[#allocation5 + $0x644] sm:$0xf0] }
  0x9e   :  { %1652 = vmatpush.bf16.msra.mxu0 %v5511_v41  ;;  %v7427_v41 = vld [vmem:[#allocation5 + $0x314] sm:$0xf] }
  0x9f   :  { %1666 = vmatpush.bf16.msra.mxu1 %v5639_v42  ;;  %v5412_v42 = vld [vmem:[#allocation5 + $0x340] sm:$0xf0] }
  0xa0   :  { %1680 = vmatpush.bf16.msra.mxu2 %v5387_v43  ;;  %1694 = vmatpush.bf16.msra.mxu3 %v5515_v47  ;;  %v5559_v43 = vor.u32 %v7463_v33, %v5556_v35  ;;  %v5290_v47 = vld [vmem:[#allocation5 + $0x18] sm:$0xf]  ;;  %v7478_v33 = vld [vmem:[#allocation5 + $0x7c4] sm:$0xf0]  ;;  %v5631_v35 = vor.u32 %v7480_v26, %v5628_v27  ;;  %v7396_v26 = vld [vmem:[#allocation5 + $0x1c] sm:$0xf] }
  0xa1   :  { %v5291_v61 = vor.u32 %v7398_v49, %v5290_v47  ;;  %v7474_v47 = vld [vmem:[#allocation5 + $0x764] sm:$0xf0]  ;;  %v5292_v27 = vld [vmem:[#allocation5 + $0x48] sm:$0xf0] }
  0xa2   :  { %1653 = vmatpush.bf16.msra.mxu0 %v5495_v53  ;;  %v7490_v53 = vld [vmem:[#allocation5 + $0x8e4] sm:$0xf0] }
  0xa3   :  { %1667 = vmatpush.bf16.msra.mxu1 %v5623_v54  ;;  %v7424_v54 = vld [vmem:[#allocation5 + $0x2bc] sm:$0xf]  ;;  %v5659_v1 = vor.u32 %v7490_v53, %v5658_v52  ;;  %v5468_v52 = vld [vmem:[#allocation5 + $0x468] sm:$0xf0] }
  0xa4   :  { %1681 = vmatpush.bf16.msra.mxu2 %v5371_v55  ;;  %1695 = vmatpush.bf16.msra.mxu3 %v5499_v60  ;;  %v5415_v55 = vor.u32 %v7427_v41, %v5412_v42  ;;  %v5543_v60 = vor.u32 %v7459_v45, %v5540_v46  ;;  %v5611_v42 = vor.u32 %v7478_v33, %v5610_v32  ;;  %v5594_v46 = vld [vmem:[#allocation5 + $0x738] sm:$0xf]  ;;  %v7472_v53 = vld [vmem:[#allocation5 + $0x73c] sm:$0xf]  ;;  %v5420_v32 = vld [vmem:[#allocation5 + $0x348] sm:$0xf0] }
  0xa5   :  { %v5487_v45 = vor.u32 %v7444_v37, %v5484_v38  ;;  %v7460_v33 = vld [vmem:[#allocation5 + $0x61c] sm:$0xf]  ;;  %v7513_v37 = vld [vmem:[#allocation8 + $0x3b0] sm:$0xf0] }
  0xa6   :  { %1654 = vmatpush.bf16.msra.mxu0 %v5479_v2  ;;  %v5407_v2 = vor.u32 %v7424_v54, %v5404_v56  ;;  %v5596_v54 = vld [vmem:[#allocation5 + $0x768] sm:$0xf0]  ;;  %v5595_v56 = vor.u32 %v7474_v47, %v5594_v46 }
  0xa7   :  { %1668 = vmatpush.bf16.msra.mxu1 %v5607_v3  ;;  %v5535_v3 = vor.u32 %v7456_v58, %v5532_v59 }
  0xa8   :  { %1682 = vmatpush.bf16.msra.mxu2 %v5355_v4  ;;  %1696 = vmatpush.bf16.msra.mxu3 %v5483_v9  ;;  %v5642_v4 = vld [vmem:[#allocation5 + $0x858] sm:$0xf]  ;;  %v5388_v9 = vld [vmem:[#allocation5 + $0x288] sm:$0xf0] }
  0xa9   :  { %v5643_v14 = vor.u32 %v7486_v6, %v5642_v4  ;;  %v7468_v4 = vld [vmem:[#allocation5 + $0x6dc] sm:$0xf]  ;;  %v5580_v6 = vld [vmem:[#allocation5 + $0x708] sm:$0xf0] }
  0xaa   :  { %1655 = vmatpush.bf16.msra.mxu0 %v5463_v15  ;;  %v5626_v15 = vld [vmem:[#allocation5 + $0x7f8] sm:$0xf] }
  0xab   :  { %1669 = vmatpush.bf16.msra.mxu1 %v5591_v16  ;;  %v5391_v16 = vor.u32 %v7420_v7, %v5388_v9 }
  0xac   :  { %1683 = vmatpush.bf16.msra.mxu2 %v5339_v17  ;;  %1697 = vmatpush.bf16.msra.mxu3 %v5467_v22  ;;  %v5519_v17 = vor.u32 %v7452_v10, %v5516_v11  ;;  %v5647_v22 = vor.u32 %v7484_v12, %v5644_v13  ;;  %v5562_v10 = vld [vmem:[#allocation5 + $0x678] sm:$0xf]  ;;  %v7466_v11 = vld [vmem:[#allocation5 + $0x6a4] sm:$0xf0]  ;;  %v7400_v12 = vld [vmem:[#allocation5 + $0x7c] sm:$0xf]  ;;  %v5583_v13 = vor.u32 %v7468_v4, %v5580_v6 }
  0xae   :  { %1656 = vmatpush.bf16.msra.mxu0 %v5447_v28  ;;  %v5627_v28 = vor.u32 %v7482_v18, %v5626_v15  ;;  %v7432_v15 = vld [vmem:[#allocation5 + $0x37c] sm:$0xf]  ;;  %v5564_v18 = vld [vmem:[#allocation5 + $0x6a8] sm:$0xf0] }
  0xaf   :  { %1670 = vmatpush.bf16.msra.mxu1 %v5575_v29  ;;  %v197_v29 = vperm.slane %v8022_v21, 0 }
  0xb0   :  { %1684 = vmatpush.bf16.msra.mxu2 %v5323_v30  ;;  %1698 = vmatpush.bf16.msra.mxu3 %v5451_v34  ;;  %v5375_v30 = vor.u32 %v7416_v19, %v5372_v23  ;;  %v7412_v34 = vld [vmem:[#allocation5 + $0x19c] sm:$0xf]  ;;  %v5563_v19 = vor.u32 %v7466_v11, %v5562_v10  ;;  %v7498_v10 = vld [vmem:[#allocation8 + $0x338] sm:$0xf0]  ;;  %v5678_v11 = vld [vmem:[#allocation8 + $0x318] sm:$0xf] }
  0xb2   :  { %1657 = vmatpush.bf16.msra.mxu0 %v5431_v40  ;;  %v5612_v40 = vld [vmem:[#allocation5 + $0x7c8] sm:$0xf0] }
  0xb3   :  { %1671 = vmatpush.bf16.msra.mxu1 %v5559_v43  ;;  %v5615_v49 = vor.u32 %v7476_v39, %v5612_v40  ;;  %v5295_v39 = vor.u32 %v7396_v26, %v5292_v27  ;;  %v5752_v26 = vld [vmem:[#allocation8 + $0x3b4] sm:$0xf0] }
  0xb4   :  { %1685 = vmatpush.bf16.msra.mxu2 %v5307_v44  ;;  %1699 = vmatpush.bf16.msra.mxu3 %v5435_v48  ;;  %v5359_v44 = vor.u32 %v7412_v34, %v5356_v36  ;;  %v7408_v48 = vld [vmem:[#allocation5 + $0x13c] sm:$0xf]  ;;  %v5750_v36 = vld [vmem:[#allocation8 + $0x3a8] sm:$0xf]  ;;  %v5822_v27 = vld [vmem:[#allocation8 + $0x438] sm:$0xf] }
  0xb5   :  { %v5343_v59 = vor.u32 %v7408_v48, %v5340_v50  ;;  %v198_v48 = vperm.slane %v8022_v21, 1 }
  0xb6   :  { %1658 = vmatpush.bf16.msra.mxu0 %v5415_v55  ;;  %v710_v41 = vpop.f32.mrf.mxu0 }
  0xb7   :  { %1672 = vmatpush.bf16.msra.mxu1 %v5543_v60  ;;  %v711_v43 = vadd.f32 %v710_v41, %v197_v29  ;;  %v724_v55 = vpop.f32.mrf.mxu1  ;;  %v5471_v60 = vor.u32 %v7440_v51, %v5468_v52  ;;  %v5726_v52 = vld [vmem:[#allocation8 + $0x378] sm:$0xf] }
  0xb8   :  { %1686 = vmatpush.bf16.msra.mxu2 %v5291_v61  ;;  %1700 = vmatpush.bf16.msra.mxu3 %v5419_v0  ;;  %v5578_v61 = vld [vmem:[#allocation5 + $0x6d8] sm:$0xf]  ;;  %v5599_v0 = vor.u32 %v7472_v53, %v5596_v54  ;;  %v7507_v53 = vld [vmem:[#allocation8 + $0x380] sm:$0xf0] }
  0xb9   :  { %1659 = vmatmul.bf16.vlgmr.msra.gmra.mxu0 %v8003_v5  ;;  %v725_v58 = vadd.f32 %v724_v55, %v711_v43  ;;  %v5579_v7 = vor.u32 %v7470_v62, %v5578_v61  ;;  %v5727_v55 = vor.u32 %v7507_v53, %v5726_v52 }
  0xba   :  { %1707 = vmatpush.bf16.msrb.mxu0 %v5659_v1  ;;  %1673 = vmatmul.bf16.vlgmr.msra.gmra.mxu1 %v8007_v20  ;;  %v5324_v1 = vld [vmem:[#allocation5 + $0x108] sm:$0xf0] }
  0xbb   :  { %1721 = vmatpush.bf16.msrb.mxu1 %v5407_v2  ;;  %1687 = vmatmul.bf16.vlgmr.msra.gmra.mxu2 %v8000_v57  ;;  %v7436_v2 = vld [vmem:[#allocation5 + $0x3dc] sm:$0xf] }
  0xbc   :  { %1735 = vmatpush.bf16.msrb.mxu2 %v5535_v3  ;;  %1749 = vmatpush.bf16.msrb.mxu3 %v5663_v8  ;;  %v5452_v3 = vld [vmem:[#allocation5 + $0x408] sm:$0xf0]  ;;  %v5327_v8 = vor.u32 %v7404_v63, %v5324_v1 }
  0xbd   :  { %1701 = vmatmul.bf16.vlgmr.msra.gmra.mxu3 %v8003_v5  ;;  %v5455_v9 = vor.u32 %v7436_v2, %v5452_v3  ;;  %v5702_v2 = vld [vmem:[#allocation8 + $0x348] sm:$0xf]  ;;  %v7501_v3 = vld [vmem:[#allocation8 + $0x350] sm:$0xf0] }
  0xbe   :  { %1708 = vmatpush.bf16.msrb.mxu0 %v5643_v14  ;;  %v5308_v14 = vld [vmem:[#allocation5 + $0xa8] sm:$0xf0]  ;;  %v8033_v43 = vpop.f32.mrf.mxu0  ;;  %v752_v46 = vpop.f32.mrf.mxu3  ;;  %v5703_v6 = vor.u32 %v7501_v3, %v5702_v2  ;;  %v5786_v2 = vld [vmem:[#allocation8 + $0x3f0] sm:$0xf]  ;;  %v7522_v3 = vld [vmem:[#allocation8 + $0x3f8] sm:$0xf0] }
  0xbf   :  { %1722 = vmatpush.bf16.msrb.mxu1 %v5391_v16  ;;  %v5436_v16 = vld [vmem:[#allocation5 + $0x3a8] sm:$0xf0]  ;;  %v5311_v23 = vor.u32 %v7400_v12, %v5308_v14  ;;  %v8035_v47 = vpop.f32.mrf.mxu1  ;;  %v753_v50 = vadd.f32 %v752_v46, %v198_v48  ;;  %v5846_v14 = vld [vmem:[#allocation8 + $0x468] sm:$0xf] }
  0xc0   :  { %1736 = vmatpush.bf16.msrb.mxu2 %v5519_v17  ;;  %1750 = vmatpush.bf16.msrb.mxu3 %v5647_v22  ;;  %v7464_v17 = vld [vmem:[#allocation5 + $0x67c] sm:$0xf]  ;;  %v5546_v22 = vld [vmem:[#allocation5 + $0x618] sm:$0xf]  ;;  %v5439_v24 = vor.u32 %v7432_v15, %v5436_v16  ;;  %v7537_v15 = vld [vmem:[#allocation8 + $0x470] sm:$0xf0] }
  0xc1   :  { %v5547_v38 = vor.u32 %v7462_v25, %v5546_v22  ;;  %v5666_v22 = vld [vmem:[#allocation8 + $0x300] sm:$0xf]  ;;  %v7512_v25 = vld [vmem:[#allocation8 + $0x3ac] sm:$0xf] }
  0xc2   :  { %1709 = vmatpush.bf16.msrb.mxu0 %v5627_v28  ;;  %v738_v28 = vpop.f32.mrf.mxu2 }
  0xc3   :  { %1723 = vmatpush.bf16.msrb.mxu1 %v5375_v30  ;;  %v5567_v30 = vor.u32 %v7464_v17, %v5564_v18  ;;  %v8031_v34 = vadd.f32 %v738_v28, %v725_v58  ;;  %v5847_v17 = vor.u32 %v7537_v15, %v5846_v14  ;;  %v5834_v18 = vld [vmem:[#allocation8 + $0x450] sm:$0xf]  ;;  %v7531_v28 = vld [vmem:[#allocation8 + $0x440] sm:$0xf0]  ;;  %v7497_v15 = vld [vmem:[#allocation8 + $0x334] sm:$0xf] }
  0xc4   :  { %1737 = vmatpush.bf16.msrb.mxu2 %v5503_v31  ;;  %1751 = vmatpush.bf16.msrb.mxu3 %v5631_v35  ;;  %v7428_v31 = vld [vmem:[#allocation5 + $0x31c] sm:$0xf]  ;;  %v5548_v35 = vld [vmem:[#allocation5 + $0x648] sm:$0xf0]  ;;  %v7519_v14 = vld [vmem:[#allocation8 + $0x3e0] sm:$0xf0] }
  0xc5   :  { %v5423_v40 = vor.u32 %v7428_v31, %v5420_v32  ;;  %v5551_v41 = vor.u32 %v7460_v33, %v5548_v35  ;;  %v5755_v31 = vor.u32 %v7512_v25, %v5752_v26  ;;  %v5823_v32 = vor.u32 %v7531_v28, %v5822_v27  ;;  %v7509_v33 = vld [vmem:[#allocation8 + $0x394] sm:$0xf]  ;;  %v5740_v35 = vld [vmem:[#allocation8 + $0x39c] sm:$0xf0]  ;;  %v7516_v25 = vld [vmem:[#allocation8 + $0x3c8] sm:$0xf0] }
  0xc6   :  { %1710 = vmatpush.bf16.msrb.mxu0 %v5611_v42  ;;  %v5751_v42 = vor.u32 %v7513_v37, %v5750_v36  ;;  %v8046_v58 = vpop.f32.mrf.mxu3  ;;  %v5810_v36 = vld [vmem:[#allocation8 + $0x420] sm:$0xf]  ;;  %v7528_v37 = vld [vmem:[#allocation8 + $0x428] sm:$0xf0]  ;;  %v7494_v26 = vld [vmem:[#allocation8 + $0x31c] sm:$0xf] }
  0xc7   :  { %1724 = vmatpush.bf16.msrb.mxu1 %v5359_v44  ;;  %v5738_v44 = vld [vmem:[#allocation8 + $0x390] sm:$0xf]  ;;  %v5680_v28 = vld [vmem:[#allocation8 + $0x324] sm:$0xf0] }
  0xc8   :  { %1738 = vmatpush.bf16.msrb.mxu2 %v5487_v45  ;;  %1752 = vmatpush.bf16.msrb.mxu3 %v5615_v49  ;;  %v7510_v45 = vld [vmem:[#allocation8 + $0x398] sm:$0xf0] }
  0xc9   :  { %v5739_v49 = vor.u32 %v7510_v45, %v5738_v44 }
  0xca   :  { %1711 = vmatpush.bf16.msrb.mxu0 %v5595_v56  ;;  %v8044_v51 = vpop.f32.mrf.mxu2 }
  0xcb   :  { %1725 = vmatpush.bf16.msrb.mxu1 %v5343_v59  ;;  %v5714_v59 = vld [vmem:[#allocation8 + $0x360] sm:$0xf] }
  0xcc   :  { %1739 = vmatpush.bf16.msrb.mxu2 %v5471_v60  ;;  %1753 = vmatpush.bf16.msrb.mxu3 %v5599_v0  ;;  %v7504_v60 = vld [vmem:[#allocation8 + $0x368] sm:$0xf0]  ;;  %v199_v0 = vperm.slane %v8022_v21, 2 }
  0xcd   :  { %v5715_v62 = vor.u32 %v7504_v60, %v5714_v59 }
  0xce   :  { %1712 = vmatpush.bf16.msrb.mxu0 %v5579_v7 }
  0xcf   :  { %1726 = vmatpush.bf16.msrb.mxu1 %v5327_v8 }
  0xd0   :  { %1740 = vmatpush.bf16.msrb.mxu2 %v5455_v9  ;;  %1754 = vmatpush.bf16.msrb.mxu3 %v5583_v13  ;;  %v5690_v9 = vld [vmem:[#allocation8 + $0x330] sm:$0xf]  ;;  %v7495_v13 = vld [vmem:[#allocation8 + $0x320] sm:$0xf0] }
  0xd1   :  { %v5691_v12 = vor.u32 %v7498_v10, %v5690_v9  ;;  %v5679_v16 = vor.u32 %v7495_v13, %v5678_v11  ;;  %v5774_v13 = vld [vmem:[#allocation8 + $0x3d8] sm:$0xf] }
  0xd2   :  { %1713 = vmatpush.bf16.msrb.mxu0 %v5563_v19  ;;  %v7534_v19 = vld [vmem:[#allocation8 + $0x458] sm:$0xf0] }
  0xd3   :  { %1727 = vmatpush.bf16.msrb.mxu1 %v5311_v23  ;;  %v7492_v23 = vld [vmem:[#allocation8 + $0x308] sm:$0xf0] }
  0xd4   :  { %1741 = vmatpush.bf16.msrb.mxu2 %v5439_v24  ;;  %1755 = vmatpush.bf16.msrb.mxu3 %v5567_v30  ;;  %v5835_v24 = vor.u32 %v7534_v19, %v5834_v18  ;;  %v5667_v30 = vor.u32 %v7492_v23, %v5666_v22  ;;  %v5942_v19 = vld [vmem:[#allocation8 + $0x528] sm:$0xf]  ;;  %v7561_v22 = vld [vmem:[#allocation8 + $0x530] sm:$0xf0] }
  0xd5   :  { %v5943_v23 = vor.u32 %v7561_v22, %v5942_v19  ;;  %v5894_v19 = vld [vmem:[#allocation8 + $0x4c8] sm:$0xf]  ;;  %v7549_v22 = vld [vmem:[#allocation8 + $0x4d0] sm:$0xf0] }
  0xd6   :  { %1714 = vmatpush.bf16.msrb.mxu0 %v5547_v38  ;;  %v766_v54 = vpop.f32.mrf.mxu0 }
  0xd7   :  { %1728 = vmatpush.bf16.msrb.mxu1 %v5295_v39  ;;  %v767_v56 = vadd.f32 %v766_v54, %v753_v50  ;;  %v780_v61 = vpop.f32.mrf.mxu1  ;;  %v5743_v39 = vor.u32 %v7509_v33, %v5740_v35  ;;  %v200_v50 = vperm.slane %v8022_v21, 3  ;;  %v5798_v54 = vld [vmem:[#allocation8 + $0x408] sm:$0xf]  ;;  %v5930_v35 = vld [vmem:[#allocation8 + $0x510] sm:$0xf] }
  0xd8   :  { %1742 = vmatpush.bf16.msrb.mxu2 %v5423_v40  ;;  %1756 = vmatpush.bf16.msrb.mxu3 %v5551_v41  ;;  %v5811_v40 = vor.u32 %v7528_v37, %v5810_v36  ;;  %v7506_v41 = vld [vmem:[#allocation8 + $0x37c] sm:$0xf]  ;;  %v7491_v37 = vld [vmem:[#allocation8 + $0x304] sm:$0xf] }
  0xd9   :  { %1715 = vmatmul.bf16.vlgmr.msrb.gmra.mxu0 %v8007_v20  ;;  %v8048_v63 = vadd.f32 %v780_v61, %v767_v56  ;;  %v7503_v56 = vld [vmem:[#allocation8 + $0x364] sm:$0xf]  ;;  %v5716_v61 = vld [vmem:[#allocation8 + $0x36c] sm:$0xf0]  ;;  %v7558_v36 = vld [vmem:[#allocation8 + $0x518] sm:$0xf0] }
  0xda   :  { %2415 = vmatpush.bf16.msra.mxu0 %v5751_v42  ;;  %1729 = vmatmul.bf16.vlgmr.msrb.gmra.mxu1 %v8000_v57  ;;  %v5728_v42 = vld [vmem:[#allocation8 + $0x384] sm:$0xf0] }
  0xdb   :  { %1743 = vmatmul.bf16.vlgmr.msrb.gmra.mxu2 %v8003_v5  ;;  %1757 = vmatmul.bf16.vlgmr.msrb.gmra.mxu3 %v8007_v20  ;;  %v5731_v45 = vor.u32 %v7506_v41, %v5728_v42  ;;  %v7533_v42 = vld [vmem:[#allocation8 + $0x454] sm:$0xf] }
  0xdc   :  { %2429 = vmatpush.bf16.msra.mxu1 %v5847_v17  ;;  %v5692_v17 = vld [vmem:[#allocation8 + $0x33c] sm:$0xf0]  ;;  %2443 = vmatpush.bf16.msra.mxu2 %v5943_v23  ;;  %v6014_v23 = vld [vmem:[#allocation8 + $0x5b8] sm:$0xf] }
  0xdd   :  { %v5695_v18 = vor.u32 %v7497_v15, %v5692_v17  ;;  %v7527_v15 = vld [vmem:[#allocation8 + $0x424] sm:$0xf] }
  0xde   :  { %2416 = vmatpush.bf16.msra.mxu0 %v5739_v49  ;;  %v794_v1 = vpop.f32.mrf.mxu2  ;;  %v8053_v38 = vpop.f32.mrf.mxu0 }
  0xdf   :  { %v795_v4 = vadd.f32 %v794_v1, %v199_v0  ;;  %v8055_v44 = vpop.f32.mrf.mxu1  ;;  %v5719_v1 = vor.u32 %v7503_v56, %v5716_v61  ;;  %v7555_v56 = vld [vmem:[#allocation8 + $0x500] sm:$0xf0] }
  0xe0   :  { %v808_v7 = vpop.f32.mrf.mxu3  ;;  %2430 = vmatpush.bf16.msra.mxu1 %v5835_v24  ;;  %v5762_v24 = vld [vmem:[#allocation8 + $0x3c0] sm:$0xf] }
  0xe1   :  { %v809_v8 = vadd.f32 %v808_v7, %v795_v4  ;;  %v7500_v4 = vld [vmem:[#allocation8 + $0x34c] sm:$0xf]  ;;  %v5787_v7 = vor.u32 %v7522_v3, %v5786_v2  ;;  %v5763_v27 = vor.u32 %v7516_v25, %v5762_v24  ;;  %v5824_v2 = vld [vmem:[#allocation8 + $0x444] sm:$0xf0]  ;;  %v5895_v24 = vor.u32 %v7549_v22, %v5894_v19  ;;  %v7579_v25 = vld [vmem:[#allocation8 + $0x5c0] sm:$0xf0] }
  0xe2   :  { %2417 = vmatpush.bf16.msra.mxu0 %v5727_v55  ;;  %v7525_v55 = vld [vmem:[#allocation8 + $0x410] sm:$0xf0] }
  0xe3   :  { %v5799_v60 = vor.u32 %v7525_v55, %v5798_v54  ;;  %v5918_v54 = vld [vmem:[#allocation8 + $0x4f8] sm:$0xf] }
  0xe4   :  { %2431 = vmatpush.bf16.msra.mxu1 %v5823_v32  ;;  %v5683_v32 = vor.u32 %v7494_v26, %v5680_v28  ;;  %v5919_v61 = vor.u32 %v7555_v56, %v5918_v54  ;;  %v6015_v28 = vor.u32 %v7579_v25, %v6014_v23  ;;  %v7570_v23 = vld [vmem:[#allocation8 + $0x578] sm:$0xf0]  ;;  %v5944_v25 = vld [vmem:[#allocation8 + $0x534] sm:$0xf0] }
  0xe6   :  { %2418 = vmatpush.bf16.msra.mxu0 %v5715_v62  ;;  %v8057_v46 = vpop.f32.mrf.mxu2 }
  0xe8   :  { %2432 = vmatpush.bf16.msra.mxu1 %v5811_v40  ;;  %v8062_v53 = vpop.f32.mrf.mxu3  ;;  %v5668_v40 = vld [vmem:[#allocation8 + $0x30c] sm:$0xf0] }
  0xe9   :  { %v5671_v41 = vor.u32 %v7491_v37, %v5668_v40  ;;  %v6002_v37 = vld [vmem:[#allocation8 + $0x5a0] sm:$0xf]  ;;  %v7576_v40 = vld [vmem:[#allocation8 + $0x5a8] sm:$0xf0] }
  0xea   :  { %2419 = vmatpush.bf16.msra.mxu0 %v5703_v6 }
  0xec   :  { %2433 = vmatpush.bf16.msra.mxu1 %v5799_v60  ;;  %v7585_v60 = vld [vmem:[#allocation8 + $0x5f0] sm:$0xf0] }
  0xee   :  { %2420 = vmatpush.bf16.msra.mxu0 %v5691_v12 }
  0xf0   :  { %2434 = vmatpush.bf16.msra.mxu1 %v5787_v7  ;;  %v7552_v7 = vld [vmem:[#allocation8 + $0x4e8] sm:$0xf0] }
  0xf2   :  { %2421 = vmatpush.bf16.msra.mxu0 %v5679_v16  ;;  %v5775_v16 = vor.u32 %v7519_v14, %v5774_v13 }
  0xf4   :  { %2435 = vmatpush.bf16.msra.mxu1 %v5775_v16  ;;  %v5812_v16 = vld [vmem:[#allocation8 + $0x42c] sm:$0xf0] }
  0xf6   :  { %2422 = vmatpush.bf16.msra.mxu0 %v5667_v30  ;;  %v822_v49 = vpop.f32.mrf.mxu0  ;;  %v7536_v30 = vld [vmem:[#allocation8 + $0x46c] sm:$0xf] }
  0xf7   :  { %v8060_v52 = vadd.f32 %v822_v49, %v809_v8  ;;  %v836_v59 = vpop.f32.mrf.mxu1  ;;  %v5704_v8 = vld [vmem:[#allocation8 + $0x354] sm:$0xf0] }
  0xf8   :  { %v837_v62 = vadd.f32 %v836_v59, %v200_v50  ;;  %v5707_v10 = vor.u32 %v7500_v4, %v5704_v8  ;;  %2436 = vmatpush.bf16.msra.mxu1 %v5763_v27  ;;  %v6038_v59 = vld [vmem:[#allocation8 + $0x5e8] sm:$0xf]  ;;  %v8072_v8 = vld [vmem:[#allocation7 + $0x4] sm:$0xf] }
  0xf9   :  { %v1107_v17 = vperm.slane %v8072_v8, 0 }
  0xfa   :  { %2471 = vmatpush.bf16.msrb.mxu0 %v5755_v31  ;;  %v5848_v31 = vld [vmem:[#allocation8 + $0x474] sm:$0xf0] }
  0xfb   :  { %v5851_v33 = vor.u32 %v7536_v30, %v5848_v31  ;;  %v7524_v30 = vld [vmem:[#allocation8 + $0x40c] sm:$0xf]  ;;  %v5800_v31 = vld [vmem:[#allocation8 + $0x414] sm:$0xf0] }
  0xfd   :  { %2485 = vmatpush.bf16.msrb.mxu1 %v5851_v33 }
  0xfe   :  { %2472 = vmatpush.bf16.msrb.mxu0 %v5743_v39  ;;  %v850_v6 = vpop.f32.mrf.mxu2  ;;  %v5931_v39 = vor.u32 %v7558_v36, %v5930_v35  ;;  %v8070_v3 = vpop.f32.mrf.mxu0  ;;  %v5882_v35 = vld [vmem:[#allocation8 + $0x4b0] sm:$0xf]  ;;  %v7546_v36 = vld [vmem:[#allocation8 + $0x4b8] sm:$0xf0] }
  0xff   :  { %v851_v9 = vadd.f32 %v850_v6, %v837_v62  ;;  %v8068_v55 = vpop.f32.mrf.mxu1  ;;  %v6039_v62 = vor.u32 %v7585_v60, %v6038_v59  ;;  %v5906_v6 = vld [vmem:[#allocation8 + $0x4e0] sm:$0xf]  ;;  %v5870_v59 = vld [vmem:[#allocation8 + $0x498] sm:$0xf]  ;;  %v7543_v60 = vld [vmem:[#allocation8 + $0x4a0] sm:$0xf0] }
 0x100   :  { %v864_v11 = vpop.f32.mrf.mxu3  ;;  %2444 = vmatpush.bf16.msra.mxu2 %v5931_v39  ;;  %v5883_v39 = vor.u32 %v7546_v36, %v5882_v35 }
 0x101   :  { %v8066_v12 = vadd.f32 %v864_v11, %v851_v9  ;;  %2457 = vmatpush.bf16.msra.mxu3 %v6039_v62  ;;  %v5907_v9 = vor.u32 %v7552_v7, %v5906_v6  ;;  %v7582_v11 = vld [vmem:[#allocation8 + $0x5d8] sm:$0xf0]  ;;  %v5871_v62 = vor.u32 %v7543_v60, %v5870_v59  ;;  %v5746_v59 = vld [vmem:[#allocation8 + $0x398] sm:$0xf] }
 0x102   :  { %2473 = vmatpush.bf16.msrb.mxu0 %v5731_v45  ;;  %v5836_v45 = vld [vmem:[#allocation8 + $0x45c] sm:$0xf0]  ;;  %v7518_v7 = vld [vmem:[#allocation8 + $0x3dc] sm:$0xf] }
 0x103   :  { %v5839_v49 = vor.u32 %v7533_v42, %v5836_v45  ;;  %v7521_v42 = vld [vmem:[#allocation8 + $0x3f4] sm:$0xf]  ;;  %v5788_v45 = vld [vmem:[#allocation8 + $0x3fc] sm:$0xf0] }
 0x104   :  { %2445 = vmatpush.bf16.msra.mxu2 %v5919_v61  ;;  %v5791_v54 = vor.u32 %v7521_v42, %v5788_v45  ;;  %v5990_v61 = vld [vmem:[#allocation8 + $0x588] sm:$0xf]  ;;  %v7557_v42 = vld [vmem:[#allocation8 + $0x514] sm:$0xf]  ;;  %v5932_v45 = vld [vmem:[#allocation8 + $0x51c] sm:$0xf0] }
 0x105   :  { %2486 = vmatpush.bf16.msrb.mxu1 %v5839_v49 }
 0x106   :  { %2474 = vmatpush.bf16.msrb.mxu0 %v5719_v1  ;;  %v7530_v1 = vld [vmem:[#allocation8 + $0x43c] sm:$0xf]  ;;  %v8074_v13 = vpop.f32.mrf.mxu2 }
 0x107   :  { %v5827_v4 = vor.u32 %v7530_v1, %v5824_v2  ;;  %v7573_v1 = vld [vmem:[#allocation8 + $0x590] sm:$0xf0] }
 0x108   :  { %2446 = vmatpush.bf16.msra.mxu2 %v5907_v9  ;;  %v5991_v6 = vor.u32 %v7573_v1, %v5990_v61  ;;  %v5776_v9 = vld [vmem:[#allocation8 + $0x3e4] sm:$0xf0]  ;;  %v7511_v61 = vld [vmem:[#allocation8 + $0x3a0] sm:$0xf0]  ;;  %v7564_v1 = vld [vmem:[#allocation8 + $0x548] sm:$0xf0] }
 0x109   :  { %2487 = vmatpush.bf16.msrb.mxu1 %v5827_v4 }
 0x10a   :  { %2475 = vmatpush.bf16.msrb.mxu0 %v5707_v10  ;;  %v6026_v10 = vld [vmem:[#allocation8 + $0x5d0] sm:$0xf] }
 0x10b   :  { %v6027_v14 = vor.u32 %v7582_v11, %v6026_v10  ;;  %v5779_v11 = vor.u32 %v7518_v7, %v5776_v9  ;;  %v7584_v7 = vld [vmem:[#allocation8 + $0x5ec] sm:$0xf] }
 0x10c   :  { %2447 = vmatpush.bf16.msra.mxu2 %v5895_v24  ;;  %v7560_v24 = vld [vmem:[#allocation8 + $0x52c] sm:$0xf] }
 0x10d   :  { %2458 = vmatpush.bf16.msra.mxu3 %v6027_v14 }
 0x10e   :  { %2476 = vmatpush.bf16.msrb.mxu0 %v5695_v18  ;;  %v5815_v18 = vor.u32 %v7527_v15, %v5812_v16  ;;  %v5858_v15 = vld [vmem:[#allocation8 + $0x480] sm:$0xf]  ;;  %v7540_v16 = vld [vmem:[#allocation8 + $0x488] sm:$0xf0] }
 0x10f   :  { %v5859_v22 = vor.u32 %v7540_v16, %v5858_v15  ;;  %v5734_v16 = vld [vmem:[#allocation8 + $0x380] sm:$0xf] }
 0x110   :  { %2488 = vmatpush.bf16.msrb.mxu1 %v5815_v18  ;;  %2448 = vmatpush.bf16.msra.mxu2 %v5883_v39  ;;  %v5978_v18 = vld [vmem:[#allocation8 + $0x570] sm:$0xf]  ;;  %v5966_v39 = vld [vmem:[#allocation8 + $0x558] sm:$0xf] }
 0x111   :  { %2459 = vmatpush.bf16.msra.mxu3 %v6015_v28  ;;  %v7515_v28 = vld [vmem:[#allocation8 + $0x3c4] sm:$0xf] }
 0x112   :  { %2477 = vmatpush.bf16.msrb.mxu0 %v5683_v32  ;;  %v5803_v32 = vor.u32 %v7524_v30, %v5800_v31  ;;  %v5764_v30 = vld [vmem:[#allocation8 + $0x3cc] sm:$0xf0]  ;;  %v8077_v31 = vpop.f32.mrf.mxu3 }
 0x113   :  { %v5767_v35 = vor.u32 %v7515_v28, %v5764_v30  ;;  %v5722_v30 = vld [vmem:[#allocation8 + $0x368] sm:$0xf] }
 0x114   :  { %2489 = vmatpush.bf16.msrb.mxu1 %v5803_v32  ;;  %2449 = vmatpush.bf16.msra.mxu2 %v5871_v62  ;;  %v5758_v32 = vld [vmem:[#allocation8 + $0x3b0] sm:$0xf]  ;;  %v5954_v62 = vld [vmem:[#allocation8 + $0x540] sm:$0xf] }
 0x116   :  { %2478 = vmatpush.bf16.msrb.mxu0 %v5671_v41  ;;  %v1604_v26 = vpop.f32.mrf.mxu0  ;;  %v6003_v41 = vor.u32 %v7576_v40, %v6002_v37  ;;  %v7567_v40 = vld [vmem:[#allocation8 + $0x560] sm:$0xf0] }
 0x117   :  { %v1618_v27 = vpop.f32.mrf.mxu1  ;;  %v1605_v33 = vadd.f32 %v1604_v26, %v1107_v17  ;;  %v5979_v26 = vor.u32 %v7570_v23, %v5978_v18  ;;  %v7508_v18 = vld [vmem:[#allocation8 + $0x388] sm:$0xf0]  ;;  %v7581_v23 = vld [vmem:[#allocation8 + $0x5d4] sm:$0xf] }
 0x118   :  { %2460 = vmatpush.bf16.msra.mxu3 %v6003_v41  ;;  %2490 = vmatpush.bf16.msrb.mxu1 %v5791_v54  ;;  %v5967_v41 = vor.u32 %v7567_v40, %v5966_v39  ;;  %v5935_v54 = vor.u32 %v7557_v42, %v5932_v45  ;;  %v6016_v39 = vld [vmem:[#allocation8 + $0x5c4] sm:$0xf0] }
 0x119   :  { %v1619_v56 = vadd.f32 %v1618_v27, %v1605_v33  ;;  %v5947_v27 = vor.u32 %v7560_v24, %v5944_v25  ;;  %v7514_v33 = vld [vmem:[#allocation8 + $0x3b8] sm:$0xf0]  ;;  %2450 = vmatpush.bf16.msra.mxu2 %v5859_v22  ;;  %v5908_v22 = vld [vmem:[#allocation8 + $0x4ec] sm:$0xf0]  ;;  %v1108_v24 = vperm.slane %v8072_v8, 1 }
 0x11c   :  { %2461 = vmatpush.bf16.msra.mxu3 %v5991_v6  ;;  %2491 = vmatpush.bf16.msrb.mxu1 %v5779_v11  ;;  %v5920_v6 = vld [vmem:[#allocation8 + $0x504] sm:$0xf0]  ;;  %v5747_v11 = vor.u32 %v7511_v61, %v5746_v59  ;;  %v7545_v59 = vld [vmem:[#allocation8 + $0x4b4] sm:$0xf]  ;;  %v5884_v61 = vld [vmem:[#allocation8 + $0x4bc] sm:$0xf0] }
 0x11d   :  { %2499 = vmatpush.bf16.msrb.mxu2 %v5947_v27  ;;  %v5735_v27 = vor.u32 %v7508_v18, %v5734_v16  ;;  %v7572_v16 = vld [vmem:[#allocation8 + $0x58c] sm:$0xf] }
 0x11e   :  { %v1632_v49 = vpop.f32.mrf.mxu2  ;;  %v1606_v2 = vpop.f32.mrf.mxu0 }
 0x11f   :  { %v1620_v4 = vpop.f32.mrf.mxu1  ;;  %v1607_v10 = vadd.f32 %v1606_v2, %v1107_v17  ;;  %v1633_v14 = vadd.f32 %v1632_v49, %v1619_v56  ;;  %v5759_v56 = vor.u32 %v7514_v33, %v5758_v32  ;;  %v5955_v2 = vor.u32 %v7564_v1, %v5954_v62  ;;  %v7548_v32 = vld [vmem:[#allocation8 + $0x4cc] sm:$0xf]  ;;  %v5896_v33 = vld [vmem:[#allocation8 + $0x4d4] sm:$0xf0]  ;;  %v7575_v62 = vld [vmem:[#allocation8 + $0x5a4] sm:$0xf] }
 0x120   :  { %2462 = vmatpush.bf16.msra.mxu3 %v5979_v26  ;;  %2492 = vmatpush.bf16.msrb.mxu1 %v5767_v35  ;;  %v6028_v26 = vld [vmem:[#allocation8 + $0x5dc] sm:$0xf0]  ;;  %v7578_v35 = vld [vmem:[#allocation8 + $0x5bc] sm:$0xf] }
 0x121   :  { %v1621_v19 = vadd.f32 %v1620_v4, %v1607_v10  ;;  %v1763_v36 = vmax.f32 %v1633_v14, 0.0  ;;  %2500 = vmatpush.bf16.msrb.mxu2 %v5935_v54  ;;  %v7554_v4 = vld [vmem:[#allocation8 + $0x4fc] sm:$0xf]  ;;  %v6040_v10 = vld [vmem:[#allocation8 + $0x5f4] sm:$0xf0]  ;;  %v1646_v14 = vpop.f32.mrf.mxu3  ;;  %v6031_v28 = vor.u32 %v7581_v23, %v6028_v26  ;;  %v6019_v42 = vor.u32 %v7578_v35, %v6016_v39 }
 0x122   :  { %v5923_v9 = vor.u32 %v7554_v4, %v5920_v6  ;;  %v6043_v15 = vor.u32 %v7584_v7, %v6040_v10  ;;  %v7502_v54 = vld [vmem:[#allocation8 + $0x358] sm:$0xf0]  ;;  %v6004_v4 = vld [vmem:[#allocation8 + $0x5ac] sm:$0xf0]  ;;  %v5698_v10 = vld [vmem:[#allocation8 + $0x338] sm:$0xf] }
 0x123   :  { %v6007_v7 = vor.u32 %v7575_v62, %v6004_v4  ;;  %v7569_v35 = vld [vmem:[#allocation8 + $0x574] sm:$0xf]  ;;  %v7538_v39 = vld [vmem:[#allocation8 + $0x478] sm:$0xf0] }
 0x124   :  { %2463 = vmatpush.bf16.msra.mxu3 %v5967_v41  ;;  %v7321_v62 = vld [vmem:[#allocation8 + $0xb0] sm:$0xf0] }
 0x125   :  { %2501 = vmatpush.bf16.msrb.mxu2 %v5923_v9 }
 0x126   :  { %v1634_v17 = vpop.f32.mrf.mxu2 }
 0x127   :  { %v1635_v37 = vadd.f32 %v1634_v17, %v1621_v19  ;;  %v7551_v19 = vld [vmem:[#allocation8 + $0x4e4] sm:$0xf]  ;;  %v7505_v17 = vld [vmem:[#allocation8 + $0x370] sm:$0xf0] }
 0x128   :  { %2464 = vmatpush.bf16.msra.mxu3 %v5955_v2  ;;  %v5911_v25 = vor.u32 %v7551_v19, %v5908_v22  ;;  %v5723_v41 = vor.u32 %v7505_v17, %v5722_v30  ;;  %v5887_v2 = vor.u32 %v7545_v59, %v5884_v61  ;;  %v5992_v22 = vld [vmem:[#allocation8 + $0x594] sm:$0xf0]  ;;  %v5686_v30 = vld [vmem:[#allocation8 + $0x320] sm:$0xf]  ;;  %v5854_v17 = vld [vmem:[#allocation8 + $0x470] sm:$0xf] }
 0x129   :  { %v1767_v49 = vmax.f32 %v1635_v37, 0.0  ;;  %v5899_v37 = vor.u32 %v7548_v32, %v5896_v33  ;;  %v5995_v26 = vor.u32 %v7572_v16, %v5992_v22  ;;  %v7539_v32 = vld [vmem:[#allocation8 + $0x484] sm:$0xf]  ;;  %v5860_v33 = vld [vmem:[#allocation8 + $0x48c] sm:$0xf0]  ;;  %v5855_v61 = vor.u32 %v7538_v39, %v5854_v17 }
 0x12a   :  { %2502 = vmatpush.bf16.msrb.mxu2 %v5911_v25  ;;  %v6134_v59 = vld [vmem:[#allocation8 + $0xa8] sm:$0xf]  ;;  %v5956_v22 = vld [vmem:[#allocation8 + $0x54c] sm:$0xf0]  ;;  %v7315_v17 = vld [vmem:[#allocation8 + $0x80] sm:$0xf0] }
 0x12b   :  { %v8079_v60 = vpack.c.bf16 %v1767_v49, %v1763_v36  ;;  %v1647_v36 = vadd.f32 %v1646_v14, %v1108_v24  ;;  %v5710_v49 = vld [vmem:[#allocation8 + $0x350] sm:$0xf]  ;;  %v7542_v14 = vld [vmem:[#allocation8 + $0x49c] sm:$0xf]  ;;  %v6098_v39 = vld [vmem:[#allocation8 + $0x60] sm:$0xf] }
 0x12c   :  { %2513 = vmatpush.bf16.msrb.mxu3 %v6043_v15  ;;  %v5711_v6 = vor.u32 %v7502_v54, %v5710_v49  ;;  %v5872_v15 = vld [vmem:[#allocation8 + $0x4a4] sm:$0xf0] }
 0x12d   :  { %2423 = vmatmul.bf16.vlgmr.msra.gmra.mxu0 %v8079_v60  ;;  %v5875_v19 = vor.u32 %v7542_v14, %v5872_v15  ;;  %v6122_v14 = vld [vmem:[#allocation8 + $0x90] sm:$0xf] }
 0x12e   :  { %2527 = vmatpush.bf16.msra.mxu0 %v5759_v56  ;;  %2503 = vmatpush.bf16.msrb.mxu2 %v5899_v37  ;;  %v1648_v56 = vpop.f32.mrf.mxu3 }
 0x12f   :  { %v1649_v9 = vadd.f32 %v1648_v56, %v1108_v24  ;;  %v7496_v24 = vld [vmem:[#allocation8 + $0x328] sm:$0xf0]  ;;  %v7493_v56 = vld [vmem:[#allocation8 + $0x310] sm:$0xf0] }
 0x130   :  { %2514 = vmatpush.bf16.msrb.mxu3 %v6031_v28 }
 0x132   :  { %2528 = vmatpush.bf16.msra.mxu0 %v5747_v11  ;;  %v7499_v11 = vld [vmem:[#allocation8 + $0x340] sm:$0xf0]  ;;  %2504 = vmatpush.bf16.msrb.mxu2 %v5887_v2  ;;  %v5968_v2 = vld [vmem:[#allocation8 + $0x564] sm:$0xf0] }
 0x133   :  { %v5699_v25 = vor.u32 %v7499_v11, %v5698_v10  ;;  %v6135_v11 = vor.u32 %v7321_v62, %v6134_v59  ;;  %v6086_v62 = vld [vmem:[#allocation8 + $0x48] sm:$0xf] }
 0x134   :  { %2515 = vmatpush.bf16.msrb.mxu3 %v6019_v42  ;;  %v5687_v42 = vor.u32 %v7496_v24, %v5686_v30  ;;  %v6110_v24 = vld [vmem:[#allocation8 + $0x78] sm:$0xf] }
 0x136   :  { %v1660_v40 = vpop.f32.mrf.mxu0  ;;  %2529 = vmatpush.bf16.msra.mxu0 %v5735_v27  ;;  %2505 = vmatpush.bf16.msrb.mxu2 %v5875_v19  ;;  %v7563_v19 = vld [vmem:[#allocation8 + $0x544] sm:$0xf] }
 0x137   :  { %v1674_v45 = vpop.f32.mrf.mxu1  ;;  %v1661_v1 = vadd.f32 %v1660_v40, %v1647_v36  ;;  %v5863_v40 = vor.u32 %v7539_v32, %v5860_v33  ;;  %v5818_v32 = vld [vmem:[#allocation8 + $0x428] sm:$0xf]  ;;  %v7529_v33 = vld [vmem:[#allocation8 + $0x430] sm:$0xf0] }
 0x138   :  { %2516 = vmatpush.bf16.msrb.mxu3 %v6007_v7  ;;  %v7535_v7 = vld [vmem:[#allocation8 + $0x460] sm:$0xf0] }
 0x139   :  { %v1675_v18 = vadd.f32 %v1674_v45, %v1661_v1  ;;  %v5674_v45 = vld [vmem:[#allocation8 + $0x308] sm:$0xf]  ;;  %v7566_v1 = vld [vmem:[#allocation8 + $0x55c] sm:$0xf] }
 0x13a   :  { %2530 = vmatpush.bf16.msra.mxu0 %v5723_v41  ;;  %v5980_v41 = vld [vmem:[#allocation8 + $0x57c] sm:$0xf0]  ;;  %2506 = vmatpush.bf16.msrb.mxu2 %v5863_v40  ;;  %v5675_v10 = vor.u32 %v7493_v56, %v5674_v45  ;;  %v7312_v40 = vld [vmem:[#allocation8 + $0x68] sm:$0xf0] }
 0x13b   :  { %v1764_v36 = vmax.f32 %v1675_v18, 0.0  ;;  %v5983_v49 = vor.u32 %v7569_v35, %v5980_v41  ;;  %v7318_v18 = vld [vmem:[#allocation8 + $0x98] sm:$0xf0]  ;;  %v6111_v35 = vor.u32 %v7315_v17, %v6110_v24  ;;  %v5806_v41 = vld [vmem:[#allocation8 + $0x410] sm:$0xf]  ;;  %v6099_v56 = vor.u32 %v7312_v40, %v6098_v39 }
 0x13c   :  { %2517 = vmatpush.bf16.msrb.mxu3 %v5995_v26  ;;  %v7532_v26 = vld [vmem:[#allocation8 + $0x448] sm:$0xf0]  ;;  %v5950_v17 = vld [vmem:[#allocation8 + $0x530] sm:$0xf] }
 0x13d   :  { %2479 = vmatmul.bf16.vlgmr.msrb.gmra.mxu0 %v8079_v60 }
 0x13e   :  { %v1662_v23 = vpop.f32.mrf.mxu0  ;;  %2531 = vmatpush.bf16.msra.mxu0 %v5711_v6  ;;  %v5842_v6 = vld [vmem:[#allocation8 + $0x458] sm:$0xf]  ;;  %v1688_v15 = vpop.f32.mrf.mxu2 }
 0x13f   :  { %v1663_v27 = vadd.f32 %v1662_v23, %v1649_v9  ;;  %v1676_v28 = vpop.f32.mrf.mxu1  ;;  %v5971_v9 = vor.u32 %v7566_v1, %v5968_v2  ;;  %v5843_v16 = vor.u32 %v7535_v7, %v5842_v6  ;;  %v7309_v1 = vld [vmem:[#allocation8 + $0x50] sm:$0xf0]  ;;  %v5794_v2 = vld [vmem:[#allocation8 + $0x3f8] sm:$0xf]  ;;  %v7523_v6 = vld [vmem:[#allocation8 + $0x400] sm:$0xf0] }
 0x140   :  { %2518 = vmatpush.bf16.msrb.mxu3 %v5983_v49  ;;  %v1702_v23 = vpop.f32.mrf.mxu3 }
 0x141   :  { %v1677_v37 = vadd.f32 %v1676_v28, %v1663_v27  ;;  %v5959_v27 = vor.u32 %v7563_v19, %v5956_v22  ;;  %v6123_v28 = vor.u32 %v7318_v18, %v6122_v14  ;;  %v7306_v18 = vld [vmem:[#allocation8 + $0x38] sm:$0xf0]  ;;  %v5782_v19 = vld [vmem:[#allocation8 + $0x3e0] sm:$0xf]  ;;  %v7520_v22 = vld [vmem:[#allocation8 + $0x3e8] sm:$0xf0] }
 0x142   :  { %2532 = vmatpush.bf16.msra.mxu0 %v5699_v25  ;;  %v5830_v25 = vld [vmem:[#allocation8 + $0x440] sm:$0xf] }
 0x143   :  { %v1768_v54 = vmax.f32 %v1677_v37, 0.0  ;;  %v5831_v30 = vor.u32 %v7532_v26, %v5830_v25  ;;  %v5819_v37 = vor.u32 %v7529_v33, %v5818_v32 }
 0x144   :  { %2519 = vmatpush.bf16.msrb.mxu3 %v5971_v9  ;;  %v1110_v9 = vperm.slane %v8072_v8, 3 }
 0x145   :  { %v8084_v4 = vpack.c.bf16 %v1768_v54, %v1764_v36  ;;  %v1109_v36 = vperm.slane %v8072_v8, 2 }
 0x146   :  { %2533 = vmatpush.bf16.msra.mxu0 %v5687_v42  ;;  %v7526_v42 = vld [vmem:[#allocation8 + $0x418] sm:$0xf0]  ;;  %v1690_v45 = vpop.f32.mrf.mxu2 }
 0x147   :  { %2437 = vmatmul.bf16.vlgmr.msra.gmra.mxu1 %v8084_v4  ;;  %v1689_v59 = vadd.f32 %v1688_v15, %v1109_v36  ;;  %v1691_v7 = vadd.f32 %v1690_v45, %v1109_v36  ;;  %v5795_v15 = vor.u32 %v7523_v6, %v5794_v2  ;;  %v5770_v36 = vld [vmem:[#allocation8 + $0x3c8] sm:$0xf]  ;;  %v7345_v45 = vld [vmem:[#allocation8 + $0x170] sm:$0xf0]  ;;  %v6050_v6 = vld [vmem:[#allocation8] sm:$0xf] }
 0x148   :  { %2541 = vmatpush.bf16.msra.mxu1 %v5855_v61  ;;  %2520 = vmatpush.bf16.msrb.mxu3 %v5959_v27  ;;  %v1704_v49 = vpop.f32.mrf.mxu3 }
 0x149   :  { %v1703_v14 = vadd.f32 %v1702_v23, %v1689_v59  ;;  %v1705_v25 = vadd.f32 %v1704_v49, %v1691_v7  ;;  %v6062_v23 = vld [vmem:[#allocation8 + $0x18] sm:$0xf]  ;;  %v7300_v7 = vld [vmem:[#allocation8 + $0x8] sm:$0xf0] }
 0x14a   :  { %2534 = vmatpush.bf16.msra.mxu0 %v5675_v10  ;;  %v6087_v10 = vor.u32 %v7309_v1, %v6086_v62  ;;  %v7559_v62 = vld [vmem:[#allocation8 + $0x520] sm:$0xf0] }
 0x14c   :  { %2542 = vmatpush.bf16.msra.mxu1 %v5843_v16  ;;  %v6074_v16 = vld [vmem:[#allocation8 + $0x30] sm:$0xf] }
 0x14d   :  { %2535 = vmatmul.bf16.vlgmr.msra.gmra.mxu0 %v8079_v60  ;;  %v5807_v60 = vor.u32 %v7526_v42, %v5806_v41  ;;  %v6075_v24 = vor.u32 %v7306_v18, %v6074_v16  ;;  %v6230_v42 = vld [vmem:[#allocation8 + $0x168] sm:$0xf]  ;;  %v6136_v16 = vld [vmem:[#allocation8 + $0xb4] sm:$0xf0] }
 0x14e   :  { %3095 = vmatpush.bf16.msrb.mxu0 %v6135_v11  ;;  %v713_v11 = vadd.f32 %v8033_v43, %v197_v29  ;;  %v5783_v29 = vor.u32 %v7520_v22, %v5782_v19  ;;  %v7562_v43 = vld [vmem:[#allocation8 + $0x538] sm:$0xf0]  ;;  %v6231_v2 = vor.u32 %v7345_v45, %v6230_v42  ;;  %v869_v22 = vmax.f32 %v8031_v34, 0.0 }
 0x150   :  { %2543 = vmatpush.bf16.msra.mxu1 %v5831_v30  ;;  %v727_v32 = vadd.f32 %v8035_v47, %v713_v11 }
 0x152   :  { %3096 = vmatpush.bf16.msrb.mxu0 %v6123_v28  ;;  %v741_v59 = vadd.f32 %v8044_v51, %v727_v32  ;;  %v6046_v32 = vld [vmem:[#allocation8 + $0x5f0] sm:$0xf] }
 0x154   :  { %2544 = vmatpush.bf16.msra.mxu1 %v5819_v37  ;;  %v7517_v37 = vld [vmem:[#allocation8 + $0x3d0] sm:$0xf0] }
 0x156   :  { %v1716_v54 = vpop.f32.mrf.mxu0  ;;  %3097 = vmatpush.bf16.msrb.mxu0 %v6111_v35  ;;  %v7303_v35 = vld [vmem:[#allocation8 + $0x20] sm:$0xf0] }
 0x157   :  { %v1730_v61 = vpop.f32.mrf.mxu1  ;;  %2493 = vmatmul.bf16.vlgmr.msrb.gmra.mxu1 %v8084_v4  ;;  %v1717_v26 = vadd.f32 %v1716_v54, %v1703_v14  ;;  %v5951_v54 = vor.u32 %v7562_v43, %v5950_v17  ;;  %v7342_v14 = vld [vmem:[#allocation8 + $0x158] sm:$0xf0]  ;;  %v7317_v43 = vld [vmem:[#allocation8 + $0x94] sm:$0xf] }
 0x158   :  { %2545 = vmatpush.bf16.msra.mxu1 %v5807_v60  ;;  %v1731_v28 = vadd.f32 %v1730_v61, %v1110_v9  ;;  %v5771_v61 = vor.u32 %v7517_v37, %v5770_v36  ;;  %v5938_v60 = vld [vmem:[#allocation8 + $0x518] sm:$0xf] }
 0x159   :  { %v1765_v39 = vmax.f32 %v1717_v26, 0.0  ;;  %v5939_v51 = vor.u32 %v7559_v62, %v5938_v60  ;;  %v7314_v60 = vld [vmem:[#allocation8 + $0x7c] sm:$0xf]  ;;  %v6112_v62 = vld [vmem:[#allocation8 + $0x84] sm:$0xf0] }
 0x15a   :  { %3098 = vmatpush.bf16.msrb.mxu0 %v6099_v56  ;;  %v6063_v56 = vor.u32 %v7303_v35, %v6062_v23  ;;  %v6124_v23 = vld [vmem:[#allocation8 + $0x9c] sm:$0xf0] }
 0x15b   :  { %v6127_v45 = vor.u32 %v7317_v43, %v6124_v23  ;;  %v5878_v43 = vld [vmem:[#allocation8 + $0x4a0] sm:$0xf]  ;;  %v7544_v23 = vld [vmem:[#allocation8 + $0x4a8] sm:$0xf0] }
 0x15c   :  { %2546 = vmatpush.bf16.msra.mxu1 %v5795_v15  ;;  %v7320_v15 = vld [vmem:[#allocation8 + $0xac] sm:$0xf] }
 0x15d   :  { %v6139_v17 = vor.u32 %v7320_v15, %v6136_v16  ;;  %v6182_v15 = vld [vmem:[#allocation8 + $0x108] sm:$0xf]  ;;  %v7333_v16 = vld [vmem:[#allocation8 + $0x110] sm:$0xf0] }
 0x15e   :  { %v1744_v27 = vpop.f32.mrf.mxu2  ;;  %v1758_v8 = vpop.f32.mrf.mxu3  ;;  %3099 = vmatpush.bf16.msrb.mxu0 %v6087_v10  ;;  %v6218_v10 = vld [vmem:[#allocation8 + $0x150] sm:$0xf] }
 0x15f   :  { %v1718_v30 = vpop.f32.mrf.mxu0  ;;  %v1732_v41 = vpop.f32.mrf.mxu1  ;;  %v1745_v49 = vadd.f32 %v1744_v27, %v1731_v28  ;;  %v5926_v27 = vld [vmem:[#allocation8 + $0x500] sm:$0xf]  ;;  %v7556_v28 = vld [vmem:[#allocation8 + $0x508] sm:$0xf0] }
 0x160   :  { %v1719_v33 = vadd.f32 %v1718_v30, %v1705_v25  ;;  %2547 = vmatpush.bf16.msra.mxu1 %v5783_v29  ;;  %v1733_v1 = vadd.f32 %v1732_v41, %v1110_v9  ;;  %v873_v25 = vmax.f32 %v741_v59, 0.0  ;;  %v6051_v9 = vor.u32 %v7300_v7, %v6050_v6  ;;  %v6206_v29 = vld [vmem:[#allocation8 + $0x138] sm:$0xf]  ;;  %v7550_v6 = vld [vmem:[#allocation8 + $0x4d8] sm:$0xf0] }
 0x161   :  { %v1759_v18 = vadd.f32 %v1758_v8, %v1745_v49  ;;  %v7339_v8 = vld [vmem:[#allocation8 + $0x140] sm:$0xf0]  ;;  %v5927_v34 = vor.u32 %v7556_v28, %v5926_v27  ;;  %v6034_v49 = vld [vmem:[#allocation8 + $0x5d8] sm:$0xf]  ;;  %v6183_v27 = vor.u32 %v7333_v16, %v6182_v15 }
 0x162   :  { %v1769_v40 = vmax.f32 %v1719_v33, 0.0  ;;  %3100 = vmatpush.bf16.msrb.mxu0 %v6075_v24  ;;  %v6219_v24 = vor.u32 %v7342_v14, %v6218_v10  ;;  %v7586_v33 = vld [vmem:[#allocation8 + $0x5f8] sm:$0xf0]  ;;  %v6207_v42 = vor.u32 %v7339_v8, %v6206_v29  ;;  %v8103_v59 = vpack.c.bf16 %v873_v25, %v869_v22  ;;  %v7580_v14 = vld [vmem:[#allocation8 + $0x5c8] sm:$0xf0] }
 0x163   :  { %v1766_v35 = vmax.f32 %v1759_v18, 0.0  ;;  %v6047_v37 = vor.u32 %v7586_v33, %v6046_v32  ;;  %v6115_v10 = vor.u32 %v7314_v60, %v6112_v62  ;;  %v7311_v18 = vld [vmem:[#allocation8 + $0x64] sm:$0xf]  ;;  %v755_v22 = vadd.f32 %v8046_v58, %v198_v48  ;;  %v7330_v32 = vld [vmem:[#allocation8 + $0xf8] sm:$0xf0] }
 0x164   :  { %v8096_v47 = vpack.c.bf16 %v1769_v40, %v1765_v39  ;;  %2548 = vmatpush.bf16.msra.mxu1 %v5771_v61  ;;  %v5914_v39 = vld [vmem:[#allocation8 + $0x4e8] sm:$0xf]  ;;  %v7553_v40 = vld [vmem:[#allocation8 + $0x4f0] sm:$0xf0]  ;;  %v7336_v61 = vld [vmem:[#allocation8 + $0x128] sm:$0xf0] }
 0x165   :  { %v7308_v33 = vld [vmem:[#allocation8 + $0x4c] sm:$0xf]  ;;  %v6088_v29 = vld [vmem:[#allocation8 + $0x54] sm:$0xf0]  ;;  %v769_v48 = vadd.f32 %v8053_v38, %v755_v22  ;;  %v7571_v62 = vld [vmem:[#allocation8 + $0x580] sm:$0xf0] }
 0x166   :  { %v1746_v11 = vpop.f32.mrf.mxu2  ;;  %2451 = vmatmul.bf16.vlgmr.msra.gmra.mxu2 %v8096_v47  ;;  %3101 = vmatpush.bf16.msrb.mxu0 %v6063_v56  ;;  %v1760_v26 = vpop.f32.mrf.mxu3  ;;  %v6194_v56 = vld [vmem:[#allocation8 + $0x120] sm:$0xf]  ;;  %v5986_v60 = vld [vmem:[#allocation8 + $0x578] sm:$0xf] }
 0x167   :  { %v1747_v19 = vadd.f32 %v1746_v11, %v1733_v1  ;;  %2555 = vmatpush.bf16.msra.mxu2 %v5951_v54  ;;  %2549 = vmatmul.bf16.vlgmr.msra.gmra.mxu1 %v8084_v4  ;;  %v7583_v54 = vld [vmem:[#allocation8 + $0x5e0] sm:$0xf0]  ;;  %v5915_v4 = vor.u32 %v7553_v40, %v5914_v39  ;;  %v6195_v7 = vor.u32 %v7336_v61, %v6194_v56  ;;  %v6022_v11 = vld [vmem:[#allocation8 + $0x5c0] sm:$0xf]  ;;  %v6158_v39 = vld [vmem:[#allocation8 + $0xd8] sm:$0xf] }
 0x168   :  { %3109 = vmatpush.bf16.msrb.mxu1 %v6231_v2  ;;  %v6035_v1 = vor.u32 %v7583_v54, %v6034_v49  ;;  %v5902_v2 = vld [vmem:[#allocation8 + $0x4d0] sm:$0xf]  ;;  %v6023_v25 = vor.u32 %v7580_v14, %v6022_v11  ;;  %v7327_v40 = vld [vmem:[#allocation8 + $0xe0] sm:$0xf0]  ;;  %v5879_v49 = vor.u32 %v7544_v23, %v5878_v43  ;;  %v5866_v54 = vld [vmem:[#allocation8 + $0x488] sm:$0xf]  ;;  %v783_v56 = vadd.f32 %v8055_v44, %v769_v48 }
 0x169   :  { %v1761_v30 = vadd.f32 %v1760_v26, %v1747_v19  ;;  %v6100_v19 = vld [vmem:[#allocation8 + $0x6c] sm:$0xf0]  ;;  %v5890_v26 = vld [vmem:[#allocation8 + $0x4b8] sm:$0xf]  ;;  %v7541_v61 = vld [vmem:[#allocation8 + $0x490] sm:$0xf0] }
 0x16a   :  { %3102 = vmatpush.bf16.msrb.mxu0 %v6051_v9  ;;  %v7547_v9 = vld [vmem:[#allocation8 + $0x4c0] sm:$0xf0]  ;;  %v6103_v28 = vor.u32 %v7311_v18, %v6100_v19  ;;  %v7302_v11 = vld [vmem:[#allocation8 + $0x1c] sm:$0xf]  ;;  %v6064_v14 = vld [vmem:[#allocation8 + $0x24] sm:$0xf0]  ;;  %v5867_v15 = vor.u32 %v7541_v61, %v5866_v54 }
 0x16b   :  { %v1770_v36 = vmax.f32 %v1761_v30, 0.0  ;;  %2556 = vmatpush.bf16.msra.mxu2 %v5939_v51  ;;  %v5903_v51 = vor.u32 %v7550_v6, %v5902_v2  ;;  %v6010_v30 = vld [vmem:[#allocation8 + $0x5a8] sm:$0xf]  ;;  %v5891_v8 = vor.u32 %v7547_v9, %v5890_v26  ;;  %v7369_v6 = vld [vmem:[#allocation8 + $0x230] sm:$0xf0]  ;;  %v870_v18 = vmax.f32 %v8048_v63, 0.0 }
 0x16c   :  { %3110 = vmatpush.bf16.msrb.mxu1 %v6219_v24  ;;  %v7577_v24 = vld [vmem:[#allocation8 + $0x5b0] sm:$0xf0]  ;;  %v6326_v2 = vld [vmem:[#allocation8 + $0x228] sm:$0xf]  ;;  %v7344_v44 = vld [vmem:[#allocation8 + $0x16c] sm:$0xf]  ;;  %v6067_v9 = vor.u32 %v7302_v11, %v6064_v14 }
 0x16d   :  { %v8101_v41 = vpack.c.bf16 %v1770_v36, %v1766_v35  ;;  %3103 = vmatmul.bf16.vlgmr.msrb.gmra.mxu0 %v8103_v59  ;;  %v6011_v58 = vor.u32 %v7577_v24, %v6010_v30  ;;  %v6091_v36 = vor.u32 %v7308_v33, %v6088_v29  ;;  %v6232_v16 = vld [vmem:[#allocation8 + $0x174] sm:$0xf0]  ;;  %v874_v19 = vmax.f32 %v783_v56, 0.0  ;;  %v7366_v30 = vld [vmem:[#allocation8 + $0x218] sm:$0xf0] }
 0x16e   :  { %3151 = vmatpush.bf16.msra.mxu0 %v6139_v17  ;;  %v6170_v17 = vld [vmem:[#allocation8 + $0xf0] sm:$0xf]  ;;  %v6327_v22 = vor.u32 %v7369_v6, %v6326_v2  ;;  %v6235_v24 = vor.u32 %v7344_v44, %v6232_v16  ;;  %v7341_v33 = vld [vmem:[#allocation8 + $0x154] sm:$0xf]  ;;  %v6220_v29 = vld [vmem:[#allocation8 + $0x15c] sm:$0xf0] }
 0x16f   :  { %2465 = vmatmul.bf16.vlgmr.msra.gmra.mxu3 %v8101_v41  ;;  %2557 = vmatpush.bf16.msra.mxu2 %v5927_v34  ;;  %v6171_v35 = vor.u32 %v7330_v32, %v6170_v17  ;;  %v5998_v34 = vld [vmem:[#allocation8 + $0x590] sm:$0xf]  ;;  %v7299_v17 = vld [vmem:[#allocation8 + $0x4] sm:$0xf]  ;;  %v7322_v63 = vld [vmem:[#allocation8 + $0xb8] sm:$0xf0] }
 0x170   :  { %2569 = vmatpush.bf16.msra.mxu3 %v6047_v37  ;;  %3111 = vmatpush.bf16.msrb.mxu1 %v6207_v42  ;;  %v7574_v37 = vld [vmem:[#allocation8 + $0x598] sm:$0xf0]  ;;  %v7305_v42 = vld [vmem:[#allocation8 + $0x34] sm:$0xf]  ;;  %v6052_v32 = vld [vmem:[#allocation8 + $0xc] sm:$0xf0] }
 0x171   :  { %v5999_v38 = vor.u32 %v7574_v37, %v5998_v34  ;;  %v6055_v23 = vor.u32 %v7299_v17, %v6052_v32  ;;  %v7363_v34 = vld [vmem:[#allocation8 + $0x200] sm:$0xf0]  ;;  %v8115_v37 = vpack.c.bf16 %v874_v19, %v870_v18  ;;  %v6208_v54 = vld [vmem:[#allocation8 + $0x144] sm:$0xf0]  ;;  %v6130_v56 = vld [vmem:[#allocation8 + $0x98] sm:$0xf] }
 0x172   :  { %3152 = vmatpush.bf16.msra.mxu0 %v6127_v45  ;;  %v6076_v45 = vld [vmem:[#allocation8 + $0x3c] sm:$0xf0]  ;;  %v6410_v6 = vld [vmem:[#allocation8 + $0x2d0] sm:$0xf]  ;;  %v6278_v18 = vld [vmem:[#allocation8 + $0x1c8] sm:$0xf] }
 0x173   :  { %2558 = vmatpush.bf16.msra.mxu2 %v5915_v4  ;;  %v6159_v4 = vor.u32 %v7327_v40, %v6158_v39  ;;  %v6223_v39 = vor.u32 %v7341_v33, %v6220_v29  ;;  %v6196_v11 = vld [vmem:[#allocation8 + $0x12c] sm:$0xf0]  ;;  %v6118_v14 = vld [vmem:[#allocation8 + $0x80] sm:$0xf]  ;;  %v7357_v19 = vld [vmem:[#allocation8 + $0x1d0] sm:$0xf0] }
 0x174   :  { %2570 = vmatpush.bf16.msra.mxu3 %v6035_v1  ;;  %3112 = vmatpush.bf16.msrb.mxu1 %v6195_v7  ;;  %v6079_v1 = vor.u32 %v7305_v42, %v6076_v45  ;;  %v6146_v7 = vld [vmem:[#allocation8 + $0xc0] sm:$0xf]  ;;  %v6422_v42 = vld [vmem:[#allocation8 + $0x2e8] sm:$0xf]  ;;  %v7393_v45 = vld [vmem:[#allocation8 + $0x2f0] sm:$0xf0]  ;;  %v6279_v17 = vor.u32 %v7357_v19, %v6278_v18 }
 0x175   :  { %v6266_v33 = vld [vmem:[#allocation8 + $0x1b0] sm:$0xf]  ;;  %v7354_v29 = vld [vmem:[#allocation8 + $0x1b8] sm:$0xf0] }
 0x176   :  { %3153 = vmatpush.bf16.msra.mxu0 %v6115_v10  ;;  %2507 = vmatmul.bf16.vlgmr.msrb.gmra.mxu2 %v8096_v47  ;;  %v7324_v10 = vld [vmem:[#allocation8 + $0xc8] sm:$0xf0]  ;;  %v6238_v18 = vld [vmem:[#allocation8 + $0x170] sm:$0xf]  ;;  %v7346_v19 = vld [vmem:[#allocation8 + $0x178] sm:$0xf0] }
 0x177   :  { %2559 = vmatpush.bf16.msra.mxu2 %v5903_v51  ;;  %v5987_v51 = vor.u32 %v7571_v62, %v5986_v60  ;;  %v6147_v26 = vor.u32 %v7324_v10, %v6146_v7  ;;  %v6423_v62 = vor.u32 %v7393_v45, %v6422_v42  ;;  %v7390_v7 = vld [vmem:[#allocation8 + $0x2d8] sm:$0xf0]  ;;  %v7335_v10 = vld [vmem:[#allocation8 + $0x124] sm:$0xf]  ;;  %v6374_v45 = vld [vmem:[#allocation8 + $0x288] sm:$0xf] }
 0x178   :  { %2571 = vmatpush.bf16.msra.mxu3 %v6023_v25  ;;  %3113 = vmatpush.bf16.msrb.mxu1 %v6183_v27  ;;  %v5974_v25 = vld [vmem:[#allocation8 + $0x560] sm:$0xf]  ;;  %v7568_v27 = vld [vmem:[#allocation8 + $0x568] sm:$0xf0]  ;;  %v6411_v16 = vor.u32 %v7390_v7, %v6410_v6 }
 0x179   :  { %v5975_v48 = vor.u32 %v7568_v27, %v5974_v25  ;;  %v6398_v25 = vld [vmem:[#allocation8 + $0x2b8] sm:$0xf] }
 0x17a   :  { %3154 = vmatpush.bf16.msra.mxu0 %v6103_v28  ;;  %v6314_v28 = vld [vmem:[#allocation8 + $0x210] sm:$0xf]  ;;  %v6184_v27 = vld [vmem:[#allocation8 + $0x114] sm:$0xf0] }
 0x17b   :  { %2560 = vmatpush.bf16.msra.mxu2 %v5891_v8  ;;  %v6142_v8 = vld [vmem:[#allocation8 + $0xb0] sm:$0xf]  ;;  %v6315_v43 = vor.u32 %v7366_v30, %v6314_v28  ;;  %v6106_v28 = vld [vmem:[#allocation8 + $0x68] sm:$0xf]  ;;  %v7313_v30 = vld [vmem:[#allocation8 + $0x70] sm:$0xf0] }
 0x17c   :  { %2572 = vmatpush.bf16.msra.mxu3 %v6011_v58  ;;  %3114 = vmatpush.bf16.msrb.mxu1 %v6171_v35  ;;  %v5962_v58 = vld [vmem:[#allocation8 + $0x548] sm:$0xf]  ;;  %v7565_v35 = vld [vmem:[#allocation8 + $0x550] sm:$0xf0]  ;;  %v6143_v40 = vor.u32 %v7322_v63, %v6142_v8  ;;  %v6107_v63 = vor.u32 %v7313_v30, %v6106_v28  ;;  %v6239_v30 = vor.u32 %v7346_v19, %v6238_v18  ;;  %v7617_v18 = vld [vmem:[#allocation5 + $0x2ec] sm:$0xf0] }
 0x17d   :  { %v5963_v61 = vor.u32 %v7565_v35, %v5962_v58  ;;  %v7384_v58 = vld [vmem:[#allocation8 + $0x2a8] sm:$0xf0]  ;;  %v7310_v35 = vld [vmem:[#allocation8 + $0x58] sm:$0xf0] }
 0x17e   :  { %3155 = vmatpush.bf16.msra.mxu0 %v6091_v36  ;;  %v6302_v36 = vld [vmem:[#allocation8 + $0x1f8] sm:$0xf] }
 0x17f   :  { %2521 = vmatmul.bf16.vlgmr.msrb.gmra.mxu3 %v8101_v41  ;;  %2561 = vmatpush.bf16.msra.mxu2 %v5879_v49  ;;  %v7338_v49 = vld [vmem:[#allocation8 + $0x13c] sm:$0xf]  ;;  %v6303_v60 = vor.u32 %v7363_v34, %v6302_v36  ;;  %v6254_v34 = vld [vmem:[#allocation8 + $0x198] sm:$0xf] }
 0x180   :  { %2573 = vmatpush.bf16.msra.mxu3 %v5999_v38  ;;  %3115 = vmatpush.bf16.msrb.mxu1 %v6159_v4  ;;  %v7319_v38 = vld [vmem:[#allocation8 + $0xa0] sm:$0xf0]  ;;  %v6290_v4 = vld [vmem:[#allocation8 + $0x1e0] sm:$0xf] }
 0x181   :  { %v6131_v2 = vor.u32 %v7319_v38, %v6130_v56  ;;  %v6160_v56 = vld [vmem:[#allocation8 + $0xe4] sm:$0xf0]  ;;  %v6082_v38 = vld [vmem:[#allocation8 + $0x38] sm:$0xf] }
 0x182   :  { %3156 = vmatpush.bf16.msra.mxu0 %v6079_v1  ;;  %v7360_v1 = vld [vmem:[#allocation8 + $0x1e8] sm:$0xf0] }
 0x183   :  { %2562 = vmatpush.bf16.msra.mxu2 %v5867_v15  ;;  %v7316_v15 = vld [vmem:[#allocation8 + $0x88] sm:$0xf0]  ;;  %v6291_v44 = vor.u32 %v7360_v1, %v6290_v4  ;;  %v6242_v4 = vld [vmem:[#allocation8 + $0x180] sm:$0xf] }
 0x184   :  { %2574 = vmatpush.bf16.msra.mxu3 %v5987_v51  ;;  %3116 = vmatpush.bf16.msrb.mxu1 %v6147_v26  ;;  %v6199_v51 = vor.u32 %v7335_v10, %v6196_v11  ;;  %v7387_v26 = vld [vmem:[#allocation8 + $0x2c0] sm:$0xf0]  ;;  %v7348_v1 = vld [vmem:[#allocation8 + $0x188] sm:$0xf0]  ;;  %v7378_v10 = vld [vmem:[#allocation8 + $0x278] sm:$0xf0] }
 0x185   :  { %v6399_v32 = vor.u32 %v7387_v26, %v6398_v25  ;;  %v7368_v11 = vld [vmem:[#allocation8 + $0x22c] sm:$0xf]  ;;  %v6243_v21 = vor.u32 %v7348_v1, %v6242_v4 }
 0x186   :  { %3157 = vmatpush.bf16.msra.mxu0 %v6067_v9  ;;  %2563 = vmatmul.bf16.vlgmr.msra.gmra.mxu2 %v8096_v47  ;;  %v6211_v47 = vor.u32 %v7338_v49, %v6208_v54  ;;  %v7332_v9 = vld [vmem:[#allocation8 + $0x10c] sm:$0xf]  ;;  %v7381_v49 = vld [vmem:[#allocation8 + $0x290] sm:$0xf0]  ;;  %v7326_v54 = vld [vmem:[#allocation8 + $0xdc] sm:$0xf] }
 0x187   :  { %3123 = vmatpush.bf16.msrb.mxu2 %v6327_v22  ;;  %3117 = vmatmul.bf16.vlgmr.msrb.gmra.mxu1 %v8115_v37  ;;  %v6119_v22 = vor.u32 %v7316_v15, %v6118_v14  ;;  %v6187_v8 = vor.u32 %v7332_v9, %v6184_v27  ;;  %v6163_v6 = vor.u32 %v7326_v54, %v6160_v56  ;;  %v6328_v14 = vld [vmem:[#allocation8 + $0x234] sm:$0xf0]  ;;  %v7323_v15 = vld [vmem:[#allocation8 + $0xc4] sm:$0xf] }
 0x188   :  { %3165 = vmatpush.bf16.msra.mxu1 %v6235_v24  ;;  %2575 = vmatpush.bf16.msra.mxu3 %v5975_v48  ;;  %v797_v24 = vadd.f32 %v8057_v46, %v199_v0  ;;  %v6386_v48 = vld [vmem:[#allocation8 + $0x2a0] sm:$0xf]  ;;  %v6267_v0 = vor.u32 %v7354_v29, %v6266_v33  ;;  %v6331_v25 = vor.u32 %v7368_v11, %v6328_v14  ;;  %v6350_v9 = vld [vmem:[#allocation8 + $0x258] sm:$0xf]  ;;  %v7375_v27 = vld [vmem:[#allocation8 + $0x260] sm:$0xf0] }
 0x189   :  { %v6387_v46 = vor.u32 %v7384_v58, %v6386_v48  ;;  %v7301_v33 = vld [vmem:[#allocation8 + $0x10] sm:$0xf0]  ;;  %v7343_v29 = vld [vmem:[#allocation8 + $0x160] sm:$0xf0]  ;;  %v6338_v58 = vld [vmem:[#allocation8 + $0x240] sm:$0xf] }
 0x18a   :  { %3158 = vmatpush.bf16.msra.mxu0 %v6055_v23  ;;  %v6094_v23 = vld [vmem:[#allocation8 + $0x50] sm:$0xf]  ;;  %v811_v36 = vadd.f32 %v8062_v53, %v797_v24  ;;  %v7365_v24 = vld [vmem:[#allocation8 + $0x214] sm:$0xf]  ;;  %v7359_v54 = vld [vmem:[#allocation8 + $0x1e4] sm:$0xf] }
 0x18b   :  { %3124 = vmatpush.bf16.msrb.mxu2 %v6315_v43  ;;  %v6172_v43 = vld [vmem:[#allocation8 + $0xfc] sm:$0xf0]  ;;  %v6095_v42 = vor.u32 %v7310_v35, %v6094_v23  ;;  %v6190_v11 = vld [vmem:[#allocation8 + $0x110] sm:$0xf]  ;;  %v7334_v14 = vld [vmem:[#allocation8 + $0x118] sm:$0xf0] }
 0x18c   :  { %3166 = vmatpush.bf16.msra.mxu1 %v6223_v39  ;;  %2576 = vmatpush.bf16.msra.mxu3 %v5963_v61  ;;  %v7351_v39 = vld [vmem:[#allocation8 + $0x1a0] sm:$0xf0]  ;;  %v6191_v19 = vor.u32 %v7334_v14, %v6190_v11 }
 0x18d   :  { %3159 = vmatmul.bf16.vlgmr.msra.gmra.mxu0 %v8103_v59  ;;  %v7307_v61 = vld [vmem:[#allocation8 + $0x40] sm:$0xf0]  ;;  %v6255_v53 = vor.u32 %v7351_v39, %v6254_v34  ;;  %v6214_v34 = vld [vmem:[#allocation8 + $0x140] sm:$0xf]  ;;  %v7340_v39 = vld [vmem:[#allocation8 + $0x148] sm:$0xf0] }
 0x18e   :  { %3207 = vmatpush.bf16.msrb.mxu0 %v6143_v40  ;;  %v6083_v7 = vor.u32 %v7307_v61, %v6082_v38  ;;  %v6215_v56 = vor.u32 %v7340_v39, %v6214_v34  ;;  %v6292_v38 = vld [vmem:[#allocation8 + $0x1ec] sm:$0xf0]  ;;  %v7389_v61 = vld [vmem:[#allocation8 + $0x2d4] sm:$0xf]  ;;  %v7370_v39 = vld [vmem:[#allocation8 + $0x238] sm:$0xf0] }
 0x18f   :  { %3125 = vmatpush.bf16.msrb.mxu2 %v6303_v60  ;;  %2577 = vmatmul.bf16.vlgmr.msra.gmra.mxu3 %v8101_v41  ;;  %v7329_v41 = vld [vmem:[#allocation8 + $0xf4] sm:$0xf]  ;;  %v825_v60 = vadd.f32 %v8070_v3, %v811_v36  ;;  %v6148_v3 = vld [vmem:[#allocation8 + $0xcc] sm:$0xf0]  ;;  %v6304_v36 = vld [vmem:[#allocation8 + $0x204] sm:$0xf0]  ;;  %v6295_v1 = vor.u32 %v7359_v54, %v6292_v38 }
 0x190   :  { %3137 = vmatpush.bf16.msrb.mxu3 %v6423_v62  ;;  %3167 = vmatpush.bf16.msra.mxu1 %v6211_v47  ;;  %v6175_v40 = vor.u32 %v7329_v41, %v6172_v43  ;;  %v6375_v62 = vor.u32 %v7381_v49, %v6374_v45  ;;  %v6362_v47 = vld [vmem:[#allocation8 + $0x270] sm:$0xf]  ;;  %v6151_v26 = vor.u32 %v7323_v15, %v6148_v3  ;;  %v7372_v41 = vld [vmem:[#allocation8 + $0x248] sm:$0xf0]  ;;  %v7362_v43 = vld [vmem:[#allocation8 + $0x1fc] sm:$0xf] }
 0x191   :  { %v6307_v45 = vor.u32 %v7362_v43, %v6304_v36  ;;  %v6546_v15 = vld [vmem:[#allocation5 + $0x2c0] sm:$0xf]  ;;  %v7609_v43 = vld [vmem:[#allocation5 + $0x22c] sm:$0xf0]  ;;  %v6364_v36 = vld [vmem:[#allocation8 + $0x27c] sm:$0xf0] }
 0x192   :  { %3208 = vmatpush.bf16.msrb.mxu0 %v6131_v2  ;;  %v839_v2 = vadd.f32 %v8068_v55, %v200_v50  ;;  %v875_v50 = vmax.f32 %v825_v60, 0.0  ;;  %v6412_v60 = vld [vmem:[#allocation8 + $0x2dc] sm:$0xf0]  ;;  %v7605_v38 = vld [vmem:[#allocation5 + $0x1cc] sm:$0xf0] }
 0x193   :  { %3126 = vmatpush.bf16.msrb.mxu2 %v6291_v44  ;;  %v6070_v44 = vld [vmem:[#allocation8 + $0x20] sm:$0xf]  ;;  %v7601_v14 = vld [vmem:[#allocation5 + $0x16c] sm:$0xf0] }
 0x194   :  { %3138 = vmatpush.bf16.msrb.mxu3 %v6411_v16  ;;  %3168 = vmatpush.bf16.msra.mxu1 %v6199_v51  ;;  %v7304_v16 = vld [vmem:[#allocation8 + $0x28] sm:$0xf0]  ;;  %v871_v51 = vmax.f32 %v8060_v52, 0.0  ;;  %v853_v55 = vadd.f32 %v8074_v13, %v839_v2  ;;  %v6226_v52 = vld [vmem:[#allocation8 + $0x158] sm:$0xf] }
 0x195   :  { %v6071_v28 = vor.u32 %v7304_v16, %v6070_v44  ;;  %v6227_v35 = vor.u32 %v7343_v29, %v6226_v52  ;;  %v7353_v16 = vld [vmem:[#allocation8 + $0x1b4] sm:$0xf]  ;;  %v6166_v52 = vld [vmem:[#allocation8 + $0xe0] sm:$0xf]  ;;  %v7328_v29 = vld [vmem:[#allocation8 + $0xe8] sm:$0xf0] }
 0x196   :  { %3209 = vmatpush.bf16.msrb.mxu0 %v6119_v22  ;;  %v6363_v22 = vor.u32 %v7378_v10, %v6362_v47  ;;  %v867_v13 = vadd.f32 %v8077_v31, %v853_v55  ;;  %v6339_v31 = vor.u32 %v7372_v41, %v6338_v58  ;;  %v7356_v47 = vld [vmem:[#allocation8 + $0x1cc] sm:$0xf]  ;;  %v6400_v10 = vld [vmem:[#allocation8 + $0x2c4] sm:$0xf0]  ;;  %v7331_v55 = vld [vmem:[#allocation8 + $0x100] sm:$0xf0] }
 0x197   :  { %3127 = vmatpush.bf16.msrb.mxu2 %v6279_v17  ;;  %v6316_v17 = vld [vmem:[#allocation8 + $0x21c] sm:$0xf0]  ;;  %v7347_v58 = vld [vmem:[#allocation8 + $0x184] sm:$0xf]  ;;  %v6244_v41 = vld [vmem:[#allocation8 + $0x18c] sm:$0xf0] }
 0x198   :  { %3139 = vmatpush.bf16.msrb.mxu3 %v6399_v32  ;;  %3169 = vmatpush.bf16.msra.mxu1 %v6187_v8  ;;  %v6058_v32 = vld [vmem:[#allocation8 + $0x8] sm:$0xf]  ;;  %v6351_v8 = vor.u32 %v7375_v27, %v6350_v9  ;;  %v6319_v48 = vor.u32 %v7365_v24, %v6316_v17  ;;  %v7350_v9 = vld [vmem:[#allocation8 + $0x19c] sm:$0xf]  ;;  %v6530_v27 = vld [vmem:[#allocation5 + $0x260] sm:$0xf] }
 0x199   :  { %v6059_v23 = vor.u32 %v7301_v33, %v6058_v32  ;;  %v6256_v24 = vld [vmem:[#allocation8 + $0x1a4] sm:$0xf0]  ;;  %v7380_v17 = vld [vmem:[#allocation8 + $0x28c] sm:$0xf]  ;;  %v6376_v32 = vld [vmem:[#allocation8 + $0x294] sm:$0xf0] }
 0x19a   :  { %3210 = vmatpush.bf16.msrb.mxu0 %v6107_v63  ;;  %v8131_v63 = vpack.c.bf16 %v875_v50, %v871_v51  ;;  %v6268_v51 = vld [vmem:[#allocation8 + $0x1bc] sm:$0xf0]  ;;  %v6178_v50 = vld [vmem:[#allocation8 + $0xf8] sm:$0xf] }
 0x19b   :  { %3128 = vmatpush.bf16.msrb.mxu2 %v6267_v0  ;;  %v7392_v0 = vld [vmem:[#allocation8 + $0x2ec] sm:$0xf] }
 0x19c   :  { %3140 = vmatpush.bf16.msrb.mxu3 %v6387_v46  ;;  %3170 = vmatpush.bf16.msra.mxu1 %v6175_v40  ;;  %v6424_v46 = vld [vmem:[#allocation8 + $0x2f4] sm:$0xf0]  ;;  %v872_v40 = vmax.f32 %v8066_v12, 0.0  ;;  %v6415_v12 = vor.u32 %v7389_v61, %v6412_v60 }
 0x19d   :  { %v6427_v49 = vor.u32 %v7392_v0, %v6424_v46  ;;  %v6334_v0 = vld [vmem:[#allocation8 + $0x230] sm:$0xf] }
 0x19e   :  { %3211 = vmatpush.bf16.msrb.mxu0 %v6095_v42  ;;  %v876_v42 = vmax.f32 %v867_v13, 0.0  ;;  %v6259_v13 = vor.u32 %v7350_v9, %v6256_v24  ;;  %v6335_v61 = vor.u32 %v7370_v39, %v6334_v0  ;;  %v7597_v9 = vld [vmem:[#allocation5 + $0x10c] sm:$0xf0]  ;;  %v7361_v24 = vld [vmem:[#allocation8 + $0x1f0] sm:$0xf0] }
 0x19f   :  { %3129 = vmatpush.bf16.msrb.mxu2 %v6255_v53  ;;  %v6202_v53 = vld [vmem:[#allocation8 + $0x128] sm:$0xf]  ;;  %v7388_v0 = vld [vmem:[#allocation8 + $0x2c8] sm:$0xf0]  ;;  %v6610_v39 = vld [vmem:[#allocation5 + $0x440] sm:$0xf] }
 0x1a0   :  { %3141 = vmatpush.bf16.msrb.mxu3 %v6375_v62  ;;  %3171 = vmatpush.bf16.msra.mxu1 %v6163_v6  ;;  %v7337_v62 = vld [vmem:[#allocation8 + $0x130] sm:$0xf0]  ;;  %v8137_v4 = vpack.c.bf16 %v876_v42, %v872_v40  ;;  %v6280_v6 = vld [vmem:[#allocation8 + $0x1d4] sm:$0xf0] }
 0x1a1   :  { %v6203_v2 = vor.u32 %v7337_v62, %v6202_v53  ;;  %v6283_v3 = vor.u32 %v7356_v47, %v6280_v6  ;;  %v7325_v40 = vld [vmem:[#allocation8 + $0xd0] sm:$0xf0]  ;;  %v7374_v53 = vld [vmem:[#allocation8 + $0x25c] sm:$0xf]  ;;  %v6352_v62 = vld [vmem:[#allocation8 + $0x264] sm:$0xf0] }
 0x1a2   :  { %3212 = vmatpush.bf16.msrb.mxu0 %v6083_v7  ;;  %v7386_v7 = vld [vmem:[#allocation8 + $0x2bc] sm:$0xf]  ;;  %v6674_v42 = vld [vmem:[#allocation5 + $0x5c0] sm:$0xf]  ;;  %v7367_v47 = vld [vmem:[#allocation8 + $0x220] sm:$0xf0]  ;;  %v6355_v11 = vor.u32 %v7374_v53, %v6352_v62 }
 0x1a3   :  { %3130 = vmatpush.bf16.msrb.mxu2 %v6243_v21  ;;  %v6403_v44 = vor.u32 %v7386_v7, %v6400_v10  ;;  %v6388_v21 = vld [vmem:[#allocation8 + $0x2ac] sm:$0xf0]  ;;  %v6658_v6 = vld [vmem:[#allocation5 + $0x560] sm:$0xf]  ;;  %v7645_v7 = vld [vmem:[#allocation5 + $0x58c] sm:$0xf0] }
 0x1a4   :  { %3142 = vmatpush.bf16.msrb.mxu3 %v6363_v22  ;;  %3172 = vmatpush.bf16.msra.mxu1 %v6151_v26  ;;  %v6547_v22 = vor.u32 %v7617_v18, %v6546_v15  ;;  %v6482_v10 = vld [vmem:[#allocation5 + $0x140] sm:$0xf]  ;;  %v7355_v62 = vld [vmem:[#allocation8 + $0x1c0] sm:$0xf0] }
 0x1a5   :  { %v6483_v18 = vor.u32 %v7601_v14, %v6482_v10  ;;  %v6262_v14 = vld [vmem:[#allocation8 + $0x1a0] sm:$0xf] }
 0x1a6   :  { %3213 = vmatpush.bf16.msrb.mxu0 %v6071_v28  ;;  %3131 = vmatmul.bf16.vlgmr.msrb.gmra.mxu2 %v8131_v63  ;;  %v7613_v28 = vld [vmem:[#allocation5 + $0x28c] sm:$0xf0] }
 0x1a7   :  { %3179 = vmatpush.bf16.msra.mxu2 %v6331_v25  ;;  %3173 = vmatmul.bf16.vlgmr.msra.gmra.mxu1 %v8115_v37  ;;  %v6271_v25 = vor.u32 %v7353_v16, %v6268_v51  ;;  %v6531_v33 = vor.u32 %v7613_v28, %v6530_v27  ;;  %v6310_v16 = vld [vmem:[#allocation8 + $0x200] sm:$0xf]  ;;  %v6430_v51 = vld [vmem:[#allocation8 + $0x2f0] sm:$0xf] }
 0x1a8   :  { %3221 = vmatpush.bf16.msrb.mxu1 %v6239_v30  ;;  %3143 = vmatpush.bf16.msrb.mxu3 %v6351_v8  ;;  %v6179_v30 = vor.u32 %v7331_v55, %v6178_v50  ;;  %v6514_v8 = vld [vmem:[#allocation5 + $0x200] sm:$0xf]  ;;  %v7641_v50 = vld [vmem:[#allocation5 + $0x52c] sm:$0xf0] }
 0x1a9   :  { %v6515_v46 = vor.u32 %v7609_v43, %v6514_v8  ;;  %v6466_v55 = vld [vmem:[#allocation5 + $0xe0] sm:$0xf]  ;;  %v7637_v8 = vld [vmem:[#allocation5 + $0x4cc] sm:$0xf0]  ;;  %v6286_v43 = vld [vmem:[#allocation8 + $0x1d0] sm:$0xf] }
 0x1aa   :  { %3214 = vmatpush.bf16.msrb.mxu0 %v6059_v23  ;;  %v6167_v23 = vor.u32 %v7328_v29, %v6166_v52  ;;  %v8141_v34 = vpop.f32.mrf.mxu0  ;;  %v6626_v29 = vld [vmem:[#allocation5 + $0x4a0] sm:$0xf] }
 0x1ab   :  { %3180 = vmatpush.bf16.msra.mxu2 %v6319_v48  ;;  %v6379_v48 = vor.u32 %v7380_v17, %v6376_v32  ;;  %v6467_v17 = vor.u32 %v7597_v9, %v6466_v55  ;;  %v6418_v32 = vld [vmem:[#allocation8 + $0x2d8] sm:$0xf]  ;;  %v7349_v9 = vld [vmem:[#allocation8 + $0x190] sm:$0xf0] }
 0x1ac   :  { %3222 = vmatpush.bf16.msrb.mxu1 %v6227_v35  ;;  %3144 = vmatpush.bf16.msrb.mxu3 %v6339_v31  ;;  %v7377_v35 = vld [vmem:[#allocation8 + $0x274] sm:$0xf]  ;;  %v6154_v31 = vld [vmem:[#allocation8 + $0xc8] sm:$0xf] }
 0x1ad   :  { %3215 = vmatmul.bf16.vlgmr.msrb.gmra.mxu0 %v8103_v59  ;;  %v7383_v59 = vld [vmem:[#allocation8 + $0x2a4] sm:$0xf]  ;;  %v6367_v54 = vor.u32 %v7377_v35, %v6364_v36  ;;  %v6155_v60 = vor.u32 %v7325_v40, %v6154_v31  ;;  %v6406_v36 = vld [vmem:[#allocation8 + $0x2c0] sm:$0xf] }
 0x1ae   :  { %3849 = vmatpush.bf16.msra.mxu0 %v6547_v22  ;;  %v6391_v26 = vor.u32 %v7383_v59, %v6388_v21  ;;  %v7394_v59 = vld [vmem:[#allocation8 + $0x2f8] sm:$0xf0]  ;;  %v6659_v21 = vor.u32 %v7645_v7, %v6658_v6  ;;  %v6642_v22 = vld [vmem:[#allocation5 + $0x500] sm:$0xf]  ;;  %v7633_v40 = vld [vmem:[#allocation5 + $0x46c] sm:$0xf0] }
 0x1af   :  { %3181 = vmatpush.bf16.msra.mxu2 %v6307_v45  ;;  %3145 = vmatmul.bf16.vlgmr.msrb.gmra.mxu3 %v8137_v4  ;;  %v7649_v45 = vld [vmem:[#allocation5 + $0x5ec] sm:$0xf0]  ;;  %v6431_v28 = vor.u32 %v7394_v59, %v6430_v51  ;;  %v6643_v52 = vor.u32 %v7641_v50, %v6642_v22  ;;  %v7643_v7 = vld [vmem:[#allocation5 + $0x564] sm:$0xf]  ;;  %v6250_v50 = vld [vmem:[#allocation8 + $0x188] sm:$0xf] }
 0x1b0   :  { %3193 = vmatpush.bf16.msra.mxu3 %v6427_v49  ;;  %3223 = vmatpush.bf16.msrb.mxu1 %v6215_v56  ;;  %v6247_v49 = vor.u32 %v7347_v58, %v6244_v41  ;;  %v6498_v56 = vld [vmem:[#allocation5 + $0x1a0] sm:$0xf]  ;;  %v7629_v6 = vld [vmem:[#allocation5 + $0x40c] sm:$0xf0] }
 0x1b1   :  { %v7625_v22 = vld [vmem:[#allocation5 + $0x3ac] sm:$0xf0] }
 0x1b2   :  { %3850 = vmatpush.bf16.msra.mxu0 %v6531_v33  ;;  %v7391_v33 = vld [vmem:[#allocation8 + $0x2e0] sm:$0xf0] }
 0x1b3   :  { %3182 = vmatpush.bf16.msra.mxu2 %v6295_v1  ;;  %v6499_v1 = vor.u32 %v7605_v38, %v6498_v56  ;;  %v6419_v41 = vor.u32 %v7391_v33, %v6418_v32  ;;  %v6407_v56 = vor.u32 %v7388_v0, %v6406_v36  ;;  %v6274_v38 = vld [vmem:[#allocation8 + $0x1b8] sm:$0xf]  ;;  %v6358_v36 = vld [vmem:[#allocation8 + $0x260] sm:$0xf]  ;;  %v7376_v0 = vld [vmem:[#allocation8 + $0x268] sm:$0xf0] }
 0x1b4   :  { %3194 = vmatpush.bf16.msra.mxu3 %v6415_v12  ;;  %3224 = vmatpush.bf16.msrb.mxu1 %v6203_v2  ;;  %v6322_v12 = vld [vmem:[#allocation8 + $0x218] sm:$0xf]  ;;  %v6675_v2 = vor.u32 %v7649_v45, %v6674_v42  ;;  %v6434_v42 = vld [vmem:[#allocation5 + $0x20] sm:$0xf]  ;;  %v7589_v45 = vld [vmem:[#allocation5 + $0x4c] sm:$0xf0]  ;;  %v6275_v10 = vor.u32 %v7355_v62, %v6274_v38 }
 0x1b5   :  { %v6323_v15 = vor.u32 %v7367_v47, %v6322_v12  ;;  %v7385_v12 = vld [vmem:[#allocation8 + $0x2b0] sm:$0xf0]  ;;  %v7631_v38 = vld [vmem:[#allocation5 + $0x444] sm:$0xf]  ;;  %v6612_v62 = vld [vmem:[#allocation5 + $0x470] sm:$0xf0] }
 0x1b6   :  { %3851 = vmatpush.bf16.msra.mxu0 %v6515_v46  ;;  %v6627_v46 = vor.u32 %v7637_v8, %v6626_v29  ;;  %v7621_v29 = vld [vmem:[#allocation5 + $0x34c] sm:$0xf0] }
 0x1b7   :  { %3183 = vmatpush.bf16.msra.mxu2 %v6283_v3  ;;  %v7371_v3 = vld [vmem:[#allocation8 + $0x244] sm:$0xf] }
 0x1b8   :  { %3195 = vmatpush.bf16.msra.mxu3 %v6403_v44  ;;  %3225 = vmatpush.bf16.msrb.mxu1 %v6191_v19  ;;  %v6340_v44 = vld [vmem:[#allocation8 + $0x24c] sm:$0xf0]  ;;  %v7364_v19 = vld [vmem:[#allocation8 + $0x208] sm:$0xf0] }
 0x1b9   :  { %v6311_v27 = vor.u32 %v7364_v19, %v6310_v16  ;;  %v6382_v16 = vld [vmem:[#allocation8 + $0x290] sm:$0xf] }
 0x1ba   :  { %3852 = vmatpush.bf16.msra.mxu0 %v6499_v1  ;;  %v6394_v1 = vld [vmem:[#allocation8 + $0x2a8] sm:$0xf] }
 0x1bb   :  { %3184 = vmatpush.bf16.msra.mxu2 %v6271_v25  ;;  %v8144_v25 = vpop.f32.mrf.mxu0 }
 0x1bc   :  { %3196 = vmatpush.bf16.msra.mxu3 %v6391_v26  ;;  %3226 = vmatpush.bf16.msrb.mxu1 %v6179_v30  ;;  %v6343_v26 = vor.u32 %v7371_v3, %v6340_v44  ;;  %v6298_v30 = vld [vmem:[#allocation8 + $0x1e8] sm:$0xf]  ;;  %v7352_v44 = vld [vmem:[#allocation8 + $0x1a8] sm:$0xf0] }
 0x1bd   :  { %v6263_v55 = vor.u32 %v7352_v44, %v6262_v14  ;;  %v7627_v14 = vld [vmem:[#allocation5 + $0x3e4] sm:$0xf] }
 0x1be   :  { %3853 = vmatpush.bf16.msra.mxu0 %v6483_v18  ;;  %v7382_v18 = vld [vmem:[#allocation8 + $0x298] sm:$0xf0] }
 0x1bf   :  { %3185 = vmatpush.bf16.msra.mxu2 %v6259_v13  ;;  %v6450_v13 = vld [vmem:[#allocation5 + $0x80] sm:$0xf] }
 0x1c0   :  { %3197 = vmatpush.bf16.msra.mxu3 %v6379_v48  ;;  %3227 = vmatpush.bf16.msrb.mxu1 %v6167_v23  ;;  %v7593_v48 = vld [vmem:[#allocation5 + $0xac] sm:$0xf0]  ;;  %v7358_v23 = vld [vmem:[#allocation8 + $0x1d8] sm:$0xf0] }
 0x1c1   :  { %v6451_v58 = vor.u32 %v7593_v48, %v6450_v13  ;;  %v7679_v13 = vld [vmem:[#allocation5 + $0x8c4] sm:$0xf]  ;;  %v6804_v48 = vld [vmem:[#allocation5 + $0x8f0] sm:$0xf0] }
 0x1c2   :  { %3854 = vmatpush.bf16.msra.mxu0 %v6467_v17  ;;  %v6802_v17 = vld [vmem:[#allocation5 + $0x8c0] sm:$0xf] }
 0x1c3   :  { %3186 = vmatpush.bf16.msra.mxu2 %v6247_v49  ;;  %v6435_v49 = vor.u32 %v7589_v45, %v6434_v42  ;;  %v8151_v53 = vpop.f32.mrf.mxu0  ;;  %v6786_v42 = vld [vmem:[#allocation5 + $0x860] sm:$0xf]  ;;  %v7677_v45 = vld [vmem:[#allocation5 + $0x88c] sm:$0xf0] }
 0x1c4   :  { %3198 = vmatpush.bf16.msra.mxu3 %v6367_v54  ;;  %3228 = vmatpush.bf16.msrb.mxu1 %v6155_v60  ;;  %v2438_v35 = vpop.f32.mrf.mxu1  ;;  %v6287_v54 = vor.u32 %v7358_v23, %v6286_v43  ;;  %v6676_v60 = vld [vmem:[#allocation5 + $0x5f0] sm:$0xf0] }
 0x1c5   :  { %v8149_v31 = vadd.f32 %v2438_v35, %v8141_v34  ;;  %v6611_v34 = vor.u32 %v7633_v40, %v6610_v39  ;;  %v6628_v43 = vld [vmem:[#allocation5 + $0x4d0] sm:$0xf0] }
 0x1c6   :  { %3187 = vmatmul.bf16.vlgmr.msra.gmra.mxu2 %v8131_v63  ;;  %3855 = vmatpush.bf16.msra.mxu0 %v6451_v58  ;;  %v7635_v58 = vld [vmem:[#allocation5 + $0x4a4] sm:$0xf] }
 0x1c7   :  { %3235 = vmatpush.bf16.msrb.mxu2 %v6335_v61  ;;  %3229 = vmatmul.bf16.vlgmr.msrb.gmra.mxu1 %v8115_v37  ;;  %v6299_v37 = vor.u32 %v7361_v24, %v6298_v30  ;;  %v7647_v61 = vld [vmem:[#allocation5 + $0x5c4] sm:$0xf]  ;;  %v7379_v24 = vld [vmem:[#allocation8 + $0x280] sm:$0xf0]  ;;  %v6631_v39 = vor.u32 %v7635_v58, %v6628_v43 }
 0x1c8   :  { %3863 = vmatpush.bf16.msra.mxu1 %v6675_v2  ;;  %3199 = vmatpush.bf16.msra.mxu3 %v6355_v11  ;;  %v6679_v47 = vor.u32 %v7647_v61, %v6676_v60  ;;  %v6594_v2 = vld [vmem:[#allocation5 + $0x3e0] sm:$0xf]  ;;  %v6395_v11 = vor.u32 %v7385_v12, %v6394_v1  ;;  %v6370_v30 = vld [vmem:[#allocation8 + $0x278] sm:$0xf]  ;;  %v6359_v61 = vor.u32 %v7376_v0, %v6358_v36  ;;  %v6346_v60 = vld [vmem:[#allocation8 + $0x248] sm:$0xf] }
 0x1c9   :  { %v6595_v19 = vor.u32 %v7629_v6, %v6594_v2  ;;  %v6787_v1 = vor.u32 %v7677_v45, %v6786_v42  ;;  %v7373_v12 = vld [vmem:[#allocation8 + $0x250] sm:$0xf0]  ;;  %v7615_v2 = vld [vmem:[#allocation5 + $0x2c4] sm:$0xf]  ;;  %v6548_v6 = vld [vmem:[#allocation5 + $0x2f0] sm:$0xf0] }
 0x1ca   :  { %3856 = vmatpush.bf16.msra.mxu0 %v6435_v49  ;;  %v6807_v49 = vor.u32 %v7679_v13, %v6804_v48  ;;  %v7663_v13 = vld [vmem:[#allocation5 + $0x744] sm:$0xf]  ;;  %v6740_v48 = vld [vmem:[#allocation5 + $0x770] sm:$0xf0]  ;;  %v6722_v36 = vld [vmem:[#allocation5 + $0x6e0] sm:$0xf] }
 0x1cb   :  { %3236 = vmatpush.bf16.msrb.mxu2 %v6323_v15  ;;  %v6660_v15 = vld [vmem:[#allocation5 + $0x590] sm:$0xf0]  ;;  %v2482_v8 = vpop.f32.mrf.mxu0  ;;  %v7619_v58 = vld [vmem:[#allocation5 + $0x324] sm:$0xf]  ;;  %v6810_v0 = vld [vmem:[#allocation5 + $0x8c8] sm:$0xf] }
 0x1cc   :  { %3864 = vmatpush.bf16.msra.mxu1 %v6659_v21  ;;  %3200 = vmatpush.bf16.msra.mxu3 %v6343_v26  ;;  %v2440_v3 = vpop.f32.mrf.mxu1  ;;  %v6663_v51 = vor.u32 %v7643_v7, %v6660_v15  ;;  %v6578_v21 = vld [vmem:[#allocation5 + $0x380] sm:$0xf]  ;;  %v6383_v26 = vor.u32 %v7382_v18, %v6382_v16  ;;  %v6596_v15 = vld [vmem:[#allocation5 + $0x410] sm:$0xf0]  ;;  %v7661_v45 = vld [vmem:[#allocation5 + $0x70c] sm:$0xf0] }
 0x1cd   :  { %3857 = vmatmul.bf16.vlgmr.msra.gmra.mxu0 %v8000_v57  ;;  %v8155_v59 = vadd.f32 %v2440_v3, %v8144_v25  ;;  %v6579_v32 = vor.u32 %v7625_v22, %v6578_v21  ;;  %v6562_v25 = vld [vmem:[#allocation5 + $0x320] sm:$0xf]  ;;  %v6347_v3 = vor.u32 %v7373_v12, %v6346_v60  ;;  %v6599_v44 = vor.u32 %v7627_v14, %v6596_v15  ;;  %v7669_v22 = vld [vmem:[#allocation5 + $0x7cc] sm:$0xf0]  ;;  %v7659_v60 = vld [vmem:[#allocation5 + $0x6e4] sm:$0xf] }
 0x1ce   :  { %3905 = vmatpush.bf16.msrb.mxu0 %v6679_v47  ;;  %v7673_v47 = vld [vmem:[#allocation5 + $0x82c] sm:$0xf0]  ;;  %v6754_v21 = vld [vmem:[#allocation5 + $0x7a0] sm:$0xf]  ;;  %v6708_v14 = vld [vmem:[#allocation5 + $0x6b0] sm:$0xf0] }
 0x1cf   :  { %3237 = vmatpush.bf16.msrb.mxu2 %v6311_v27  ;;  %3201 = vmatmul.bf16.vlgmr.msra.gmra.mxu3 %v8137_v4  ;;  %v7639_v27 = vld [vmem:[#allocation5 + $0x504] sm:$0xf]  ;;  %v6778_v15 = vld [vmem:[#allocation5 + $0x808] sm:$0xf] }
 0x1d0   :  { %3249 = vmatpush.bf16.msrb.mxu3 %v6431_v28  ;;  %3865 = vmatpush.bf16.msra.mxu1 %v6643_v52  ;;  %v6644_v28 = vld [vmem:[#allocation5 + $0x530] sm:$0xf0]  ;;  %v7681_v52 = vld [vmem:[#allocation5 + $0x8ec] sm:$0xf0] }
 0x1d1   :  { %v6647_v33 = vor.u32 %v7639_v27, %v6644_v28  ;;  %v6803_v35 = vor.u32 %v7681_v52, %v6802_v17  ;;  %v6756_v27 = vld [vmem:[#allocation5 + $0x7d0] sm:$0xf0]  ;;  %v7623_v28 = vld [vmem:[#allocation5 + $0x384] sm:$0xf]  ;;  %v6755_v17 = vor.u32 %v7669_v22, %v6754_v21  ;;  %v7665_v52 = vld [vmem:[#allocation5 + $0x76c] sm:$0xf0] }
 0x1d2   :  { %3906 = vmatpush.bf16.msrb.mxu0 %v6663_v51  ;;  %v6551_v51 = vor.u32 %v7615_v2, %v6548_v6  ;;  %v7657_v2 = vld [vmem:[#allocation5 + $0x6ac] sm:$0xf0]  ;;  %v7599_v6 = vld [vmem:[#allocation5 + $0x144] sm:$0xf] }
 0x1d3   :  { %3238 = vmatpush.bf16.msrb.mxu2 %v6299_v37  ;;  %v6251_v37 = vor.u32 %v7349_v9, %v6250_v50  ;;  %v2536_v16 = vpop.f32.mrf.mxu0  ;;  %v7667_v9 = vld [vmem:[#allocation5 + $0x7a4] sm:$0xf] }
 0x1d4   :  { %3250 = vmatpush.bf16.msrb.mxu3 %v6419_v41  ;;  %3866 = vmatpush.bf16.msra.mxu1 %v6627_v46  ;;  %v6371_v41 = vor.u32 %v7379_v24, %v6370_v30  ;;  %v2494_v23 = vpop.f32.mrf.mxu1  ;;  %v6563_v46 = vor.u32 %v7621_v29, %v6562_v25  ;;  %v6580_v30 = vld [vmem:[#allocation5 + $0x3b0] sm:$0xf0]  ;;  %v7607_v25 = vld [vmem:[#allocation5 + $0x204] sm:$0xf] }
 0x1d5   :  { %v8158_v40 = vadd.f32 %v2494_v23, %v8151_v53  ;;  %v6615_v53 = vor.u32 %v7631_v38, %v6612_v62  ;;  %v6583_v24 = vor.u32 %v7623_v28, %v6580_v30  ;;  %v6516_v29 = vld [vmem:[#allocation5 + $0x230] sm:$0xf0] }
 0x1d6   :  { %3907 = vmatpush.bf16.msrb.mxu0 %v6647_v33  ;;  %v6738_v33 = vld [vmem:[#allocation5 + $0x740] sm:$0xf]  ;;  %v6724_v62 = vld [vmem:[#allocation5 + $0x710] sm:$0xf0] }
 0x1d7   :  { %3239 = vmatpush.bf16.msrb.mxu2 %v6287_v54  ;;  %v7675_v54 = vld [vmem:[#allocation5 + $0x864] sm:$0xf]  ;;  %v6739_v23 = vor.u32 %v7665_v52, %v6738_v33  ;;  %v6692_v33 = vld [vmem:[#allocation5 + $0x650] sm:$0xf0] }
 0x1d8   :  { %3251 = vmatpush.bf16.msrb.mxu3 %v6407_v56  ;;  %3867 = vmatpush.bf16.msra.mxu1 %v6611_v34  ;;  %v6788_v56 = vld [vmem:[#allocation5 + $0x890] sm:$0xf0]  ;;  %v6770_v34 = vld [vmem:[#allocation5 + $0x800] sm:$0xf] }
 0x1d9   :  { %v6791_v7 = vor.u32 %v7675_v54, %v6788_v56  ;;  %v6500_v54 = vld [vmem:[#allocation5 + $0x1d0] sm:$0xf0] }
 0x1da   :  { %3908 = vmatpush.bf16.msrb.mxu0 %v6631_v39 }
 0x1db   :  { %3240 = vmatpush.bf16.msrb.mxu2 %v6275_v10  ;;  %v7671_v10 = vld [vmem:[#allocation5 + $0x804] sm:$0xf]  ;;  %v2538_v38 = vpop.f32.mrf.mxu0 }
 0x1dc   :  { %3252 = vmatpush.bf16.msrb.mxu3 %v6395_v11  ;;  %3868 = vmatpush.bf16.msra.mxu1 %v6595_v19  ;;  %v6772_v11 = vld [vmem:[#allocation5 + $0x830] sm:$0xf0]  ;;  %v2496_v18 = vpop.f32.mrf.mxu1  ;;  %v6771_v19 = vor.u32 %v7673_v47, %v6770_v34  ;;  %v6706_v34 = vld [vmem:[#allocation5 + $0x680] sm:$0xf]  ;;  %v6794_v47 = vld [vmem:[#allocation5 + $0x868] sm:$0xf] }
 0x1dd   :  { %v8162_v50 = vadd.f32 %v2496_v18, %v2482_v8  ;;  %v6759_v8 = vor.u32 %v7667_v9, %v6756_v27  ;;  %v6690_v18 = vld [vmem:[#allocation5 + $0x620] sm:$0xf] }
 0x1de   :  { %3909 = vmatpush.bf16.msrb.mxu0 %v6615_v53  ;;  %v7678_v53 = vld [vmem:[#allocation5 + $0x894] sm:$0xf0] }
 0x1df   :  { %3241 = vmatpush.bf16.msrb.mxu2 %v6263_v55  ;;  %v7611_v55 = vld [vmem:[#allocation5 + $0x264] sm:$0xf] }
 0x1e0   :  { %3253 = vmatpush.bf16.msrb.mxu3 %v6383_v26  ;;  %3869 = vmatpush.bf16.msra.mxu1 %v6579_v32  ;;  %v6775_v26 = vor.u32 %v7671_v10, %v6772_v11  ;;  %v6727_v10 = vor.u32 %v7659_v60, %v6724_v62  ;;  %v6795_v11 = vor.u32 %v7678_v53, %v6794_v47  ;;  %v6522_v60 = vld [vmem:[#allocation5 + $0x208] sm:$0xf]  ;;  %v7610_v62 = vld [vmem:[#allocation5 + $0x234] sm:$0xf0]  ;;  %v7612_v53 = vld [vmem:[#allocation5 + $0x26c] sm:$0xf] }
 0x1e1   :  { %v7650_v47 = vld [vmem:[#allocation5 + $0x5f4] sm:$0xf0] }
 0x1e2   :  { %3910 = vmatpush.bf16.msrb.mxu0 %v6599_v44  ;;  %v6707_v44 = vor.u32 %v7657_v2, %v6706_v34  ;;  %v6540_v2 = vld [vmem:[#allocation5 + $0x298] sm:$0xf0] }
 0x1e3   :  { %3242 = vmatpush.bf16.msrb.mxu2 %v6251_v37  ;;  %v6564_v37 = vld [vmem:[#allocation5 + $0x350] sm:$0xf0] }
 0x1e4   :  { %3254 = vmatpush.bf16.msrb.mxu3 %v6371_v41  ;;  %3870 = vmatpush.bf16.msra.mxu1 %v6563_v46  ;;  %v6567_v41 = vor.u32 %v7619_v58, %v6564_v37  ;;  %v2550_v43 = vpop.f32.mrf.mxu1  ;;  %v7682_v46 = vld [vmem:[#allocation5 + $0x8f4] sm:$0xf0]  ;;  %v7591_v58 = vld [vmem:[#allocation5 + $0x84] sm:$0xf]  ;;  %v6452_v37 = vld [vmem:[#allocation5 + $0xb0] sm:$0xf0] }
 0x1e5   :  { %v8165_v39 = vadd.f32 %v2550_v43, %v2536_v16  ;;  %v6811_v56 = vor.u32 %v7682_v46, %v6810_v0  ;;  %v6556_v0 = vld [vmem:[#allocation5 + $0x2f8] sm:$0xf0] }
 0x1e6   :  { %3243 = vmatmul.bf16.vlgmr.msrb.gmra.mxu2 %v8131_v63  ;;  %v6532_v63 = vld [vmem:[#allocation5 + $0x290] sm:$0xf0]  ;;  %3911 = vmatpush.bf16.msrb.mxu0 %v6583_v24 }
 0x1e7   :  { %3877 = vmatpush.bf16.msra.mxu2 %v6803_v35  ;;  %3871 = vmatmul.bf16.vlgmr.msra.gmra.mxu1 %v8003_v5  ;;  %v6535_v32 = vor.u32 %v7611_v55, %v6532_v63  ;;  %v6519_v35 = vor.u32 %v7607_v25, %v6516_v29  ;;  %v7595_v55 = vld [vmem:[#allocation5 + $0xe4] sm:$0xf]  ;;  %v6468_v63 = vld [vmem:[#allocation5 + $0x110] sm:$0xf0] }
 0x1e8   :  { %3919 = vmatpush.bf16.msrb.mxu1 %v6807_v49  ;;  %3255 = vmatpush.bf16.msrb.mxu3 %v6359_v61  ;;  %v7603_v49 = vld [vmem:[#allocation5 + $0x1a4] sm:$0xf]  ;;  %v6471_v29 = vor.u32 %v7595_v55, %v6468_v63  ;;  %v6524_v55 = vld [vmem:[#allocation5 + $0x238] sm:$0xf0] }
 0x1e9   :  { %v2452_v42 = vpop.f32.mrf.mxu2  ;;  %v6503_v12 = vor.u32 %v7603_v49, %v6500_v54  ;;  %v6455_v49 = vor.u32 %v7591_v58, %v6452_v37  ;;  %v7587_v54 = vld [vmem:[#allocation5 + $0x24] sm:$0xf]  ;;  %v6698_v37 = vld [vmem:[#allocation5 + $0x628] sm:$0xf] }
 0x1ea   :  { %v2453_v61 = vadd.f32 %v2452_v42, %v8149_v31  ;;  %3912 = vmatpush.bf16.msrb.mxu0 %v6567_v41  ;;  %v7655_v31 = vld [vmem:[#allocation5 + $0x684] sm:$0xf]  ;;  %v3104_v28 = vpop.f32.mrf.mxu0  ;;  %v6538_v41 = vld [vmem:[#allocation5 + $0x268] sm:$0xf] }
 0x1eb   :  { %3878 = vmatpush.bf16.msra.mxu2 %v6787_v1  ;;  %v6723_v1 = vor.u32 %v7661_v45, %v6722_v36  ;;  %v6711_v9 = vor.u32 %v7655_v31, %v6708_v14  ;;  %v7616_v36 = vld [vmem:[#allocation5 + $0x2cc] sm:$0xf]  ;;  %v6746_v42 = vld [vmem:[#allocation5 + $0x748] sm:$0xf]  ;;  %v7666_v45 = vld [vmem:[#allocation5 + $0x774] sm:$0xf0] }
 0x1ec   :  { %3920 = vmatpush.bf16.msrb.mxu1 %v6791_v7  ;;  %3256 = vmatpush.bf16.msrb.mxu3 %v6347_v3  ;;  %v6484_v7 = vld [vmem:[#allocation5 + $0x170] sm:$0xf0]  ;;  %v2552_v3 = vpop.f32.mrf.mxu1  ;;  %v6559_v46 = vor.u32 %v7616_v36, %v6556_v0  ;;  %v7662_v14 = vld [vmem:[#allocation5 + $0x714] sm:$0xf0]  ;;  %v6474_v0 = vld [vmem:[#allocation5 + $0xe8] sm:$0xf] }
 0x1ed   :  { %3913 = vmatmul.bf16.vlgmr.msrb.gmra.mxu0 %v8003_v5  ;;  %v6487_v16 = vor.u32 %v7599_v6, %v6484_v7  ;;  %v8169_v21 = vadd.f32 %v2552_v3, %v2538_v38  ;;  %v6543_v7 = vor.u32 %v7612_v53, %v6540_v2  ;;  %v7634_v53 = vld [vmem:[#allocation5 + $0x474] sm:$0xf0]  ;;  %v7596_v2 = vld [vmem:[#allocation5 + $0xec] sm:$0xf] }
 0x1ee   :  { %3961 = vmatpush.bf16.msra.mxu0 %v6811_v56  ;;  %v6747_v56 = vor.u32 %v7666_v45, %v6746_v42  ;;  %v7638_v45 = vld [vmem:[#allocation5 + $0x4d4] sm:$0xf0] }
 0x1ef   :  { %3879 = vmatpush.bf16.msra.mxu2 %v6771_v19  ;;  %3257 = vmatmul.bf16.vlgmr.msrb.gmra.mxu3 %v8137_v4  ;;  %v6743_v4 = vor.u32 %v7663_v13, %v6740_v48  ;;  %v7653_v19 = vld [vmem:[#allocation5 + $0x64c] sm:$0xf0]  ;;  %v7670_v13 = vld [vmem:[#allocation5 + $0x7d4] sm:$0xf0] }
 0x1f0   :  { %3891 = vmatpush.bf16.msra.mxu3 %v6551_v51  ;;  %3921 = vmatpush.bf16.msrb.mxu1 %v6775_v26  ;;  %v7674_v51 = vld [vmem:[#allocation5 + $0x834] sm:$0xf0]  ;;  %v6554_v26 = vld [vmem:[#allocation5 + $0x2c8] sm:$0xf]  ;;  %v6691_v25 = vor.u32 %v7653_v19, %v6690_v18 }
 0x1f1   :  { %v2454_v22 = vpop.f32.mrf.mxu2  ;;  %v6779_v27 = vor.u32 %v7674_v51, %v6778_v15  ;;  %v6523_v15 = vor.u32 %v7610_v62, %v6522_v60  ;;  %v7646_v51 = vld [vmem:[#allocation5 + $0x594] sm:$0xf0]  ;;  %v6458_v62 = vld [vmem:[#allocation5 + $0x88] sm:$0xf] }
 0x1f2   :  { %3962 = vmatpush.bf16.msra.mxu0 %v6795_v11  ;;  %v2455_v30 = vadd.f32 %v2454_v22, %v8155_v59  ;;  %v2466_v24 = vpop.f32.mrf.mxu3  ;;  %v3106_v11 = vpop.f32.mrf.mxu0  ;;  %v7608_v22 = vld [vmem:[#allocation5 + $0x20c] sm:$0xf] }
 0x1f3   :  { %3880 = vmatpush.bf16.msra.mxu2 %v6755_v17  ;;  %v7618_v17 = vld [vmem:[#allocation5 + $0x2f4] sm:$0xf0]  ;;  %v2467_v52 = vadd.f32 %v2466_v24, %v2453_v61  ;;  %v6527_v63 = vor.u32 %v7608_v22, %v6524_v55  ;;  %v6684_v22 = vld [vmem:[#allocation5 + $0x5f8] sm:$0xf0] }
 0x1f4   :  { %3892 = vmatpush.bf16.msra.mxu3 %v6535_v32  ;;  %3922 = vmatpush.bf16.msrb.mxu1 %v6759_v8  ;;  %v7651_v32 = vld [vmem:[#allocation5 + $0x624] sm:$0xf]  ;;  %v6762_v8 = vld [vmem:[#allocation5 + $0x7a8] sm:$0xf]  ;;  %v6555_v48 = vor.u32 %v7618_v17, %v6554_v26 }
 0x1f5   :  { %v8172_v43 = vadd.f32 %v3104_v28, %v2467_v52  ;;  %v6695_v59 = vor.u32 %v7651_v32, %v6692_v33  ;;  %v6714_v26 = vld [vmem:[#allocation5 + $0x688] sm:$0xf]  ;;  %v7602_v32 = vld [vmem:[#allocation5 + $0x174] sm:$0xf0] }
 0x1f6   :  { %3963 = vmatpush.bf16.msra.mxu0 %v6779_v27  ;;  %v6490_v17 = vld [vmem:[#allocation5 + $0x148] sm:$0xf] }
 0x1f7   :  { %3881 = vmatpush.bf16.msra.mxu2 %v6739_v23  ;;  %v6763_v23 = vor.u32 %v7670_v13, %v6762_v8  ;;  %v6650_v33 = vld [vmem:[#allocation5 + $0x508] sm:$0xf]  ;;  %v7604_v8 = vld [vmem:[#allocation5 + $0x1ac] sm:$0xf]  ;;  %v6508_v13 = vld [vmem:[#allocation5 + $0x1d8] sm:$0xf0] }
 0x1f8   :  { %3893 = vmatpush.bf16.msra.mxu3 %v6519_v35  ;;  %3923 = vmatpush.bf16.msrb.mxu1 %v6743_v4  ;;  %v7614_v35 = vld [vmem:[#allocation5 + $0x294] sm:$0xf0]  ;;  %v6436_v4 = vld [vmem:[#allocation5 + $0x50] sm:$0xf0]  ;;  %v6511_v58 = vor.u32 %v7604_v8, %v6508_v13  ;;  %v6668_v8 = vld [vmem:[#allocation5 + $0x598] sm:$0xf0] }
 0x1f9   :  { %v2508_v38 = vpop.f32.mrf.mxu2  ;;  %v6539_v61 = vor.u32 %v7614_v35, %v6538_v41  ;;  %v6439_v31 = vor.u32 %v7587_v54, %v6436_v4  ;;  %v7654_v41 = vld [vmem:[#allocation5 + $0x654] sm:$0xf0]  ;;  %v6491_v35 = vor.u32 %v7602_v32, %v6490_v17  ;;  %v6492_v54 = vld [vmem:[#allocation5 + $0x178] sm:$0xf0] }
 0x1fa   :  { %3964 = vmatpush.bf16.msra.mxu0 %v6763_v23  ;;  %v2509_v34 = vadd.f32 %v2508_v38, %v8158_v40  ;;  %v6506_v40 = vld [vmem:[#allocation5 + $0x1a8] sm:$0xf]  ;;  %v7626_v32 = vld [vmem:[#allocation5 + $0x3b4] sm:$0xf0] }
 0x1fb   :  { %3882 = vmatpush.bf16.msra.mxu2 %v6723_v1  ;;  %v6682_v1 = vld [vmem:[#allocation5 + $0x5c8] sm:$0xf] }
 0x1fc   :  { %3894 = vmatpush.bf16.msra.mxu3 %v6503_v12  ;;  %3924 = vmatpush.bf16.msrb.mxu1 %v6727_v10  ;;  %v2468_v12 = vpop.f32.mrf.mxu3  ;;  %v6730_v10 = vld [vmem:[#allocation5 + $0x6e8] sm:$0xf]  ;;  %v6683_v3 = vor.u32 %v7650_v47, %v6682_v1  ;;  %v7594_v1 = vld [vmem:[#allocation5 + $0xb4] sm:$0xf0] }
 0x1fd   :  { %v2469_v6 = vadd.f32 %v2468_v12, %v2455_v30  ;;  %v6731_v19 = vor.u32 %v7662_v14, %v6730_v10  ;;  %v6618_v12 = vld [vmem:[#allocation5 + $0x448] sm:$0xf] }
 0x1fe   :  { %3965 = vmatpush.bf16.msra.mxu0 %v6747_v56  ;;  %v6619_v14 = vor.u32 %v7634_v53, %v6618_v12  ;;  %v6780_v12 = vld [vmem:[#allocation5 + $0x838] sm:$0xf0]  ;;  %v7628_v53 = vld [vmem:[#allocation5 + $0x3ec] sm:$0xf] }
 0x1ff   :  { %3883 = vmatpush.bf16.msra.mxu2 %v6707_v44  ;;  %v7606_v44 = vld [vmem:[#allocation5 + $0x1d4] sm:$0xf0]  ;;  %v8177_v18 = vadd.f32 %v3106_v11, %v2469_v6  ;;  %v6476_v6 = vld [vmem:[#allocation5 + $0x118] sm:$0xf0] }
 0x200   :  { %3895 = vmatpush.bf16.msra.mxu3 %v6487_v16  ;;  %3925 = vmatpush.bf16.msrb.mxu1 %v6711_v9  ;;  %v6666_v16 = vld [vmem:[#allocation5 + $0x568] sm:$0xf]  ;;  %v7658_v9 = vld [vmem:[#allocation5 + $0x6b4] sm:$0xf0]  ;;  %v6507_v30 = vor.u32 %v7606_v44, %v6506_v40  ;;  %v6479_v10 = vor.u32 %v7596_v2, %v6476_v6  ;;  %v6604_v6 = vld [vmem:[#allocation5 + $0x418] sm:$0xf0] }
 0x201   :  { %v6715_v27 = vor.u32 %v7658_v9, %v6714_v26  ;;  %v2510_v28 = vpop.f32.mrf.mxu2  ;;  %v6667_v24 = vor.u32 %v7646_v51, %v6666_v16  ;;  %v6602_v40 = vld [vmem:[#allocation5 + $0x3e8] sm:$0xf]  ;;  %v7592_v16 = vld [vmem:[#allocation5 + $0x8c] sm:$0xf] }
 0x202   :  { %3966 = vmatpush.bf16.msra.mxu0 %v6731_v19  ;;  %v2511_v52 = vadd.f32 %v2510_v28, %v8162_v50  ;;  %v7598_v50 = vld [vmem:[#allocation5 + $0x114] sm:$0xf0]  ;;  %v6460_v19 = vld [vmem:[#allocation5 + $0xb8] sm:$0xf0]  ;;  %v7648_v51 = vld [vmem:[#allocation5 + $0x5cc] sm:$0xf] }
 0x203   :  { %3884 = vmatpush.bf16.msra.mxu2 %v6691_v25  ;;  %v6463_v55 = vor.u32 %v7592_v16, %v6460_v19  ;;  %v6586_v28 = vld [vmem:[#allocation5 + $0x388] sm:$0xf]  ;;  %v6687_v17 = vor.u32 %v7648_v51, %v6684_v22 }
 0x204   :  { %3896 = vmatpush.bf16.msra.mxu3 %v6471_v29  ;;  %3926 = vmatpush.bf16.msrb.mxu1 %v6695_v59  ;;  %v2522_v25 = vpop.f32.mrf.mxu3  ;;  %v7642_v29 = vld [vmem:[#allocation5 + $0x534] sm:$0xf0]  ;;  %v6699_v59 = vor.u32 %v7654_v41, %v6698_v37  ;;  %v3118_v23 = vpop.f32.mrf.mxu1  ;;  %v6570_v37 = vld [vmem:[#allocation5 + $0x328] sm:$0xf] }
 0x205   :  { %v6651_v36 = vor.u32 %v7642_v29, %v6650_v33  ;;  %v8182_v42 = vadd.f32 %v3118_v23, %v8172_v43  ;;  %v7588_v33 = vld [vmem:[#allocation5 + $0x2c] sm:$0xf]  ;;  %v7622_v41 = vld [vmem:[#allocation5 + $0x354] sm:$0xf0] }
 0x206   :  { %3885 = vmatmul.bf16.vlgmr.msra.gmra.mxu2 %v8007_v20  ;;  %3967 = vmatpush.bf16.msra.mxu0 %v6715_v27  ;;  %v7644_v29 = vld [vmem:[#allocation5 + $0x56c] sm:$0xf] }
 0x207   :  { %3933 = vmatpush.bf16.msrb.mxu2 %v6555_v48  ;;  %3927 = vmatmul.bf16.vlgmr.msrb.gmra.mxu1 %v8007_v20  ;;  %v2523_v48 = vadd.f32 %v2522_v25, %v2509_v34  ;;  %v7680_v23 = vld [vmem:[#allocation5 + $0x8cc] sm:$0xf] }
 0x208   :  { %3975 = vmatpush.bf16.msra.mxu1 %v6559_v46  ;;  %3897 = vmatpush.bf16.msra.mxu3 %v6455_v49  ;;  %v6634_v46 = vld [vmem:[#allocation5 + $0x4a8] sm:$0xf]  ;;  %v7600_v49 = vld [vmem:[#allocation5 + $0x14c] sm:$0xf] }
 0x209   :  { %v6495_v4 = vor.u32 %v7600_v49, %v6492_v54  ;;  %v2564_v38 = vpop.f32.mrf.mxu2  ;;  %v6635_v60 = vor.u32 %v7638_v45, %v6634_v46  ;;  %v7636_v45 = vld [vmem:[#allocation5 + $0x4ac] sm:$0xf]  ;;  %v6636_v54 = vld [vmem:[#allocation5 + $0x4d8] sm:$0xf0] }
 0x20a   :  { %3968 = vmatpush.bf16.msra.mxu0 %v6699_v59  ;;  %v3160_v56 = vpop.f32.mrf.mxu0  ;;  %v2565_v43 = vadd.f32 %v2564_v38, %v8165_v39  ;;  %v7630_v39 = vld [vmem:[#allocation5 + $0x414] sm:$0xf0]  ;;  %v7640_v59 = vld [vmem:[#allocation5 + $0x50c] sm:$0xf]  ;;  %v6639_v38 = vor.u32 %v7636_v45, %v6636_v54 }
 0x20b   :  { %3934 = vmatpush.bf16.msrb.mxu2 %v6539_v61  ;;  %v6475_v61 = vor.u32 %v7598_v50, %v6474_v0  ;;  %v8184_v34 = vadd.f32 %v3160_v56, %v2523_v48  ;;  %v6603_v27 = vor.u32 %v7630_v39, %v6602_v40  ;;  %v6587_v48 = vor.u32 %v7626_v32, %v6586_v28  ;;  %v6796_v56 = vld [vmem:[#allocation5 + $0x898] sm:$0xf0]  ;;  %v7664_v40 = vld [vmem:[#allocation5 + $0x74c] sm:$0xf] }
 0x20c   :  { %3976 = vmatpush.bf16.msra.mxu1 %v6543_v7  ;;  %3898 = vmatpush.bf16.msra.mxu3 %v6439_v31  ;;  %v2524_v47 = vpop.f32.mrf.mxu3  ;;  %v3120_v11 = vpop.f32.mrf.mxu1  ;;  %v6459_v31 = vor.u32 %v7594_v1, %v6458_v62  ;;  %v6620_v62 = vld [vmem:[#allocation5 + $0x478] sm:$0xf0]  ;;  %v7672_v1 = vld [vmem:[#allocation5 + $0x80c] sm:$0xf] }
 0x20d   :  { %3969 = vmatmul.bf16.vlgmr.msra.gmra.mxu0 %v8007_v20  ;;  %v2525_v7 = vadd.f32 %v2524_v47, %v2511_v52  ;;  %v8189_v44 = vadd.f32 %v3120_v11, %v8177_v18  ;;  %v6444_v52 = vld [vmem:[#allocation5 + $0x58] sm:$0xf0]  ;;  %v6607_v11 = vor.u32 %v7628_v53, %v6604_v6  ;;  %v7656_v32 = vld [vmem:[#allocation5 + $0x68c] sm:$0xf] }
 0x20e   :  { %v6447_v13 = vor.u32 %v7588_v33, %v6444_v52  ;;  %v6748_v39 = vld [vmem:[#allocation5 + $0x778] sm:$0xf0] }
 0x20f   :  { %3935 = vmatpush.bf16.msrb.mxu2 %v6523_v15  ;;  %3899 = vmatmul.bf16.vlgmr.msra.gmra.mxu3 %v8000_v57  ;;  %v6442_v15 = vld [vmem:[#allocation5 + $0x28] sm:$0xf]  ;;  %v6732_v28 = vld [vmem:[#allocation5 + $0x718] sm:$0xf0] }
 0x210   :  { %3947 = vmatpush.bf16.msrb.mxu3 %v6683_v3  ;;  %3977 = vmatpush.bf16.msra.mxu1 %v6527_v63  ;;  %v7590_v3 = vld [vmem:[#allocation5 + $0x54] sm:$0xf0]  ;;  %v6716_v33 = vld [vmem:[#allocation5 + $0x6b8] sm:$0xf0] }
 0x211   :  { %v2566_v26 = vpop.f32.mrf.mxu2  ;;  %v6443_v9 = vor.u32 %v7590_v3, %v6442_v15  ;;  %v6588_v3 = vld [vmem:[#allocation5 + $0x3b8] sm:$0xf0] }
 0x212   :  { %v3162_v63 = vpop.f32.mrf.mxu0 }
 0x213   :  { %3936 = vmatpush.bf16.msrb.mxu2 %v6507_v30  ;;  %v8191_v30 = vadd.f32 %v3162_v63, %v2525_v7  ;;  %v7668_v7 = vld [vmem:[#allocation5 + $0x7ac] sm:$0xf] }
 0x214   :  { %3948 = vmatpush.bf16.msrb.mxu3 %v6667_v24  ;;  %3978 = vmatpush.bf16.msra.mxu1 %v6511_v58  ;;  %v2567_v24 = vadd.f32 %v2566_v26, %v8169_v21  ;;  %v2578_v18 = vpop.f32.mrf.mxu3  ;;  %v6671_v58 = vor.u32 %v7644_v29, %v6668_v8  ;;  %v6652_v21 = vld [vmem:[#allocation5 + $0x538] sm:$0xf0]  ;;  %v7620_v63 = vld [vmem:[#allocation5 + $0x32c] sm:$0xf] }
 0x215   :  { %v2579_v25 = vadd.f32 %v2578_v18, %v2565_v43  ;;  %v6655_v50 = vor.u32 %v7640_v59, %v6652_v21  ;;  %v6783_v43 = vor.u32 %v7672_v1, %v6780_v12  ;;  %v6890_v59 = vld [vmem:[#allocation8 + $0x690] sm:$0xf]  ;;  %v7702_v21 = vld [vmem:[#allocation8 + $0x698] sm:$0xf0] }
 0x216   :  { %v6986_v1 = vld [vmem:[#allocation8 + $0x750] sm:$0xf] }
 0x217   :  { %3937 = vmatpush.bf16.msrb.mxu2 %v6491_v35  ;;  %v6812_v35 = vld [vmem:[#allocation5 + $0x8f8] sm:$0xf0] }
 0x218   :  { %3949 = vmatpush.bf16.msrb.mxu3 %v6651_v36  ;;  %3979 = vmatpush.bf16.msra.mxu1 %v6495_v4  ;;  %v6571_v36 = vor.u32 %v7622_v41, %v6570_v37  ;;  %v6815_v46 = vor.u32 %v7680_v23, %v6812_v35  ;;  %v7676_v4 = vld [vmem:[#allocation5 + $0x86c] sm:$0xf]  ;;  %v6700_v37 = vld [vmem:[#allocation5 + $0x658] sm:$0xf0]  ;;  %v6878_v35 = vld [vmem:[#allocation8 + $0x678] sm:$0xf] }
 0x21b   :  { %3938 = vmatpush.bf16.msrb.mxu2 %v6475_v61  ;;  %v6799_v61 = vor.u32 %v7676_v4, %v6796_v56  ;;  %v6866_v4 = vld [vmem:[#allocation8 + $0x660] sm:$0xf]  ;;  %v7696_v56 = vld [vmem:[#allocation8 + $0x668] sm:$0xf0] }
 0x21c   :  { %3950 = vmatpush.bf16.msrb.mxu3 %v6635_v60  ;;  %3980 = vmatpush.bf16.msra.mxu1 %v6479_v10  ;;  %v2580_v0 = vpop.f32.mrf.mxu3  ;;  %v7632_v60 = vld [vmem:[#allocation5 + $0x44c] sm:$0xf]  ;;  %v6764_v10 = vld [vmem:[#allocation5 + $0x7d8] sm:$0xf0] }
 0x21d   :  { %v2581_v49 = vadd.f32 %v2580_v0, %v2567_v24  ;;  %v6623_v47 = vor.u32 %v7632_v60, %v6620_v62  ;;  %v6854_v60 = vld [vmem:[#allocation8 + $0x648] sm:$0xf]  ;;  %v7693_v62 = vld [vmem:[#allocation8 + $0x650] sm:$0xf0] }
 0x21e   :  { %v6855_v12 = vor.u32 %v7693_v62, %v6854_v60  ;;  %v7082_v60 = vld [vmem:[#allocation8 + $0x810] sm:$0xf]  ;;  %v7750_v62 = vld [vmem:[#allocation8 + $0x818] sm:$0xf0] }
 0x21f   :  { %3939 = vmatpush.bf16.msrb.mxu2 %v6459_v31  ;;  %v6767_v31 = vor.u32 %v7668_v7, %v6764_v10  ;;  %v6974_v7 = vld [vmem:[#allocation8 + $0x738] sm:$0xf]  ;;  %v7723_v10 = vld [vmem:[#allocation8 + $0x740] sm:$0xf0] }
 0x220   :  { %3951 = vmatpush.bf16.msrb.mxu3 %v6619_v14  ;;  %3981 = vmatpush.bf16.msra.mxu1 %v6463_v55  ;;  %v7624_v14 = vld [vmem:[#allocation5 + $0x38c] sm:$0xf]  ;;  %v6751_v55 = vor.u32 %v7664_v40, %v6748_v39  ;;  %v7687_v40 = vld [vmem:[#allocation8 + $0x620] sm:$0xf0] }
 0x221   :  { %v6591_v22 = vor.u32 %v7624_v14, %v6588_v3  ;;  %v6830_v3 = vld [vmem:[#allocation8 + $0x618] sm:$0xf]  ;;  %v6962_v39 = vld [vmem:[#allocation8 + $0x720] sm:$0xf] }
 0x223   :  { %3940 = vmatpush.bf16.msrb.mxu2 %v6443_v9  ;;  %v6572_v9 = vld [vmem:[#allocation5 + $0x358] sm:$0xf0] }
 0x224   :  { %3952 = vmatpush.bf16.msrb.mxu3 %v6603_v27  ;;  %3982 = vmatpush.bf16.msra.mxu1 %v6447_v13  ;;  %v7660_v27 = vld [vmem:[#allocation5 + $0x6ec] sm:$0xf]  ;;  %v6575_v24 = vor.u32 %v7620_v63, %v6572_v9  ;;  %v6902_v13 = vld [vmem:[#allocation8 + $0x6a8] sm:$0xf]  ;;  %v7717_v9 = vld [vmem:[#allocation8 + $0x710] sm:$0xf0] }
 0x225   :  { %v6735_v18 = vor.u32 %v7660_v27, %v6732_v28 }
 0x226   :  { %3941 = vmatmul.bf16.vlgmr.msrb.gmra.mxu2 %v8000_v57 }
 0x227   :  { %3989 = vmatpush.bf16.msra.mxu2 %v6687_v17  ;;  %3983 = vmatmul.bf16.vlgmr.msra.gmra.mxu1 %v8000_v57  ;;  %v3174_v57 = vpop.f32.mrf.mxu1 }
 0x228   :  { %3953 = vmatpush.bf16.msrb.mxu3 %v6587_v48  ;;  %v8198_v2 = vadd.f32 %v3174_v57, %v8184_v34  ;;  %v7705_v48 = vld [vmem:[#allocation8 + $0x6b0] sm:$0xf0]  ;;  %v7726_v57 = vld [vmem:[#allocation8 + $0x758] sm:$0xf0] }
 0x229   :  { %v3132_v15 = vpop.f32.mrf.mxu2  ;;  %v6903_v41 = vor.u32 %v7705_v48, %v6902_v13  ;;  %v6987_v6 = vor.u32 %v7726_v57, %v6986_v1  ;;  %v6926_v13 = vld [vmem:[#allocation8 + $0x6d8] sm:$0xf]  ;;  %v7083_v1 = vor.u32 %v7750_v62, %v7082_v60  ;;  %v7777_v60 = vld [vmem:[#allocation8 + $0x8f0] sm:$0xf0] }
 0x22a   :  { %v3133_v16 = vadd.f32 %v3132_v15, %v8182_v42  ;;  %v3216_v19 = vpop.f32.mrf.mxu0  ;;  %v6856_v57 = vld [vmem:[#allocation8 + $0x654] sm:$0xf0] }
 0x22b   :  { %3990 = vmatpush.bf16.msra.mxu2 %v6671_v58  ;;  %v3217_v51 = vadd.f32 %v3216_v19, %v2579_v25  ;;  %v7652_v58 = vld [vmem:[#allocation5 + $0x62c] sm:$0xf]  ;;  %4669 = vmatpush.bf16.msrb.mxu0 %v6903_v41  ;;  %v7720_v19 = vld [vmem:[#allocation8 + $0x728] sm:$0xf0] }
 0x22c   :  { %3954 = vmatpush.bf16.msrb.mxu3 %v6571_v36  ;;  %v6703_v23 = vor.u32 %v7652_v58, %v6700_v37  ;;  %v7699_v36 = vld [vmem:[#allocation8 + $0x680] sm:$0xf0]  ;;  %v6963_v63 = vor.u32 %v7720_v19, %v6962_v39  ;;  %v7698_v37 = vld [vmem:[#allocation8 + $0x67c] sm:$0xf]  ;;  %v6976_v39 = vld [vmem:[#allocation8 + $0x744] sm:$0xf0] }
 0x22d   :  { %v6879_v54 = vor.u32 %v7699_v36, %v6878_v35  ;;  %v7711_v58 = vld [vmem:[#allocation8 + $0x6e0] sm:$0xf0] }
 0x22f   :  { %3991 = vmatpush.bf16.msra.mxu2 %v6655_v50  ;;  %3955 = vmatmul.bf16.vlgmr.msrb.gmra.mxu3 %v8003_v5  ;;  %v3176_v34 = vpop.f32.mrf.mxu1  ;;  %v6998_v50 = vld [vmem:[#allocation8 + $0x768] sm:$0xf] }
 0x230   :  { %4003 = vmatpush.bf16.msra.mxu3 %v6815_v46  ;;  %v8202_v26 = vadd.f32 %v3176_v34, %v8191_v30  ;;  %v6719_v30 = vor.u32 %v7656_v32, %v6716_v33  ;;  %v7729_v46 = vld [vmem:[#allocation8 + $0x770] sm:$0xf0]  ;;  %v7684_v34 = vld [vmem:[#allocation8 + $0x608] sm:$0xf0]  ;;  %v6938_v33 = vld [vmem:[#allocation8 + $0x6f0] sm:$0xf] }
 0x231   :  { %v3134_v17 = vpop.f32.mrf.mxu2 }
 0x232   :  { %v3146_v42 = vpop.f32.mrf.mxu3  ;;  %v3135_v52 = vadd.f32 %v3134_v17, %v8189_v44  ;;  %v3218_v29 = vpop.f32.mrf.mxu0  ;;  %v6891_v44 = vor.u32 %v7702_v21, %v6890_v59  ;;  %v7704_v17 = vld [vmem:[#allocation8 + $0x6ac] sm:$0xf]  ;;  %v6880_v59 = vld [vmem:[#allocation8 + $0x684] sm:$0xf0] }
 0x233   :  { %3992 = vmatpush.bf16.msra.mxu2 %v6639_v38  ;;  %v8205_v25 = vadd.f32 %v3146_v42, %v3133_v16  ;;  %v3219_v8 = vadd.f32 %v3218_v29, %v2581_v49  ;;  %v6999_v49 = vor.u32 %v7729_v46, %v6998_v50  ;;  %v6831_v16 = vor.u32 %v7687_v40, %v6830_v3  ;;  %v6904_v42 = vld [vmem:[#allocation8 + $0x6b4] sm:$0xf0]  ;;  %v7701_v29 = vld [vmem:[#allocation8 + $0x694] sm:$0xf]  ;;  %v7094_v21 = vld [vmem:[#allocation8 + $0x828] sm:$0xf] }
 0x234   :  { %4004 = vmatpush.bf16.msra.mxu3 %v6799_v61  ;;  %4670 = vmatpush.bf16.msrb.mxu0 %v6891_v44  ;;  %v6907_v32 = vor.u32 %v7704_v17, %v6904_v42  ;;  %v6927_v44 = vor.u32 %v7711_v58, %v6926_v13  ;;  %v6883_v35 = vor.u32 %v7698_v37, %v6880_v59  ;;  %v7708_v50 = vld [vmem:[#allocation8 + $0x6c8] sm:$0xf0]  ;;  %v7695_v46 = vld [vmem:[#allocation8 + $0x664] sm:$0xf]  ;;  %v6844_v3 = vld [vmem:[#allocation8 + $0x63c] sm:$0xf0] }
 0x235   :  { %4683 = vmatpush.bf16.msrb.mxu1 %v6999_v49  ;;  %v6868_v49 = vld [vmem:[#allocation8 + $0x66c] sm:$0xf0]  ;;  %v7722_v40 = vld [vmem:[#allocation8 + $0x73c] sm:$0xf]  ;;  %v7046_v17 = vld [vmem:[#allocation8 + $0x7c8] sm:$0xf] }
 0x236   :  { %v6979_v19 = vor.u32 %v7722_v40, %v6976_v39  ;;  %v7741_v42 = vld [vmem:[#allocation8 + $0x7d0] sm:$0xf0]  ;;  %v7716_v13 = vld [vmem:[#allocation8 + $0x70c] sm:$0xf]  ;;  %v7034_v58 = vld [vmem:[#allocation8 + $0x7b0] sm:$0xf] }
 0x237   :  { %3993 = vmatpush.bf16.msra.mxu2 %v6623_v47  ;;  %v6842_v47 = vld [vmem:[#allocation8 + $0x630] sm:$0xf]  ;;  %v7738_v37 = vld [vmem:[#allocation8 + $0x7b8] sm:$0xf0]  ;;  %v7749_v40 = vld [vmem:[#allocation8 + $0x814] sm:$0xf] }
 0x238   :  { %4005 = vmatpush.bf16.msra.mxu3 %v6783_v43  ;;  %4671 = vmatpush.bf16.msrb.mxu0 %v6879_v54  ;;  %v7690_v43 = vld [vmem:[#allocation8 + $0x638] sm:$0xf0]  ;;  %v7728_v54 = vld [vmem:[#allocation8 + $0x76c] sm:$0xf]  ;;  %v7035_v59 = vor.u32 %v7738_v37, %v7034_v58  ;;  %v7084_v39 = vld [vmem:[#allocation8 + $0x81c] sm:$0xf0] }
 0x239   :  { %4684 = vmatpush.bf16.msrb.mxu1 %v6987_v6  ;;  %v7765_v58 = vld [vmem:[#allocation8 + $0x890] sm:$0xf0] }
 0x23a   :  { %v3148_v0 = vpop.f32.mrf.mxu3 }
 0x23b   :  { %3994 = vmatpush.bf16.msra.mxu2 %v6607_v11  ;;  %v8208_v45 = vadd.f32 %v3148_v0, %v3135_v52  ;;  %v7714_v52 = vld [vmem:[#allocation8 + $0x6f8] sm:$0xf0]  ;;  %v6914_v0 = vld [vmem:[#allocation8 + $0x6c0] sm:$0xf] }
 0x23c   :  { %4006 = vmatpush.bf16.msra.mxu3 %v6767_v31  ;;  %v6975_v31 = vor.u32 %v7723_v10, %v6974_v7  ;;  %v7070_v10 = vld [vmem:[#allocation8 + $0x7f8] sm:$0xf] }
 0x23e   :  { %4685 = vmatpush.bf16.msrb.mxu1 %v6975_v31 }
 0x23f   :  { %3995 = vmatpush.bf16.msra.mxu2 %v6591_v22 }
 0x240   :  { %4007 = vmatpush.bf16.msra.mxu3 %v6751_v55 }
 0x242   :  { %4686 = vmatpush.bf16.msrb.mxu1 %v6963_v63  ;;  %v6832_v63 = vld [vmem:[#allocation8 + $0x624] sm:$0xf0] }
 0x243   :  { %3996 = vmatpush.bf16.msra.mxu2 %v6575_v24 }
 0x244   :  { %4008 = vmatpush.bf16.msra.mxu3 %v6735_v18  ;;  %v3230_v38 = vpop.f32.mrf.mxu1 }
 0x245   :  { %v8211_v61 = vadd.f32 %v3230_v38, %v3217_v51  ;;  %v6818_v51 = vld [vmem:[#allocation8 + $0x600] sm:$0xf] }
 0x246   :  { %3997 = vmatmul.bf16.vlgmr.msra.gmra.mxu2 %v8003_v5  ;;  %v6867_v5 = vor.u32 %v7696_v56, %v6866_v4  ;;  %v6819_v24 = vor.u32 %v7684_v34, %v6818_v51  ;;  %v7000_v4 = vld [vmem:[#allocation8 + $0x774] sm:$0xf0]  ;;  %v6915_v56 = vor.u32 %v7708_v50, %v6914_v0  ;;  %v7058_v51 = vld [vmem:[#allocation8 + $0x7e0] sm:$0xf]  ;;  %v7744_v34 = vld [vmem:[#allocation8 + $0x7e8] sm:$0xf0] }
 0x247   :  { %v7003_v38 = vor.u32 %v7728_v54, %v7000_v4  ;;  %v7022_v0 = vld [vmem:[#allocation8 + $0x798] sm:$0xf]  ;;  %v7735_v50 = vld [vmem:[#allocation8 + $0x7a0] sm:$0xf0]  ;;  %v7710_v54 = vld [vmem:[#allocation8 + $0x6dc] sm:$0xf] }
 0x248   :  { %4009 = vmatpush.bf16.msra.mxu3 %v6719_v30  ;;  %4672 = vmatpush.bf16.msrb.mxu0 %v6867_v5  ;;  %v6892_v30 = vld [vmem:[#allocation8 + $0x69c] sm:$0xf0]  ;;  %v6871_v5 = vor.u32 %v7695_v46, %v6868_v49  ;;  %v7023_v49 = vor.u32 %v7735_v50, %v7022_v0  ;;  %v6928_v4 = vld [vmem:[#allocation8 + $0x6e4] sm:$0xf0]  ;;  %v6910_v50 = vld [vmem:[#allocation8 + $0x6b0] sm:$0xf] }
 0x249   :  { %v3188_v53 = vpop.f32.mrf.mxu2 }
 0x24a   :  { %v3189_v11 = vadd.f32 %v3188_v53, %v8198_v2  ;;  %v6950_v2 = vld [vmem:[#allocation8 + $0x708] sm:$0xf]  ;;  %v6988_v53 = vld [vmem:[#allocation8 + $0x75c] sm:$0xf0] }
 0x24b   :  { %v6951_v18 = vor.u32 %v7717_v9, %v6950_v2  ;;  %v7719_v2 = vld [vmem:[#allocation8 + $0x724] sm:$0xf] }
 0x24c   :  { %4010 = vmatpush.bf16.msra.mxu3 %v6703_v23  ;;  %4673 = vmatpush.bf16.msrb.mxu0 %v6855_v12  ;;  %v3232_v14 = vpop.f32.mrf.mxu1  ;;  %v7753_v23 = vld [vmem:[#allocation8 + $0x830] sm:$0xf0]  ;;  %v7692_v12 = vld [vmem:[#allocation8 + $0x64c] sm:$0xf] }
 0x24d   :  { %v8214_v15 = vadd.f32 %v3232_v14, %v3219_v8  ;;  %4687 = vmatpush.bf16.msrb.mxu1 %v6951_v18  ;;  %v6939_v8 = vor.u32 %v7714_v52, %v6938_v33  ;;  %v7095_v36 = vor.u32 %v7753_v23, %v7094_v21  ;;  %v7047_v52 = vor.u32 %v7741_v42, %v7046_v17  ;;  %v7713_v21 = vld [vmem:[#allocation8 + $0x6f4] sm:$0xf]  ;;  %v6940_v23 = vld [vmem:[#allocation8 + $0x6fc] sm:$0xf0]  ;;  %v7768_v17 = vld [vmem:[#allocation8 + $0x8a8] sm:$0xf0] }
 0x24f   :  { %4011 = vmatmul.bf16.vlgmr.msra.gmra.mxu3 %v8007_v20  ;;  %v6843_v20 = vor.u32 %v7690_v43, %v6842_v47  ;;  %4697 = vmatpush.bf16.msrb.mxu2 %v7095_v36  ;;  %v7725_v47 = vld [vmem:[#allocation8 + $0x754] sm:$0xf]  ;;  %v6859_v43 = vor.u32 %v7692_v12, %v6856_v57  ;;  %v7732_v12 = vld [vmem:[#allocation8 + $0x788] sm:$0xf0] }
 0x250   :  { %v6991_v7 = vor.u32 %v7725_v47, %v6988_v53  ;;  %v7752_v47 = vld [vmem:[#allocation8 + $0x82c] sm:$0xf] }
 0x251   :  { %4674 = vmatpush.bf16.msrb.mxu0 %v6843_v20  ;;  %v3190_v22 = vpop.f32.mrf.mxu2  ;;  %4688 = vmatpush.bf16.msrb.mxu1 %v6939_v8  ;;  %v7689_v20 = vld [vmem:[#allocation8 + $0x634] sm:$0xf]  ;;  %v6820_v8 = vld [vmem:[#allocation8 + $0x60c] sm:$0xf0] }
 0x252   :  { %v3202_v55 = vpop.f32.mrf.mxu3  ;;  %v3191_v27 = vadd.f32 %v3190_v22, %v8202_v26  ;;  %v6895_v26 = vor.u32 %v7701_v29, %v6892_v30  ;;  %v7059_v22 = vor.u32 %v7744_v34, %v7058_v51  ;;  %v7683_v29 = vld [vmem:[#allocation8 + $0x604] sm:$0xf]  ;;  %v7087_v51 = vor.u32 %v7749_v40, %v7084_v39  ;;  %v7166_v34 = vld [vmem:[#allocation8 + $0x8b8] sm:$0xf]  ;;  %v7024_v40 = vld [vmem:[#allocation8 + $0x7a4] sm:$0xf0] }
 0x253   :  { %v8217_v28 = vadd.f32 %v3202_v55, %v3189_v11  ;;  %4698 = vmatpush.bf16.msrb.mxu2 %v7083_v1  ;;  %v7747_v11 = vld [vmem:[#allocation8 + $0x800] sm:$0xf0]  ;;  %v7686_v55 = vld [vmem:[#allocation8 + $0x61c] sm:$0xf]  ;;  %v6823_v30 = vor.u32 %v7683_v29, %v6820_v8  ;;  %v7010_v1 = vld [vmem:[#allocation8 + $0x780] sm:$0xf] }
 0x254   :  { %v7071_v14 = vor.u32 %v7747_v11, %v7070_v10  ;;  %v6835_v9 = vor.u32 %v7686_v55, %v6832_v63  ;;  %v7011_v57 = vor.u32 %v7732_v12, %v7010_v1  ;;  %v6916_v10 = vld [vmem:[#allocation8 + $0x6cc] sm:$0xf0]  ;;  %v7737_v1 = vld [vmem:[#allocation8 + $0x7b4] sm:$0xf]  ;;  %v7036_v12 = vld [vmem:[#allocation8 + $0x7bc] sm:$0xf0] }
 0x255   :  { %4675 = vmatpush.bf16.msrb.mxu0 %v6831_v16  ;;  %4689 = vmatpush.bf16.msrb.mxu1 %v6927_v44  ;;  %v6847_v16 = vor.u32 %v7689_v20, %v6844_v3  ;;  %v6943_v44 = vor.u32 %v7713_v21, %v6940_v23  ;;  %v7178_v20 = vld [vmem:[#allocation8 + $0x8d0] sm:$0xf] }
 0x257   :  { %4699 = vmatpush.bf16.msrb.mxu2 %v7071_v14 }
 0x259   :  { %4676 = vmatpush.bf16.msrb.mxu0 %v6819_v24  ;;  %4690 = vmatpush.bf16.msrb.mxu1 %v6915_v56  ;;  %v8227_v56 = vld [vmem:[#allocation7 + $0x8] sm:$0xf] }
 0x25a   :  { %v3204_v48 = vpop.f32.mrf.mxu3  ;;  %v3361_v53 = vperm.slane %v8227_v56, 0 }
 0x25b   :  { %v8219_v41 = vadd.f32 %v3204_v48, %v3191_v27  ;;  %4700 = vmatpush.bf16.msrb.mxu2 %v7059_v22  ;;  %v6952_v48 = vld [vmem:[#allocation8 + $0x714] sm:$0xf0]  ;;  %v7771_v22 = vld [vmem:[#allocation8 + $0x8c0] sm:$0xf0] }
 0x25c   :  { %v7167_v55 = vor.u32 %v7771_v22, %v7166_v34 }
 0x25d   :  { %4725 = vmatpush.bf16.msra.mxu0 %v6907_v32  ;;  %4739 = vmatpush.bf16.msra.mxu1 %v7003_v38  ;;  %v7190_v38 = vld [vmem:[#allocation8 + $0x8e8] sm:$0xf] }
 0x25e   :  { %v7191_v62 = vor.u32 %v7777_v60, %v7190_v38 }
 0x25f   :  { %4701 = vmatpush.bf16.msrb.mxu2 %v7047_v52  ;;  %v7060_v52 = vld [vmem:[#allocation8 + $0x7ec] sm:$0xf0] }
 0x260   :  { %4711 = vmatpush.bf16.msrb.mxu3 %v7191_v62 }
 0x261   :  { %4726 = vmatpush.bf16.msra.mxu0 %v6895_v26  ;;  %4740 = vmatpush.bf16.msra.mxu1 %v6991_v7  ;;  %v6955_v26 = vor.u32 %v7716_v13, %v6952_v48  ;;  %v7707_v7 = vld [vmem:[#allocation8 + $0x6c4] sm:$0xf] }
 0x262   :  { %v6919_v11 = vor.u32 %v7707_v7, %v6916_v10  ;;  %v7118_v7 = vld [vmem:[#allocation8 + $0x858] sm:$0xf]  ;;  %v7759_v10 = vld [vmem:[#allocation8 + $0x860] sm:$0xf0] }
 0x263   :  { %4702 = vmatpush.bf16.msrb.mxu2 %v7035_v59 }
 0x264   :  { %v3872_v36 = vpop.f32.mrf.mxu1 }
 0x265   :  { %4727 = vmatpush.bf16.msra.mxu0 %v6883_v35  ;;  %4741 = vmatpush.bf16.msra.mxu1 %v6979_v19 }
 0x267   :  { %4703 = vmatpush.bf16.msrb.mxu2 %v7023_v49  ;;  %v7706_v49 = vld [vmem:[#allocation8 + $0x6b8] sm:$0xf0] }
 0x268   :  { %v6911_v62 = vor.u32 %v7706_v49, %v6910_v50  ;;  %v7770_v50 = vld [vmem:[#allocation8 + $0x8bc] sm:$0xf]  ;;  %v7168_v49 = vld [vmem:[#allocation8 + $0x8c4] sm:$0xf0] }
 0x269   :  { %4728 = vmatpush.bf16.msra.mxu0 %v6871_v5  ;;  %v3244_v6 = vpop.f32.mrf.mxu2  ;;  %v6931_v5 = vor.u32 %v7710_v54, %v6928_v4  ;;  %v7130_v4 = vld [vmem:[#allocation8 + $0x870] sm:$0xf] }
 0x26a   :  { %v3245_v31 = vadd.f32 %v3244_v6, %v8211_v61  ;;  %v6964_v61 = vld [vmem:[#allocation8 + $0x72c] sm:$0xf0] }
 0x26b   :  { %v6967_v18 = vor.u32 %v7719_v2, %v6964_v61  ;;  %4704 = vmatpush.bf16.msrb.mxu2 %v7011_v57  ;;  %v7746_v2 = vld [vmem:[#allocation8 + $0x7fc] sm:$0xf] }
 0x26c   :  { %v3874_v19 = vpop.f32.mrf.mxu1 }
 0x26d   :  { %4729 = vmatpush.bf16.msra.mxu0 %v6859_v43  ;;  %4742 = vmatpush.bf16.msra.mxu1 %v6967_v18  ;;  %v7096_v43 = vld [vmem:[#allocation8 + $0x834] sm:$0xf0]  ;;  %v7154_v18 = vld [vmem:[#allocation8 + $0x8a0] sm:$0xf] }
 0x26e   :  { %v7099_v6 = vor.u32 %v7752_v47, %v7096_v43  ;;  %v7155_v42 = vor.u32 %v7768_v17, %v7154_v18  ;;  %v6898_v43 = vld [vmem:[#allocation8 + $0x698] sm:$0xf]  ;;  %v7697_v17 = vld [vmem:[#allocation8 + $0x670] sm:$0xf0] }
 0x270   :  { %4753 = vmatpush.bf16.msra.mxu2 %v7099_v6  ;;  %v7039_v6 = vor.u32 %v7737_v1, %v7036_v12  ;;  %v6982_v1 = vld [vmem:[#allocation8 + $0x740] sm:$0xf]  ;;  %v7724_v12 = vld [vmem:[#allocation8 + $0x748] sm:$0xf0] }
 0x271   :  { %4730 = vmatpush.bf16.msra.mxu0 %v6847_v16  ;;  %v3246_v27 = vpop.f32.mrf.mxu2  ;;  %4743 = vmatpush.bf16.msra.mxu1 %v6955_v26  ;;  %v7142_v26 = vld [vmem:[#allocation8 + $0x888] sm:$0xf] }
 0x272   :  { %v3258_v24 = vpop.f32.mrf.mxu3  ;;  %v3247_v32 = vadd.f32 %v3246_v27, %v8214_v15  ;;  %v3858_v15 = vpop.f32.mrf.mxu0  ;;  %v7143_v59 = vor.u32 %v7765_v58, %v7142_v26  ;;  %v7773_v58 = vld [vmem:[#allocation8 + $0x8d4] sm:$0xf] }
 0x273   :  { %v8223_v33 = vadd.f32 %v3258_v24, %v3245_v31  ;;  %v7774_v31 = vld [vmem:[#allocation8 + $0x8d8] sm:$0xf0]  ;;  %v3859_v16 = vadd.f32 %v3858_v15, %v3361_v53  ;;  %v7740_v15 = vld [vmem:[#allocation8 + $0x7cc] sm:$0xf] }
 0x274   :  { %v7179_v14 = vor.u32 %v7774_v31, %v7178_v20  ;;  %4754 = vmatpush.bf16.msra.mxu2 %v7087_v51  ;;  %v7700_v51 = vld [vmem:[#allocation8 + $0x688] sm:$0xf0] }
 0x275   :  { %4731 = vmatpush.bf16.msra.mxu0 %v6835_v9  ;;  %4744 = vmatpush.bf16.msra.mxu1 %v6943_v44  ;;  %v7072_v9 = vld [vmem:[#allocation8 + $0x804] sm:$0xf0]  ;;  %v3873_v61 = vadd.f32 %v3872_v36, %v3859_v16  ;;  %v7048_v44 = vld [vmem:[#allocation8 + $0x7d4] sm:$0xf0] }
 0x276   :  { %4712 = vmatpush.bf16.msrb.mxu3 %v7179_v14  ;;  %v7075_v24 = vor.u32 %v7746_v2, %v7072_v9  ;;  %v7051_v54 = vor.u32 %v7740_v15, %v7048_v44  ;;  %v6874_v9 = vld [vmem:[#allocation8 + $0x668] sm:$0xf] }
 0x278   :  { %4755 = vmatpush.bf16.msra.mxu2 %v7075_v24  ;;  %v7192_v24 = vld [vmem:[#allocation8 + $0x8f4] sm:$0xf0] }
 0x279   :  { %4732 = vmatpush.bf16.msra.mxu0 %v6823_v30  ;;  %4745 = vmatpush.bf16.msra.mxu1 %v6931_v5  ;;  %v3362_v30 = vperm.slane %v8227_v56, 1  ;;  %v7762_v5 = vld [vmem:[#allocation8 + $0x878] sm:$0xf0] }
 0x27a   :  { %v3260_v35 = vpop.f32.mrf.mxu3  ;;  %v3860_v3 = vpop.f32.mrf.mxu0  ;;  %4713 = vmatpush.bf16.msrb.mxu3 %v7167_v55  ;;  %v7131_v60 = vor.u32 %v7762_v5, %v7130_v4  ;;  %v7106_v55 = vld [vmem:[#allocation8 + $0x840] sm:$0xf]  ;;  %v6850_v5 = vld [vmem:[#allocation8 + $0x638] sm:$0xf] }
 0x27b   :  { %v8225_v46 = vadd.f32 %v3260_v35, %v3247_v32  ;;  %v3861_v27 = vadd.f32 %v3860_v3, %v3361_v53  ;;  %v7743_v32 = vld [vmem:[#allocation8 + $0x7e4] sm:$0xf]  ;;  %v7734_v3 = vld [vmem:[#allocation8 + $0x79c] sm:$0xf] }
 0x27c   :  { %v7063_v13 = vor.u32 %v7743_v32, %v7060_v52  ;;  %v7703_v53 = vld [vmem:[#allocation8 + $0x6a0] sm:$0xf0]  ;;  %v7027_v34 = vor.u32 %v7734_v3, %v7024_v40  ;;  %v7012_v52 = vld [vmem:[#allocation8 + $0x78c] sm:$0xf0] }
 0x27d   :  { %4746 = vmatpush.bf16.msra.mxu1 %v6919_v11  ;;  %v3875_v8 = vadd.f32 %v3874_v19, %v3861_v27  ;;  %v7119_v11 = vor.u32 %v7759_v10, %v7118_v7  ;;  %v6899_v14 = vor.u32 %v7703_v53, %v6898_v43  ;;  %v6886_v19 = vld [vmem:[#allocation8 + $0x680] sm:$0xf]  ;;  %v7776_v27 = vld [vmem:[#allocation8 + $0x8ec] sm:$0xf]  ;;  %v7731_v32 = vld [vmem:[#allocation8 + $0x784] sm:$0xf]  ;;  %v6983_v7 = vor.u32 %v7724_v12, %v6982_v1 }
 0x27e   :  { %4714 = vmatpush.bf16.msrb.mxu3 %v7155_v42  ;;  %4756 = vmatpush.bf16.msra.mxu2 %v7063_v13  ;;  %v6887_v18 = vor.u32 %v7700_v51, %v6886_v19  ;;  %v7195_v42 = vor.u32 %v7776_v27, %v7192_v24  ;;  %v7730_v13 = vld [vmem:[#allocation8 + $0x778] sm:$0xf0]  ;;  %v7156_v43 = vld [vmem:[#allocation8 + $0x8ac] sm:$0xf0]  ;;  %v3363_v53 = vperm.slane %v8227_v56, 2 }
 0x27f   :  { %v6838_v10 = vld [vmem:[#allocation8 + $0x620] sm:$0xf]  ;;  %v7761_v24 = vld [vmem:[#allocation8 + $0x874] sm:$0xf] }
 0x282   :  { %v3914_v48 = vpop.f32.mrf.mxu0  ;;  %4715 = vmatpush.bf16.msrb.mxu3 %v7143_v59  ;;  %4757 = vmatpush.bf16.msra.mxu2 %v7051_v54  ;;  %v6875_v59 = vor.u32 %v7697_v17, %v6874_v9  ;;  %v7718_v9 = vld [vmem:[#allocation8 + $0x718] sm:$0xf0] }
 0x284   :  { %v3928_v37 = vpop.f32.mrf.mxu1 }
 0x286   :  { %4716 = vmatpush.bf16.msrb.mxu3 %v7131_v60  ;;  %4758 = vmatpush.bf16.msra.mxu2 %v7039_v6 }
 0x289   :  { %v3886_v63 = vpop.f32.mrf.mxu2 }
 0x28a   :  { %v3887_v29 = vadd.f32 %v3886_v63, %v3873_v61  ;;  %v3916_v31 = vpop.f32.mrf.mxu0  ;;  %4717 = vmatpush.bf16.msrb.mxu3 %v7119_v11  ;;  %v7756_v63 = vld [vmem:[#allocation8 + $0x848] sm:$0xf0]  ;;  %4759 = vmatpush.bf16.msra.mxu2 %v7027_v34  ;;  %v6826_v34 = vld [vmem:[#allocation8 + $0x608] sm:$0xf] }
 0x28b   :  { %v7107_v61 = vor.u32 %v7756_v63, %v7106_v55  ;;  %v7688_v11 = vld [vmem:[#allocation8 + $0x628] sm:$0xf0] }
 0x28c   :  { %v4017_v35 = vmax.f32 %v3887_v29, 0.0  ;;  %v3930_v22 = vpop.f32.mrf.mxu1  ;;  %v6839_v40 = vor.u32 %v7688_v11, %v6838_v10 }
 0x28e   :  { %4718 = vmatpush.bf16.msrb.mxu3 %v7107_v61 }
 0x291   :  { %v3888_v21 = vpop.f32.mrf.mxu2 }
 0x292   :  { %v3900_v23 = vpop.f32.mrf.mxu3  ;;  %v3889_v36 = vadd.f32 %v3888_v21, %v3875_v8  ;;  %4767 = vmatpush.bf16.msra.mxu3 %v7195_v42  ;;  %v3970_v3 = vpop.f32.mrf.mxu0 }
 0x293   :  { %v3901_v0 = vadd.f32 %v3900_v23, %v3362_v30  ;;  %v6862_v23 = vld [vmem:[#allocation8 + $0x650] sm:$0xf] }
 0x294   :  { %v4021_v38 = vmax.f32 %v3889_v36, 0.0  ;;  %v6994_v36 = vld [vmem:[#allocation8 + $0x758] sm:$0xf] }
 0x295   :  { %v3915_v47 = vadd.f32 %v3914_v48, %v3901_v0  ;;  %v7015_v48 = vor.u32 %v7731_v32, %v7012_v52  ;;  %v7727_v0 = vld [vmem:[#allocation8 + $0x760] sm:$0xf0]  ;;  %v6946_v52 = vld [vmem:[#allocation8 + $0x6f8] sm:$0xf] }
 0x296   :  { %v8231_v57 = vpack.c.bf16 %v4021_v38, %v4017_v35  ;;  %v7694_v35 = vld [vmem:[#allocation8 + $0x658] sm:$0xf0]  ;;  %v6995_v4 = vor.u32 %v7727_v0, %v6994_v36  ;;  %v7171_v38 = vor.u32 %v7770_v50, %v7168_v49  ;;  %v7108_v36 = vld [vmem:[#allocation8 + $0x84c] sm:$0xf0] }
 0x297   :  { %v3929_v39 = vadd.f32 %v3928_v37, %v3915_v47  ;;  %4760 = vmatpush.bf16.msra.mxu2 %v7015_v48  ;;  %v7180_v37 = vld [vmem:[#allocation8 + $0x8dc] sm:$0xf0]  ;;  %v6863_v54 = vor.u32 %v7694_v35, %v6862_v23  ;;  %v7767_v47 = vld [vmem:[#allocation8 + $0x8a4] sm:$0xf]  ;;  %v7712_v23 = vld [vmem:[#allocation8 + $0x6e8] sm:$0xf0] }
 0x298   :  { %4677 = vmatmul.bf16.vlgmr.msrb.gmra.mxu0 %v8231_v57  ;;  %v7183_v15 = vor.u32 %v7773_v58, %v7180_v37  ;;  %v7755_v35 = vld [vmem:[#allocation8 + $0x844] sm:$0xf] }
 0x299   :  { %4781 = vmatpush.bf16.msrb.mxu0 %v6911_v62  ;;  %v4018_v29 = vmax.f32 %v3929_v39, 0.0  ;;  %v7691_v62 = vld [vmem:[#allocation8 + $0x640] sm:$0xf0]  ;;  %v7764_v39 = vld [vmem:[#allocation8 + $0x88c] sm:$0xf] }
 0x29a   :  { %v3902_v20 = vpop.f32.mrf.mxu3  ;;  %4768 = vmatpush.bf16.msra.mxu3 %v7183_v15  ;;  %v6851_v6 = vor.u32 %v7691_v62, %v6850_v5  ;;  %v7111_v5 = vor.u32 %v7755_v35, %v7108_v36  ;;  %v7772_v35 = vld [vmem:[#allocation8 + $0x8c8] sm:$0xf0] }
 0x29b   :  { %v3903_v16 = vadd.f32 %v3902_v20, %v3362_v30  ;;  %v7006_v30 = vld [vmem:[#allocation8 + $0x770] sm:$0xf]  ;;  %v7159_v20 = vor.u32 %v7767_v47, %v7156_v43  ;;  %v7090_v43 = vld [vmem:[#allocation8 + $0x818] sm:$0xf] }
 0x29c   :  { %v7007_v21 = vor.u32 %v7730_v13, %v7006_v30  ;;  %v7758_v30 = vld [vmem:[#allocation8 + $0x85c] sm:$0xf]  ;;  %v7120_v13 = vld [vmem:[#allocation8 + $0x864] sm:$0xf0] }
 0x29d   :  { %v3917_v2 = vadd.f32 %v3916_v31, %v3903_v16  ;;  %4782 = vmatpush.bf16.msrb.mxu0 %v6899_v14  ;;  %v6970_v31 = vld [vmem:[#allocation8 + $0x728] sm:$0xf]  ;;  %v7721_v14 = vld [vmem:[#allocation8 + $0x730] sm:$0xf0]  ;;  %v7144_v16 = vld [vmem:[#allocation8 + $0x894] sm:$0xf0]  ;;  %v7123_v58 = vor.u32 %v7758_v30, %v7120_v13 }
 0x29e   :  { %4769 = vmatpush.bf16.msra.mxu3 %v7171_v38  ;;  %v6971_v51 = vor.u32 %v7721_v14, %v6970_v31  ;;  %v7147_v55 = vor.u32 %v7764_v39, %v7144_v16  ;;  %v6922_v38 = vld [vmem:[#allocation8 + $0x6c8] sm:$0xf]  ;;  %v7745_v14 = vld [vmem:[#allocation8 + $0x7f0] sm:$0xf0]  ;;  %v7054_v39 = vld [vmem:[#allocation8 + $0x7d0] sm:$0xf] }
 0x29f   :  { %v3931_v8 = vadd.f32 %v3930_v22, %v3917_v2  ;;  %v7685_v22 = vld [vmem:[#allocation8 + $0x610] sm:$0xf0]  ;;  %v6958_v2 = vld [vmem:[#allocation8 + $0x710] sm:$0xf]  ;;  %v7066_v31 = vld [vmem:[#allocation8 + $0x7e8] sm:$0xf] }
 0x2a0   :  { %v6827_v27 = vor.u32 %v7685_v22, %v6826_v34  ;;  %v6959_v42 = vor.u32 %v7718_v9, %v6958_v2  ;;  %v7742_v16 = vld [vmem:[#allocation8 + $0x7d8] sm:$0xf0]  ;;  %v7733_v30 = vld [vmem:[#allocation8 + $0x790] sm:$0xf0] }
 0x2a1   :  { %v4022_v26 = vmax.f32 %v3931_v8, 0.0  ;;  %4783 = vmatpush.bf16.msrb.mxu0 %v6887_v18  ;;  %v7132_v18 = vld [vmem:[#allocation8 + $0x87c] sm:$0xf0]  ;;  %v7055_v34 = vor.u32 %v7742_v16, %v7054_v39 }
 0x2a2   :  { %4770 = vmatpush.bf16.msra.mxu3 %v7159_v20  ;;  %v7135_v32 = vor.u32 %v7761_v24, %v7132_v18  ;;  %v7736_v24 = vld [vmem:[#allocation8 + $0x7a8] sm:$0xf0] }
 0x2a3   :  { %v8234_v44 = vpack.c.bf16 %v4022_v26, %v4018_v29  ;;  %v7715_v29 = vld [vmem:[#allocation8 + $0x700] sm:$0xf0] }
 0x2a4   :  { %v6947_v26 = vor.u32 %v7715_v29, %v6946_v52  ;;  %v3984_v10 = vpop.f32.mrf.mxu1  ;;  %v7198_v52 = vld [vmem:[#allocation8 + $0x8f0] sm:$0xf]  ;;  %v7778_v29 = vld [vmem:[#allocation8 + $0x8f8] sm:$0xf0] }
 0x2a5   :  { %4691 = vmatmul.bf16.vlgmr.msrb.gmra.mxu1 %v8234_v44  ;;  %4784 = vmatpush.bf16.msrb.mxu0 %v6875_v59  ;;  %v3972_v59 = vpop.f32.mrf.mxu0 }
 0x2a6   :  { %4795 = vmatpush.bf16.msrb.mxu1 %v7007_v21  ;;  %4771 = vmatpush.bf16.msra.mxu3 %v7147_v55  ;;  %v6934_v21 = vld [vmem:[#allocation8 + $0x6e0] sm:$0xf]  ;;  %v7042_v55 = vld [vmem:[#allocation8 + $0x7b8] sm:$0xf] }
 0x2a7   :  { %v6935_v49 = vor.u32 %v7712_v23, %v6934_v21  ;;  %v7775_v21 = vld [vmem:[#allocation8 + $0x8e0] sm:$0xf0] }
 0x2a8   :  { %4733 = vmatmul.bf16.vlgmr.msra.gmra.mxu0 %v8231_v57 }
 0x2a9   :  { %v3942_v60 = vpop.f32.mrf.mxu2  ;;  %4785 = vmatpush.bf16.msrb.mxu0 %v6863_v54  ;;  %v7102_v54 = vld [vmem:[#allocation8 + $0x830] sm:$0xf] }
 0x2aa   :  { %4796 = vmatpush.bf16.msrb.mxu1 %v6995_v4  ;;  %v3943_v19 = vadd.f32 %v3942_v60, %v3363_v53  ;;  %4772 = vmatpush.bf16.msra.mxu3 %v7135_v32  ;;  %v7754_v4 = vld [vmem:[#allocation8 + $0x838] sm:$0xf0]  ;;  %v7709_v60 = vld [vmem:[#allocation8 + $0x6d0] sm:$0xf0] }
 0x2ab   :  { %v7103_v1 = vor.u32 %v7754_v4, %v7102_v54  ;;  %v6923_v47 = vor.u32 %v7709_v60, %v6922_v38  ;;  %v7150_v54 = vld [vmem:[#allocation8 + $0x890] sm:$0xf]  ;;  %v7766_v4 = vld [vmem:[#allocation8 + $0x898] sm:$0xf0]  ;;  %v7138_v38 = vld [vmem:[#allocation8 + $0x878] sm:$0xf] }
 0x2ac   :  { %v3986_v22 = vpop.f32.mrf.mxu1  ;;  %v7763_v60 = vld [vmem:[#allocation8 + $0x880] sm:$0xf0] }
 0x2ad   :  { %4786 = vmatpush.bf16.msrb.mxu0 %v6851_v6  ;;  %v7078_v6 = vld [vmem:[#allocation8 + $0x800] sm:$0xf] }
 0x2ae   :  { %4797 = vmatpush.bf16.msrb.mxu1 %v6983_v7  ;;  %4773 = vmatpush.bf16.msra.mxu3 %v7123_v58  ;;  %v7748_v7 = vld [vmem:[#allocation8 + $0x808] sm:$0xf0] }
 0x2af   :  { %v7079_v11 = vor.u32 %v7748_v7, %v7078_v6 }
 0x2b1   :  { %v3944_v61 = vpop.f32.mrf.mxu2  ;;  %4787 = vmatpush.bf16.msrb.mxu0 %v6839_v40  ;;  %v7067_v40 = vor.u32 %v7745_v14, %v7066_v31 }
 0x2b2   :  { %v3956_v63 = vpop.f32.mrf.mxu3  ;;  %4798 = vmatpush.bf16.msrb.mxu1 %v6971_v51  ;;  %v3945_v8 = vadd.f32 %v3944_v61, %v3363_v53  ;;  %4774 = vmatpush.bf16.msra.mxu3 %v7111_v5  ;;  %v7751_v53 = vld [vmem:[#allocation8 + $0x820] sm:$0xf0]  ;;  %v7151_v5 = vor.u32 %v7766_v4, %v7150_v54 }
 0x2b3   :  { %v3957_v17 = vadd.f32 %v3956_v63, %v3943_v19  ;;  %v7739_v63 = vld [vmem:[#allocation8 + $0x7c0] sm:$0xf0] }
 0x2b4   :  { %v7043_v61 = vor.u32 %v7739_v63, %v7042_v55 }
 0x2b5   :  { %4747 = vmatmul.bf16.vlgmr.msra.gmra.mxu1 %v8234_v44  ;;  %v3971_v48 = vadd.f32 %v3970_v3, %v3957_v17  ;;  %4788 = vmatpush.bf16.msrb.mxu0 %v6827_v27  ;;  %v3364_v3 = vperm.slane %v8227_v56, 3  ;;  %v7030_v27 = vld [vmem:[#allocation8 + $0x7a0] sm:$0xf] }
 0x2b6   :  { %4799 = vmatpush.bf16.msrb.mxu1 %v6959_v42  ;;  %v7031_v32 = vor.u32 %v7736_v24, %v7030_v27 }
 0x2b7   :  { %v4019_v0 = vmax.f32 %v3971_v48, 0.0  ;;  %v3985_v19 = vadd.f32 %v3984_v10, %v3364_v3  ;;  %v3987_v9 = vadd.f32 %v3986_v22, %v3364_v3  ;;  %v4843_v3 = vld [vmem:[#allocation10] sm:$0x7] }
 0x2b8   :  { %4789 = vmatmul.bf16.vlgmr.msrb.gmra.mxu0 %v8231_v57  ;;  %v7091_v57 = vor.u32 %v7751_v53, %v7090_v43  ;;  %v7757_v53 = vld [vmem:[#allocation8 + $0x850] sm:$0xf0] }
 0x2ba   :  { %v3958_v37 = vpop.f32.mrf.mxu3  ;;  %4800 = vmatpush.bf16.msrb.mxu1 %v6947_v26  ;;  %v7199_v26 = vor.u32 %v7778_v29, %v7198_v52  ;;  %v4846_v29 = vperm.slane %v4843_v3, 1 }
 0x2bb   :  { %v3959_v15 = vadd.f32 %v3958_v37, %v3945_v8  ;;  %v7018_v8 = vld [vmem:[#allocation8 + $0x788] sm:$0xf] }
 0x2bc   :  { %v7019_v37 = vor.u32 %v7733_v30, %v7018_v8 }
 0x2bd   :  { %v3973_v50 = vadd.f32 %v3972_v59, %v3959_v15  ;;  %v7186_v59 = vld [vmem:[#allocation8 + $0x8d8] sm:$0xf]  ;;  %v7174_v15 = vld [vmem:[#allocation8 + $0x8c0] sm:$0xf] }
 0x2be   :  { %4801 = vmatpush.bf16.msrb.mxu1 %v6935_v49  ;;  %v7187_v23 = vor.u32 %v7775_v21, %v7186_v59  ;;  %v7175_v36 = vor.u32 %v7772_v35, %v7174_v15 }
 0x2bf   :  { %v4023_v62 = vmax.f32 %v3973_v50, 0.0  ;;  %v7769_v50 = vld [vmem:[#allocation8 + $0x8b0] sm:$0xf0] }
 0x2c1   :  { %v4027_v12 = vpack.c.bf16 %v4023_v62, %v4019_v0  ;;  %v7162_v0 = vld [vmem:[#allocation8 + $0x8a8] sm:$0xf]  ;;  %v7139_v62 = vor.u32 %v7763_v60, %v7138_v38 }
 0x2c2   :  { %4802 = vmatpush.bf16.msrb.mxu1 %v6923_v47  ;;  %v7163_v49 = vor.u32 %v7769_v50, %v7162_v0  ;;  %v7760_v47 = vld [vmem:[#allocation8 + $0x868] sm:$0xf0]  ;;  %v4847_v50 = vperm.slane %v4843_v3, 2 }
 0x2c3   :  { %4705 = vmatmul.bf16.vlgmr.msrb.gmra.mxu2 %v4027_v12 }
 0x2c4   :  { %4809 = vmatpush.bf16.msrb.mxu2 %v7103_v1  ;;  %v7126_v1 = vld [vmem:[#allocation8 + $0x860] sm:$0xf] }
 0x2c5   :  { %4803 = vmatmul.bf16.vlgmr.msrb.gmra.mxu1 %v8234_v44  ;;  %v7127_v43 = vor.u32 %v7760_v47, %v7126_v1 }
 0x2c8   :  { %4810 = vmatpush.bf16.msrb.mxu2 %v7091_v57 }
 0x2c9   :  { %v3998_v20 = vpop.f32.mrf.mxu2 }
 0x2ca   :  { %v3999_v2 = vadd.f32 %v3998_v20, %v3985_v19  ;;  %v4845_v19 = vperm.slane %v4843_v3, 0 }
 0x2cc   :  { %4811 = vmatpush.bf16.msrb.mxu2 %v7079_v11 }
 0x2d0   :  { %4812 = vmatpush.bf16.msrb.mxu2 %v7067_v40 }
 0x2d1   :  { %v4000_v44 = vpop.f32.mrf.mxu2 }
 0x2d2   :  { %v4012_v51 = vpop.f32.mrf.mxu3  ;;  %v4001_v56 = vadd.f32 %v4000_v44, %v3987_v9 }
 0x2d3   :  { %4761 = vmatmul.bf16.vlgmr.msra.gmra.mxu2 %v4027_v12  ;;  %v4013_v18 = vadd.f32 %v4012_v51, %v3999_v2 }
 0x2d4   :  { %4813 = vmatpush.bf16.msrb.mxu2 %v7055_v34 }
 0x2d5   :  { %v4020_v13 = vmax.f32 %v4013_v18, 0.0 }
 0x2d8   :  { %4814 = vmatpush.bf16.msrb.mxu2 %v7043_v61 }
 0x2da   :  { %v4014_v17 = vpop.f32.mrf.mxu3 }
 0x2db   :  { %v4015_v42 = vadd.f32 %v4014_v17, %v4001_v56 }
 0x2dc   :  { %4815 = vmatpush.bf16.msrb.mxu2 %v7031_v32 }
 0x2dd   :  { %v4024_v48 = vmax.f32 %v4015_v42, 0.0 }
 0x2df   :  { %v4028_v58 = vpack.c.bf16 %v4024_v48, %v4020_v13 }
 0x2e0   :  { %4816 = vmatpush.bf16.msrb.mxu2 %v7019_v37 }
 0x2e1   :  { %4719 = vmatmul.bf16.vlgmr.msrb.gmra.mxu3 %v4028_v58 }
 0x2e2   :  { %4823 = vmatpush.bf16.msrb.mxu3 %v7199_v26 }
 0x2e3   :  { %4817 = vmatmul.bf16.vlgmr.msrb.gmra.mxu2 %v4027_v12  ;;  %v7114_v12 = vld [vmem:[#allocation8 + $0x848] sm:$0xf] }
 0x2e4   :  { %v7115_v57 = vor.u32 %v7757_v53, %v7114_v12 }
 0x2e6   :  { %4824 = vmatpush.bf16.msrb.mxu3 %v7187_v23 }
 0x2ea   :  { %4825 = vmatpush.bf16.msrb.mxu3 %v7175_v36 }
 0x2ee   :  { %4826 = vmatpush.bf16.msrb.mxu3 %v7163_v49 }
 0x2f1   :  { %4775 = vmatmul.bf16.vlgmr.msra.gmra.mxu3 %v4028_v58 }
 0x2f2   :  { %4827 = vmatpush.bf16.msrb.mxu3 %v7151_v5 }
 0x2f6   :  { %4828 = vmatpush.bf16.msrb.mxu3 %v7139_v62 }
 0x2fa   :  { %4829 = vmatpush.bf16.msrb.mxu3 %v7127_v43 }
 0x2fe   :  { %4830 = vmatpush.bf16.msrb.mxu3 %v7115_v57 }
 0x301   :  { %4831 = vmatmul.bf16.vlgmr.msrb.gmra.mxu3 %v4028_v58 }
 0x315   :  { %v4678_v7 = vpop.f32.mrf.mxu0 }
 0x31d   :  { %v4680_v20 = vpop.f32.mrf.mxu0 }
 0x322   :  { %v4692_v6 = vpop.f32.mrf.mxu1 }
 0x323   :  { %v4693_v14 = vadd.f32 %v4692_v6, %v4678_v7 }
 0x325   :  { %v4734_v22 = vpop.f32.mrf.mxu0 }
 0x32a   :  { %v4694_v11 = vpop.f32.mrf.mxu1 }
 0x32b   :  { %v4695_v55 = vadd.f32 %v4694_v11, %v4680_v20 }
 0x32d   :  { %v4736_v17 = vpop.f32.mrf.mxu0 }
 0x332   :  { %v4748_v34 = vpop.f32.mrf.mxu1 }
 0x333   :  { %v4749_v24 = vadd.f32 %v4748_v34, %v4734_v22 }
 0x33a   :  { %v4750_v18 = vpop.f32.mrf.mxu1 }
 0x33b   :  { %v4751_v30 = vadd.f32 %v4750_v18, %v4736_v17 }
 0x342   :  { %v4804_v26 = vpop.f32.mrf.mxu1 }
 0x346   :  { %v4706_v10 = vpop.f32.mrf.mxu2 }
 0x347   :  { %v4707_v40 = vadd.f32 %v4706_v10, %v4693_v14 }
 0x34a   :  { %v4806_v49 = vpop.f32.mrf.mxu1 }
 0x34e   :  { %v4708_v31 = vpop.f32.mrf.mxu2 }
 0x34f   :  { %v4709_v44 = vadd.f32 %v4708_v31, %v4695_v55 }
 0x356   :  { %v4762_v2 = vpop.f32.mrf.mxu2 }
 0x357   :  { %v4763_v42 = vadd.f32 %v4762_v2, %v4749_v24 }
 0x35e   :  { %v4764_v32 = vpop.f32.mrf.mxu2 }
 0x35f   :  { %v4765_v48 = vadd.f32 %v4764_v32, %v4751_v30 }
 0x364   :  { %v4720_v39 = vpop.f32.mrf.mxu3 }
 0x365   :  { %v4721_v16 = vadd.f32 %v4720_v39, %v4707_v40 }
 0x366   :  { %v4818_v59 = vpop.f32.mrf.mxu2 }
 0x367   :  { %v4837_v51 = vadd.f32 %v4721_v16, %v8205_v25 }
 0x369   :  { %v4851_v63 = vadd.f32 %v4845_v19, %v4837_v51 }
 0x36b   :  { %4857 = vst [vmem:[#allocation11] sm:$0xff] %v4851_v63 }
 0x36c   :  { %v4722_v9 = vpop.f32.mrf.mxu3 }
 0x36d   :  { %v4723_v61 = vadd.f32 %v4722_v9, %v4709_v44 }
 0x36e   :  { %v4820_v4 = vpop.f32.mrf.mxu2 }
 0x36f   :  { %v4840_v27 = vadd.f32 %v4723_v61, %v8208_v45  ;;  %v4790_v45 = vpop.f32.mrf.mxu0 }
 0x370   :  { %v4805_v23 = vadd.f32 %v4804_v26, %v4790_v45 }
 0x371   :  { %v4854_v56 = vadd.f32 %v4845_v19, %v4840_v27 }
 0x372   :  { %v4819_v35 = vadd.f32 %v4818_v59, %v4805_v23 }
 0x373   :  { %4860 = vst [vmem:[#allocation11 + $0x18] sm:$0xff] %v4854_v56 }
 0x374   :  { %v4776_v52 = vpop.f32.mrf.mxu3 }
 0x375   :  { %v4777_v25 = vadd.f32 %v4776_v52, %v4763_v42 }
 0x377   :  { %v4838_v8 = vadd.f32 %v4777_v25, %v8217_v28  ;;  %v4792_v54 = vpop.f32.mrf.mxu0 }
 0x378   :  { %v4807_v5 = vadd.f32 %v4806_v49, %v4792_v54 }
 0x379   :  { %v4852_v13 = vadd.f32 %v4846_v29, %v4838_v8 }
 0x37a   :  { %v4821_v60 = vadd.f32 %v4820_v4, %v4807_v5 }
 0x37b   :  { %4858 = vst [vmem:[#allocation11 + $0x8] sm:$0xff] %v4852_v13 }
 0x37c   :  { %v4778_v58 = vpop.f32.mrf.mxu3 }
 0x37d   :  { %v4779_v37 = vadd.f32 %v4778_v58, %v4765_v48 }
 0x37f   :  { %v4841_v21 = vadd.f32 %v4779_v37, %v8219_v41 }
 0x381   :  { %v4855_v15 = vadd.f32 %v4846_v29, %v4841_v21 }
 0x383   :  { %4861 = vst [vmem:[#allocation11 + $0x20] sm:$0xff] %v4855_v15 }
 0x384   :  { %v4832_v36 = vpop.f32.mrf.mxu3 }
 0x385   :  { %v4833_v0 = vadd.f32 %v4832_v36, %v4819_v35 }
 0x387   :  { %v4839_v28 = vadd.f32 %v4833_v0, %v8223_v33 }
 0x389   :  { %v4853_v38 = vadd.f32 %v4847_v50, %v4839_v28 }
 0x38b   :  { %4859 = vst [vmem:[#allocation11 + $0x10] sm:$0xff] %v4853_v38 }
 0x38c   :  { %v4834_v62 = vpop.f32.mrf.mxu3 }
 0x38d   :  { %v4835_v1 = vadd.f32 %v4834_v62, %v4821_v60 }
 0x38f   :  { %v4842_v41 = vadd.f32 %v4835_v1, %v8225_v46 }
 0x391   :  { %v4856_v47 = vadd.f32 %v4847_v50, %v4842_v41 }
 0x393   :  { %4862 = vst [vmem:[#allocation11 + $0x28] sm:$0xff] %v4856_v47 }
 0x394   :  { %4875 = dma.vmem_to_hbm [thread:$0]  %s4868_s4, 768, %s4870_s21, [#allocation4], %s7953_s22, %s7953_s22, %s7954_s23  }
 0x395   :  { %7941 = dma.done.wait [#allocation4], 768  }
 0x396   :  { %7942 = vsyncadd [#allocation4], 4294966528 }
 0x397   :  { %4880 = vsyncpa [#allocation3], 1 }
 0x398   :  { %4881 = vsyncpa [#allocation6], 1 }
 0x399   :  { %4882 = vsyncpa [#allocation9], 1 }
 0x39a   :  { %4883 = vsyncpa [#allocation4], 1 }

</bundles_post_ra>
